<compile_context>
chip_gen: v5e
topology: v5e:2x2
jax: 0.10.0
libtpu: 0.0.40
codegen_flags: <defaults>
</compile_context>

<pallas_src>
import math
import jax
import jax.numpy as jnp
from jax.experimental import pallas as pl
from jax.experimental.pallas import tpu as pltpu

N_EMBD = 512
HIDDEN = 4 * N_EMBD  # 2048
GELU_C = math.sqrt(2.0 / math.pi)


def _ffn_kernel(x_ref, w1_ref, b1_ref, w2_ref, b2_ref, o_ref):
    """One grid step: a tm-row slab of the input.

    out_tile = gelu_tanh(x_tile @ W1 + b1) @ W2 + b2
    """
    # First matmul: bf16 operands, f32 accumulation on the MXU.
    x_bf16 = x_ref[...].astype(jnp.bfloat16)
    h = jnp.dot(x_bf16, w1_ref[...], preferred_element_type=jnp.float32)
    h = h + b1_ref[...]  # (1, H) broadcasts over rows, f32

    # GPT-2 tanh-approximation GELU (exactly as GeLUThatWasUsedInGPT2), in f32.
    g = 0.5 * h * (1.0 + jnp.tanh(GELU_C * (h + 0.044715 * h * h * h)))

    # Second matmul: bf16 operands, f32 accumulation.
    out = jnp.dot(g.astype(jnp.bfloat16), w2_ref[...],
                  preferred_element_type=jnp.float32)
    o_ref[...] = (out + b2_ref[...]).astype(o_ref.dtype)


def _round_up(n, m):
    return ((n + m - 1) // m) * m


def feed_forward(x, w1, b1, w2, b2, *, tile_m=256):
    """x: (B, T, C) float32. Returns (B, T, C) float32."""
    B, T, C = x.shape
    H = w1.shape[1]
    assert C == N_EMBD and H == HIDDEN

    M = B * T
    x2d = x.reshape(M, C)

    # Adapt the row tile: never larger than the (8-aligned) number of rows so
    # tiny inputs don't waste MXU/DMA work on padding.
    tm = min(tile_m, _round_up(M, 8))
    n_tiles = pl.cdiv(M, tm)
    M_pad = n_tiles * tm
    if M_pad != M:
        x2d = jnp.pad(x2d, ((0, M_pad - M), (0, 0)))

    # Weights fed to the MXU as bf16 (halves weight DMA bytes, ~3x MXU
    # throughput); biases stay f32 and are added post-accumulation.
    w1_bf16 = w1.astype(jnp.bfloat16)
    w2_bf16 = w2.astype(jnp.bfloat16)
    b1_2d = b1.reshape(1, H).astype(jnp.float32)
    b2_2d = b2.reshape(1, C).astype(jnp.float32)

    out = pl.pallas_call(
        _ffn_kernel,
        out_shape=jax.ShapeDtypeStruct((M_pad, C), x.dtype),
        grid_spec=pltpu.PrefetchScalarGridSpec(
            num_scalar_prefetch=0,
            grid=(n_tiles,),
            in_specs=[
                pl.BlockSpec((tm, C), lambda i: (i, 0)),  # x row slab (streamed)
                pl.BlockSpec((C, H), lambda i: (0, 0)),   # W1 (VMEM-resident)
                pl.BlockSpec((1, H), lambda i: (0, 0)),   # b1 (resident)
                pl.BlockSpec((H, C), lambda i: (0, 0)),   # W2 (resident)
                pl.BlockSpec((1, C), lambda i: (0, 0)),   # b2 (resident)
            ],
            out_specs=pl.BlockSpec((tm, C), lambda i: (i, 0)),
        ),
        compiler_params=pltpu.CompilerParams(
            dimension_semantics=("parallel",),
            vmem_limit_bytes=64 << 20,
        ),
    )(x2d, w1_bf16, b1_2d, w2_bf16, b2_2d)

    return out[:M].reshape(B, T, C)


def init_params(key):
    """Deterministic init mimicking nn.Linear's U(-1/sqrt(fan_in), +1/sqrt(fan_in))."""
    k1, k2, k3, k4 = jax.random.split(key, 4)
    bound1 = 1.0 / math.sqrt(N_EMBD)
    bound2 = 1.0 / math.sqrt(HIDDEN)
    # PyTorch stores weight as (out, in); we keep the (in, out) transpose for x @ W.
    w1 = jax.random.uniform(k1, (N_EMBD, HIDDEN), jnp.float32, -bound1, bound1)
    b1 = jax.random.uniform(k2, (HIDDEN,), jnp.float32, -bound1, bound1)
    w2 = jax.random.uniform(k3, (HIDDEN, N_EMBD), jnp.float32, -bound2, bound2)
    b2 = jax.random.uniform(k4, (N_EMBD,), jnp.float32, -bound2, bound2)
    return w1, b1, w2, b2


def _reference_mixed(x, w1, b1, w2, b2):
    """Reference with the same bf16-operand / f32-accumulation policy."""
    h = jnp.dot(x.astype(jnp.bfloat16), w1.astype(jnp.bfloat16),
                preferred_element_type=jnp.float32) + b1
    g = 0.5 * h * (1.0 + jnp.tanh(GELU_C * (h + 0.044715 * h ** 3)))
    return jnp.dot(g.astype(jnp.bfloat16), w2.astype(jnp.bfloat16),
                   preferred_element_type=jnp.float32) + b2


def _reference_f32(x, w1, b1, w2, b2):
    h = x @ w1 + b1
    g = 0.5 * h * (1.0 + jnp.tanh(GELU_C * (h + 0.044715 * h ** 3)))
    return g @ w2 + b2


if __name__ == "__main__":
    key = jax.random.PRNGKey(0)
    kp, kx = jax.random.split(key)
    w1, b1, w2, b2 = init_params(kp)

    B, T = 2, 8
    x = jax.random.normal(kx, (B, T, N_EMBD), jnp.float32)

    out = feed_forward(x, w1, b1, w2, b2)
    out = jax.block_until_ready(out)
    assert out.shape == (B, T, N_EMBD)

    # Tight check against a reference using the identical mixed-precision
    # policy (bf16 MXU operands, f32 accumulation).
    ref_mixed = _reference_mixed(x, w1, b1, w2, b2)
    assert jnp.allclose(out, ref_mixed, atol=2e-2, rtol=2e-2), \
        "mismatch vs mixed-precision reference"

    # Looser sanity check against the pure-f32 reference (expected bf16
    # rounding error, not a bug).
    ref_f32 = _reference_f32(x, w1, b1, w2, b2)
    assert jnp.allclose(out, ref_f32, atol=1e-1, rtol=1e-1), \
        "mismatch vs f32 reference beyond expected bf16 error"

    print("KERNEL_OK")
</pallas_src>

<mosaic_0001>
module attributes {stable_mosaic.version = 11 : i64} {
  func.func @_ffn_kernel(%arg0: i32, %arg1: memref<16x512xf32, #tpu.memory_space<vmem>>, %arg2: memref<512x2048xbf16, #tpu.memory_space<vmem>>, %arg3: memref<1x2048xf32, #tpu.memory_space<vmem>>, %arg4: memref<2048x512xbf16, #tpu.memory_space<vmem>>, %arg5: memref<1x512xf32, #tpu.memory_space<vmem>>, %arg6: memref<16x512xf32, #tpu.memory_space<vmem>>) attributes {dimension_semantics = [#tpu.dimension_semantics<parallel>], iteration_bounds = array<i64: 1>, scalar_prefetch = 0 : i64, scratch_operands = 0 : i64, tpu.core_type = #tpu.core_type<tc>, window_params = [{transform_indices = @transform_0, window_bounds = array<i64: 16, 512>}, {pipeline_mode = #tpu.pipeline_mode<synchronous>, transform_indices = @transform_1, window_bounds = array<i64: 512, 2048>}, {pipeline_mode = #tpu.pipeline_mode<synchronous>, transform_indices = @transform_2, window_bounds = array<i64: 1, 2048>}, {pipeline_mode = #tpu.pipeline_mode<synchronous>, transform_indices = @transform_3, window_bounds = array<i64: 2048, 512>}, {pipeline_mode = #tpu.pipeline_mode<synchronous>, transform_indices = @transform_4, window_bounds = array<i64: 1, 512>}, {transform_indices = @transform_5, window_bounds = array<i64: 16, 512>}]} {
    %c0 = arith.constant 0 : index
    %c0_0 = arith.constant 0 : index
    %0 = vector.load %arg1[%c0, %c0_0] : memref<16x512xf32, #tpu.memory_space<vmem>>, vector<16x512xf32>
    %1 = arith.truncf %0 : vector<16x512xf32> to vector<16x512xbf16>
    %c0_1 = arith.constant 0 : index
    %c0_2 = arith.constant 0 : index
    %2 = vector.load %arg2[%c0_1, %c0_2] : memref<512x2048xbf16, #tpu.memory_space<vmem>>, vector<512x2048xbf16>
    %cst = arith.constant dense<0.000000e+00> : vector<16x2048xf32>
    %3 = tpu.matmul %1, %2, %cst {dimension_numbers = #tpu.dot_dimension_numbers<[1], [0], [0], [1], [0, 0, 1, 1], [], []>} : vector<16x512xbf16>, vector<512x2048xbf16>, vector<16x2048xf32> -> vector<16x2048xf32>
    %c0_3 = arith.constant 0 : index
    %c0_4 = arith.constant 0 : index
    %4 = vector.load %arg3[%c0_3, %c0_4] : memref<1x2048xf32, #tpu.memory_space<vmem>>, vector<1x2048xf32>
    %5 = vector.broadcast %4 : vector<1x2048xf32> to vector<16x2048xf32>
    %6 = arith.addf %3, %5 : vector<16x2048xf32>
    %cst_5 = arith.constant 5.000000e-01 : f32
    %7 = vector.broadcast %cst_5 : f32 to vector<16x2048xf32>
    %8 = arith.mulf %7, %6 : vector<16x2048xf32>
    %cst_6 = arith.constant 4.471500e-02 : f32
    %9 = vector.broadcast %cst_6 : f32 to vector<16x2048xf32>
    %10 = arith.mulf %9, %6 : vector<16x2048xf32>
    %11 = arith.mulf %10, %6 : vector<16x2048xf32>
    %12 = arith.mulf %11, %6 : vector<16x2048xf32>
    %13 = arith.addf %6, %12 : vector<16x2048xf32>
    %cst_7 = arith.constant 0.797884583 : f32
    %14 = vector.broadcast %cst_7 : f32 to vector<16x2048xf32>
    %15 = arith.mulf %14, %13 : vector<16x2048xf32>
    %16 = math.tanh %15 : vector<16x2048xf32>
    %cst_8 = arith.constant 1.000000e+00 : f32
    %17 = vector.broadcast %cst_8 : f32 to vector<16x2048xf32>
    %18 = arith.addf %17, %16 : vector<16x2048xf32>
    %19 = arith.mulf %8, %18 : vector<16x2048xf32>
    %20 = arith.truncf %19 : vector<16x2048xf32> to vector<16x2048xbf16>
    %c0_9 = arith.constant 0 : index
    %c0_10 = arith.constant 0 : index
    %21 = vector.load %arg4[%c0_9, %c0_10] : memref<2048x512xbf16, #tpu.memory_space<vmem>>, vector<2048x512xbf16>
    %cst_11 = arith.constant dense<0.000000e+00> : vector<16x512xf32>
    %22 = tpu.matmul %20, %21, %cst_11 {dimension_numbers = #tpu.dot_dimension_numbers<[1], [0], [0], [1], [0, 0, 1, 1], [], []>} : vector<16x2048xbf16>, vector<2048x512xbf16>, vector<16x512xf32> -> vector<16x512xf32>
    %c0_12 = arith.constant 0 : index
    %c0_13 = arith.constant 0 : index
    %23 = vector.load %arg5[%c0_12, %c0_13] : memref<1x512xf32, #tpu.memory_space<vmem>>, vector<1x512xf32>
    %24 = vector.broadcast %23 : vector<1x512xf32> to vector<16x512xf32>
    %25 = arith.addf %22, %24 : vector<16x512xf32>
    %c0_14 = arith.constant 0 : index
    %c0_15 = arith.constant 0 : index
    %26 = vector.load %arg6[%c0_14, %c0_15] : memref<16x512xf32, #tpu.memory_space<vmem>>, vector<16x512xf32>
    tpu.vector_store %arg6[%c0_14, %c0_15], %25 {strides = array<i32>} : memref<16x512xf32, #tpu.memory_space<vmem>>, vector<16x512xf32>,
    return
  }
  func.func @transform_0(%arg0: i32) -> (i32, i32) {
    %c0_i32 = arith.constant 0 : i32
    %c0_i32_0 = arith.constant 0 : i32
    return %arg0, %c0_i32 : i32, i32
  }
  func.func @transform_1(%arg0: i32) -> (i32, i32) {
    %c0_i32 = arith.constant 0 : i32
    %c0_i32_0 = arith.constant 0 : i32
    %c0_i32_1 = arith.constant 0 : i32
    return %c0_i32, %c0_i32_0 : i32, i32
  }
  func.func @transform_2(%arg0: i32) -> (i32, i32) {
    %c0_i32 = arith.constant 0 : i32
    %c0_i32_0 = arith.constant 0 : i32
    %c0_i32_1 = arith.constant 0 : i32
    return %c0_i32, %c0_i32_0 : i32, i32
  }
  func.func @transform_3(%arg0: i32) -> (i32, i32) {
    %c0_i32 = arith.constant 0 : i32
    %c0_i32_0 = arith.constant 0 : i32
    %c0_i32_1 = arith.constant 0 : i32
    return %c0_i32, %c0_i32_0 : i32, i32
  }
  func.func @transform_4(%arg0: i32) -> (i32, i32) {
    %c0_i32 = arith.constant 0 : i32
    %c0_i32_0 = arith.constant 0 : i32
    %c0_i32_1 = arith.constant 0 : i32
    return %c0_i32, %c0_i32_0 : i32, i32
  }
  func.func @transform_5(%arg0: i32) -> (i32, i32) {
    %c0_i32 = arith.constant 0 : i32
    %c0_i32_0 = arith.constant 0 : i32
    return %arg0, %c0_i32 : i32, i32
  }
}

</mosaic_0001>

<bundles_post_ra>
// kernel: tpu_custom_call.1
= control target key start
LH: loop header
LB: loop body
LE: loop exit
PB: predicated region body
PF: predicated region fallthrough
CT: control target
= control target key end

     0   :  { %10 = vsyncpa [#allocation3], 0  ;;  %s14768_s0 = inlined_call_operand.hbm [shape: f32[16,512], index: 0, kind: input, shape index: {}]   ;;  %s14769_s1 = inlined_call_operand.hbm [shape: bf16[512,2048], index: 1, kind: input, shape index: {}]   ;;  %s14770_s2 = inlined_call_operand.hbm [shape: f32[1,2048], index: 2, kind: input, shape index: {}]   ;;  %s14771_s3 = inlined_call_operand.hbm [shape: bf16[2048,512], index: 3, kind: input, shape index: {}]   ;;  %s14772_s4 = inlined_call_operand.hbm [shape: f32[1,512], index: 4, kind: input, shape index: {}]   ;;  %s14773_s5 = inlined_call_operand.hbm [shape: f32[16,512], index: 5, kind: output, shape index: {}]  }
   0x1   :  { %11 = vsyncpa [#allocation6], 0 }
   0x2   :  { %12 = vsyncpa [#allocation9], 0  ;;  %s31_s20 = sshll.u32 %s14769_s1, 4  ;;  %s32_s20 = int_to_ptr.hbm [resolvable:$true] %s31_s20 }
   0x3   :  { %13 = vsyncpa [#allocation4], 0  ;;  %s13774_s21 = smov [#allocation5]   ;;  %s55_s25 = sshll.u32 %s14771_s3, 4  ;;  %s56_s25 = int_to_ptr.hbm [resolvable:$true] %s55_s25 }
   0x4   :  { %s33_s22 = sshll.u32 %s13774_s21, 4  ;;  %s13775_s26 = smov 1024   ;;  %s34_s22 = int_to_ptr.vmem [resolvable:$true] %s33_s22 }
   0x5   :  { %s13776_s27 = smov 64   ;;  %s13777_s28 = smov [#allocation8]  }
   0x6   :  { %39 = dma.hbm_to_vmem [thread:$0]  %s32_s20, 65536, %s34_s22, [#allocation6], %s13775_s26, %s13775_s26, %s13776_s27  }
   0x7   :  { %s57_s29 = sshll.u32 %s13777_s28, 4  ;;  %s13778_s30 = smov 256   ;;  %s58_s29 = int_to_ptr.vmem [resolvable:$true] %s57_s29 }
   0x8   :  { %s13779_s6 = smov 16   ;;  %s18_s8 = sshll.u32 %s14768_s0, 4  ;;  %s19_s8 = int_to_ptr.hbm [resolvable:$true] %s18_s8 }
   0x9   :  { %63 = dma.hbm_to_vmem [thread:$0]  %s56_s25, 65536, %s58_s29, [#allocation9], %s13778_s30, %s13778_s30, %s13779_s6  }
   0xa   :  { %s13780_s9 = smov [#allocation2]   ;;  %s45_s12 = sshll.u32 %s14770_s2, 4  ;;  %s46_s12 = int_to_ptr.hbm [resolvable:$true] %s45_s12 }
   0xb   :  { %s20_s10 = sshll.u32 %s13780_s9, 4  ;;  %s13781_s13 = smov 512   ;;  %s21_s10 = int_to_ptr.vmem [resolvable:$true] %s20_s10 }
   0xc   :  { %s13782_s14 = smov 32   ;;  %s13783_s15 = smov [#allocation7]  }
   0xd   :  { %26 = dma.hbm_to_vmem [thread:$0]  %s19_s8, 1024, %s21_s10, [#allocation3], %s13781_s13, %s13781_s13, %s13782_s14  }
   0xe   :  { %s47_s16 = sshll.u32 %s13783_s15, 4  ;;  %s69_s0 = sshll.u32 %s14772_s4, 4  ;;  %s48_s16 = int_to_ptr.vmem [resolvable:$true] %s47_s16  ;;  %s70_s0 = int_to_ptr.hbm [resolvable:$true] %s69_s0 }
   0xf   :  { %50 = dma.hbm_to_vmem [thread:$0]  %s46_s12, 256, %s48_s16, [#allocation6]  }
  0x10   :  { %s13784_s19 = smov [#allocation10]  }
  0x11   :  { %s71_s20 = sshll.u32 %s13784_s19, 4  ;;  %s72_s20 = int_to_ptr.vmem [resolvable:$true] %s71_s20 }
  0x12   :  { %74 = dma.hbm_to_vmem [thread:$0]  %s70_s0, 64, %s72_s20, [#allocation9]  }
  0x13   :  { %13766 = dma.done.wait [#allocation3], 1024  }
  0x14   :  { %13767 = vsyncadd [#allocation3], 4294966272 }
  0x15   :  { %13768 = dma.done.wait [#allocation6], 65792  }
  0x16   :  { %13769 = vsyncadd [#allocation6], 4294901504 }
  0x17   :  { %13770 = dma.done.wait [#allocation9], 65600  }
  0x18   :  { %13771 = vsyncadd [#allocation9], 4294901696  ;;  %v8872_v0 = vld [vmem:[#allocation5 + $0x380] sm:$0xf]  ;;  %s13785_s2 = smov [#allocation11]   ;;  %s8407_s23 = sshll.u32 %s14773_s5, 4  ;;  %s8408_s23 = int_to_ptr.hbm [resolvable:$true] %s8407_s23 }
  0x19   :  { %v12638_v1 = vld [vmem:[#allocation5 + $0x3bc] sm:$0xf0]  ;;  %s8405_s4 = sshll.u32 %s13785_s2, 4  ;;  %s8406_s4 = int_to_ptr.vmem [resolvable:$true] %s8405_s4 }
  0x1a   :  { %v9384_v2 = vld [vmem:[#allocation5 + $0x780] sm:$0xf]  ;;  %v8873_v3 = vor.u32 %v12638_v1, %v8872_v0 }
  0x1b   :  { %v12766_v4 = vld [vmem:[#allocation5 + $0x7bc] sm:$0xf0] }
  0x1c   :  { %v9896_v5 = vld [vmem:[#allocation5 + $0xb80] sm:$0xf]  ;;  %v9385_v7 = vor.u32 %v12766_v4, %v9384_v2  ;;  %3215 = vmatpush.bf16.msra.mxu0 %v8873_v3 }
  0x1d   :  { %v12894_v6 = vld [vmem:[#allocation5 + $0xbbc] sm:$0xf0] }
  0x1e   :  { %v9897_v8 = vor.u32 %v12894_v6, %v9896_v5  ;;  %v10408_v9 = vld [vmem:[#allocation5 + $0xf80] sm:$0xf]  ;;  %3229 = vmatpush.bf16.msra.mxu1 %v9385_v7 }
  0x1f   :  { %v13022_v10 = vld [vmem:[#allocation5 + $0xfbc] sm:$0xf0] }
  0x20   :  { %v8808_v11 = vld [vmem:[#allocation5 + $0x300] sm:$0xf]  ;;  %v10409_v12 = vor.u32 %v13022_v10, %v10408_v9  ;;  %3243 = vmatpush.bf16.msra.mxu2 %v9897_v8 }
  0x21   :  { %v12622_v13 = vld [vmem:[#allocation5 + $0x33c] sm:$0xf0] }
  0x22   :  { %v9320_v14 = vld [vmem:[#allocation5 + $0x700] sm:$0xf]  ;;  %v8809_v16 = vor.u32 %v12622_v13, %v8808_v11  ;;  %3257 = vmatpush.bf16.msra.mxu3 %v10409_v12 }
  0x23   :  { %v12750_v15 = vld [vmem:[#allocation5 + $0x73c] sm:$0xf0] }
  0x24   :  { %v9321_v17 = vor.u32 %v12750_v15, %v9320_v14  ;;  %v9832_v18 = vld [vmem:[#allocation5 + $0xb00] sm:$0xf]  ;;  %3216 = vmatpush.bf16.msra.mxu0 %v8809_v16 }
  0x25   :  { %v12878_v19 = vld [vmem:[#allocation5 + $0xb3c] sm:$0xf0] }
  0x26   :  { %v10344_v20 = vld [vmem:[#allocation5 + $0xf00] sm:$0xf]  ;;  %v9833_v21 = vor.u32 %v12878_v19, %v9832_v18  ;;  %3230 = vmatpush.bf16.msra.mxu1 %v9321_v17 }
  0x27   :  { %v13006_v22 = vld [vmem:[#allocation5 + $0xf3c] sm:$0xf0] }
  0x28   :  { %v8744_v23 = vld [vmem:[#allocation5 + $0x280] sm:$0xf]  ;;  %v10345_v25 = vor.u32 %v13006_v22, %v10344_v20  ;;  %3244 = vmatpush.bf16.msra.mxu2 %v9833_v21 }
  0x29   :  { %v12606_v24 = vld [vmem:[#allocation5 + $0x2bc] sm:$0xf0] }
  0x2a   :  { %v9256_v26 = vld [vmem:[#allocation5 + $0x680] sm:$0xf]  ;;  %v8745_v29 = vor.u32 %v12606_v24, %v8744_v23  ;;  %3258 = vmatpush.bf16.msra.mxu3 %v10345_v25 }
  0x2b   :  { %v12734_v27 = vld [vmem:[#allocation5 + $0x6bc] sm:$0xf0] }
  0x2c   :  { %v9768_v28 = vld [vmem:[#allocation5 + $0xa80] sm:$0xf]  ;;  %v9257_v33 = vor.u32 %v12734_v27, %v9256_v26  ;;  %3217 = vmatpush.bf16.msra.mxu0 %v8745_v29  ;;  %v12630_v27 = vld [vmem:[#allocation5 + $0x384] sm:$0xf] }
  0x2d   :  { %v12862_v30 = vld [vmem:[#allocation5 + $0xabc] sm:$0xf0]  ;;  %v8874_v29 = vld [vmem:[#allocation5 + $0x3c0] sm:$0xf0] }
  0x2e   :  { %v10280_v31 = vld [vmem:[#allocation5 + $0xe80] sm:$0xf]  ;;  %v9769_v34 = vor.u32 %v12862_v30, %v9768_v28  ;;  %3231 = vmatpush.bf16.msra.mxu1 %v9257_v33  ;;  %v12758_v30 = vld [vmem:[#allocation5 + $0x784] sm:$0xf] }
  0x2f   :  { %v12990_v32 = vld [vmem:[#allocation5 + $0xebc] sm:$0xf0]  ;;  %v9898_v33 = vld [vmem:[#allocation5 + $0xbc0] sm:$0xf0] }
  0x30   :  { %v8680_v35 = vld [vmem:[#allocation5 + $0x200] sm:$0xf]  ;;  %v10281_v38 = vor.u32 %v12990_v32, %v10280_v31  ;;  %3245 = vmatpush.bf16.msra.mxu2 %v9769_v34  ;;  %v9386_v31 = vld [vmem:[#allocation5 + $0x7c0] sm:$0xf0] }
  0x31   :  { %v12590_v36 = vld [vmem:[#allocation5 + $0x23c] sm:$0xf0]  ;;  %v12886_v32 = vld [vmem:[#allocation5 + $0xb84] sm:$0xf] }
  0x32   :  { %v9192_v37 = vld [vmem:[#allocation5 + $0x600] sm:$0xf]  ;;  %v8681_v44 = vor.u32 %v12590_v36, %v8680_v35  ;;  %3259 = vmatpush.bf16.msra.mxu3 %v10281_v38  ;;  %v13014_v34 = vld [vmem:[#allocation5 + $0xf84] sm:$0xf]  ;;  %v101_v38 = vld [vmem:[#allocation2 + $0x30] sm:$0xff] }
  0x33   :  { %v12718_v39 = vld [vmem:[#allocation5 + $0x63c] sm:$0xf0]  ;;  %v10410_v36 = vld [vmem:[#allocation5 + $0xfc0] sm:$0xf0] }
  0x34   :  { %v9704_v40 = vld [vmem:[#allocation5 + $0xa00] sm:$0xf]  ;;  %v9193_v45 = vor.u32 %v12718_v39, %v9192_v37  ;;  %3218 = vmatpush.bf16.msra.mxu0 %v8681_v44  ;;  %v97_v37 = vld [vmem:[#allocation2 + $0x10] sm:$0xff] }
  0x35   :  { %v12846_v41 = vld [vmem:[#allocation5 + $0xa3c] sm:$0xf0] }
  0x36   :  { %v10216_v42 = vld [vmem:[#allocation5 + $0xe00] sm:$0xf]  ;;  %v9705_v46 = vor.u32 %v12846_v41, %v9704_v40  ;;  %3232 = vmatpush.bf16.msra.mxu1 %v9193_v45  ;;  %v12614_v41 = vld [vmem:[#allocation5 + $0x304] sm:$0xf]  ;;  %v8877_v45 = vor.u32 %v12630_v27, %v8874_v29 }
  0x37   :  { %v12974_v43 = vld [vmem:[#allocation5 + $0xe3c] sm:$0xf0]  ;;  %v12566_v27 = vld [vmem:[#allocation5 + $0x184] sm:$0xf] }
  0x38   :  { %v8616_v47 = vld [vmem:[#allocation5 + $0x180] sm:$0xf]  ;;  %v10217_v50 = vor.u32 %v12974_v43, %v10216_v42  ;;  %3246 = vmatpush.bf16.msra.mxu2 %v9705_v46  ;;  %v8810_v42 = vld [vmem:[#allocation5 + $0x340] sm:$0xf0] }
  0x39   :  { %v12574_v48 = vld [vmem:[#allocation5 + $0x1bc] sm:$0xf0]  ;;  %v12694_v29 = vld [vmem:[#allocation5 + $0x584] sm:$0xf] }
  0x3a   :  { %v9128_v49 = vld [vmem:[#allocation5 + $0x580] sm:$0xf]  ;;  %v8617_v56 = vor.u32 %v12574_v48, %v8616_v47  ;;  %3260 = vmatpush.bf16.msra.mxu3 %v10217_v50  ;;  %v98_v47 = vld [vmem:[#allocation2 + $0x18] sm:$0xff]  ;;  %v9901_v50 = vor.u32 %v12886_v32, %v9898_v33  ;;  %v12822_v32 = vld [vmem:[#allocation5 + $0x984] sm:$0xf] }
  0x3b   :  { %v12702_v51 = vld [vmem:[#allocation5 + $0x5bc] sm:$0xf0]  ;;  %v102_v48 = vld [vmem:[#allocation2 + $0x38] sm:$0xff]  ;;  %v9642_v33 = vld [vmem:[#allocation5 + $0x9c0] sm:$0xf0] }
  0x3c   :  { %v9640_v52 = vld [vmem:[#allocation5 + $0x980] sm:$0xf]  ;;  %v9129_v57 = vor.u32 %v12702_v51, %v9128_v49  ;;  %3219 = vmatpush.bf16.msra.mxu0 %v8617_v56  ;;  %v9389_v49 = vor.u32 %v12758_v30, %v9386_v31  ;;  %v12742_v51 = vld [vmem:[#allocation5 + $0x704] sm:$0xf] }
  0x3d   :  { %v12830_v53 = vld [vmem:[#allocation5 + $0x9bc] sm:$0xf0]  ;;  %v9322_v56 = vld [vmem:[#allocation5 + $0x740] sm:$0xf0] }
  0x3e   :  { %v10152_v54 = vld [vmem:[#allocation5 + $0xd80] sm:$0xf]  ;;  %v9641_v58 = vor.u32 %v12830_v53, %v9640_v52  ;;  %3233 = vmatpush.bf16.msra.mxu1 %v9129_v57  ;;  %v96_v52 = vld [vmem:[#allocation2 + $0x8] sm:$0xff]  ;;  %v12870_v57 = vld [vmem:[#allocation5 + $0xb04] sm:$0xf] }
  0x3f   :  { %v12958_v55 = vld [vmem:[#allocation5 + $0xdbc] sm:$0xf0]  ;;  %v100_v53 = vld [vmem:[#allocation2 + $0x28] sm:$0xff]  ;;  %v9130_v31 = vld [vmem:[#allocation5 + $0x5c0] sm:$0xf0] }
  0x40   :  { %v8552_v59 = vld [vmem:[#allocation5 + $0x100] sm:$0xf]  ;;  %v10153_v62 = vor.u32 %v12958_v55, %v10152_v54  ;;  %3247 = vmatpush.bf16.msra.mxu2 %v9641_v58  ;;  %v10413_v54 = vor.u32 %v13014_v34, %v10410_v36  ;;  %v13834_v55 = vpack.c.bf16 %v101_v38, %v97_v37  ;;  %v9834_v58 = vld [vmem:[#allocation5 + $0xb40] sm:$0xf0]  ;;  %v9133_v37 = vor.u32 %v12694_v29, %v9130_v31  ;;  %v9328_v29 = vld [vmem:[#allocation5 + $0x708] sm:$0xf] }
  0x41   :  { %v12558_v60 = vld [vmem:[#allocation5 + $0x13c] sm:$0xf0]  ;;  %v12950_v34 = vld [vmem:[#allocation5 + $0xd84] sm:$0xf]  ;;  %v9645_v38 = vor.u32 %v12822_v32, %v9642_v33  ;;  %v12751_v31 = vld [vmem:[#allocation5 + $0x744] sm:$0xf0] }
  0x42   :  { %v9064_v61 = vld [vmem:[#allocation5 + $0x500] sm:$0xf]  ;;  %v8553_v4 = vor.u32 %v12558_v60, %v8552_v59  ;;  %3261 = vmatpush.bf16.msra.mxu3 %v10153_v62  ;;  %v12998_v59 = vld [vmem:[#allocation5 + $0xf04] sm:$0xf]  ;;  %v13838_v62 = vpack.c.bf16 %v102_v48, %v98_v47  ;;  %v9840_v32 = vld [vmem:[#allocation5 + $0xb08] sm:$0xf] }
  0x43   :  { %v12686_v63 = vld [vmem:[#allocation5 + $0x53c] sm:$0xf0]  ;;  %v10346_v60 = vld [vmem:[#allocation5 + $0xf40] sm:$0xf0]  ;;  %v12879_v33 = vld [vmem:[#allocation5 + $0xb44] sm:$0xf0] }
  0x44   :  { %v9576_v0 = vld [vmem:[#allocation5 + $0x900] sm:$0xf]  ;;  %v9065_v6 = vor.u32 %v12686_v63, %v9064_v61  ;;  %3220 = vmatpush.bf16.msra.mxu0 %v8553_v4  ;;  %v8813_v63 = vor.u32 %v12614_v41, %v8810_v42  ;;  %v8746_v4 = vld [vmem:[#allocation5 + $0x2c0] sm:$0xf0] }
  0x45   :  { %v12814_v1 = vld [vmem:[#allocation5 + $0x93c] sm:$0xf0]  ;;  %v12678_v41 = vld [vmem:[#allocation5 + $0x504] sm:$0xf] }
  0x46   :  { %v10088_v2 = vld [vmem:[#allocation5 + $0xd00] sm:$0xf]  ;;  %v9577_v7 = vor.u32 %v12814_v1, %v9576_v0  ;;  %3234 = vmatpush.bf16.msra.mxu1 %v9065_v6  ;;  %v13840_v0 = vpack.c.bf16 %v100_v53, %v96_v52  ;;  %v9325_v1 = vor.u32 %v12742_v51, %v9322_v56  ;;  %v10349_v6 = vor.u32 %v12998_v59, %v10346_v60  ;;  %v10090_v47 = vld [vmem:[#allocation5 + $0xd40] sm:$0xf0] }
  0x47   :  { %v12942_v3 = vld [vmem:[#allocation5 + $0xd3c] sm:$0xf0]  ;;  %v12534_v51 = vld [vmem:[#allocation5 + $0x84] sm:$0xf] }
  0x48   :  { %v8488_v5 = vld [vmem:[#allocation5 + $0x80] sm:$0xf]  ;;  %v10089_v11 = vor.u32 %v12942_v3, %v10088_v2  ;;  %3248 = vmatpush.bf16.msra.mxu2 %v9577_v7  ;;  %v9837_v2 = vor.u32 %v12870_v57, %v9834_v58  ;;  %v12598_v3 = vld [vmem:[#allocation5 + $0x284] sm:$0xf] }
  0x49   :  { %v12542_v8 = vld [vmem:[#allocation5 + $0xbc] sm:$0xf0]  ;;  %v9258_v7 = vld [vmem:[#allocation5 + $0x6c0] sm:$0xf0] }
  0x4a   :  { %v9000_v9 = vld [vmem:[#allocation5 + $0x480] sm:$0xf]  ;;  %v8489_v18 = vor.u32 %v12542_v8, %v8488_v5  ;;  %3262 = vmatpush.bf16.msra.mxu3 %v10089_v11  ;;  %v12726_v5 = vld [vmem:[#allocation5 + $0x684] sm:$0xf] }
  0x4b   :  { %v12670_v10 = vld [vmem:[#allocation5 + $0x4bc] sm:$0xf0]  ;;  %v12854_v8 = vld [vmem:[#allocation5 + $0xa84] sm:$0xf] }
  0x4c   :  { %v9512_v12 = vld [vmem:[#allocation5 + $0x880] sm:$0xf]  ;;  %v9001_v23 = vor.u32 %v12670_v10, %v9000_v9  ;;  %3221 = vmatpush.bf16.msra.mxu0 %v8489_v18  ;;  %v9770_v9 = vld [vmem:[#allocation5 + $0xac0] sm:$0xf0] }
  0x4d   :  { %v12798_v13 = vld [vmem:[#allocation5 + $0x8bc] sm:$0xf0]  ;;  %v12982_v10 = vld [vmem:[#allocation5 + $0xe84] sm:$0xf] }
  0x4e   :  { %v10024_v14 = vld [vmem:[#allocation5 + $0xc80] sm:$0xf]  ;;  %v9513_v24 = vor.u32 %v12798_v13, %v9512_v12  ;;  %3235 = vmatpush.bf16.msra.mxu1 %v9001_v23  ;;  %v10282_v11 = vld [vmem:[#allocation5 + $0xec0] sm:$0xf0]  ;;  %v8749_v12 = vor.u32 %v12598_v3, %v8746_v4  ;;  %v9261_v13 = vor.u32 %v12726_v5, %v9258_v7 }
  0x4f   :  { %v12926_v15 = vld [vmem:[#allocation5 + $0xcbc] sm:$0xf0]  ;;  %v10285_v18 = vor.u32 %v12982_v10, %v10282_v11  ;;  %v10218_v23 = vld [vmem:[#allocation5 + $0xe40] sm:$0xf0] }
  0x50   :  { %v8424_v16 = vld [vmem:[#allocation5] sm:$0xf]  ;;  %v10025_v28 = vor.u32 %v12926_v15, %v10024_v14  ;;  %3249 = vmatpush.bf16.msra.mxu2 %v9513_v24  ;;  %v9773_v14 = vor.u32 %v12854_v8, %v9770_v9  ;;  %v12582_v15 = vld [vmem:[#allocation5 + $0x204] sm:$0xf] }
  0x51   :  { %v12526_v17 = vld [vmem:[#allocation5 + $0x3c] sm:$0xf0]  ;;  %v8490_v52 = vld [vmem:[#allocation5 + $0xc0] sm:$0xf0] }
  0x52   :  { %v8936_v19 = vld [vmem:[#allocation5 + $0x400] sm:$0xf]  ;;  %v8425_v35 = vor.u32 %v12526_v17, %v8424_v16  ;;  %3263 = vmatpush.bf16.msra.mxu3 %v10025_v28  ;;  %v8682_v16 = vld [vmem:[#allocation5 + $0x240] sm:$0xf0] }
  0x53   :  { %v12654_v20 = vld [vmem:[#allocation5 + $0x43c] sm:$0xf0]  ;;  %v12710_v17 = vld [vmem:[#allocation5 + $0x604] sm:$0xf]  ;;  %v8685_v24 = vor.u32 %v12582_v15, %v8682_v16  ;;  %v12767_v16 = vld [vmem:[#allocation5 + $0x7c4] sm:$0xf0] }
  0x54   :  { %v9448_v21 = vld [vmem:[#allocation5 + $0x800] sm:$0xf]  ;;  %v8937_v39 = vor.u32 %v12654_v20, %v8936_v19  ;;  %3222 = vmatpush.bf16.msra.mxu0 %v8425_v35  ;;  %v9194_v19 = vld [vmem:[#allocation5 + $0x640] sm:$0xf0] }
  0x55   :  { %v12782_v22 = vld [vmem:[#allocation5 + $0x83c] sm:$0xf0]  ;;  %v12838_v20 = vld [vmem:[#allocation5 + $0xa04] sm:$0xf] }
  0x56   :  { %v9960_v25 = vld [vmem:[#allocation5 + $0xc00] sm:$0xf]  ;;  %v9449_v40 = vor.u32 %v12782_v22, %v9448_v21  ;;  %3236 = vmatpush.bf16.msra.mxu1 %v8937_v39  ;;  %v9706_v21 = vld [vmem:[#allocation5 + $0xa40] sm:$0xf0] }
  0x57   :  { %v12910_v26 = vld [vmem:[#allocation5 + $0xc3c] sm:$0xf0]  ;;  %v12966_v22 = vld [vmem:[#allocation5 + $0xe04] sm:$0xf] }
  0x58   :  { %v95_v43 = vld [vmem:[#allocation2] sm:$0xff]  ;;  %v9961_v44 = vor.u32 %v12910_v26, %v9960_v25  ;;  %3250 = vmatpush.bf16.msra.mxu2 %v9449_v40  ;;  %3271 = vmatpush.bf16.msrb.mxu0 %v8877_v45  ;;  %v9197_v25 = vor.u32 %v12710_v17, %v9194_v19  ;;  %v9709_v26 = vor.u32 %v12838_v20, %v9706_v21  ;;  %v9904_v17 = vld [vmem:[#allocation5 + $0xb88] sm:$0xf] }
  0x59   :  { %v99_v46 = vld [vmem:[#allocation2 + $0x20] sm:$0xff]  ;;  %3237 = vmatmul.bf16.vlgmr.msra.gmra.mxu1 %v13840_v0  ;;  %v10221_v30 = vor.u32 %v12966_v22, %v10218_v23  ;;  %v10416_v21 = vld [vmem:[#allocation5 + $0xf88] sm:$0xf] }
  0x5a   :  { %v13836_v61 = vpack.c.bf16 %v99_v46, %v95_v43  ;;  %3264 = vmatpush.bf16.msra.mxu3 %v9961_v44  ;;  %3285 = vmatpush.bf16.msrb.mxu1 %v9389_v49  ;;  %v8618_v28 = vld [vmem:[#allocation5 + $0x1c0] sm:$0xf0]  ;;  %v13023_v22 = vld [vmem:[#allocation5 + $0xfc4] sm:$0xf0] }
  0x5b   :  { %3251 = vmatmul.bf16.vlgmr.msra.gmra.mxu2 %v13834_v55  ;;  %v10154_v35 = vld [vmem:[#allocation5 + $0xdc0] sm:$0xf0]  ;;  %v8621_v36 = vor.u32 %v12566_v27, %v8618_v28  ;;  %v8816_v27 = vld [vmem:[#allocation5 + $0x308] sm:$0xf] }
  0x5c   :  { %3299 = vmatpush.bf16.msrb.mxu2 %v9901_v50  ;;  %3223 = vmatmul.bf16.vlgmr.msra.gmra.mxu0 %v13836_v61  ;;  %v12550_v39 = vld [vmem:[#allocation5 + $0x104] sm:$0xf]  ;;  %v10157_v42 = vor.u32 %v12950_v34, %v10154_v35  ;;  %v12623_v28 = vld [vmem:[#allocation5 + $0x344] sm:$0xf0] }
  0x5d   :  { %3265 = vmatmul.bf16.vlgmr.msra.gmra.mxu3 %v13838_v62  ;;  %3272 = vmatpush.bf16.msrb.mxu0 %v8813_v63  ;;  %v8554_v40 = vld [vmem:[#allocation5 + $0x140] sm:$0xf0]  ;;  %v8493_v63 = vor.u32 %v12534_v51, %v8490_v52  ;;  %v10352_v34 = vld [vmem:[#allocation5 + $0xf08] sm:$0xf] }
  0x5e   :  { %3313 = vmatpush.bf16.msrb.mxu3 %v10413_v54  ;;  %3286 = vmatpush.bf16.msrb.mxu1 %v9325_v1  ;;  %v9066_v43 = vld [vmem:[#allocation5 + $0x540] sm:$0xf0]  ;;  %v8557_v48 = vor.u32 %v12550_v39, %v8554_v40  ;;  %v13007_v35 = vld [vmem:[#allocation5 + $0xf44] sm:$0xf0] }
  0x5f   :  { %v12806_v44 = vld [vmem:[#allocation5 + $0x904] sm:$0xf]  ;;  %v9069_v49 = vor.u32 %v12678_v41, %v9066_v43  ;;  %v8752_v39 = vld [vmem:[#allocation5 + $0x288] sm:$0xf] }
  0x60   :  { %3300 = vmatpush.bf16.msrb.mxu2 %v9837_v2  ;;  %v9578_v45 = vld [vmem:[#allocation5 + $0x940] sm:$0xf0]  ;;  %v12607_v40 = vld [vmem:[#allocation5 + $0x2c4] sm:$0xf0] }
  0x61   :  { %3273 = vmatpush.bf16.msrb.mxu0 %v8749_v12  ;;  %v12934_v46 = vld [vmem:[#allocation5 + $0xd04] sm:$0xf]  ;;  %v9581_v50 = vor.u32 %v12806_v44, %v9578_v45  ;;  %v8880_v12 = vld [vmem:[#allocation5 + $0x388] sm:$0xf] }
  0x62   :  { %3314 = vmatpush.bf16.msrb.mxu3 %v10349_v6  ;;  %3287 = vmatpush.bf16.msrb.mxu1 %v9261_v13  ;;  %v12662_v53 = vld [vmem:[#allocation5 + $0x484] sm:$0xf]  ;;  %v10093_v54 = vor.u32 %v12934_v46, %v10090_v47  ;;  %v12639_v13 = vld [vmem:[#allocation5 + $0x3c4] sm:$0xf0] }
  0x63   :  { %v9002_v56 = vld [vmem:[#allocation5 + $0x4c0] sm:$0xf0]  ;;  %v9264_v41 = vld [vmem:[#allocation5 + $0x688] sm:$0xf] }
  0x64   :  { %3301 = vmatpush.bf16.msrb.mxu2 %v9773_v14  ;;  %v12790_v57 = vld [vmem:[#allocation5 + $0x884] sm:$0xf]  ;;  %v9005_v3 = vor.u32 %v12662_v53, %v9002_v56  ;;  %v9392_v14 = vld [vmem:[#allocation5 + $0x788] sm:$0xf] }
  0x65   :  { %3274 = vmatpush.bf16.msrb.mxu0 %v8685_v24  ;;  %v9514_v58 = vld [vmem:[#allocation5 + $0x8c0] sm:$0xf0]  ;;  %v8881_v24 = vor.u32 %v12639_v13, %v8880_v12  ;;  %v12735_v43 = vld [vmem:[#allocation5 + $0x6c4] sm:$0xf0] }
  0x66   :  { %3315 = vmatpush.bf16.msrb.mxu3 %v10285_v18  ;;  %3288 = vmatpush.bf16.msrb.mxu1 %v9197_v25  ;;  %v12918_v59 = vld [vmem:[#allocation5 + $0xc84] sm:$0xf]  ;;  %v9517_v4 = vor.u32 %v12790_v57, %v9514_v58  ;;  %v12895_v18 = vld [vmem:[#allocation5 + $0xbc4] sm:$0xf0]  ;;  %v9393_v25 = vor.u32 %v12767_v16, %v9392_v14 }
  0x67   :  { %v10026_v60 = vld [vmem:[#allocation5 + $0xcc0] sm:$0xf0]  ;;  %v9776_v44 = vld [vmem:[#allocation5 + $0xa88] sm:$0xf] }
  0x68   :  { %3302 = vmatpush.bf16.msrb.mxu2 %v9709_v26  ;;  %v12518_v1 = vld [vmem:[#allocation5 + $0x4] sm:$0xf]  ;;  %v10029_v8 = vor.u32 %v12918_v59, %v10026_v60  ;;  %v9905_v26 = vor.u32 %v12895_v18, %v9904_v17  ;;  %v12863_v45 = vld [vmem:[#allocation5 + $0xac4] sm:$0xf0] }
  0x69   :  { %3275 = vmatpush.bf16.msrb.mxu0 %v8621_v36  ;;  %v8426_v2 = vld [vmem:[#allocation5 + $0x40] sm:$0xf0]  ;;  %v8817_v36 = vor.u32 %v12623_v28, %v8816_v27  ;;  %v10288_v46 = vld [vmem:[#allocation5 + $0xe88] sm:$0xf] }
  0x6a   :  { %3316 = vmatpush.bf16.msrb.mxu3 %v10221_v30  ;;  %3289 = vmatpush.bf16.msrb.mxu1 %v9133_v37  ;;  %v12646_v5 = vld [vmem:[#allocation5 + $0x404] sm:$0xf]  ;;  %v8429_v15 = vor.u32 %v12518_v1, %v8426_v2  ;;  %v10417_v30 = vor.u32 %v13023_v22, %v10416_v21  ;;  %v9329_v37 = vor.u32 %v12751_v31, %v9328_v29  ;;  %v12991_v47 = vld [vmem:[#allocation5 + $0xec4] sm:$0xf0] }
  0x6b   :  { %v8938_v6 = vld [vmem:[#allocation5 + $0x440] sm:$0xf0]  ;;  %v8688_v51 = vld [vmem:[#allocation5 + $0x208] sm:$0xf] }
  0x6c   :  { %3303 = vmatpush.bf16.msrb.mxu2 %v9645_v38  ;;  %v12774_v7 = vld [vmem:[#allocation5 + $0x804] sm:$0xf]  ;;  %v8941_v19 = vor.u32 %v12646_v5, %v8938_v6  ;;  %v9841_v38 = vor.u32 %v12879_v33, %v9840_v32  ;;  %v12591_v52 = vld [vmem:[#allocation5 + $0x244] sm:$0xf0] }
  0x6d   :  { %3276 = vmatpush.bf16.msrb.mxu0 %v8557_v48  ;;  %v9450_v9 = vld [vmem:[#allocation5 + $0x840] sm:$0xf0]  ;;  %v8753_v48 = vor.u32 %v12607_v40, %v8752_v39  ;;  %v9200_v53 = vld [vmem:[#allocation5 + $0x608] sm:$0xf] }
  0x6e   :  { %3317 = vmatpush.bf16.msrb.mxu3 %v10157_v42  ;;  %3290 = vmatpush.bf16.msrb.mxu1 %v9069_v49  ;;  %v12902_v10 = vld [vmem:[#allocation5 + $0xc04] sm:$0xf]  ;;  %v9453_v20 = vor.u32 %v12774_v7, %v9450_v9  ;;  %v10353_v42 = vor.u32 %v13007_v35, %v10352_v34  ;;  %v9265_v49 = vor.u32 %v12735_v43, %v9264_v41  ;;  %v12719_v56 = vld [vmem:[#allocation5 + $0x644] sm:$0xf0] }
  0x6f   :  { %v9962_v11 = vld [vmem:[#allocation5 + $0xc40] sm:$0xf0]  ;;  %v9712_v57 = vld [vmem:[#allocation5 + $0xa08] sm:$0xf]  ;;  %v9201_v1 = vor.u32 %v12719_v56, %v9200_v53  ;;  %v12887_v53 = vld [vmem:[#allocation5 + $0xb8c] sm:$0xf] }
  0x70   :  { %3304 = vmatpush.bf16.msrb.mxu2 %v9581_v50  ;;  %v9965_v23 = vor.u32 %v12902_v10, %v9962_v11  ;;  %v9777_v50 = vor.u32 %v12863_v45, %v9776_v44  ;;  %v12847_v58 = vld [vmem:[#allocation5 + $0xa44] sm:$0xf0] }
  0x71   :  { %3277 = vmatpush.bf16.msrb.mxu0 %v8493_v63  ;;  %v10224_v59 = vld [vmem:[#allocation5 + $0xe08] sm:$0xf]  ;;  %v8689_v63 = vor.u32 %v12591_v52, %v8688_v51  ;;  %v9713_v2 = vor.u32 %v12847_v58, %v9712_v57  ;;  %v9394_v52 = vld [vmem:[#allocation5 + $0x7c8] sm:$0xf0] }
  0x72   :  { %3318 = vmatpush.bf16.msrb.mxu3 %v10093_v54  ;;  %3291 = vmatpush.bf16.msrb.mxu1 %v9005_v3  ;;  %v10289_v54 = vor.u32 %v12991_v47, %v10288_v46  ;;  %v12975_v60 = vld [vmem:[#allocation5 + $0xe44] sm:$0xf0]  ;;  %v13015_v58 = vld [vmem:[#allocation5 + $0xf8c] sm:$0xf] }
  0x73   :  { %v8624_v3 = vld [vmem:[#allocation5 + $0x188] sm:$0xf]  ;;  %v10225_v6 = vor.u32 %v12975_v60, %v10224_v59  ;;  %v10418_v59 = vld [vmem:[#allocation5 + $0xfc8] sm:$0xf0] }
  0x74   :  { %3305 = vmatpush.bf16.msrb.mxu2 %v9517_v4  ;;  %v12575_v4 = vld [vmem:[#allocation5 + $0x1c4] sm:$0xf0] }
  0x75   :  { %3278 = vmatpush.bf16.msrb.mxu0 %v8429_v15  ;;  %v9136_v5 = vld [vmem:[#allocation5 + $0x588] sm:$0xf]  ;;  %v8625_v12 = vor.u32 %v12575_v4, %v8624_v3  ;;  %v12615_v3 = vld [vmem:[#allocation5 + $0x30c] sm:$0xf] }
  0x76   :  { %3319 = vmatpush.bf16.msrb.mxu3 %v10029_v8  ;;  %3292 = vmatpush.bf16.msrb.mxu1 %v8941_v19  ;;  %v12703_v7 = vld [vmem:[#allocation5 + $0x5c4] sm:$0xf0]  ;;  %v8818_v4 = vld [vmem:[#allocation5 + $0x348] sm:$0xf0] }
  0x77   :  { %v9648_v8 = vld [vmem:[#allocation5 + $0x988] sm:$0xf]  ;;  %v9137_v13 = vor.u32 %v12703_v7, %v9136_v5  ;;  %v12743_v5 = vld [vmem:[#allocation5 + $0x70c] sm:$0xf] }
  0x78   :  { %3306 = vmatpush.bf16.msrb.mxu2 %v9453_v20  ;;  %3279 = vmatmul.bf16.vlgmr.msrb.gmra.mxu0 %v13836_v61  ;;  %v12831_v9 = vld [vmem:[#allocation5 + $0x9c4] sm:$0xf0]  ;;  %v9330_v7 = vld [vmem:[#allocation5 + $0x748] sm:$0xf0] }
  0x79   :  { %3327 = vmatpush.bf16.msra.mxu0 %v8881_v24  ;;  %3293 = vmatmul.bf16.vlgmr.msrb.gmra.mxu1 %v13840_v0  ;;  %v10160_v10 = vld [vmem:[#allocation5 + $0xd88] sm:$0xf]  ;;  %v9649_v14 = vor.u32 %v12831_v9, %v9648_v8  ;;  %v12871_v8 = vld [vmem:[#allocation5 + $0xb0c] sm:$0xf] }
  0x7a   :  { %3320 = vmatpush.bf16.msrb.mxu3 %v9965_v23  ;;  %3341 = vmatpush.bf16.msra.mxu1 %v9393_v25  ;;  %v12959_v11 = vld [vmem:[#allocation5 + $0xdc4] sm:$0xf0]  ;;  %v9842_v9 = vld [vmem:[#allocation5 + $0xb48] sm:$0xf0] }
  0x7b   :  { %3307 = vmatmul.bf16.vlgmr.msrb.gmra.mxu2 %v13834_v55  ;;  %v8560_v15 = vld [vmem:[#allocation5 + $0x108] sm:$0xf]  ;;  %v10161_v18 = vor.u32 %v12959_v11, %v10160_v10  ;;  %v12999_v10 = vld [vmem:[#allocation5 + $0xf0c] sm:$0xf] }
  0x7c   :  { %3355 = vmatpush.bf16.msra.mxu2 %v9905_v26  ;;  %v12559_v16 = vld [vmem:[#allocation5 + $0x144] sm:$0xf0]  ;;  %v10354_v11 = vld [vmem:[#allocation5 + $0xf48] sm:$0xf0] }
  0x7d   :  { %3321 = vmatmul.bf16.vlgmr.msrb.gmra.mxu3 %v13838_v62  ;;  %3328 = vmatpush.bf16.msra.mxu0 %v8817_v36  ;;  %v9072_v17 = vld [vmem:[#allocation5 + $0x508] sm:$0xf]  ;;  %v8561_v24 = vor.u32 %v12559_v16, %v8560_v15  ;;  %v12599_v15 = vld [vmem:[#allocation5 + $0x28c] sm:$0xf] }
  0x7e   :  { %3369 = vmatpush.bf16.msra.mxu3 %v10417_v30  ;;  %3342 = vmatpush.bf16.msra.mxu1 %v9329_v37  ;;  %v12687_v19 = vld [vmem:[#allocation5 + $0x544] sm:$0xf0]  ;;  %v8754_v16 = vld [vmem:[#allocation5 + $0x2c8] sm:$0xf0] }
  0x7f   :  { %v9584_v20 = vld [vmem:[#allocation5 + $0x908] sm:$0xf]  ;;  %v9073_v25 = vor.u32 %v12687_v19, %v9072_v17  ;;  %v12727_v17 = vld [vmem:[#allocation5 + $0x68c] sm:$0xf] }
  0x80   :  { %3356 = vmatpush.bf16.msra.mxu2 %v9841_v38  ;;  %v12815_v21 = vld [vmem:[#allocation5 + $0x944] sm:$0xf0]  ;;  %v9266_v19 = vld [vmem:[#allocation5 + $0x6c8] sm:$0xf0] }
  0x81   :  { %3329 = vmatpush.bf16.msra.mxu0 %v8753_v48  ;;  %v10096_v22 = vld [vmem:[#allocation5 + $0xd08] sm:$0xf]  ;;  %v9585_v26 = vor.u32 %v12815_v21, %v9584_v20  ;;  %v12631_v48 = vld [vmem:[#allocation5 + $0x38c] sm:$0xf] }
  0x82   :  { %3370 = vmatpush.bf16.msra.mxu3 %v10353_v42  ;;  %3343 = vmatpush.bf16.msra.mxu1 %v9265_v49  ;;  %v12943_v23 = vld [vmem:[#allocation5 + $0xd44] sm:$0xf0]  ;;  %v8882_v49 = vld [vmem:[#allocation5 + $0x3c8] sm:$0xf0] }
  0x83   :  { %v8496_v27 = vld [vmem:[#allocation5 + $0x88] sm:$0xf]  ;;  %v10097_v30 = vor.u32 %v12943_v23, %v10096_v22  ;;  %v12855_v20 = vld [vmem:[#allocation5 + $0xa8c] sm:$0xf] }
  0x84   :  { %3357 = vmatpush.bf16.msra.mxu2 %v9777_v50  ;;  %v12543_v28 = vld [vmem:[#allocation5 + $0xc4] sm:$0xf0]  ;;  %v12759_v50 = vld [vmem:[#allocation5 + $0x78c] sm:$0xf] }
  0x85   :  { %3330 = vmatpush.bf16.msra.mxu0 %v8689_v63  ;;  %v9008_v29 = vld [vmem:[#allocation5 + $0x488] sm:$0xf]  ;;  %v8497_v36 = vor.u32 %v12543_v28, %v8496_v27  ;;  %v8885_v63 = vor.u32 %v12631_v48, %v8882_v49  ;;  %v9778_v21 = vld [vmem:[#allocation5 + $0xac8] sm:$0xf0] }
  0x86   :  { %3371 = vmatpush.bf16.msra.mxu3 %v10289_v54  ;;  %3344 = vmatpush.bf16.msra.mxu1 %v9201_v1  ;;  %v12671_v31 = vld [vmem:[#allocation5 + $0x4c4] sm:$0xf0]  ;;  %v9906_v54 = vld [vmem:[#allocation5 + $0xbc8] sm:$0xf0]  ;;  %v9397_v1 = vor.u32 %v12759_v50, %v9394_v52 }
  0x87   :  { %v9520_v32 = vld [vmem:[#allocation5 + $0x888] sm:$0xf]  ;;  %v9009_v39 = vor.u32 %v12671_v31, %v9008_v29  ;;  %v12983_v22 = vld [vmem:[#allocation5 + $0xe8c] sm:$0xf] }
  0x88   :  { %3358 = vmatpush.bf16.msra.mxu2 %v9713_v2  ;;  %v12799_v33 = vld [vmem:[#allocation5 + $0x8c4] sm:$0xf0]  ;;  %v9909_v2 = vor.u32 %v12887_v53, %v9906_v54  ;;  %v10290_v23 = vld [vmem:[#allocation5 + $0xec8] sm:$0xf0] }
  0x89   :  { %3331 = vmatpush.bf16.msra.mxu0 %v8625_v12  ;;  %v10032_v34 = vld [vmem:[#allocation5 + $0xc88] sm:$0xf]  ;;  %v9521_v40 = vor.u32 %v12799_v33, %v9520_v32  ;;  %v8821_v12 = vor.u32 %v12615_v3, %v8818_v4  ;;  %v12583_v27 = vld [vmem:[#allocation5 + $0x20c] sm:$0xf] }
  0x8a   :  { %3372 = vmatpush.bf16.msra.mxu3 %v10225_v6  ;;  %3345 = vmatpush.bf16.msra.mxu1 %v9137_v13  ;;  %v12927_v35 = vld [vmem:[#allocation5 + $0xcc4] sm:$0xf0]  ;;  %v10421_v6 = vor.u32 %v13015_v58, %v10418_v59  ;;  %v9333_v13 = vor.u32 %v12743_v5, %v9330_v7  ;;  %v8690_v28 = vld [vmem:[#allocation5 + $0x248] sm:$0xf0] }
  0x8b   :  { %v8432_v37 = vld [vmem:[#allocation5 + $0x8] sm:$0xf]  ;;  %v10033_v44 = vor.u32 %v12927_v35, %v10032_v34  ;;  %v12711_v29 = vld [vmem:[#allocation5 + $0x60c] sm:$0xf] }
  0x8c   :  { %3359 = vmatpush.bf16.msra.mxu2 %v9649_v14  ;;  %v12527_v38 = vld [vmem:[#allocation5 + $0x44] sm:$0xf0]  ;;  %v9845_v14 = vor.u32 %v12871_v8, %v9842_v9  ;;  %v9202_v31 = vld [vmem:[#allocation5 + $0x648] sm:$0xf0] }
  0x8d   :  { %3332 = vmatpush.bf16.msra.mxu0 %v8561_v24  ;;  %v8944_v41 = vld [vmem:[#allocation5 + $0x408] sm:$0xf]  ;;  %v8433_v51 = vor.u32 %v12527_v38, %v8432_v37  ;;  %v8757_v24 = vor.u32 %v12599_v15, %v8754_v16  ;;  %v12839_v32 = vld [vmem:[#allocation5 + $0xa0c] sm:$0xf]  ;;  %v9205_v37 = vor.u32 %v12711_v29, %v9202_v31  ;;  %v9912_v29 = vld [vmem:[#allocation5 + $0xb90] sm:$0xf] }
  0x8e   :  { %3373 = vmatpush.bf16.msra.mxu3 %v10161_v18  ;;  %3346 = vmatpush.bf16.msra.mxu1 %v9073_v25  ;;  %v12655_v42 = vld [vmem:[#allocation5 + $0x444] sm:$0xf0]  ;;  %v10357_v18 = vor.u32 %v12999_v10, %v10354_v11  ;;  %v9269_v25 = vor.u32 %v12727_v17, %v9266_v19  ;;  %v9714_v33 = vld [vmem:[#allocation5 + $0xa48] sm:$0xf0] }
  0x8f   :  { %v9456_v43 = vld [vmem:[#allocation5 + $0x808] sm:$0xf]  ;;  %v8945_v56 = vor.u32 %v12655_v42, %v8944_v41  ;;  %v12967_v34 = vld [vmem:[#allocation5 + $0xe0c] sm:$0xf]  ;;  %v9717_v38 = vor.u32 %v12839_v32, %v9714_v33  ;;  %v10424_v33 = vld [vmem:[#allocation5 + $0xf90] sm:$0xf] }
  0x90   :  { %3360 = vmatpush.bf16.msra.mxu2 %v9585_v26  ;;  %v12783_v45 = vld [vmem:[#allocation5 + $0x844] sm:$0xf0]  ;;  %v9781_v26 = vor.u32 %v12855_v20, %v9778_v21  ;;  %v10226_v35 = vld [vmem:[#allocation5 + $0xe48] sm:$0xf0] }
  0x91   :  { %v9968_v46 = vld [vmem:[#allocation5 + $0xc08] sm:$0xf]  ;;  %3333 = vmatpush.bf16.msra.mxu0 %v8497_v36  ;;  %v9457_v57 = vor.u32 %v12783_v45, %v9456_v43  ;;  %v8693_v36 = vor.u32 %v12583_v27, %v8690_v28  ;;  %v12695_v41 = vld [vmem:[#allocation5 + $0x58c] sm:$0xf]  ;;  %v10229_v42 = vor.u32 %v12967_v34, %v10226_v35  ;;  %v12768_v28 = vld [vmem:[#allocation5 + $0x7cc] sm:$0xf0] }
  0x92   :  { %3374 = vmatpush.bf16.msra.mxu3 %v10097_v30  ;;  %v12911_v47 = vld [vmem:[#allocation5 + $0xc44] sm:$0xf0]  ;;  %3347 = vmatpush.bf16.msra.mxu1 %v9009_v39  ;;  %v10293_v30 = vor.u32 %v12983_v22, %v10290_v23  ;;  %v12567_v39 = vld [vmem:[#allocation5 + $0x18c] sm:$0xf]  ;;  %v13024_v34 = vld [vmem:[#allocation5 + $0xfcc] sm:$0xf0] }
  0x93   :  { %v9969_v60 = vor.u32 %v12911_v47, %v9968_v46  ;;  %v9138_v43 = vld [vmem:[#allocation5 + $0x5c8] sm:$0xf0] }
  0x94   :  { %3361 = vmatpush.bf16.msra.mxu2 %v9521_v40  ;;  %v8626_v40 = vld [vmem:[#allocation5 + $0x1c8] sm:$0xf0]  ;;  %v9141_v49 = vor.u32 %v12695_v41, %v9138_v43  ;;  %v9336_v41 = vld [vmem:[#allocation5 + $0x710] sm:$0xf] }
  0x95   :  { %3334 = vmatpush.bf16.msra.mxu0 %v8433_v51  ;;  %v9650_v45 = vld [vmem:[#allocation5 + $0x9c8] sm:$0xf0]  ;;  %v8629_v48 = vor.u32 %v12567_v39, %v8626_v40  ;;  %v8824_v39 = vld [vmem:[#allocation5 + $0x310] sm:$0xf] }
  0x96   :  { %3375 = vmatpush.bf16.msra.mxu3 %v10033_v44  ;;  %3348 = vmatpush.bf16.msra.mxu1 %v8945_v56  ;;  %v12823_v44 = vld [vmem:[#allocation5 + $0x98c] sm:$0xf]  ;;  %v12624_v40 = vld [vmem:[#allocation5 + $0x34c] sm:$0xf0] }
  0x97   :  { %v12951_v46 = vld [vmem:[#allocation5 + $0xd8c] sm:$0xf]  ;;  %v9653_v50 = vor.u32 %v12823_v44, %v9650_v45  ;;  %v12752_v43 = vld [vmem:[#allocation5 + $0x74c] sm:$0xf0] }
  0x98   :  { %3362 = vmatpush.bf16.msra.mxu2 %v9457_v57  ;;  %3335 = vmatmul.bf16.vlgmr.msra.gmra.mxu0 %v13836_v61  ;;  %v10162_v47 = vld [vmem:[#allocation5 + $0xdc8] sm:$0xf0]  ;;  %v9848_v44 = vld [vmem:[#allocation5 + $0xb10] sm:$0xf] }
  0x99   :  { %3383 = vmatpush.bf16.msrb.mxu0 %v8885_v63  ;;  %3349 = vmatmul.bf16.vlgmr.msra.gmra.mxu1 %v13840_v0  ;;  %v12551_v51 = vld [vmem:[#allocation5 + $0x10c] sm:$0xf]  ;;  %v10165_v54 = vor.u32 %v12951_v46, %v10162_v47  ;;  %v12880_v45 = vld [vmem:[#allocation5 + $0xb4c] sm:$0xf0] }
  0x9a   :  { %3376 = vmatpush.bf16.msra.mxu3 %v9969_v60  ;;  %3397 = vmatpush.bf16.msrb.mxu1 %v9397_v1  ;;  %v8562_v52 = vld [vmem:[#allocation5 + $0x148] sm:$0xf0]  ;;  %v10360_v46 = vld [vmem:[#allocation5 + $0xf10] sm:$0xf] }
  0x9b   :  { %3363 = vmatmul.bf16.vlgmr.msra.gmra.mxu2 %v13834_v55  ;;  %v12679_v53 = vld [vmem:[#allocation5 + $0x50c] sm:$0xf]  ;;  %v8565_v63 = vor.u32 %v12551_v51, %v8562_v52  ;;  %v13008_v47 = vld [vmem:[#allocation5 + $0xf4c] sm:$0xf0] }
  0x9c   :  { %3411 = vmatpush.bf16.msrb.mxu2 %v9909_v2  ;;  %v9074_v56 = vld [vmem:[#allocation5 + $0x548] sm:$0xf0]  ;;  %v8760_v51 = vld [vmem:[#allocation5 + $0x290] sm:$0xf] }
  0x9d   :  { %3377 = vmatmul.bf16.vlgmr.msra.gmra.mxu3 %v13838_v62  ;;  %3384 = vmatpush.bf16.msrb.mxu0 %v8821_v12  ;;  %v12807_v57 = vld [vmem:[#allocation5 + $0x90c] sm:$0xf]  ;;  %v9077_v1 = vor.u32 %v12679_v53, %v9074_v56  ;;  %v12608_v52 = vld [vmem:[#allocation5 + $0x2cc] sm:$0xf0] }
  0x9e   :  { %3425 = vmatpush.bf16.msrb.mxu3 %v10421_v6  ;;  %3398 = vmatpush.bf16.msrb.mxu1 %v9333_v13  ;;  %v9586_v58 = vld [vmem:[#allocation5 + $0x948] sm:$0xf0]  ;;  %v9272_v53 = vld [vmem:[#allocation5 + $0x690] sm:$0xf] }
  0x9f   :  { %v12935_v59 = vld [vmem:[#allocation5 + $0xd0c] sm:$0xf]  ;;  %v9589_v2 = vor.u32 %v12807_v57, %v9586_v58  ;;  %v12736_v56 = vld [vmem:[#allocation5 + $0x6cc] sm:$0xf0] }
  0xa0   :  { %3412 = vmatpush.bf16.msrb.mxu2 %v9845_v14  ;;  %v10098_v60 = vld [vmem:[#allocation5 + $0xd48] sm:$0xf0]  ;;  %v9784_v57 = vld [vmem:[#allocation5 + $0xa90] sm:$0xf] }
  0xa1   :  { %3385 = vmatpush.bf16.msrb.mxu0 %v8757_v24  ;;  %v12535_v3 = vld [vmem:[#allocation5 + $0x8c] sm:$0xf]  ;;  %v10101_v6 = vor.u32 %v12935_v59, %v10098_v60  ;;  %v8888_v24 = vld [vmem:[#allocation5 + $0x390] sm:$0xf] }
  0xa2   :  { %3426 = vmatpush.bf16.msrb.mxu3 %v10357_v18  ;;  %3399 = vmatpush.bf16.msrb.mxu1 %v9269_v25  ;;  %v8498_v4 = vld [vmem:[#allocation5 + $0xc8] sm:$0xf0]  ;;  %v12640_v25 = vld [vmem:[#allocation5 + $0x3cc] sm:$0xf0] }
  0xa3   :  { %v12663_v5 = vld [vmem:[#allocation5 + $0x48c] sm:$0xf]  ;;  %v8501_v12 = vor.u32 %v12535_v3, %v8498_v4  ;;  %v12864_v58 = vld [vmem:[#allocation5 + $0xacc] sm:$0xf0] }
  0xa4   :  { %3413 = vmatpush.bf16.msrb.mxu2 %v9781_v26  ;;  %v9010_v7 = vld [vmem:[#allocation5 + $0x4c8] sm:$0xf0]  ;;  %v9400_v26 = vld [vmem:[#allocation5 + $0x790] sm:$0xf] }
  0xa5   :  { %3386 = vmatpush.bf16.msrb.mxu0 %v8693_v36  ;;  %v12791_v8 = vld [vmem:[#allocation5 + $0x88c] sm:$0xf]  ;;  %v9013_v15 = vor.u32 %v12663_v5, %v9010_v7  ;;  %v8889_v36 = vor.u32 %v12640_v25, %v8888_v24  ;;  %v10296_v59 = vld [vmem:[#allocation5 + $0xe90] sm:$0xf] }
  0xa6   :  { %3427 = vmatpush.bf16.msrb.mxu3 %v10293_v30  ;;  %3400 = vmatpush.bf16.msrb.mxu1 %v9205_v37  ;;  %v9522_v9 = vld [vmem:[#allocation5 + $0x8c8] sm:$0xf0]  ;;  %v12896_v30 = vld [vmem:[#allocation5 + $0xbcc] sm:$0xf0]  ;;  %v9401_v37 = vor.u32 %v12768_v28, %v9400_v26 }
  0xa7   :  { %v12919_v10 = vld [vmem:[#allocation5 + $0xc8c] sm:$0xf]  ;;  %v9525_v16 = vor.u32 %v12791_v8, %v9522_v9  ;;  %v12992_v60 = vld [vmem:[#allocation5 + $0xecc] sm:$0xf0] }
  0xa8   :  { %3414 = vmatpush.bf16.msrb.mxu2 %v9717_v38  ;;  %v10034_v11 = vld [vmem:[#allocation5 + $0xcc8] sm:$0xf0]  ;;  %v9913_v38 = vor.u32 %v12896_v30, %v9912_v29  ;;  %v8696_v3 = vld [vmem:[#allocation5 + $0x210] sm:$0xf] }
  0xa9   :  { %3387 = vmatpush.bf16.msrb.mxu0 %v8629_v48  ;;  %v12519_v13 = vld [vmem:[#allocation5 + $0xc] sm:$0xf]  ;;  %v10037_v20 = vor.u32 %v12919_v10, %v10034_v11  ;;  %v8825_v48 = vor.u32 %v12624_v40, %v8824_v39  ;;  %v12592_v4 = vld [vmem:[#allocation5 + $0x24c] sm:$0xf0] }
  0xaa   :  { %3428 = vmatpush.bf16.msrb.mxu3 %v10229_v42  ;;  %3401 = vmatpush.bf16.msrb.mxu1 %v9141_v49  ;;  %v8434_v14 = vld [vmem:[#allocation5 + $0x48] sm:$0xf0]  ;;  %v10425_v42 = vor.u32 %v13024_v34, %v10424_v33  ;;  %v9337_v49 = vor.u32 %v12752_v43, %v9336_v41  ;;  %v9208_v5 = vld [vmem:[#allocation5 + $0x610] sm:$0xf] }
  0xab   :  { %v12647_v17 = vld [vmem:[#allocation5 + $0x40c] sm:$0xf]  ;;  %v8437_v27 = vor.u32 %v12519_v13, %v8434_v14  ;;  %v12720_v7 = vld [vmem:[#allocation5 + $0x64c] sm:$0xf0] }
  0xac   :  { %3415 = vmatpush.bf16.msrb.mxu2 %v9653_v50  ;;  %v8946_v18 = vld [vmem:[#allocation5 + $0x448] sm:$0xf0]  ;;  %v9849_v50 = vor.u32 %v12880_v45, %v9848_v44  ;;  %v9720_v8 = vld [vmem:[#allocation5 + $0xa10] sm:$0xf]  ;;  %v9209_v13 = vor.u32 %v12720_v7, %v9208_v5  ;;  %v12888_v5 = vld [vmem:[#allocation5 + $0xb94] sm:$0xf] }
  0xad   :  { %3388 = vmatpush.bf16.msrb.mxu0 %v8565_v63  ;;  %v12775_v19 = vld [vmem:[#allocation5 + $0x80c] sm:$0xf]  ;;  %v8949_v31 = vor.u32 %v12647_v17, %v8946_v18  ;;  %v8761_v63 = vor.u32 %v12608_v52, %v8760_v51  ;;  %v12848_v9 = vld [vmem:[#allocation5 + $0xa4c] sm:$0xf0] }
  0xae   :  { %3429 = vmatpush.bf16.msrb.mxu3 %v10165_v54  ;;  %3402 = vmatpush.bf16.msrb.mxu1 %v9077_v1  ;;  %v9458_v21 = vld [vmem:[#allocation5 + $0x848] sm:$0xf0]  ;;  %v10361_v54 = vor.u32 %v13008_v47, %v10360_v46  ;;  %v9273_v1 = vor.u32 %v12736_v56, %v9272_v53  ;;  %v10232_v10 = vld [vmem:[#allocation5 + $0xe10] sm:$0xf]  ;;  %v9721_v14 = vor.u32 %v12848_v9, %v9720_v8  ;;  %v13016_v9 = vld [vmem:[#allocation5 + $0xf94] sm:$0xf] }
  0xaf   :  { %v12903_v22 = vld [vmem:[#allocation5 + $0xc0c] sm:$0xf]  ;;  %v9461_v32 = vor.u32 %v12775_v19, %v9458_v21  ;;  %v12976_v11 = vld [vmem:[#allocation5 + $0xe4c] sm:$0xf0] }
  0xb0   :  { %3416 = vmatpush.bf16.msrb.mxu2 %v9589_v2  ;;  %v9970_v23 = vld [vmem:[#allocation5 + $0xc48] sm:$0xf0]  ;;  %v9785_v2 = vor.u32 %v12864_v58, %v9784_v57  ;;  %v9144_v17 = vld [vmem:[#allocation5 + $0x590] sm:$0xf]  ;;  %v10233_v18 = vor.u32 %v12976_v11, %v10232_v10  ;;  %v10426_v10 = vld [vmem:[#allocation5 + $0xfd0] sm:$0xf0] }
  0xb1   :  { %3389 = vmatpush.bf16.msrb.mxu0 %v8501_v12  ;;  %v9973_v35 = vor.u32 %v12903_v22, %v9970_v23  ;;  %v8697_v12 = vor.u32 %v12592_v4, %v8696_v3  ;;  %v12704_v19 = vld [vmem:[#allocation5 + $0x5cc] sm:$0xf0]  ;;  %v9402_v4 = vld [vmem:[#allocation5 + $0x7d0] sm:$0xf0] }
  0xb2   :  { %3430 = vmatpush.bf16.msrb.mxu3 %v10101_v6  ;;  %3403 = vmatpush.bf16.msrb.mxu1 %v9013_v15  ;;  %v10297_v6 = vor.u32 %v12992_v60, %v10296_v59  ;;  %v8632_v15 = vld [vmem:[#allocation5 + $0x190] sm:$0xf]  ;;  %v9145_v25 = vor.u32 %v12704_v19, %v9144_v17  ;;  %v12744_v17 = vld [vmem:[#allocation5 + $0x714] sm:$0xf] }
  0xb3   :  { %v12832_v21 = vld [vmem:[#allocation5 + $0x9cc] sm:$0xf0]  ;;  %v9338_v19 = vld [vmem:[#allocation5 + $0x750] sm:$0xf0] }
  0xb4   :  { %3417 = vmatpush.bf16.msrb.mxu2 %v9525_v16  ;;  %v12576_v16 = vld [vmem:[#allocation5 + $0x1cc] sm:$0xf0] }
  0xb5   :  { %3390 = vmatpush.bf16.msrb.mxu0 %v8437_v27  ;;  %v10168_v22 = vld [vmem:[#allocation5 + $0xd90] sm:$0xf]  ;;  %v8633_v24 = vor.u32 %v12576_v16, %v8632_v15  ;;  %v12616_v15 = vld [vmem:[#allocation5 + $0x314] sm:$0xf] }
  0xb6   :  { %3431 = vmatpush.bf16.msrb.mxu3 %v10037_v20  ;;  %3404 = vmatpush.bf16.msrb.mxu1 %v8949_v31  ;;  %v9656_v20 = vld [vmem:[#allocation5 + $0x990] sm:$0xf]  ;;  %v8826_v16 = vld [vmem:[#allocation5 + $0x350] sm:$0xf0] }
  0xb7   :  { %v12960_v23 = vld [vmem:[#allocation5 + $0xdcc] sm:$0xf0]  ;;  %v9657_v26 = vor.u32 %v12832_v21, %v9656_v20  ;;  %v12872_v20 = vld [vmem:[#allocation5 + $0xb14] sm:$0xf] }
  0xb8   :  { %3418 = vmatpush.bf16.msrb.mxu2 %v9461_v32  ;;  %3391 = vmatmul.bf16.vlgmr.msrb.gmra.mxu0 %v13836_v61  ;;  %v8568_v27 = vld [vmem:[#allocation5 + $0x110] sm:$0xf]  ;;  %v10169_v30 = vor.u32 %v12960_v23, %v10168_v22  ;;  %v9850_v21 = vld [vmem:[#allocation5 + $0xb50] sm:$0xf0] }
  0xb9   :  { %3439 = vmatpush.bf16.msra.mxu0 %v8889_v36  ;;  %3405 = vmatmul.bf16.vlgmr.msrb.gmra.mxu1 %v13840_v0  ;;  %v12560_v28 = vld [vmem:[#allocation5 + $0x14c] sm:$0xf0]  ;;  %v13000_v22 = vld [vmem:[#allocation5 + $0xf14] sm:$0xf] }
  0xba   :  { %3432 = vmatpush.bf16.msrb.mxu3 %v9973_v35  ;;  %3453 = vmatpush.bf16.msra.mxu1 %v9401_v37  ;;  %v9080_v29 = vld [vmem:[#allocation5 + $0x510] sm:$0xf]  ;;  %v8569_v36 = vor.u32 %v12560_v28, %v8568_v27  ;;  %v10362_v23 = vld [vmem:[#allocation5 + $0xf50] sm:$0xf0]  ;;  %v9853_v27 = vor.u32 %v12872_v20, %v9850_v21 }
  0xbb   :  { %3419 = vmatmul.bf16.vlgmr.msrb.gmra.mxu2 %v13834_v55  ;;  %v12688_v31 = vld [vmem:[#allocation5 + $0x54c] sm:$0xf0]  ;;  %v8762_v28 = vld [vmem:[#allocation5 + $0x2d0] sm:$0xf0] }
  0xbc   :  { %3467 = vmatpush.bf16.msra.mxu2 %v9913_v38  ;;  %v9592_v32 = vld [vmem:[#allocation5 + $0x910] sm:$0xf]  ;;  %v9081_v37 = vor.u32 %v12688_v31, %v9080_v29  ;;  %v12728_v29 = vld [vmem:[#allocation5 + $0x694] sm:$0xf]  ;;  %v10365_v31 = vor.u32 %v13000_v22, %v10362_v23 }
  0xbd   :  { %3433 = vmatmul.bf16.vlgmr.msrb.gmra.mxu3 %v13838_v62  ;;  %3440 = vmatpush.bf16.msra.mxu0 %v8825_v48  ;;  %v12816_v33 = vld [vmem:[#allocation5 + $0x94c] sm:$0xf0] }
  0xbe   :  { %3481 = vmatpush.bf16.msra.mxu3 %v10425_v42  ;;  %3454 = vmatpush.bf16.msra.mxu1 %v9337_v49  ;;  %v10104_v34 = vld [vmem:[#allocation5 + $0xd10] sm:$0xf]  ;;  %v9593_v38 = vor.u32 %v12816_v33, %v9592_v32  ;;  %v12856_v32 = vld [vmem:[#allocation5 + $0xa94] sm:$0xf] }
  0xbf   :  { %v12944_v35 = vld [vmem:[#allocation5 + $0xd4c] sm:$0xf0]  ;;  %v9786_v33 = vld [vmem:[#allocation5 + $0xad0] sm:$0xf0] }
  0xc0   :  { %3468 = vmatpush.bf16.msra.mxu2 %v9849_v50  ;;  %v8504_v39 = vld [vmem:[#allocation5 + $0x90] sm:$0xf]  ;;  %v10105_v42 = vor.u32 %v12944_v35, %v10104_v34  ;;  %v13859_v34 = vld [vmem:[#allocation7] sm:$0xff]  ;;  %v12984_v35 = vld [vmem:[#allocation5 + $0xe94] sm:$0xf] }
  0xc1   :  { %3441 = vmatpush.bf16.msra.mxu0 %v8761_v63  ;;  %v12544_v40 = vld [vmem:[#allocation5 + $0xcc] sm:$0xf0]  ;;  %v12632_v63 = vld [vmem:[#allocation5 + $0x394] sm:$0xf] }
  0xc2   :  { %3482 = vmatpush.bf16.msra.mxu3 %v10361_v54  ;;  %3455 = vmatpush.bf16.msra.mxu1 %v9273_v1  ;;  %v9016_v41 = vld [vmem:[#allocation5 + $0x490] sm:$0xf]  ;;  %v8505_v48 = vor.u32 %v12544_v40, %v8504_v39  ;;  %v8890_v1 = vld [vmem:[#allocation5 + $0x3d0] sm:$0xf0]  ;;  %v9789_v40 = vor.u32 %v12856_v32, %v9786_v33 }
  0xc3   :  { %v12672_v43 = vld [vmem:[#allocation5 + $0x4cc] sm:$0xf0]  ;;  %v12920_v32 = vld [vmem:[#allocation5 + $0xc94] sm:$0xf] }
  0xc4   :  { %3469 = vmatpush.bf16.msra.mxu2 %v9785_v2  ;;  %v9528_v44 = vld [vmem:[#allocation5 + $0x890] sm:$0xf]  ;;  %v9017_v51 = vor.u32 %v12672_v43, %v9016_v41  ;;  %v12760_v2 = vld [vmem:[#allocation5 + $0x794] sm:$0xf]  ;;  %v623_v43 = vperm.slane %v13859_v34, 0 }
  0xc5   :  { %3442 = vmatpush.bf16.msra.mxu0 %v8697_v12  ;;  %v12800_v45 = vld [vmem:[#allocation5 + $0x8cc] sm:$0xf0]  ;;  %v8893_v12 = vor.u32 %v12632_v63, %v8890_v1  ;;  %v8698_v41 = vld [vmem:[#allocation5 + $0x250] sm:$0xf0] }
  0xc6   :  { %3483 = vmatpush.bf16.msra.mxu3 %v10297_v6  ;;  %3456 = vmatpush.bf16.msra.mxu1 %v9209_v13  ;;  %v10040_v46 = vld [vmem:[#allocation5 + $0xc90] sm:$0xf]  ;;  %v9529_v52 = vor.u32 %v12800_v45, %v9528_v44  ;;  %v9914_v6 = vld [vmem:[#allocation5 + $0xbd0] sm:$0xf0]  ;;  %v9405_v13 = vor.u32 %v12760_v2, %v9402_v4 }
  0xc7   :  { %v12928_v47 = vld [vmem:[#allocation5 + $0xccc] sm:$0xf0]  ;;  %v9210_v45 = vld [vmem:[#allocation5 + $0x650] sm:$0xf0] }
  0xc8   :  { %3470 = vmatpush.bf16.msra.mxu2 %v9721_v14  ;;  %v8440_v49 = vld [vmem:[#allocation5 + $0x10] sm:$0xf]  ;;  %v10041_v57 = vor.u32 %v12928_v47, %v10040_v46  ;;  %v9917_v14 = vor.u32 %v12888_v5, %v9914_v6  ;;  %v12840_v46 = vld [vmem:[#allocation5 + $0xa14] sm:$0xf] }
  0xc9   :  { %3443 = vmatpush.bf16.msra.mxu0 %v8633_v24  ;;  %v12528_v50 = vld [vmem:[#allocation5 + $0x4c] sm:$0xf0]  ;;  %v8829_v24 = vor.u32 %v12616_v15, %v8826_v16  ;;  %v9722_v47 = vld [vmem:[#allocation5 + $0xa50] sm:$0xf0] }
  0xca   :  { %3484 = vmatpush.bf16.msra.mxu3 %v10233_v18  ;;  %3457 = vmatpush.bf16.msra.mxu1 %v9145_v25  ;;  %v8952_v53 = vld [vmem:[#allocation5 + $0x410] sm:$0xf]  ;;  %v8441_v3 = vor.u32 %v12528_v50, %v8440_v49  ;;  %v10429_v18 = vor.u32 %v13016_v9, %v10426_v10  ;;  %v12600_v25 = vld [vmem:[#allocation5 + $0x294] sm:$0xf] }
  0xcb   :  { %v12656_v54 = vld [vmem:[#allocation5 + $0x44c] sm:$0xf0]  ;;  %v10234_v49 = vld [vmem:[#allocation5 + $0xe50] sm:$0xf0] }
  0xcc   :  { %3471 = vmatpush.bf16.msra.mxu2 %v9657_v26  ;;  %v9464_v56 = vld [vmem:[#allocation5 + $0x810] sm:$0xf]  ;;  %v8953_v7 = vor.u32 %v12656_v54, %v8952_v53  ;;  %v9341_v26 = vor.u32 %v12744_v17, %v9338_v19  ;;  %v9725_v53 = vor.u32 %v12840_v46, %v9722_v47  ;;  %v12824_v63 = vld [vmem:[#allocation5 + $0x994] sm:$0xf] }
  0xcd   :  { %3444 = vmatpush.bf16.msra.mxu0 %v8569_v36  ;;  %v12784_v58 = vld [vmem:[#allocation5 + $0x84c] sm:$0xf0]  ;;  %v10298_v36 = vld [vmem:[#allocation5 + $0xed0] sm:$0xf0] }
  0xce   :  { %3485 = vmatpush.bf16.msra.mxu3 %v10169_v30  ;;  %3458 = vmatpush.bf16.msra.mxu1 %v9081_v37  ;;  %v9976_v59 = vld [vmem:[#allocation5 + $0xc10] sm:$0xf]  ;;  %v9465_v8 = vor.u32 %v12784_v58, %v9464_v56  ;;  %v9274_v30 = vld [vmem:[#allocation5 + $0x6d0] sm:$0xf0]  ;;  %v8765_v37 = vor.u32 %v12600_v25, %v8762_v28  ;;  %v10301_v44 = vor.u32 %v12984_v35, %v10298_v36 }
  0xcf   :  { %v12912_v60 = vld [vmem:[#allocation5 + $0xc4c] sm:$0xf0]  ;;  %v9277_v39 = vor.u32 %v12728_v29, %v9274_v30  ;;  %v12568_v56 = vld [vmem:[#allocation5 + $0x194] sm:$0xf] }
  0xd0   :  { %3472 = vmatpush.bf16.msra.mxu2 %v9593_v38  ;;  %v9977_v11 = vor.u32 %v12912_v60, %v9976_v59  ;;  %v12584_v38 = vld [vmem:[#allocation5 + $0x214] sm:$0xf] }
  0xd1   :  { %3445 = vmatpush.bf16.msra.mxu0 %v8505_v48  ;;  %v12968_v48 = vld [vmem:[#allocation5 + $0xe14] sm:$0xf]  ;;  %v8701_v50 = vor.u32 %v12584_v38, %v8698_v41 }
  0xd2   :  { %3486 = vmatpush.bf16.msra.mxu3 %v10105_v42  ;;  %3459 = vmatpush.bf16.msra.mxu1 %v9017_v51  ;;  %v12712_v42 = vld [vmem:[#allocation5 + $0x614] sm:$0xf]  ;;  %v10237_v59 = vor.u32 %v12968_v48, %v10234_v49  ;;  %v8896_v48 = vld [vmem:[#allocation5 + $0x398] sm:$0xf] }
  0xd3   :  { %v12696_v58 = vld [vmem:[#allocation5 + $0x594] sm:$0xf]  ;;  %v12641_v49 = vld [vmem:[#allocation5 + $0x3d4] sm:$0xf0] }
  0xd4   :  { %3473 = vmatpush.bf16.msra.mxu2 %v9529_v52  ;;  %v9213_v52 = vor.u32 %v12712_v42, %v9210_v45  ;;  %v9146_v60 = vld [vmem:[#allocation5 + $0x5d0] sm:$0xf0] }
  0xd5   :  { %3446 = vmatpush.bf16.msra.mxu0 %v8441_v3  ;;  %v9658_v1 = vld [vmem:[#allocation5 + $0x9d0] sm:$0xf0] }
  0xd6   :  { %3487 = vmatpush.bf16.msra.mxu3 %v10041_v57  ;;  %3460 = vmatpush.bf16.msra.mxu1 %v8953_v7  ;;  %v8634_v57 = vld [vmem:[#allocation5 + $0x1d0] sm:$0xf0]  ;;  %v3238_v2 = vpop.f32.mrf.mxu1  ;;  %v9149_v7 = vor.u32 %v12696_v58, %v9146_v60  ;;  %v10432_v58 = vld [vmem:[#allocation5 + $0xf98] sm:$0xf] }
  0xd7   :  { %v12952_v3 = vld [vmem:[#allocation5 + $0xd94] sm:$0xf]  ;;  %v8637_v6 = vor.u32 %v12568_v56, %v8634_v57 }
  0xd8   :  { %3474 = vmatpush.bf16.msra.mxu2 %v9465_v8  ;;  %3447 = vmatmul.bf16.vlgmr.msra.gmra.mxu0 %v13836_v61  ;;  %v10170_v4 = vld [vmem:[#allocation5 + $0xdd0] sm:$0xf0]  ;;  %v9661_v8 = vor.u32 %v12824_v63, %v9658_v1  ;;  %v8897_v63 = vor.u32 %v12641_v49, %v8896_v48  ;;  %v8640_v49 = vld [vmem:[#allocation5 + $0x198] sm:$0xf] }
  0xd9   :  { %3495 = vmatpush.bf16.msrb.mxu0 %v8893_v12  ;;  %3461 = vmatmul.bf16.vlgmr.msra.gmra.mxu1 %v13840_v0  ;;  %v3224_v51 = vpop.f32.mrf.mxu0  ;;  %v12552_v10 = vld [vmem:[#allocation5 + $0x114] sm:$0xf] }
  0xda   :  { %3488 = vmatpush.bf16.msra.mxu3 %v9977_v11  ;;  %3509 = vmatpush.bf16.msrb.mxu1 %v9405_v13  ;;  %v3225_v54 = vadd.f32 %v3224_v51, %v623_v43  ;;  %v8570_v11 = vld [vmem:[#allocation5 + $0x150] sm:$0xf0]  ;;  %v10173_v13 = vor.u32 %v12952_v3, %v10170_v4  ;;  %v8832_v3 = vld [vmem:[#allocation5 + $0x318] sm:$0xf] }
  0xdb   :  { %3475 = vmatmul.bf16.vlgmr.msra.gmra.mxu2 %v13834_v55  ;;  %v12680_v12 = vld [vmem:[#allocation5 + $0x514] sm:$0xf]  ;;  %v8573_v21 = vor.u32 %v12552_v10, %v8570_v11  ;;  %v12625_v4 = vld [vmem:[#allocation5 + $0x354] sm:$0xf0] }
  0xdc   :  { %3523 = vmatpush.bf16.msrb.mxu2 %v9917_v14  ;;  %v3239_v5 = vadd.f32 %v3238_v2, %v3225_v54  ;;  %v9082_v15 = vld [vmem:[#allocation5 + $0x550] sm:$0xf0]  ;;  %v12897_v54 = vld [vmem:[#allocation5 + $0xbd4] sm:$0xf0] }
  0xdd   :  { %3489 = vmatmul.bf16.vlgmr.msra.gmra.mxu3 %v13838_v62  ;;  %3496 = vmatpush.bf16.msrb.mxu0 %v8829_v24  ;;  %v12808_v16 = vld [vmem:[#allocation5 + $0x914] sm:$0xf]  ;;  %v9085_v23 = vor.u32 %v12680_v12, %v9082_v15  ;;  %v10368_v10 = vld [vmem:[#allocation5 + $0xf18] sm:$0xf] }
  0xde   :  { %3537 = vmatpush.bf16.msrb.mxu3 %v10429_v18  ;;  %3510 = vmatpush.bf16.msrb.mxu1 %v9341_v26  ;;  %v3252_v9 = vpop.f32.mrf.mxu2  ;;  %v9594_v17 = vld [vmem:[#allocation5 + $0x950] sm:$0xf0]  ;;  %v13009_v11 = vld [vmem:[#allocation5 + $0xf54] sm:$0xf0] }
  0xdf   :  { %v3253_v14 = vadd.f32 %v3252_v9, %v3239_v5  ;;  %v12936_v18 = vld [vmem:[#allocation5 + $0xd14] sm:$0xf]  ;;  %v9597_v24 = vor.u32 %v12808_v16, %v9594_v17  ;;  %v9344_v5 = vld [vmem:[#allocation5 + $0x718] sm:$0xf] }
  0xe0   :  { %3524 = vmatpush.bf16.msrb.mxu2 %v9853_v27  ;;  %v10106_v19 = vld [vmem:[#allocation5 + $0xd50] sm:$0xf0]  ;;  %v3266_v20 = vpop.f32.mrf.mxu3  ;;  %v12881_v9 = vld [vmem:[#allocation5 + $0xb54] sm:$0xf0] }
  0xe1   :  { %3497 = vmatpush.bf16.msrb.mxu0 %v8765_v37  ;;  %v13867_v22 = vadd.f32 %v3266_v20, %v3253_v14  ;;  %v12536_v25 = vld [vmem:[#allocation5 + $0x94] sm:$0xf]  ;;  %v10109_v28 = vor.u32 %v12936_v18, %v10106_v19  ;;  %v13869_v12 = vpop.f32.mrf.mxu0  ;;  %v8768_v16 = vld [vmem:[#allocation5 + $0x298] sm:$0xf]  ;;  %v13871_v19 = vpop.f32.mrf.mxu1  ;;  %v10369_v20 = vor.u32 %v13009_v11, %v10368_v10 }
  0xe2   :  { %3538 = vmatpush.bf16.msrb.mxu3 %v10365_v31  ;;  %3511 = vmatpush.bf16.msrb.mxu1 %v9277_v39  ;;  %v8506_v26 = vld [vmem:[#allocation5 + $0xd0] sm:$0xf0]  ;;  %v12609_v17 = vld [vmem:[#allocation5 + $0x2d4] sm:$0xf0] }
  0xe3   :  { %v12664_v27 = vld [vmem:[#allocation5 + $0x494] sm:$0xf]  ;;  %v8509_v35 = vor.u32 %v12536_v25, %v8506_v26  ;;  %v9280_v18 = vld [vmem:[#allocation5 + $0x698] sm:$0xf] }
  0xe4   :  { %3525 = vmatpush.bf16.msrb.mxu2 %v9789_v40  ;;  %v9018_v29 = vld [vmem:[#allocation5 + $0x4d0] sm:$0xf0]  ;;  %v10304_v25 = vld [vmem:[#allocation5 + $0xe98] sm:$0xf] }
  0xe5   :  { %3498 = vmatpush.bf16.msrb.mxu0 %v8701_v50  ;;  %v12792_v30 = vld [vmem:[#allocation5 + $0x894] sm:$0xf]  ;;  %v9021_v38 = vor.u32 %v12664_v27, %v9018_v29  ;;  %v9408_v50 = vld [vmem:[#allocation5 + $0x798] sm:$0xf]  ;;  %v8769_v27 = vor.u32 %v12609_v17, %v8768_v16 }
  0xe6   :  { %3539 = vmatpush.bf16.msrb.mxu3 %v10301_v44  ;;  %3512 = vmatpush.bf16.msrb.mxu1 %v9213_v52  ;;  %v9530_v31 = vld [vmem:[#allocation5 + $0x8d0] sm:$0xf0]  ;;  %v12769_v52 = vld [vmem:[#allocation5 + $0x7d4] sm:$0xf0]  ;;  %v13877_v29 = vpop.f32.mrf.mxu2 }
  0xe7   :  { %v10042_v33 = vld [vmem:[#allocation5 + $0xcd0] sm:$0xf0]  ;;  %v9533_v39 = vor.u32 %v12792_v30, %v9530_v31  ;;  %v9409_v1 = vor.u32 %v12769_v52, %v9408_v50  ;;  %v12993_v26 = vld [vmem:[#allocation5 + $0xed4] sm:$0xf0] }
  0xe8   :  { %3526 = vmatpush.bf16.msrb.mxu2 %v9725_v53  ;;  %v12520_v36 = vld [vmem:[#allocation5 + $0x14] sm:$0xf]  ;;  %v10045_v44 = vor.u32 %v12920_v32, %v10042_v33  ;;  %v9920_v53 = vld [vmem:[#allocation5 + $0xb98] sm:$0xf] }
  0xe9   :  { %3499 = vmatpush.bf16.msrb.mxu0 %v8637_v6  ;;  %v8442_v37 = vld [vmem:[#allocation5 + $0x50] sm:$0xf0]  ;;  %v9921_v2 = vor.u32 %v12897_v54, %v9920_v53  ;;  %v12593_v32 = vld [vmem:[#allocation5 + $0x254] sm:$0xf0] }
  0xea   :  { %3540 = vmatpush.bf16.msrb.mxu3 %v10237_v59  ;;  %3513 = vmatpush.bf16.msrb.mxu1 %v9149_v7  ;;  %v12648_v40 = vld [vmem:[#allocation5 + $0x414] sm:$0xf]  ;;  %v8445_v51 = vor.u32 %v12520_v36, %v8442_v37  ;;  %v13025_v59 = vld [vmem:[#allocation5 + $0xfd4] sm:$0xf0]  ;;  %v10305_v36 = vor.u32 %v12993_v26, %v10304_v25 }
  0xeb   :  { %v8954_v41 = vld [vmem:[#allocation5 + $0x450] sm:$0xf0]  ;;  %v10433_v6 = vor.u32 %v13025_v59, %v10432_v58  ;;  %v12753_v7 = vld [vmem:[#allocation5 + $0x754] sm:$0xf0] }
  0xec   :  { %3527 = vmatpush.bf16.msrb.mxu2 %v9661_v8  ;;  %v12776_v42 = vld [vmem:[#allocation5 + $0x814] sm:$0xf]  ;;  %v8957_v56 = vor.u32 %v12648_v40, %v8954_v41  ;;  %v9856_v8 = vld [vmem:[#allocation5 + $0xb18] sm:$0xf]  ;;  %v9345_v14 = vor.u32 %v12753_v7, %v9344_v5  ;;  %v13880_v40 = vpop.f32.mrf.mxu3 }
  0xed   :  { %3500 = vmatpush.bf16.msrb.mxu0 %v8573_v21  ;;  %v9466_v45 = vld [vmem:[#allocation5 + $0x850] sm:$0xf0]  ;;  %v9857_v15 = vor.u32 %v12881_v9, %v9856_v8  ;;  %v12737_v21 = vld [vmem:[#allocation5 + $0x6d4] sm:$0xf0] }
  0xee   :  { %3541 = vmatpush.bf16.msrb.mxu3 %v10173_v13  ;;  %3514 = vmatpush.bf16.msrb.mxu1 %v9085_v23  ;;  %v12904_v46 = vld [vmem:[#allocation5 + $0xc14] sm:$0xf]  ;;  %v9469_v57 = vor.u32 %v12776_v42, %v9466_v45  ;;  %v8833_v13 = vor.u32 %v12625_v4, %v8832_v3  ;;  %v9792_v23 = vld [vmem:[#allocation5 + $0xa98] sm:$0xf]  ;;  %v9281_v30 = vor.u32 %v12737_v21, %v9280_v18 }
  0xef   :  { %v9978_v47 = vld [vmem:[#allocation5 + $0xc50] sm:$0xf0]  ;;  %v9216_v33 = vld [vmem:[#allocation5 + $0x618] sm:$0xf] }
  0xf0   :  { %3528 = vmatpush.bf16.msrb.mxu2 %v9597_v24  ;;  %v9981_v60 = vor.u32 %v12904_v46, %v9978_v47  ;;  %v12865_v24 = vld [vmem:[#allocation5 + $0xad4] sm:$0xf0] }
  0xf1   :  { %3501 = vmatpush.bf16.msrb.mxu0 %v8509_v35  ;;  %v9793_v31 = vor.u32 %v12865_v24, %v9792_v23  ;;  %v14778_v35 = vperm.slane %v13859_v34, 1  ;;  %v12721_v37 = vld [vmem:[#allocation5 + $0x654] sm:$0xf0] }
  0xf2   :  { %3542 = vmatpush.bf16.msrb.mxu3 %v10109_v28  ;;  %3515 = vmatpush.bf16.msrb.mxu1 %v9021_v38  ;;  %v8704_v28 = vld [vmem:[#allocation5 + $0x218] sm:$0xf]  ;;  %v9217_v46 = vor.u32 %v12721_v37, %v9216_v33 }
  0xf3   :  { %v9728_v38 = vld [vmem:[#allocation5 + $0xa18] sm:$0xf] }
  0xf4   :  { %3529 = vmatpush.bf16.msrb.mxu2 %v9533_v39  ;;  %v12849_v39 = vld [vmem:[#allocation5 + $0xa54] sm:$0xf0] }
  0xf5   :  { %3502 = vmatpush.bf16.msrb.mxu0 %v8445_v51  ;;  %v10240_v41 = vld [vmem:[#allocation5 + $0xe18] sm:$0xf]  ;;  %v3280_v45 = vpop.f32.mrf.mxu0  ;;  %v9729_v47 = vor.u32 %v12849_v39, %v9728_v38 }
  0xf6   :  { %3543 = vmatpush.bf16.msrb.mxu3 %v10045_v44  ;;  %3516 = vmatpush.bf16.msrb.mxu1 %v8957_v56  ;;  %v12977_v42 = vld [vmem:[#allocation5 + $0xe54] sm:$0xf0]  ;;  %v8705_v44 = vor.u32 %v12593_v32, %v8704_v28  ;;  %v3281_v48 = vadd.f32 %v3280_v45, %v14778_v35  ;;  %v9874_v35 = vld [vmem:[#allocation5 + $0xb68] sm:$0xf0] }
  0xf7   :  { %v12577_v50 = vld [vmem:[#allocation5 + $0x1d4] sm:$0xf0]  ;;  %v10241_v52 = vor.u32 %v12977_v42, %v10240_v41 }
  0xf8   :  { %3530 = vmatpush.bf16.msrb.mxu2 %v9469_v57  ;;  %3503 = vmatmul.bf16.vlgmr.msrb.gmra.mxu0 %v13836_v61  ;;  %v9152_v51 = vld [vmem:[#allocation5 + $0x598] sm:$0xf]  ;;  %v3294_v57 = vpop.f32.mrf.mxu1 }
  0xf9   :  { %3551 = vmatpush.bf16.msra.mxu0 %v8897_v63  ;;  %3517 = vmatmul.bf16.vlgmr.msrb.gmra.mxu1 %v13840_v0  ;;  %v12705_v53 = vld [vmem:[#allocation5 + $0x5d4] sm:$0xf0]  ;;  %v8641_v63 = vor.u32 %v12577_v50, %v8640_v49  ;;  %v8898_v49 = vld [vmem:[#allocation5 + $0x3d8] sm:$0xf0] }
  0xfa   :  { %3544 = vmatpush.bf16.msrb.mxu3 %v9981_v60  ;;  %3565 = vmatpush.bf16.msra.mxu1 %v9409_v1  ;;  %v9664_v54 = vld [vmem:[#allocation5 + $0x998] sm:$0xf]  ;;  %v3295_v60 = vadd.f32 %v3294_v57, %v3281_v48  ;;  %v9153_v1 = vor.u32 %v12705_v53, %v9152_v51  ;;  %v12633_v48 = vld [vmem:[#allocation5 + $0x39c] sm:$0xf] }
  0xfb   :  { %3531 = vmatmul.bf16.vlgmr.msrb.gmra.mxu2 %v13834_v55  ;;  %v12833_v56 = vld [vmem:[#allocation5 + $0x9d4] sm:$0xf0]  ;;  %v12761_v50 = vld [vmem:[#allocation5 + $0x79c] sm:$0xf] }
  0xfc   :  { %3579 = vmatpush.bf16.msra.mxu2 %v9921_v2  ;;  %v10176_v58 = vld [vmem:[#allocation5 + $0xd98] sm:$0xf]  ;;  %v9665_v2 = vor.u32 %v12833_v56, %v9664_v54  ;;  %v12889_v53 = vld [vmem:[#allocation5 + $0xb9c] sm:$0xf] }
  0xfd   :  { %3545 = vmatmul.bf16.vlgmr.msrb.gmra.mxu3 %v13838_v62  ;;  %3552 = vmatpush.bf16.msra.mxu0 %v8833_v13  ;;  %v12961_v59 = vld [vmem:[#allocation5 + $0xdd4] sm:$0xf0]  ;;  %v9922_v54 = vld [vmem:[#allocation5 + $0xbd8] sm:$0xf0] }
  0xfe   :  { %3593 = vmatpush.bf16.msra.mxu3 %v10433_v6  ;;  %3566 = vmatpush.bf16.msra.mxu1 %v9345_v14  ;;  %v3308_v3 = vpop.f32.mrf.mxu2  ;;  %v8576_v4 = vld [vmem:[#allocation5 + $0x118] sm:$0xf]  ;;  %v10177_v7 = vor.u32 %v12961_v59, %v10176_v58  ;;  %v13017_v58 = vld [vmem:[#allocation5 + $0xf9c] sm:$0xf] }
  0xff   :  { %v12561_v5 = vld [vmem:[#allocation5 + $0x154] sm:$0xf0]  ;;  %v3309_v8 = vadd.f32 %v3308_v3, %v3295_v60  ;;  %v10434_v59 = vld [vmem:[#allocation5 + $0xfd8] sm:$0xf0] }
 0x100   :  { %3580 = vmatpush.bf16.msra.mxu2 %v9857_v15  ;;  %v9088_v6 = vld [vmem:[#allocation5 + $0x518] sm:$0xf]  ;;  %v3322_v15 = vpop.f32.mrf.mxu3  ;;  %v8577_v16 = vor.u32 %v12561_v5, %v8576_v4  ;;  %v12617_v3 = vld [vmem:[#allocation5 + $0x31c] sm:$0xf] }
 0x101   :  { %3553 = vmatpush.bf16.msra.mxu0 %v8769_v27  ;;  %v12689_v9 = vld [vmem:[#allocation5 + $0x554] sm:$0xf0]  ;;  %v13884_v17 = vadd.f32 %v3322_v15, %v3309_v8  ;;  %v8834_v4 = vld [vmem:[#allocation5 + $0x358] sm:$0xf0] }
 0x102   :  { %3594 = vmatpush.bf16.msra.mxu3 %v10369_v20  ;;  %3567 = vmatpush.bf16.msra.mxu1 %v9281_v30  ;;  %v9600_v10 = vld [vmem:[#allocation5 + $0x918] sm:$0xf]  ;;  %v9089_v18 = vor.u32 %v12689_v9, %v9088_v6  ;;  %v12745_v5 = vld [vmem:[#allocation5 + $0x71c] sm:$0xf]  ;;  %v10437_v6 = vor.u32 %v13017_v58, %v10434_v59 }
 0x103   :  { %v12817_v11 = vld [vmem:[#allocation5 + $0x954] sm:$0xf0]  ;;  %v12873_v8 = vld [vmem:[#allocation5 + $0xb1c] sm:$0xf] }
 0x104   :  { %3581 = vmatpush.bf16.msra.mxu2 %v9793_v31  ;;  %v10112_v13 = vld [vmem:[#allocation5 + $0xd18] sm:$0xf]  ;;  %v9601_v20 = vor.u32 %v12817_v11, %v9600_v10  ;;  %v9858_v9 = vld [vmem:[#allocation5 + $0xb58] sm:$0xf0] }
 0x105   :  { %3554 = vmatpush.bf16.msra.mxu0 %v8705_v44  ;;  %v12945_v14 = vld [vmem:[#allocation5 + $0xd54] sm:$0xf0]  ;;  %v13001_v10 = vld [vmem:[#allocation5 + $0xf1c] sm:$0xf] }
 0x106   :  { %3595 = vmatpush.bf16.msra.mxu3 %v10305_v36  ;;  %3568 = vmatpush.bf16.msra.mxu1 %v9217_v46  ;;  %v8512_v21 = vld [vmem:[#allocation5 + $0x98] sm:$0xf]  ;;  %v10113_v25 = vor.u32 %v12945_v14, %v10112_v13  ;;  %v10370_v11 = vld [vmem:[#allocation5 + $0xf58] sm:$0xf0]  ;;  %v13886_v13 = vpop.f32.mrf.mxu0  ;;  %v8837_v14 = vor.u32 %v12617_v3, %v8834_v4 }
 0x107   :  { %v12545_v23 = vld [vmem:[#allocation5 + $0xd4] sm:$0xf0]  ;;  %v12697_v58 = vld [vmem:[#allocation5 + $0x59c] sm:$0xf] }
 0x108   :  { %3582 = vmatpush.bf16.msra.mxu2 %v9729_v47  ;;  %v9024_v24 = vld [vmem:[#allocation5 + $0x498] sm:$0xf]  ;;  %v8513_v32 = vor.u32 %v12545_v23, %v8512_v21  ;;  %v12729_v21 = vld [vmem:[#allocation5 + $0x69c] sm:$0xf]  ;;  %v13888_v23 = vpop.f32.mrf.mxu1 }
 0x109   :  { %3555 = vmatpush.bf16.msra.mxu0 %v8641_v63  ;;  %v12673_v26 = vld [vmem:[#allocation5 + $0x4d4] sm:$0xf0]  ;;  %v8901_v63 = vor.u32 %v12633_v48, %v8898_v49  ;;  %v12969_v48 = vld [vmem:[#allocation5 + $0xe1c] sm:$0xf] }
 0x10a   :  { %3596 = vmatpush.bf16.msra.mxu3 %v10241_v52  ;;  %3569 = vmatpush.bf16.msra.mxu1 %v9153_v1  ;;  %v9536_v27 = vld [vmem:[#allocation5 + $0x898] sm:$0xf]  ;;  %v9025_v37 = vor.u32 %v12673_v26, %v9024_v24  ;;  %v9410_v52 = vld [vmem:[#allocation5 + $0x7d8] sm:$0xf0]  ;;  %v10373_v24 = vor.u32 %v13001_v10, %v10370_v11 }
 0x10b   :  { %v12801_v28 = vld [vmem:[#allocation5 + $0x8d4] sm:$0xf0]  ;;  %v9413_v1 = vor.u32 %v12761_v50, %v9410_v52  ;;  %v12857_v26 = vld [vmem:[#allocation5 + $0xa9c] sm:$0xf] }
 0x10c   :  { %3583 = vmatpush.bf16.msra.mxu2 %v9665_v2  ;;  %v10048_v30 = vld [vmem:[#allocation5 + $0xc98] sm:$0xf]  ;;  %v9537_v38 = vor.u32 %v12801_v28, %v9536_v27  ;;  %v9925_v2 = vor.u32 %v12889_v53, %v9922_v54  ;;  %v9794_v27 = vld [vmem:[#allocation5 + $0xad8] sm:$0xf0] }
 0x10d   :  { %v12929_v31 = vld [vmem:[#allocation5 + $0xcd4] sm:$0xf0]  ;;  %3556 = vmatpush.bf16.msra.mxu0 %v8577_v16  ;;  %v9861_v16 = vor.u32 %v12873_v8, %v9858_v9  ;;  %v12985_v28 = vld [vmem:[#allocation5 + $0xe9c] sm:$0xf] }
 0x10e   :  { %3597 = vmatpush.bf16.msra.mxu3 %v10177_v7  ;;  %v8448_v33 = vld [vmem:[#allocation5 + $0x18] sm:$0xf]  ;;  %3570 = vmatpush.bf16.msra.mxu1 %v9089_v18  ;;  %v10049_v44 = vor.u32 %v12929_v31, %v10048_v30  ;;  %v9346_v7 = vld [vmem:[#allocation5 + $0x758] sm:$0xf0] }
 0x10f   :  { %v12529_v36 = vld [vmem:[#allocation5 + $0x54] sm:$0xf0]  ;;  %v9349_v15 = vor.u32 %v12745_v5, %v9346_v7  ;;  %v12601_v18 = vld [vmem:[#allocation5 + $0x29c] sm:$0xf] }
 0x110   :  { %3584 = vmatpush.bf16.msra.mxu2 %v9601_v20  ;;  %v8960_v39 = vld [vmem:[#allocation5 + $0x418] sm:$0xf]  ;;  %v8449_v51 = vor.u32 %v12529_v36, %v8448_v33  ;;  %v8770_v20 = vld [vmem:[#allocation5 + $0x2d8] sm:$0xf0]  ;;  %v13894_v33 = vpop.f32.mrf.mxu2 }
 0x111   :  { %v12657_v41 = vld [vmem:[#allocation5 + $0x454] sm:$0xf0]  ;;  %3557 = vmatpush.bf16.msra.mxu0 %v8513_v32  ;;  %v10306_v30 = vld [vmem:[#allocation5 + $0xed8] sm:$0xf0]  ;;  %v8773_v31 = vor.u32 %v12601_v18, %v8770_v20 }
 0x112   :  { %v9472_v42 = vld [vmem:[#allocation5 + $0x818] sm:$0xf]  ;;  %3598 = vmatpush.bf16.msra.mxu3 %v10113_v25  ;;  %3571 = vmatpush.bf16.msra.mxu1 %v9025_v37  ;;  %v8961_v56 = vor.u32 %v12657_v41, %v8960_v39  ;;  %v9282_v25 = vld [vmem:[#allocation5 + $0x6d8] sm:$0xf0]  ;;  %v9797_v37 = vor.u32 %v12857_v26, %v9794_v27  ;;  %v14777_v41 = vperm.slane %v13859_v34, 2 }
 0x113   :  { %v12785_v45 = vld [vmem:[#allocation5 + $0x854] sm:$0xf0]  ;;  %v12585_v32 = vld [vmem:[#allocation5 + $0x21c] sm:$0xf]  ;;  %v9285_v36 = vor.u32 %v12729_v21, %v9282_v25 }
 0x114   :  { %v9984_v46 = vld [vmem:[#allocation5 + $0xc18] sm:$0xf]  ;;  %3585 = vmatpush.bf16.msra.mxu2 %v9537_v38  ;;  %v9473_v57 = vor.u32 %v12785_v45, %v9472_v42  ;;  %v8706_v38 = vld [vmem:[#allocation5 + $0x258] sm:$0xf0]  ;;  %v10309_v42 = vor.u32 %v12985_v28, %v10306_v30 }
 0x115   :  { %v12913_v47 = vld [vmem:[#allocation5 + $0xc54] sm:$0xf0]  ;;  %3558 = vmatpush.bf16.msra.mxu0 %v8449_v51  ;;  %v12713_v39 = vld [vmem:[#allocation5 + $0x61c] sm:$0xf]  ;;  %v8709_v50 = vor.u32 %v12585_v32, %v8706_v38  ;;  %v3336_v51 = vpop.f32.mrf.mxu0 }
 0x116   :  { %3599 = vmatpush.bf16.msra.mxu3 %v10049_v44  ;;  %v9985_v60 = vor.u32 %v12913_v47, %v9984_v46  ;;  %3572 = vmatpush.bf16.msra.mxu1 %v8961_v56  ;;  %v9218_v44 = vld [vmem:[#allocation5 + $0x658] sm:$0xf0]  ;;  %v13897_v47 = vpop.f32.mrf.mxu3  ;;  %v3337_v54 = vadd.f32 %v3336_v51, %v14777_v41  ;;  %v12747_v41 = vld [vmem:[#allocation5 + $0x72c] sm:$0xf] }
 0x117   :  { %v12841_v45 = vld [vmem:[#allocation5 + $0xa1c] sm:$0xf]  ;;  %v9221_v52 = vor.u32 %v12713_v39, %v9218_v44 }
 0x118   :  { %3586 = vmatpush.bf16.msra.mxu2 %v9473_v57  ;;  %3559 = vmatmul.bf16.vlgmr.msra.gmra.mxu0 %v13836_v61  ;;  %v9730_v46 = vld [vmem:[#allocation5 + $0xa58] sm:$0xf0] }
 0x119   :  { %3607 = vmatpush.bf16.msrb.mxu0 %v8901_v63  ;;  %3573 = vmatmul.bf16.vlgmr.msra.gmra.mxu1 %v13840_v0  ;;  %v10242_v49 = vld [vmem:[#allocation5 + $0xe58] sm:$0xf0]  ;;  %v9733_v53 = vor.u32 %v12841_v45, %v9730_v46 }
 0x11a   :  { %3600 = vmatpush.bf16.msra.mxu3 %v9985_v60  ;;  %3621 = vmatpush.bf16.msrb.mxu1 %v9413_v1  ;;  %v12569_v56 = vld [vmem:[#allocation5 + $0x19c] sm:$0xf]  ;;  %v10245_v59 = vor.u32 %v12969_v48, %v10242_v49 }
 0x11b   :  { %3587 = vmatmul.bf16.vlgmr.msra.gmra.mxu2 %v13834_v55  ;;  %v8642_v57 = vld [vmem:[#allocation5 + $0x1d8] sm:$0xf0] }
 0x11c   :  { %3635 = vmatpush.bf16.msrb.mxu2 %v9925_v2  ;;  %v9154_v60 = vld [vmem:[#allocation5 + $0x5d8] sm:$0xf0]  ;;  %v3350_v2 = vpop.f32.mrf.mxu1 }
 0x11d   :  { %3601 = vmatmul.bf16.vlgmr.msra.gmra.mxu3 %v13838_v62  ;;  %3608 = vmatpush.bf16.msrb.mxu0 %v8837_v14  ;;  %v12825_v63 = vld [vmem:[#allocation5 + $0x99c] sm:$0xf]  ;;  %v3351_v5 = vadd.f32 %v3350_v2, %v3337_v54  ;;  %v9157_v7 = vor.u32 %v12697_v58, %v9154_v60  ;;  %v9416_v2 = vld [vmem:[#allocation5 + $0x7a0] sm:$0xf] }
 0x11e   :  { %3649 = vmatpush.bf16.msrb.mxu3 %v10437_v6  ;;  %3622 = vmatpush.bf16.msrb.mxu1 %v9349_v15  ;;  %v9666_v1 = vld [vmem:[#allocation5 + $0x9d8] sm:$0xf0]  ;;  %v8645_v6 = vor.u32 %v12569_v56, %v8642_v57  ;;  %v3364_v9 = vpop.f32.mrf.mxu2 }
 0x11f   :  { %v12953_v3 = vld [vmem:[#allocation5 + $0xd9c] sm:$0xf]  ;;  %v9669_v8 = vor.u32 %v12825_v63, %v9666_v1  ;;  %v8904_v63 = vld [vmem:[#allocation5 + $0x3a0] sm:$0xf] }
 0x120   :  { %3636 = vmatpush.bf16.msrb.mxu2 %v9861_v16  ;;  %v10178_v4 = vld [vmem:[#allocation5 + $0xdd8] sm:$0xf0]  ;;  %v3365_v16 = vadd.f32 %v3364_v9, %v3351_v5  ;;  %v3378_v26 = vpop.f32.mrf.mxu3  ;;  %v12642_v1 = vld [vmem:[#allocation5 + $0x3dc] sm:$0xf0] }
 0x121   :  { %3609 = vmatpush.bf16.msrb.mxu0 %v8773_v31  ;;  %v12553_v10 = vld [vmem:[#allocation5 + $0x11c] sm:$0xf]  ;;  %v10181_v15 = vor.u32 %v12953_v3, %v10178_v4  ;;  %v12770_v4 = vld [vmem:[#allocation5 + $0x7dc] sm:$0xf0] }
 0x122   :  { %3650 = vmatpush.bf16.msrb.mxu3 %v10373_v24  ;;  %3623 = vmatpush.bf16.msrb.mxu1 %v9285_v36  ;;  %v8578_v11 = vld [vmem:[#allocation5 + $0x158] sm:$0xf0]  ;;  %v13901_v28 = vadd.f32 %v3378_v26, %v3365_v16  ;;  %v9928_v5 = vld [vmem:[#allocation5 + $0xba0] sm:$0xf] }
 0x123   :  { %v12681_v14 = vld [vmem:[#allocation5 + $0x51c] sm:$0xf]  ;;  %v8581_v27 = vor.u32 %v12553_v10, %v8578_v11  ;;  %v10440_v9 = vld [vmem:[#allocation5 + $0xfa0] sm:$0xf] }
 0x124   :  { %3637 = vmatpush.bf16.msrb.mxu2 %v9797_v37  ;;  %v9090_v18 = vld [vmem:[#allocation5 + $0x558] sm:$0xf0]  ;;  %v13026_v10 = vld [vmem:[#allocation5 + $0xfdc] sm:$0xf0] }
 0x125   :  { %3610 = vmatpush.bf16.msrb.mxu0 %v8709_v50  ;;  %v12809_v20 = vld [vmem:[#allocation5 + $0x91c] sm:$0xf]  ;;  %v9093_v30 = vor.u32 %v12681_v14, %v9090_v18  ;;  %v8905_v14 = vor.u32 %v12642_v1, %v8904_v63  ;;  %v8840_v18 = vld [vmem:[#allocation5 + $0x320] sm:$0xf]  ;;  %v14776_v63 = vperm.slane %v13859_v34, 3 }
 0x126   :  { %3651 = vmatpush.bf16.msrb.mxu3 %v10309_v42  ;;  %3624 = vmatpush.bf16.msrb.mxu1 %v9221_v52  ;;  %v9602_v21 = vld [vmem:[#allocation5 + $0x958] sm:$0xf0]  ;;  %v9864_v26 = vld [vmem:[#allocation5 + $0xb20] sm:$0xf] }
 0x127   :  { %v12937_v24 = vld [vmem:[#allocation5 + $0xd1c] sm:$0xf]  ;;  %v9605_v31 = vor.u32 %v12809_v20, %v9602_v21  ;;  %v12626_v20 = vld [vmem:[#allocation5 + $0x35c] sm:$0xf0] }
 0x128   :  { %3638 = vmatpush.bf16.msrb.mxu2 %v9733_v53  ;;  %v10114_v25 = vld [vmem:[#allocation5 + $0xd58] sm:$0xf0]  ;;  %v9352_v21 = vld [vmem:[#allocation5 + $0x720] sm:$0xf] }
 0x129   :  { %3611 = vmatpush.bf16.msrb.mxu0 %v8645_v6  ;;  %v12537_v32 = vld [vmem:[#allocation5 + $0x9c] sm:$0xf]  ;;  %v10117_v38 = vor.u32 %v12937_v24, %v10114_v25  ;;  %v12898_v6 = vld [vmem:[#allocation5 + $0xbdc] sm:$0xf0]  ;;  %v10441_v24 = vor.u32 %v13026_v10, %v10440_v9 }
 0x12a   :  { %3652 = vmatpush.bf16.msrb.mxu3 %v10245_v59  ;;  %3625 = vmatpush.bf16.msrb.mxu1 %v9157_v7  ;;  %v8514_v36 = vld [vmem:[#allocation5 + $0xd8] sm:$0xf0]  ;;  %v9929_v16 = vor.u32 %v12898_v6, %v9928_v5  ;;  %v12754_v25 = vld [vmem:[#allocation5 + $0x75c] sm:$0xf0]  ;;  %v13914_v5 = vpop.f32.mrf.mxu3 }
 0x12b   :  { %v12665_v37 = vld [vmem:[#allocation5 + $0x49c] sm:$0xf]  ;;  %v8517_v48 = vor.u32 %v12537_v32, %v8514_v36  ;;  %v13903_v32 = vpop.f32.mrf.mxu0  ;;  %v8841_v36 = vor.u32 %v12626_v20, %v8840_v18  ;;  %v10248_v6 = vld [vmem:[#allocation5 + $0xe20] sm:$0xf] }
 0x12c   :  { %3639 = vmatpush.bf16.msrb.mxu2 %v9669_v8  ;;  %v9026_v39 = vld [vmem:[#allocation5 + $0x4d8] sm:$0xf0]  ;;  %v9160_v18 = vld [vmem:[#allocation5 + $0x5a0] sm:$0xf] }
 0x12d   :  { %v12793_v42 = vld [vmem:[#allocation5 + $0x89c] sm:$0xf]  ;;  %3612 = vmatpush.bf16.msrb.mxu0 %v8581_v27  ;;  %v9029_v51 = vor.u32 %v12665_v37, %v9026_v39  ;;  %v12882_v27 = vld [vmem:[#allocation5 + $0xb5c] sm:$0xf0]  ;;  %v9353_v37 = vor.u32 %v12754_v25, %v9352_v21 }
 0x12e   :  { %3653 = vmatpush.bf16.msrb.mxu3 %v10181_v15  ;;  %v9538_v44 = vld [vmem:[#allocation5 + $0x8d8] sm:$0xf0]  ;;  %3626 = vmatpush.bf16.msrb.mxu1 %v9093_v30  ;;  %v9417_v15 = vor.u32 %v12770_v4, %v9416_v2  ;;  %v10376_v30 = vld [vmem:[#allocation5 + $0xf20] sm:$0xf] }
 0x12f   :  { %v12921_v45 = vld [vmem:[#allocation5 + $0xc9c] sm:$0xf]  ;;  %v9541_v52 = vor.u32 %v12793_v42, %v9538_v44  ;;  %v8776_v39 = vld [vmem:[#allocation5 + $0x2a0] sm:$0xf] }
 0x130   :  { %v10050_v46 = vld [vmem:[#allocation5 + $0xcd8] sm:$0xf0]  ;;  %3640 = vmatpush.bf16.msrb.mxu2 %v9605_v31  ;;  %v13010_v31 = vld [vmem:[#allocation5 + $0xf5c] sm:$0xf0] }
 0x131   :  { %v12521_v49 = vld [vmem:[#allocation5 + $0x1c] sm:$0xf]  ;;  %v10053_v57 = vor.u32 %v12921_v45, %v10050_v46  ;;  %3613 = vmatpush.bf16.msrb.mxu0 %v8517_v48  ;;  %v12610_v42 = vld [vmem:[#allocation5 + $0x2dc] sm:$0xf0]  ;;  %v13905_v45 = vpop.f32.mrf.mxu1  ;;  %v10377_v46 = vor.u32 %v13010_v31, %v10376_v30 }
 0x132   :  { %v8450_v50 = vld [vmem:[#allocation5 + $0x58] sm:$0xf0]  ;;  %3654 = vmatpush.bf16.msrb.mxu3 %v10117_v38  ;;  %3627 = vmatpush.bf16.msrb.mxu1 %v9029_v51  ;;  %v9865_v38 = vor.u32 %v12882_v27, %v9864_v26  ;;  %v9288_v44 = vld [vmem:[#allocation5 + $0x6a0] sm:$0xf] }
 0x133   :  { %v12649_v53 = vld [vmem:[#allocation5 + $0x41c] sm:$0xf]  ;;  %v8453_v3 = vor.u32 %v12521_v49, %v8450_v50  ;;  %v12738_v48 = vld [vmem:[#allocation5 + $0x6dc] sm:$0xf0] }
 0x134   :  { %v8962_v54 = vld [vmem:[#allocation5 + $0x458] sm:$0xf0]  ;;  %3641 = vmatpush.bf16.msrb.mxu2 %v9541_v52  ;;  %v9800_v49 = vld [vmem:[#allocation5 + $0xaa0] sm:$0xf] }
 0x135   :  { %v12777_v56 = vld [vmem:[#allocation5 + $0x81c] sm:$0xf]  ;;  %v8965_v7 = vor.u32 %v12649_v53, %v8962_v54  ;;  %3614 = vmatpush.bf16.msrb.mxu0 %v8453_v3  ;;  %v12866_v50 = vld [vmem:[#allocation5 + $0xadc] sm:$0xf0]  ;;  %v8777_v53 = vor.u32 %v12610_v42, %v8776_v39  ;;  %v3392_v9 = vpop.f32.mrf.mxu0 }
 0x136   :  { %v9474_v58 = vld [vmem:[#allocation5 + $0x858] sm:$0xf0]  ;;  %3655 = vmatpush.bf16.msrb.mxu3 %v10053_v57  ;;  %v10312_v51 = vld [vmem:[#allocation5 + $0xea0] sm:$0xf]  ;;  %v9289_v57 = vor.u32 %v12738_v48, %v9288_v44 }
 0x137   :  { %v12905_v59 = vld [vmem:[#allocation5 + $0xc1c] sm:$0xf]  ;;  %v9477_v8 = vor.u32 %v12777_v56, %v9474_v58  ;;  %3628 = vmatpush.bf16.msrb.mxu1 %v8965_v7  ;;  %v12994_v52 = vld [vmem:[#allocation5 + $0xedc] sm:$0xf0]  ;;  %v13911_v56 = vpop.f32.mrf.mxu2  ;;  %v9801_v58 = vor.u32 %v12866_v50, %v9800_v49 }
 0x138   :  { %v9986_v60 = vld [vmem:[#allocation5 + $0xc58] sm:$0xf0]  ;;  %3615 = vmatmul.bf16.vlgmr.msrb.gmra.mxu0 %v13836_v61  ;;  %v8712_v54 = vld [vmem:[#allocation5 + $0x220] sm:$0xf]  ;;  %v10313_v1 = vor.u32 %v12994_v52, %v10312_v51 }
 0x139   :  { %v9989_v11 = vor.u32 %v12905_v59, %v9986_v60  ;;  %3642 = vmatpush.bf16.msrb.mxu2 %v9477_v8  ;;  %3663 = vmatpush.bf16.msra.mxu0 %v8905_v14  ;;  %v12594_v59 = vld [vmem:[#allocation5 + $0x25c] sm:$0xf0]  ;;  %v3393_v14 = vadd.f32 %v3392_v9, %v14776_v63  ;;  %v3406_v26 = vpop.f32.mrf.mxu1 }
 0x13a   :  { %3629 = vmatmul.bf16.vlgmr.msrb.gmra.mxu1 %v13840_v0  ;;  %v9224_v60 = vld [vmem:[#allocation5 + $0x620] sm:$0xf]  ;;  %v8713_v8 = vor.u32 %v12594_v59, %v8712_v54 }
 0x13b   :  { %3656 = vmatpush.bf16.msrb.mxu3 %v9989_v11  ;;  %3677 = vmatpush.bf16.msra.mxu1 %v9417_v15  ;;  %v12722_v2 = vld [vmem:[#allocation5 + $0x65c] sm:$0xf0]  ;;  %v3407_v31 = vadd.f32 %v3406_v26, %v3393_v14 }
 0x13c   :  { %3643 = vmatmul.bf16.vlgmr.msrb.gmra.mxu2 %v13834_v55  ;;  %v9736_v3 = vld [vmem:[#allocation5 + $0xa20] sm:$0xf]  ;;  %v9225_v10 = vor.u32 %v12722_v2, %v9224_v60 }
 0x13d   :  { %3691 = vmatpush.bf16.msra.mxu2 %v9929_v16  ;;  %3664 = vmatpush.bf16.msra.mxu0 %v8841_v36  ;;  %v12850_v4 = vld [vmem:[#allocation5 + $0xa5c] sm:$0xf0] }
 0x13e   :  { %3657 = vmatmul.bf16.vlgmr.msrb.gmra.mxu3 %v13838_v62  ;;  %v12978_v7 = vld [vmem:[#allocation5 + $0xe5c] sm:$0xf0]  ;;  %v9737_v11 = vor.u32 %v12850_v4, %v9736_v3 }
 0x13f   :  { %3705 = vmatpush.bf16.msra.mxu3 %v10441_v24  ;;  %3678 = vmatpush.bf16.msra.mxu1 %v9353_v37  ;;  %v8648_v15 = vld [vmem:[#allocation5 + $0x1a0] sm:$0xf]  ;;  %v10249_v20 = vor.u32 %v12978_v7, %v10248_v6  ;;  %v3420_v39 = vpop.f32.mrf.mxu2 }
 0x140   :  { %v12578_v16 = vld [vmem:[#allocation5 + $0x1dc] sm:$0xf0]  ;;  %v3421_v49 = vadd.f32 %v3420_v39, %v3407_v31 }
 0x141   :  { %3692 = vmatpush.bf16.msra.mxu2 %v9865_v38  ;;  %3665 = vmatpush.bf16.msra.mxu0 %v8777_v53  ;;  %v12706_v21 = vld [vmem:[#allocation5 + $0x5dc] sm:$0xf0]  ;;  %v8649_v36 = vor.u32 %v12578_v16, %v8648_v15 }
 0x142   :  { %v9672_v24 = vld [vmem:[#allocation5 + $0x9a0] sm:$0xf]  ;;  %v9161_v37 = vor.u32 %v12706_v21, %v9160_v18 }
 0x143   :  { %3706 = vmatpush.bf16.msra.mxu3 %v10377_v46  ;;  %3679 = vmatpush.bf16.msra.mxu1 %v9289_v57  ;;  %v12834_v25 = vld [vmem:[#allocation5 + $0x9dc] sm:$0xf0]  ;;  %v3434_v57 = vpop.f32.mrf.mxu3 }
 0x144   :  { %v10184_v27 = vld [vmem:[#allocation5 + $0xda0] sm:$0xf]  ;;  %v9673_v38 = vor.u32 %v12834_v25, %v9672_v24  ;;  %v13918_v59 = vadd.f32 %v3434_v57, %v3421_v49 }
 0x145   :  { %3693 = vmatpush.bf16.msra.mxu2 %v9801_v58  ;;  %v12962_v30 = vld [vmem:[#allocation5 + $0xddc] sm:$0xf0]  ;;  %3666 = vmatpush.bf16.msra.mxu0 %v8713_v8 }
 0x146   :  { %v8584_v42 = vld [vmem:[#allocation5 + $0x120] sm:$0xf]  ;;  %v10185_v48 = vor.u32 %v12962_v30, %v10184_v27 }
 0x147   :  { %3707 = vmatpush.bf16.msra.mxu3 %v10313_v1  ;;  %3680 = vmatpush.bf16.msra.mxu1 %v9225_v10  ;;  %v12562_v44 = vld [vmem:[#allocation5 + $0x15c] sm:$0xf0] }
 0x148   :  { %v9096_v46 = vld [vmem:[#allocation5 + $0x520] sm:$0xf]  ;;  %v8585_v58 = vor.u32 %v12562_v44, %v8584_v42  ;;  %v9418_v42 = vld [vmem:[#allocation5 + $0x7e0] sm:$0xf0] }
 0x149   :  { %3694 = vmatpush.bf16.msra.mxu2 %v9737_v11  ;;  %v12690_v50 = vld [vmem:[#allocation5 + $0x55c] sm:$0xf0]  ;;  %3667 = vmatpush.bf16.msra.mxu0 %v8649_v36  ;;  %v12634_v36 = vld [vmem:[#allocation5 + $0x3a4] sm:$0xf] }
 0x14a   :  { %v9608_v51 = vld [vmem:[#allocation5 + $0x920] sm:$0xf]  ;;  %v9097_v60 = vor.u32 %v12690_v50, %v9096_v46  ;;  %v12890_v44 = vld [vmem:[#allocation5 + $0xba4] sm:$0xf] }
 0x14b   :  { %3708 = vmatpush.bf16.msra.mxu3 %v10249_v20  ;;  %v12818_v52 = vld [vmem:[#allocation5 + $0x95c] sm:$0xf0]  ;;  %3681 = vmatpush.bf16.msra.mxu1 %v9161_v37  ;;  %v8906_v37 = vld [vmem:[#allocation5 + $0x3e0] sm:$0xf0] }
 0x14c   :  { %v10120_v53 = vld [vmem:[#allocation5 + $0xd20] sm:$0xf]  ;;  %v9609_v1 = vor.u32 %v12818_v52, %v9608_v51  ;;  %v9930_v46 = vld [vmem:[#allocation5 + $0xbe0] sm:$0xf0] }
 0x14d   :  { %v12946_v54 = vld [vmem:[#allocation5 + $0xd5c] sm:$0xf0]  ;;  %3695 = vmatpush.bf16.msra.mxu2 %v9673_v38  ;;  %3668 = vmatpush.bf16.msra.mxu0 %v8585_v58  ;;  %v12762_v38 = vld [vmem:[#allocation5 + $0x7a4] sm:$0xf]  ;;  %v9933_v57 = vor.u32 %v12890_v44, %v9930_v46 }
 0x14e   :  { %v8520_v2 = vld [vmem:[#allocation5 + $0xa0] sm:$0xf]  ;;  %v10121_v6 = vor.u32 %v12946_v54, %v10120_v53  ;;  %v13018_v50 = vld [vmem:[#allocation5 + $0xfa4] sm:$0xf]  ;;  %v8909_v53 = vor.u32 %v12634_v36, %v8906_v37  ;;  %v9421_v54 = vor.u32 %v12762_v38, %v9418_v42  ;;  %v13928_v37 = vpop.f32.mrf.mxu2 }
 0x14f   :  { %v12546_v3 = vld [vmem:[#allocation5 + $0xdc] sm:$0xf0]  ;;  %3709 = vmatpush.bf16.msra.mxu3 %v10185_v48  ;;  %3682 = vmatpush.bf16.msra.mxu1 %v9097_v60  ;;  %v10442_v51 = vld [vmem:[#allocation5 + $0xfe0] sm:$0xf0] }
 0x150   :  { %v9032_v4 = vld [vmem:[#allocation5 + $0x4a0] sm:$0xf]  ;;  %v8521_v14 = vor.u32 %v12546_v3, %v8520_v2  ;;  %v12618_v58 = vld [vmem:[#allocation5 + $0x324] sm:$0xf]  ;;  %v10445_v2 = vor.u32 %v13018_v50, %v10442_v51 }
 0x151   :  { %v12674_v7 = vld [vmem:[#allocation5 + $0x4dc] sm:$0xf0]  ;;  %3696 = vmatpush.bf16.msra.mxu2 %v9609_v1  ;;  %v8842_v60 = vld [vmem:[#allocation5 + $0x360] sm:$0xf0] }
 0x152   :  { %v9544_v8 = vld [vmem:[#allocation5 + $0x8a0] sm:$0xf]  ;;  %v9033_v18 = vor.u32 %v12674_v7, %v9032_v4  ;;  %3669 = vmatpush.bf16.msra.mxu0 %v8521_v14  ;;  %v12746_v1 = vld [vmem:[#allocation5 + $0x724] sm:$0xf] }
 0x153   :  { %v12802_v9 = vld [vmem:[#allocation5 + $0x8dc] sm:$0xf0]  ;;  %3710 = vmatpush.bf16.msra.mxu3 %v10121_v6  ;;  %v9354_v3 = vld [vmem:[#allocation5 + $0x760] sm:$0xf0] }
 0x154   :  { %v10056_v10 = vld [vmem:[#allocation5 + $0xca0] sm:$0xf]  ;;  %v9545_v20 = vor.u32 %v12802_v9, %v9544_v8  ;;  %3683 = vmatpush.bf16.msra.mxu1 %v9033_v18  ;;  %v12874_v4 = vld [vmem:[#allocation5 + $0xb24] sm:$0xf]  ;;  %v13920_v9 = vpop.f32.mrf.mxu0 }
 0x155   :  { %v12930_v11 = vld [vmem:[#allocation5 + $0xcdc] sm:$0xf0]  ;;  %v9866_v6 = vld [vmem:[#allocation5 + $0xb60] sm:$0xf0] }
 0x156   :  { %v8456_v15 = vld [vmem:[#allocation5 + $0x20] sm:$0xf]  ;;  %v10057_v26 = vor.u32 %v12930_v11, %v10056_v10  ;;  %3697 = vmatpush.bf16.msra.mxu2 %v9545_v20  ;;  %v13002_v7 = vld [vmem:[#allocation5 + $0xf24] sm:$0xf]  ;;  %v8845_v10 = vor.u32 %v12618_v58, %v8842_v60  ;;  %v9357_v11 = vor.u32 %v12746_v1, %v9354_v3  ;;  %v9869_v14 = vor.u32 %v12874_v4, %v9866_v6  ;;  %v13922_v20 = vpop.f32.mrf.mxu1 }
 0x157   :  { %v12530_v16 = vld [vmem:[#allocation5 + $0x5c] sm:$0xf0]  ;;  %v10378_v8 = vld [vmem:[#allocation5 + $0xf60] sm:$0xf0] }
 0x158   :  { %v8968_v21 = vld [vmem:[#allocation5 + $0x420] sm:$0xf]  ;;  %v8457_v39 = vor.u32 %v12530_v16, %v8456_v15  ;;  %3711 = vmatpush.bf16.msra.mxu3 %v10057_v26  ;;  %v12602_v15 = vld [vmem:[#allocation5 + $0x2a4] sm:$0xf] }
 0x159   :  { %v12658_v24 = vld [vmem:[#allocation5 + $0x45c] sm:$0xf0]  ;;  %v8778_v16 = vld [vmem:[#allocation5 + $0x2e0] sm:$0xf0] }
 0x15a   :  { %v9480_v25 = vld [vmem:[#allocation5 + $0x820] sm:$0xf]  ;;  %v8969_v48 = vor.u32 %v12658_v24, %v8968_v21  ;;  %3670 = vmatpush.bf16.msra.mxu0 %v8457_v39  ;;  %v12730_v18 = vld [vmem:[#allocation5 + $0x6a4] sm:$0xf]  ;;  %v10381_v21 = vor.u32 %v13002_v7, %v10378_v8 }
 0x15b   :  { %v12786_v27 = vld [vmem:[#allocation5 + $0x85c] sm:$0xf0]  ;;  %v9290_v24 = vld [vmem:[#allocation5 + $0x6e0] sm:$0xf0] }
 0x15c   :  { %v9992_v30 = vld [vmem:[#allocation5 + $0xc20] sm:$0xf]  ;;  %v9481_v49 = vor.u32 %v12786_v27, %v9480_v25  ;;  %3684 = vmatpush.bf16.msra.mxu1 %v8969_v48  ;;  %v12858_v25 = vld [vmem:[#allocation5 + $0xaa4] sm:$0xf]  ;;  %v9293_v38 = vor.u32 %v12730_v18, %v9290_v24  ;;  %v3448_v60 = vpop.f32.mrf.mxu0 }
 0x15d   :  { %v12914_v31 = vld [vmem:[#allocation5 + $0xc5c] sm:$0xf0]  ;;  %v9802_v26 = vld [vmem:[#allocation5 + $0xae0] sm:$0xf0]  ;;  %3671 = vmatmul.bf16.vlgmr.msra.gmra.mxu0 %v13836_v61 }
 0x15e   :  { %v9993_v52 = vor.u32 %v12914_v31, %v9992_v30  ;;  %3698 = vmatpush.bf16.msra.mxu2 %v9481_v49  ;;  %3719 = vmatpush.bf16.msrb.mxu0 %v8909_v53  ;;  %v12986_v27 = vld [vmem:[#allocation5 + $0xea4] sm:$0xf]  ;;  %v8781_v31 = vor.u32 %v12602_v15, %v8778_v16  ;;  %v9805_v39 = vor.u32 %v12858_v25, %v9802_v26  ;;  %v13933_v53 = vpop.f32.mrf.mxu3  ;;  %v3462_v15 = vpop.f32.mrf.mxu1 }
 0x15f   :  { %v10314_v30 = vld [vmem:[#allocation5 + $0xee0] sm:$0xf0]  ;;  %3685 = vmatmul.bf16.vlgmr.msra.gmra.mxu1 %v13840_v0 }
 0x160   :  { %3712 = vmatpush.bf16.msra.mxu3 %v9993_v52  ;;  %3733 = vmatpush.bf16.msrb.mxu1 %v9421_v54  ;;  %v12586_v36 = vld [vmem:[#allocation5 + $0x224] sm:$0xf]  ;;  %v10317_v49 = vor.u32 %v12986_v27, %v10314_v30  ;;  %v3476_v27 = vpop.f32.mrf.mxu2 }
 0x161   :  { %3699 = vmatmul.bf16.vlgmr.msra.gmra.mxu2 %v13834_v55  ;;  %v8714_v42 = vld [vmem:[#allocation5 + $0x260] sm:$0xf0] }
 0x162   :  { %3747 = vmatpush.bf16.msrb.mxu2 %v9933_v57  ;;  %3720 = vmatpush.bf16.msrb.mxu0 %v8845_v10  ;;  %v12714_v44 = vld [vmem:[#allocation5 + $0x624] sm:$0xf]  ;;  %v8717_v58 = vor.u32 %v12586_v36, %v8714_v42 }
 0x163   :  { %3713 = vmatmul.bf16.vlgmr.msra.gmra.mxu3 %v13838_v62  ;;  %v13930_v46 = vld [vmem:[#allocation7] sm:$0xff] }
 0x164   :  { %3761 = vmatpush.bf16.msrb.mxu3 %v10445_v2  ;;  %3734 = vmatpush.bf16.msrb.mxu1 %v9357_v11  ;;  %v14775_v48 = vperm.slane %v13930_v46, 4  ;;  %v9226_v50 = vld [vmem:[#allocation5 + $0x660] sm:$0xf0] }
 0x165   :  { %v12842_v51 = vld [vmem:[#allocation5 + $0xa24] sm:$0xf]  ;;  %v9229_v1 = vor.u32 %v12714_v44, %v9226_v50 }
 0x166   :  { %3748 = vmatpush.bf16.msrb.mxu2 %v9869_v14  ;;  %v9738_v52 = vld [vmem:[#allocation5 + $0xa60] sm:$0xf0]  ;;  %3721 = vmatpush.bf16.msrb.mxu0 %v8781_v31  ;;  %v3449_v3 = vadd.f32 %v3448_v60, %v14775_v48  ;;  %v12947_v48 = vld [vmem:[#allocation5 + $0xd64] sm:$0xf0] }
 0x167   :  { %v12970_v54 = vld [vmem:[#allocation5 + $0xe24] sm:$0xf]  ;;  %v9741_v2 = vor.u32 %v12842_v51, %v9738_v52  ;;  %v3490_v52 = vpop.f32.mrf.mxu3 }
 0x168   :  { %3762 = vmatpush.bf16.msrb.mxu3 %v10381_v21  ;;  %v10250_v57 = vld [vmem:[#allocation5 + $0xe60] sm:$0xf0]  ;;  %3735 = vmatpush.bf16.msrb.mxu1 %v9293_v38  ;;  %v3463_v21 = vadd.f32 %v3462_v15, %v3449_v3 }
 0x169   :  { %v12570_v4 = vld [vmem:[#allocation5 + $0x1a4] sm:$0xf]  ;;  %v10253_v8 = vor.u32 %v12970_v54, %v10250_v57 }
 0x16a   :  { %3749 = vmatpush.bf16.msrb.mxu2 %v9805_v39  ;;  %v8650_v6 = vld [vmem:[#allocation5 + $0x1e0] sm:$0xf0]  ;;  %3722 = vmatpush.bf16.msrb.mxu0 %v8717_v58  ;;  %v3477_v39 = vadd.f32 %v3476_v27, %v3463_v21 }
 0x16b   :  { %v12698_v7 = vld [vmem:[#allocation5 + $0x5a4] sm:$0xf]  ;;  %v8653_v24 = vor.u32 %v12570_v4, %v8650_v6 }
 0x16c   :  { %3763 = vmatpush.bf16.msrb.mxu3 %v10317_v49  ;;  %v9162_v10 = vld [vmem:[#allocation5 + $0x5e0] sm:$0xf0]  ;;  %3736 = vmatpush.bf16.msrb.mxu1 %v9229_v1  ;;  %v13937_v57 = vadd.f32 %v3490_v52, %v3477_v39  ;;  %v12643_v39 = vld [vmem:[#allocation5 + $0x3e4] sm:$0xf0] }
 0x16d   :  { %v12826_v11 = vld [vmem:[#allocation5 + $0x9a4] sm:$0xf]  ;;  %v9165_v25 = vor.u32 %v12698_v7, %v9162_v10 }
 0x16e   :  { %v9674_v14 = vld [vmem:[#allocation5 + $0x9e0] sm:$0xf0]  ;;  %3750 = vmatpush.bf16.msrb.mxu2 %v9741_v2  ;;  %3723 = vmatpush.bf16.msrb.mxu0 %v8653_v24 }
 0x16f   :  { %v12954_v16 = vld [vmem:[#allocation5 + $0xda4] sm:$0xf]  ;;  %v9677_v26 = vor.u32 %v12826_v11, %v9674_v14 }
 0x170   :  { %v10186_v18 = vld [vmem:[#allocation5 + $0xde0] sm:$0xf0]  ;;  %3764 = vmatpush.bf16.msrb.mxu3 %v10253_v8  ;;  %3737 = vmatpush.bf16.msrb.mxu1 %v9165_v25 }
 0x171   :  { %v12554_v30 = vld [vmem:[#allocation5 + $0x124] sm:$0xf]  ;;  %v10189_v38 = vor.u32 %v12954_v16, %v10186_v18 }
 0x172   :  { %v8586_v31 = vld [vmem:[#allocation5 + $0x160] sm:$0xf0]  ;;  %3751 = vmatpush.bf16.msrb.mxu2 %v9677_v26 }
 0x173   :  { %v12682_v36 = vld [vmem:[#allocation5 + $0x524] sm:$0xf]  ;;  %v8589_v54 = vor.u32 %v12554_v30, %v8586_v31 }
 0x174   :  { %v9098_v42 = vld [vmem:[#allocation5 + $0x560] sm:$0xf0]  ;;  %3765 = vmatpush.bf16.msrb.mxu3 %v10189_v38  ;;  %v8912_v38 = vld [vmem:[#allocation5 + $0x3a8] sm:$0xf] }
 0x175   :  { %v12810_v44 = vld [vmem:[#allocation5 + $0x924] sm:$0xf]  ;;  %v9101_v58 = vor.u32 %v12682_v36, %v9098_v42  ;;  %3724 = vmatpush.bf16.msrb.mxu0 %v8589_v54  ;;  %v9424_v42 = vld [vmem:[#allocation5 + $0x7a8] sm:$0xf] }
 0x176   :  { %v9610_v49 = vld [vmem:[#allocation5 + $0x960] sm:$0xf0] }
 0x177   :  { %v12938_v50 = vld [vmem:[#allocation5 + $0xd24] sm:$0xf]  ;;  %v9613_v60 = vor.u32 %v12810_v44, %v9610_v49  ;;  %3738 = vmatpush.bf16.msrb.mxu1 %v9101_v58  ;;  %v12771_v49 = vld [vmem:[#allocation5 + $0x7e4] sm:$0xf0] }
 0x178   :  { %v10122_v51 = vld [vmem:[#allocation5 + $0xd60] sm:$0xf0]  ;;  %v10448_v58 = vld [vmem:[#allocation5 + $0xfa8] sm:$0xf] }
 0x179   :  { %v12538_v1 = vld [vmem:[#allocation5 + $0xa4] sm:$0xf]  ;;  %v10125_v4 = vor.u32 %v12938_v50, %v10122_v51  ;;  %3752 = vmatpush.bf16.msrb.mxu2 %v9613_v60  ;;  %v9936_v50 = vld [vmem:[#allocation5 + $0xba8] sm:$0xf] }
 0x17a   :  { %v8522_v2 = vld [vmem:[#allocation5 + $0xe0] sm:$0xf0]  ;;  %v12899_v51 = vld [vmem:[#allocation5 + $0xbe4] sm:$0xf0] }
 0x17b   :  { %v12666_v3 = vld [vmem:[#allocation5 + $0x4a4] sm:$0xf]  ;;  %v8525_v14 = vor.u32 %v12538_v1, %v8522_v2  ;;  %3766 = vmatpush.bf16.msrb.mxu3 %v10125_v4  ;;  %v13027_v60 = vld [vmem:[#allocation5 + $0xfe4] sm:$0xf0]  ;;  %v8913_v2 = vor.u32 %v12643_v39, %v8912_v38  ;;  %v9937_v4 = vor.u32 %v12899_v51, %v9936_v50 }
 0x17c   :  { %v9034_v6 = vld [vmem:[#allocation5 + $0x4e0] sm:$0xf0]  ;;  %v12739_v39 = vld [vmem:[#allocation5 + $0x6e4] sm:$0xf0] }
 0x17d   :  { %v12794_v7 = vld [vmem:[#allocation5 + $0x8a4] sm:$0xf]  ;;  %v9037_v18 = vor.u32 %v12666_v3, %v9034_v6  ;;  %3725 = vmatpush.bf16.msrb.mxu0 %v8525_v14  ;;  %v9425_v3 = vor.u32 %v12771_v49, %v9424_v42  ;;  %v8848_v6 = vld [vmem:[#allocation5 + $0x328] sm:$0xf] }
 0x17e   :  { %v9546_v8 = vld [vmem:[#allocation5 + $0x8e0] sm:$0xf0]  ;;  %v9872_v14 = vld [vmem:[#allocation5 + $0xb28] sm:$0xf] }
 0x17f   :  { %v12922_v10 = vld [vmem:[#allocation5 + $0xca4] sm:$0xf]  ;;  %v9549_v21 = vor.u32 %v12794_v7, %v9546_v8  ;;  %3739 = vmatpush.bf16.msrb.mxu1 %v9037_v18  ;;  %v12627_v7 = vld [vmem:[#allocation5 + $0x364] sm:$0xf0] }
 0x180   :  { %v10058_v11 = vld [vmem:[#allocation5 + $0xce0] sm:$0xf0]  ;;  %v9360_v8 = vld [vmem:[#allocation5 + $0x728] sm:$0xf] }
 0x181   :  { %v12522_v15 = vld [vmem:[#allocation5 + $0x24] sm:$0xf]  ;;  %v10061_v27 = vor.u32 %v12922_v10, %v10058_v11  ;;  %3753 = vmatpush.bf16.msrb.mxu2 %v9549_v21  ;;  %v10449_v10 = vor.u32 %v13027_v60, %v10448_v58  ;;  %v12755_v11 = vld [vmem:[#allocation5 + $0x764] sm:$0xf0]  ;;  %v13939_v21 = vpop.f32.mrf.mxu0 }
 0x182   :  { %v8458_v16 = vld [vmem:[#allocation5 + $0x60] sm:$0xf0]  ;;  %v13011_v18 = vld [vmem:[#allocation5 + $0xf64] sm:$0xf0] }
 0x183   :  { %v12650_v24 = vld [vmem:[#allocation5 + $0x424] sm:$0xf]  ;;  %v8461_v44 = vor.u32 %v12522_v15, %v8458_v16  ;;  %3767 = vmatpush.bf16.msrb.mxu3 %v10061_v27  ;;  %v12883_v15 = vld [vmem:[#allocation5 + $0xb64] sm:$0xf0] }
 0x184   :  { %v8970_v25 = vld [vmem:[#allocation5 + $0x460] sm:$0xf0]  ;;  %v10384_v16 = vld [vmem:[#allocation5 + $0xf28] sm:$0xf] }
 0x185   :  { %v12778_v26 = vld [vmem:[#allocation5 + $0x824] sm:$0xf]  ;;  %v8973_v52 = vor.u32 %v12650_v24, %v8970_v25  ;;  %3726 = vmatpush.bf16.msrb.mxu0 %v8461_v44  ;;  %v8849_v24 = vor.u32 %v12627_v7, %v8848_v6  ;;  %v9361_v25 = vor.u32 %v12755_v11, %v9360_v8  ;;  %v8784_v27 = vld [vmem:[#allocation5 + $0x2a8] sm:$0xf]  ;;  %v10385_v38 = vor.u32 %v13011_v18, %v10384_v16 }
 0x186   :  { %v9482_v30 = vld [vmem:[#allocation5 + $0x860] sm:$0xf0]  ;;  %v9808_v42 = vld [vmem:[#allocation5 + $0xaa8] sm:$0xf] }
 0x187   :  { %v12906_v31 = vld [vmem:[#allocation5 + $0xc24] sm:$0xf]  ;;  %v9485_v54 = vor.u32 %v12778_v26, %v9482_v30  ;;  %3740 = vmatpush.bf16.msrb.mxu1 %v8973_v52  ;;  %v9873_v26 = vor.u32 %v12883_v15, %v9872_v14  ;;  %v12611_v30 = vld [vmem:[#allocation5 + $0x2e4] sm:$0xf0] }
 0x188   :  { %v9994_v36 = vld [vmem:[#allocation5 + $0xc60] sm:$0xf0]  ;;  %v12867_v44 = vld [vmem:[#allocation5 + $0xae4] sm:$0xf0]  ;;  %3727 = vmatmul.bf16.vlgmr.msrb.gmra.mxu0 %v13836_v61  ;;  %v8785_v51 = vor.u32 %v12611_v30, %v8784_v27 }
 0x189   :  { %v9997_v1 = vor.u32 %v12906_v31, %v9994_v36  ;;  %3754 = vmatpush.bf16.msrb.mxu2 %v9485_v54  ;;  %3775 = vmatpush.bf16.msra.mxu0 %v8913_v2  ;;  %v9296_v31 = vld [vmem:[#allocation5 + $0x6a8] sm:$0xf]  ;;  %v13941_v36 = vpop.f32.mrf.mxu1  ;;  %v13947_v54 = vpop.f32.mrf.mxu2  ;;  %v9809_v60 = vor.u32 %v12867_v44, %v9808_v42 }
 0x18a   :  { %v10320_v49 = vld [vmem:[#allocation5 + $0xea8] sm:$0xf]  ;;  %3741 = vmatmul.bf16.vlgmr.msrb.gmra.mxu1 %v13840_v0  ;;  %v9297_v58 = vor.u32 %v12739_v39, %v9296_v31  ;;  %v3504_v16 = vpop.f32.mrf.mxu0 }
 0x18b   :  { %3768 = vmatpush.bf16.msrb.mxu3 %v9997_v1  ;;  %3789 = vmatpush.bf16.msra.mxu1 %v9425_v3  ;;  %v12995_v50 = vld [vmem:[#allocation5 + $0xee4] sm:$0xf0]  ;;  %v14774_v3 = vperm.slane %v13930_v46, 5 }
 0x18c   :  { %3755 = vmatmul.bf16.vlgmr.msrb.gmra.mxu2 %v13834_v55  ;;  %v8720_v52 = vld [vmem:[#allocation5 + $0x228] sm:$0xf] }
 0x18d   :  { %3803 = vmatpush.bf16.msra.mxu2 %v9937_v4  ;;  %3776 = vmatpush.bf16.msra.mxu0 %v8849_v24  ;;  %v12595_v1 = vld [vmem:[#allocation5 + $0x264] sm:$0xf0]  ;;  %v10321_v4 = vor.u32 %v12995_v50, %v10320_v49 }
 0x18e   :  { %3769 = vmatmul.bf16.vlgmr.msrb.gmra.mxu3 %v13838_v62  ;;  %v9232_v2 = vld [vmem:[#allocation5 + $0x628] sm:$0xf]  ;;  %v8721_v15 = vor.u32 %v12595_v1, %v8720_v52 }
 0x18f   :  { %3817 = vmatpush.bf16.msra.mxu3 %v10449_v10  ;;  %3790 = vmatpush.bf16.msra.mxu1 %v9361_v25  ;;  %v12723_v6 = vld [vmem:[#allocation5 + $0x664] sm:$0xf0]  ;;  %v13950_v10 = vpop.f32.mrf.mxu3  ;;  %v3505_v25 = vadd.f32 %v3504_v16, %v14774_v3 }
 0x190   :  { %v9744_v7 = vld [vmem:[#allocation5 + $0xa28] sm:$0xf]  ;;  %v9233_v18 = vor.u32 %v12723_v6, %v9232_v2 }
 0x191   :  { %3804 = vmatpush.bf16.msra.mxu2 %v9873_v26  ;;  %v12851_v8 = vld [vmem:[#allocation5 + $0xa64] sm:$0xf0]  ;;  %3777 = vmatpush.bf16.msra.mxu0 %v8785_v51  ;;  %v3518_v44 = vpop.f32.mrf.mxu1  ;;  %v3532_v1 = vpop.f32.mrf.mxu2 }
 0x192   :  { %v10256_v11 = vld [vmem:[#allocation5 + $0xe28] sm:$0xf]  ;;  %v9745_v24 = vor.u32 %v12851_v8, %v9744_v7  ;;  %v3519_v51 = vadd.f32 %v3518_v44, %v3505_v25 }
 0x193   :  { %3818 = vmatpush.bf16.msra.mxu3 %v10385_v38  ;;  %v12979_v14 = vld [vmem:[#allocation5 + $0xe64] sm:$0xf0]  ;;  %3791 = vmatpush.bf16.msra.mxu1 %v9297_v58 }
 0x194   :  { %v8656_v26 = vld [vmem:[#allocation5 + $0x1a8] sm:$0xf]  ;;  %v10257_v31 = vor.u32 %v12979_v14, %v10256_v11  ;;  %v3533_v8 = vadd.f32 %v3532_v1, %v3519_v51 }
 0x195   :  { %3805 = vmatpush.bf16.msra.mxu2 %v9809_v60  ;;  %v12579_v27 = vld [vmem:[#allocation5 + $0x1e4] sm:$0xf0]  ;;  %3778 = vmatpush.bf16.msra.mxu0 %v8721_v15 }
 0x196   :  { %v9168_v30 = vld [vmem:[#allocation5 + $0x5a8] sm:$0xf]  ;;  %v8657_v52 = vor.u32 %v12579_v27, %v8656_v26 }
 0x197   :  { %3819 = vmatpush.bf16.msra.mxu3 %v10321_v4  ;;  %v12707_v38 = vld [vmem:[#allocation5 + $0x5e4] sm:$0xf0]  ;;  %3792 = vmatpush.bf16.msra.mxu1 %v9233_v18  ;;  %v3546_v63 = vpop.f32.mrf.mxu3 }
 0x198   :  { %v9680_v39 = vld [vmem:[#allocation5 + $0x9a8] sm:$0xf]  ;;  %v9169_v58 = vor.u32 %v12707_v38, %v9168_v30  ;;  %v13954_v25 = vadd.f32 %v3546_v63, %v3533_v8  ;;  %v8914_v8 = vld [vmem:[#allocation5 + $0x3e8] sm:$0xf0] }
 0x199   :  { %v12835_v42 = vld [vmem:[#allocation5 + $0x9e4] sm:$0xf0]  ;;  %3806 = vmatpush.bf16.msra.mxu2 %v9745_v24  ;;  %3779 = vmatpush.bf16.msra.mxu0 %v8657_v52 }
 0x19a   :  { %v10192_v49 = vld [vmem:[#allocation5 + $0xda8] sm:$0xf]  ;;  %v9681_v60 = vor.u32 %v12835_v42, %v9680_v39 }
 0x19b   :  { %v12963_v50 = vld [vmem:[#allocation5 + $0xde4] sm:$0xf0]  ;;  %3820 = vmatpush.bf16.msra.mxu3 %v10257_v31  ;;  %3793 = vmatpush.bf16.msra.mxu1 %v9169_v58 }
 0x19c   :  { %v8592_v2 = vld [vmem:[#allocation5 + $0x128] sm:$0xf]  ;;  %v10193_v4 = vor.u32 %v12963_v50, %v10192_v49 }
 0x19d   :  { %v12563_v6 = vld [vmem:[#allocation5 + $0x164] sm:$0xf0]  ;;  %3807 = vmatpush.bf16.msra.mxu2 %v9681_v60 }
 0x19e   :  { %v9104_v7 = vld [vmem:[#allocation5 + $0x528] sm:$0xf]  ;;  %v8593_v15 = vor.u32 %v12563_v6, %v8592_v2 }
 0x19f   :  { %v12691_v11 = vld [vmem:[#allocation5 + $0x564] sm:$0xf0]  ;;  %3821 = vmatpush.bf16.msra.mxu3 %v10193_v4  ;;  %v12635_v4 = vld [vmem:[#allocation5 + $0x3ac] sm:$0xf] }
 0x1a0   :  { %v9616_v14 = vld [vmem:[#allocation5 + $0x928] sm:$0xf]  ;;  %v9105_v18 = vor.u32 %v12691_v11, %v9104_v7  ;;  %3780 = vmatpush.bf16.msra.mxu0 %v8593_v15  ;;  %v12763_v11 = vld [vmem:[#allocation5 + $0x7ac] sm:$0xf] }
 0x1a1   :  { %v12819_v16 = vld [vmem:[#allocation5 + $0x964] sm:$0xf0]  ;;  %v12891_v15 = vld [vmem:[#allocation5 + $0xbac] sm:$0xf] }
 0x1a2   :  { %v10128_v3 = vld [vmem:[#allocation5 + $0xd28] sm:$0xf]  ;;  %v9617_v24 = vor.u32 %v12819_v16, %v9616_v14  ;;  %3794 = vmatpush.bf16.msra.mxu1 %v9105_v18  ;;  %v9426_v16 = vld [vmem:[#allocation5 + $0x7e8] sm:$0xf0] }
 0x1a3   :  { %v8528_v26 = vld [vmem:[#allocation5 + $0xa8] sm:$0xf]  ;;  %v10129_v31 = vor.u32 %v12947_v48, %v10128_v3 }
 0x1a4   :  { %v12547_v27 = vld [vmem:[#allocation5 + $0xe4] sm:$0xf0]  ;;  %3808 = vmatpush.bf16.msra.mxu2 %v9617_v24 }
 0x1a5   :  { %v9040_v30 = vld [vmem:[#allocation5 + $0x4a8] sm:$0xf]  ;;  %v8529_v50 = vor.u32 %v12547_v27, %v8528_v26  ;;  %3822 = vmatpush.bf16.msra.mxu3 %v10129_v31  ;;  %v9938_v26 = vld [vmem:[#allocation5 + $0xbe8] sm:$0xf0] }
 0x1a6   :  { %v12675_v38 = vld [vmem:[#allocation5 + $0x4e4] sm:$0xf0]  ;;  %v13019_v27 = vld [vmem:[#allocation5 + $0xfac] sm:$0xf] }
 0x1a7   :  { %v9552_v39 = vld [vmem:[#allocation5 + $0x8a8] sm:$0xf]  ;;  %v9041_v63 = vor.u32 %v12675_v38, %v9040_v30  ;;  %3781 = vmatpush.bf16.msra.mxu0 %v8529_v50  ;;  %v10450_v30 = vld [vmem:[#allocation5 + $0xfe8] sm:$0xf0]  ;;  %v8917_v38 = vor.u32 %v12635_v4, %v8914_v8 }
 0x1a8   :  { %v12803_v42 = vld [vmem:[#allocation5 + $0x8e4] sm:$0xf0]  ;;  %v10453_v50 = vor.u32 %v13019_v27, %v10450_v30  ;;  %v9298_v4 = vld [vmem:[#allocation5 + $0x6e8] sm:$0xf0] }
 0x1a9   :  { %v10064_v44 = vld [vmem:[#allocation5 + $0xca8] sm:$0xf]  ;;  %v9553_v58 = vor.u32 %v12803_v42, %v9552_v39  ;;  %3795 = vmatpush.bf16.msra.mxu1 %v9041_v63  ;;  %v9429_v39 = vor.u32 %v12763_v11, %v9426_v16  ;;  %v9941_v42 = vor.u32 %v12891_v15, %v9938_v26  ;;  %v13003_v63 = vld [vmem:[#allocation5 + $0xf2c] sm:$0xf] }
 0x1aa   :  { %v12931_v49 = vld [vmem:[#allocation5 + $0xce4] sm:$0xf0]  ;;  %v12859_v8 = vld [vmem:[#allocation5 + $0xaac] sm:$0xf] }
 0x1ab   :  { %v8464_v51 = vld [vmem:[#allocation5 + $0x28] sm:$0xf]  ;;  %v10065_v6 = vor.u32 %v12931_v49, %v10064_v44  ;;  %3809 = vmatpush.bf16.msra.mxu2 %v9553_v58  ;;  %v12619_v44 = vld [vmem:[#allocation5 + $0x32c] sm:$0xf] }
 0x1ac   :  { %v12531_v52 = vld [vmem:[#allocation5 + $0x64] sm:$0xf0]  ;;  %v8850_v49 = vld [vmem:[#allocation5 + $0x368] sm:$0xf0] }
 0x1ad   :  { %v8976_v60 = vld [vmem:[#allocation5 + $0x428] sm:$0xf]  ;;  %v8465_v14 = vor.u32 %v12531_v52, %v8464_v51  ;;  %3823 = vmatpush.bf16.msra.mxu3 %v10065_v6  ;;  %v9362_v51 = vld [vmem:[#allocation5 + $0x768] sm:$0xf0] }
 0x1ae   :  { %v12659_v1 = vld [vmem:[#allocation5 + $0x464] sm:$0xf0]  ;;  %v12875_v52 = vld [vmem:[#allocation5 + $0xb2c] sm:$0xf] }
 0x1af   :  { %v9488_v2 = vld [vmem:[#allocation5 + $0x828] sm:$0xf]  ;;  %v8977_v18 = vor.u32 %v12659_v1, %v8976_v60  ;;  %3782 = vmatpush.bf16.msra.mxu0 %v8465_v14  ;;  %v10386_v58 = vld [vmem:[#allocation5 + $0xf68] sm:$0xf0]  ;;  %v8853_v60 = vor.u32 %v12619_v44, %v8850_v49  ;;  %v9365_v1 = vor.u32 %v12747_v41, %v9362_v51 }
 0x1b0   :  { %v12787_v7 = vld [vmem:[#allocation5 + $0x864] sm:$0xf0]  ;;  %v12603_v6 = vld [vmem:[#allocation5 + $0x2ac] sm:$0xf] }
 0x1b1   :  { %v10000_v48 = vld [vmem:[#allocation5 + $0xc28] sm:$0xf]  ;;  %v9489_v24 = vor.u32 %v12787_v7, %v9488_v2  ;;  %3796 = vmatpush.bf16.msra.mxu1 %v8977_v18  ;;  %v9877_v2 = vor.u32 %v12875_v52, %v9874_v35  ;;  %v8786_v7 = vld [vmem:[#allocation5 + $0x2e8] sm:$0xf0] }
 0x1b2   :  { %v12915_v3 = vld [vmem:[#allocation5 + $0xc64] sm:$0xf0]  ;;  %v9810_v11 = vld [vmem:[#allocation5 + $0xae8] sm:$0xf0]  ;;  %3783 = vmatmul.bf16.vlgmr.msra.gmra.mxu0 %v13836_v61  ;;  %v8789_v35 = vor.u32 %v12603_v6, %v8786_v7 }
 0x1b3   :  { %v10001_v31 = vor.u32 %v12915_v3, %v10000_v48  ;;  %3810 = vmatpush.bf16.msra.mxu2 %v9489_v24  ;;  %3831 = vmatpush.bf16.msrb.mxu0 %v8917_v38  ;;  %v12731_v48 = vld [vmem:[#allocation5 + $0x6ac] sm:$0xf]  ;;  %v10389_v3 = vor.u32 %v13003_v63, %v10386_v58  ;;  %v9813_v15 = vor.u32 %v12859_v8, %v9810_v11 }
 0x1b4   :  { %v12987_v14 = vld [vmem:[#allocation5 + $0xeac] sm:$0xf]  ;;  %3797 = vmatmul.bf16.vlgmr.msra.gmra.mxu1 %v13840_v0  ;;  %v9301_v41 = vor.u32 %v12731_v48, %v9298_v4 }
 0x1b5   :  { %3824 = vmatpush.bf16.msra.mxu3 %v10001_v31  ;;  %3845 = vmatpush.bf16.msrb.mxu1 %v9429_v39  ;;  %v10322_v16 = vld [vmem:[#allocation5 + $0xee8] sm:$0xf0] }
 0x1b6   :  { %3811 = vmatmul.bf16.vlgmr.msra.gmra.mxu2 %v13834_v55  ;;  %v12587_v26 = vld [vmem:[#allocation5 + $0x22c] sm:$0xf]  ;;  %v10325_v27 = vor.u32 %v12987_v14, %v10322_v16 }
 0x1b7   :  { %3859 = vmatpush.bf16.msrb.mxu2 %v9941_v42  ;;  %3832 = vmatpush.bf16.msrb.mxu0 %v8853_v60  ;;  %v8722_v18 = vld [vmem:[#allocation5 + $0x268] sm:$0xf0] }
 0x1b8   :  { %3825 = vmatmul.bf16.vlgmr.msra.gmra.mxu3 %v13838_v62  ;;  %v12715_v24 = vld [vmem:[#allocation5 + $0x62c] sm:$0xf]  ;;  %v8725_v44 = vor.u32 %v12587_v26, %v8722_v18 }
 0x1b9   :  { %3873 = vmatpush.bf16.msrb.mxu3 %v10453_v50  ;;  %3846 = vmatpush.bf16.msrb.mxu1 %v9365_v1  ;;  %v9234_v30 = vld [vmem:[#allocation5 + $0x668] sm:$0xf0] }
 0x1ba   :  { %v12843_v31 = vld [vmem:[#allocation5 + $0xa2c] sm:$0xf]  ;;  %v9237_v49 = vor.u32 %v12715_v24, %v9234_v30 }
 0x1bb   :  { %3860 = vmatpush.bf16.msrb.mxu2 %v9877_v2  ;;  %v9746_v38 = vld [vmem:[#allocation5 + $0xa68] sm:$0xf0]  ;;  %3833 = vmatpush.bf16.msrb.mxu0 %v8789_v35 }
 0x1bc   :  { %v12971_v39 = vld [vmem:[#allocation5 + $0xe2c] sm:$0xf]  ;;  %v9749_v50 = vor.u32 %v12843_v31, %v9746_v38 }
 0x1bd   :  { %3874 = vmatpush.bf16.msrb.mxu3 %v10389_v3  ;;  %v10258_v42 = vld [vmem:[#allocation5 + $0xe68] sm:$0xf0]  ;;  %3847 = vmatpush.bf16.msrb.mxu1 %v9301_v41 }
 0x1be   :  { %v12571_v51 = vld [vmem:[#allocation5 + $0x1ac] sm:$0xf]  ;;  %v10261_v58 = vor.u32 %v12971_v39, %v10258_v42 }
 0x1bf   :  { %3861 = vmatpush.bf16.msrb.mxu2 %v9813_v15  ;;  %v8658_v52 = vld [vmem:[#allocation5 + $0x1e8] sm:$0xf0]  ;;  %3834 = vmatpush.bf16.msrb.mxu0 %v8725_v44 }
 0x1c0   :  { %v12699_v63 = vld [vmem:[#allocation5 + $0x5ac] sm:$0xf]  ;;  %v8661_v48 = vor.u32 %v12571_v51, %v8658_v52 }
 0x1c1   :  { %3875 = vmatpush.bf16.msrb.mxu3 %v10325_v27  ;;  %v9170_v60 = vld [vmem:[#allocation5 + $0x5e8] sm:$0xf0]  ;;  %3848 = vmatpush.bf16.msrb.mxu1 %v9237_v49 }
 0x1c2   :  { %v12827_v1 = vld [vmem:[#allocation5 + $0x9ac] sm:$0xf]  ;;  %v9173_v3 = vor.u32 %v12699_v63, %v9170_v60 }
 0x1c3   :  { %v9682_v2 = vld [vmem:[#allocation5 + $0x9e8] sm:$0xf0]  ;;  %3862 = vmatpush.bf16.msrb.mxu2 %v9749_v50  ;;  %3835 = vmatpush.bf16.msrb.mxu0 %v8661_v48 }
 0x1c4   :  { %v12955_v6 = vld [vmem:[#allocation5 + $0xdac] sm:$0xf]  ;;  %v9685_v4 = vor.u32 %v12827_v1, %v9682_v2 }
 0x1c5   :  { %v10194_v7 = vld [vmem:[#allocation5 + $0xde8] sm:$0xf0]  ;;  %3876 = vmatpush.bf16.msrb.mxu3 %v10261_v58  ;;  %3849 = vmatpush.bf16.msrb.mxu1 %v9173_v3 }
 0x1c6   :  { %v12555_v8 = vld [vmem:[#allocation5 + $0x12c] sm:$0xf]  ;;  %v10197_v16 = vor.u32 %v12955_v6, %v10194_v7 }
 0x1c7   :  { %v8594_v11 = vld [vmem:[#allocation5 + $0x168] sm:$0xf0]  ;;  %3863 = vmatpush.bf16.msrb.mxu2 %v9685_v4 }
 0x1c8   :  { %v12683_v14 = vld [vmem:[#allocation5 + $0x52c] sm:$0xf]  ;;  %v8597_v24 = vor.u32 %v12555_v8, %v8594_v11 }
 0x1c9   :  { %v9106_v35 = vld [vmem:[#allocation5 + $0x568] sm:$0xf0]  ;;  %3877 = vmatpush.bf16.msrb.mxu3 %v10197_v16  ;;  %v12644_v16 = vld [vmem:[#allocation5 + $0x3ec] sm:$0xf0] }
 0x1ca   :  { %v12811_v41 = vld [vmem:[#allocation5 + $0x92c] sm:$0xf]  ;;  %v9109_v27 = vor.u32 %v12683_v14, %v9106_v35  ;;  %3836 = vmatpush.bf16.msrb.mxu0 %v8597_v24  ;;  %v8920_v14 = vld [vmem:[#allocation5 + $0x3b0] sm:$0xf] }
 0x1cb   :  { %v9618_v15 = vld [vmem:[#allocation5 + $0x968] sm:$0xf0]  ;;  %v9432_v35 = vld [vmem:[#allocation5 + $0x7b0] sm:$0xf] }
 0x1cc   :  { %v12939_v26 = vld [vmem:[#allocation5 + $0xd2c] sm:$0xf]  ;;  %v9621_v30 = vor.u32 %v12811_v41, %v9618_v15  ;;  %3850 = vmatpush.bf16.msrb.mxu1 %v9109_v27  ;;  %v12772_v15 = vld [vmem:[#allocation5 + $0x7ec] sm:$0xf0] }
 0x1cd   :  { %v10130_v18 = vld [vmem:[#allocation5 + $0xd68] sm:$0xf0] }
 0x1ce   :  { %v12539_v31 = vld [vmem:[#allocation5 + $0xac] sm:$0xf]  ;;  %v10133_v42 = vor.u32 %v12939_v26, %v10130_v18  ;;  %3864 = vmatpush.bf16.msrb.mxu2 %v9621_v30  ;;  %v9944_v26 = vld [vmem:[#allocation5 + $0xbb0] sm:$0xf] }
 0x1cf   :  { %v8530_v38 = vld [vmem:[#allocation5 + $0xe8] sm:$0xf0]  ;;  %v12900_v18 = vld [vmem:[#allocation5 + $0xbec] sm:$0xf0] }
 0x1d0   :  { %v12667_v39 = vld [vmem:[#allocation5 + $0x4ac] sm:$0xf]  ;;  %v8533_v63 = vor.u32 %v12539_v31, %v8530_v38  ;;  %3878 = vmatpush.bf16.msrb.mxu3 %v10133_v42  ;;  %v10456_v30 = vld [vmem:[#allocation5 + $0xfb0] sm:$0xf]  ;;  %v9433_v42 = vor.u32 %v12772_v15, %v9432_v35 }
 0x1d1   :  { %v9042_v44 = vld [vmem:[#allocation5 + $0x4e8] sm:$0xf0]  ;;  %v13028_v31 = vld [vmem:[#allocation5 + $0xfec] sm:$0xf0] }
 0x1d2   :  { %v12795_v49 = vld [vmem:[#allocation5 + $0x8ac] sm:$0xf]  ;;  %v9045_v1 = vor.u32 %v12667_v39, %v9042_v44  ;;  %3837 = vmatpush.bf16.msrb.mxu0 %v8533_v63  ;;  %v8921_v39 = vor.u32 %v12644_v16, %v8920_v14  ;;  %v9945_v44 = vor.u32 %v12900_v18, %v9944_v26  ;;  %v12756_v63 = vld [vmem:[#allocation5 + $0x76c] sm:$0xf0] }
 0x1d3   :  { %v9554_v50 = vld [vmem:[#allocation5 + $0x8e8] sm:$0xf0]  ;;  %v12740_v14 = vld [vmem:[#allocation5 + $0x6ec] sm:$0xf0] }
 0x1d4   :  { %v12923_v51 = vld [vmem:[#allocation5 + $0xcac] sm:$0xf]  ;;  %v9557_v2 = vor.u32 %v12795_v49, %v9554_v50  ;;  %3851 = vmatpush.bf16.msrb.mxu1 %v9045_v1  ;;  %v8856_v49 = vld [vmem:[#allocation5 + $0x330] sm:$0xf] }
 0x1d5   :  { %v10066_v52 = vld [vmem:[#allocation5 + $0xce8] sm:$0xf0]  ;;  %v12628_v50 = vld [vmem:[#allocation5 + $0x36c] sm:$0xf0] }
 0x1d6   :  { %v12523_v58 = vld [vmem:[#allocation5 + $0x2c] sm:$0xf]  ;;  %v10069_v3 = vor.u32 %v12923_v51, %v10066_v52  ;;  %3865 = vmatpush.bf16.msrb.mxu2 %v9557_v2  ;;  %v9368_v51 = vld [vmem:[#allocation5 + $0x730] sm:$0xf]  ;;  %v10457_v52 = vor.u32 %v13028_v31, %v10456_v30 }
 0x1d7   :  { %v8466_v60 = vld [vmem:[#allocation5 + $0x68] sm:$0xf0]  ;;  %v10392_v1 = vld [vmem:[#allocation5 + $0xf30] sm:$0xf] }
 0x1d8   :  { %v12651_v6 = vld [vmem:[#allocation5 + $0x42c] sm:$0xf]  ;;  %v8469_v41 = vor.u32 %v12523_v58, %v8466_v60  ;;  %3879 = vmatpush.bf16.msrb.mxu3 %v10069_v3  ;;  %v9880_v58 = vld [vmem:[#allocation5 + $0xb30] sm:$0xf] }
 0x1d9   :  { %v8978_v7 = vld [vmem:[#allocation5 + $0x468] sm:$0xf0]  ;;  %v12884_v60 = vld [vmem:[#allocation5 + $0xb6c] sm:$0xf0] }
 0x1da   :  { %v12779_v48 = vld [vmem:[#allocation5 + $0x82c] sm:$0xf]  ;;  %v8981_v24 = vor.u32 %v12651_v6, %v8978_v7  ;;  %3838 = vmatpush.bf16.msrb.mxu0 %v8469_v41  ;;  %v13012_v2 = vld [vmem:[#allocation5 + $0xf6c] sm:$0xf0]  ;;  %v8857_v6 = vor.u32 %v12628_v50, %v8856_v49  ;;  %v9369_v7 = vor.u32 %v12756_v63, %v9368_v51 }
 0x1db   :  { %v9490_v4 = vld [vmem:[#allocation5 + $0x868] sm:$0xf0]  ;;  %v8792_v3 = vld [vmem:[#allocation5 + $0x2b0] sm:$0xf] }
 0x1dc   :  { %v12907_v8 = vld [vmem:[#allocation5 + $0xc2c] sm:$0xf]  ;;  %v9493_v27 = vor.u32 %v12779_v48, %v9490_v4  ;;  %3852 = vmatpush.bf16.msrb.mxu1 %v8981_v24  ;;  %v9881_v48 = vor.u32 %v12884_v60, %v9880_v58  ;;  %v12612_v4 = vld [vmem:[#allocation5 + $0x2ec] sm:$0xf0] }
 0x1dd   :  { %v10002_v11 = vld [vmem:[#allocation5 + $0xc68] sm:$0xf0]  ;;  %v9816_v16 = vld [vmem:[#allocation5 + $0xab0] sm:$0xf]  ;;  %3839 = vmatmul.bf16.vlgmr.msrb.gmra.mxu0 %v13836_v61  ;;  %v8793_v26 = vor.u32 %v12612_v4, %v8792_v3 }
 0x1de   :  { %v10005_v38 = vor.u32 %v12907_v8, %v10002_v11  ;;  %3866 = vmatpush.bf16.msrb.mxu2 %v9493_v27  ;;  %3887 = vmatpush.bf16.msra.mxu0 %v8921_v39  ;;  %v9304_v8 = vld [vmem:[#allocation5 + $0x6b0] sm:$0xf]  ;;  %v10393_v11 = vor.u32 %v13012_v2, %v10392_v1 }
 0x1df   :  { %v12868_v35 = vld [vmem:[#allocation5 + $0xaec] sm:$0xf0]  ;;  %3853 = vmatmul.bf16.vlgmr.msrb.gmra.mxu1 %v13840_v0  ;;  %v9305_v18 = vor.u32 %v12740_v14, %v9304_v8 }
 0x1e0   :  { %3880 = vmatpush.bf16.msrb.mxu3 %v10005_v38  ;;  %3901 = vmatpush.bf16.msra.mxu1 %v9433_v42  ;;  %v10328_v41 = vld [vmem:[#allocation5 + $0xeb0] sm:$0xf]  ;;  %v9817_v24 = vor.u32 %v12868_v35, %v9816_v16 }
 0x1e1   :  { %3867 = vmatmul.bf16.vlgmr.msrb.gmra.mxu2 %v13834_v55  ;;  %v12996_v15 = vld [vmem:[#allocation5 + $0xeec] sm:$0xf0] }
 0x1e2   :  { %3915 = vmatpush.bf16.msra.mxu2 %v9945_v44  ;;  %3888 = vmatpush.bf16.msra.mxu0 %v8857_v6  ;;  %v8728_v27 = vld [vmem:[#allocation5 + $0x230] sm:$0xf]  ;;  %v10329_v38 = vor.u32 %v12996_v15, %v10328_v41 }
 0x1e3   :  { %3881 = vmatmul.bf16.vlgmr.msrb.gmra.mxu3 %v13838_v62  ;;  %v12596_v30 = vld [vmem:[#allocation5 + $0x26c] sm:$0xf0] }
 0x1e4   :  { %3929 = vmatpush.bf16.msra.mxu3 %v10457_v52  ;;  %3902 = vmatpush.bf16.msra.mxu1 %v9369_v7  ;;  %v9240_v31 = vld [vmem:[#allocation5 + $0x630] sm:$0xf]  ;;  %v8729_v51 = vor.u32 %v12596_v30, %v8728_v27 }
 0x1e5   :  { %v12724_v39 = vld [vmem:[#allocation5 + $0x66c] sm:$0xf0] }
 0x1e6   :  { %3916 = vmatpush.bf16.msra.mxu2 %v9881_v48  ;;  %v9752_v42 = vld [vmem:[#allocation5 + $0xa30] sm:$0xf]  ;;  %3889 = vmatpush.bf16.msra.mxu0 %v8793_v26  ;;  %v9241_v52 = vor.u32 %v12724_v39, %v9240_v31 }
 0x1e7   :  { %v12852_v44 = vld [vmem:[#allocation5 + $0xa6c] sm:$0xf0] }
 0x1e8   :  { %3930 = vmatpush.bf16.msra.mxu3 %v10393_v11  ;;  %v10264_v49 = vld [vmem:[#allocation5 + $0xe30] sm:$0xf]  ;;  %3903 = vmatpush.bf16.msra.mxu1 %v9305_v18  ;;  %v9753_v63 = vor.u32 %v12852_v44, %v9752_v42 }
 0x1e9   :  { %v12980_v50 = vld [vmem:[#allocation5 + $0xe6c] sm:$0xf0] }
 0x1ea   :  { %3917 = vmatpush.bf16.msra.mxu2 %v9817_v24  ;;  %v8664_v58 = vld [vmem:[#allocation5 + $0x1b0] sm:$0xf]  ;;  %v10265_v2 = vor.u32 %v12980_v50, %v10264_v49  ;;  %3890 = vmatpush.bf16.msra.mxu0 %v8729_v51 }
 0x1eb   :  { %v12580_v60 = vld [vmem:[#allocation5 + $0x1ec] sm:$0xf0] }
 0x1ec   :  { %v9176_v1 = vld [vmem:[#allocation5 + $0x5b0] sm:$0xf]  ;;  %3931 = vmatpush.bf16.msra.mxu3 %v10329_v38  ;;  %v8665_v8 = vor.u32 %v12580_v60, %v8664_v58  ;;  %3904 = vmatpush.bf16.msra.mxu1 %v9241_v52 }
 0x1ed   :  { %v12708_v6 = vld [vmem:[#allocation5 + $0x5ec] sm:$0xf0] }
 0x1ee   :  { %v9688_v7 = vld [vmem:[#allocation5 + $0x9b0] sm:$0xf]  ;;  %3918 = vmatpush.bf16.msra.mxu2 %v9753_v63  ;;  %v9177_v11 = vor.u32 %v12708_v6, %v9176_v1  ;;  %3891 = vmatpush.bf16.msra.mxu0 %v8665_v8 }
 0x1ef   :  { %v12836_v48 = vld [vmem:[#allocation5 + $0x9ec] sm:$0xf0] }
 0x1f0   :  { %v10200_v3 = vld [vmem:[#allocation5 + $0xdb0] sm:$0xf]  ;;  %v9689_v14 = vor.u32 %v12836_v48, %v9688_v7  ;;  %3932 = vmatpush.bf16.msra.mxu3 %v10265_v2  ;;  %3905 = vmatpush.bf16.msra.mxu1 %v9177_v11  ;;  %v3227_v7 = vadd.f32 %v13869_v12, %v623_v43  ;;  %v9946_v43 = vld [vmem:[#allocation5 + $0xbf0] sm:$0xf0] }
 0x1f1   :  { %v12964_v4 = vld [vmem:[#allocation5 + $0xdec] sm:$0xf0] }
 0x1f2   :  { %v8600_v16 = vld [vmem:[#allocation5 + $0x130] sm:$0xf]  ;;  %v10201_v15 = vor.u32 %v12964_v4, %v10200_v3  ;;  %3919 = vmatpush.bf16.msra.mxu2 %v9689_v14  ;;  %v3241_v12 = vadd.f32 %v13871_v19, %v3227_v7  ;;  %v9882_v7 = vld [vmem:[#allocation5 + $0xb70] sm:$0xf0] }
 0x1f3   :  { %v12564_v35 = vld [vmem:[#allocation5 + $0x16c] sm:$0xf0] }
 0x1f4   :  { %v9112_v41 = vld [vmem:[#allocation5 + $0x530] sm:$0xf]  ;;  %v8601_v31 = vor.u32 %v12564_v35, %v8600_v16  ;;  %3933 = vmatpush.bf16.msra.mxu3 %v10201_v15  ;;  %v12636_v15 = vld [vmem:[#allocation5 + $0x3b4] sm:$0xf] }
 0x1f5   :  { %v12692_v26 = vld [vmem:[#allocation5 + $0x56c] sm:$0xf0] }
 0x1f6   :  { %v9624_v18 = vld [vmem:[#allocation5 + $0x930] sm:$0xf]  ;;  %v9113_v38 = vor.u32 %v12692_v26, %v9112_v41  ;;  %3892 = vmatpush.bf16.msra.mxu0 %v8601_v31  ;;  %v8922_v26 = vld [vmem:[#allocation5 + $0x3f0] sm:$0xf0] }
 0x1f7   :  { %v12820_v24 = vld [vmem:[#allocation5 + $0x96c] sm:$0xf0] }
 0x1f8   :  { %v10136_v27 = vld [vmem:[#allocation5 + $0xd30] sm:$0xf]  ;;  %v9625_v39 = vor.u32 %v12820_v24, %v9624_v18  ;;  %3906 = vmatpush.bf16.msra.mxu1 %v9113_v38  ;;  %v12764_v18 = vld [vmem:[#allocation5 + $0x7b4] sm:$0xf] }
 0x1f9   :  { %v12948_v30 = vld [vmem:[#allocation5 + $0xd6c] sm:$0xf0] }
 0x1fa   :  { %v8536_v42 = vld [vmem:[#allocation5 + $0xb0] sm:$0xf]  ;;  %v10137_v50 = vor.u32 %v12948_v30, %v10136_v27  ;;  %3920 = vmatpush.bf16.msra.mxu2 %v9625_v39  ;;  %v9434_v27 = vld [vmem:[#allocation5 + $0x7f0] sm:$0xf0] }
 0x1fb   :  { %v12548_v44 = vld [vmem:[#allocation5 + $0xec] sm:$0xf0]  ;;  %v12892_v30 = vld [vmem:[#allocation5 + $0xbb4] sm:$0xf] }
 0x1fc   :  { %v9048_v49 = vld [vmem:[#allocation5 + $0x4b0] sm:$0xf]  ;;  %v8537_v1 = vor.u32 %v12548_v44, %v8536_v42  ;;  %3934 = vmatpush.bf16.msra.mxu3 %v10137_v50  ;;  %v13020_v39 = vld [vmem:[#allocation5 + $0xfb4] sm:$0xf]  ;;  %v14780_v44 = vperm.slane %v13859_v34, 1 }
 0x1fd   :  { %v12676_v51 = vld [vmem:[#allocation5 + $0x4ec] sm:$0xf0]  ;;  %v10458_v42 = vld [vmem:[#allocation5 + $0xff0] sm:$0xf0] }
 0x1fe   :  { %v9560_v52 = vld [vmem:[#allocation5 + $0x8b0] sm:$0xf]  ;;  %v9049_v48 = vor.u32 %v12676_v51, %v9048_v49  ;;  %3893 = vmatpush.bf16.msra.mxu0 %v8537_v1  ;;  %v3283_v49 = vadd.f32 %v13886_v13, %v14780_v44  ;;  %v8925_v51 = vor.u32 %v12636_v15, %v8922_v26  ;;  %v12748_v1 = vld [vmem:[#allocation5 + $0x734] sm:$0xf]  ;;  %v10461_v19 = vor.u32 %v13020_v39, %v10458_v42 }
 0x1ff   :  { %v12804_v63 = vld [vmem:[#allocation5 + $0x8ec] sm:$0xf0]  ;;  %v8794_v15 = vld [vmem:[#allocation5 + $0x2f0] sm:$0xf0] }
 0x200   :  { %v10072_v58 = vld [vmem:[#allocation5 + $0xcb0] sm:$0xf]  ;;  %v9561_v3 = vor.u32 %v12804_v63, %v9560_v52  ;;  %3907 = vmatpush.bf16.msra.mxu1 %v9049_v48  ;;  %v9437_v52 = vor.u32 %v12764_v18, %v9434_v27  ;;  %v9949_v63 = vor.u32 %v12892_v30, %v9946_v43  ;;  %v3255_v48 = vadd.f32 %v13877_v29, %v3241_v12  ;;  %v12732_v29 = vld [vmem:[#allocation5 + $0x6b4] sm:$0xf] }
 0x201   :  { %v12932_v60 = vld [vmem:[#allocation5 + $0xcec] sm:$0xf0]  ;;  %v3297_v13 = vadd.f32 %v13888_v23, %v3283_v49  ;;  %v9306_v18 = vld [vmem:[#allocation5 + $0x6f0] sm:$0xf0]  ;;  %v4143_v27 = vmul.f32 0.044715, %v13867_v22 }
 0x202   :  { %v8472_v2 = vld [vmem:[#allocation5 + $0x30] sm:$0xf]  ;;  %v10073_v14 = vor.u32 %v12932_v60, %v10072_v58  ;;  %3921 = vmatpush.bf16.msra.mxu2 %v9561_v3  ;;  %v12620_v58 = vld [vmem:[#allocation5 + $0x334] sm:$0xf]  ;;  %v9309_v39 = vor.u32 %v12732_v29, %v9306_v18  ;;  %v13999_v18 = vpop.f32.mrf.mxu0 }
 0x203   :  { %v12532_v6 = vld [vmem:[#allocation5 + $0x6c] sm:$0xf0]  ;;  %v8858_v60 = vld [vmem:[#allocation5 + $0x370] sm:$0xf0]  ;;  %v3311_v12 = vadd.f32 %v13894_v33, %v3297_v13  ;;  %v4175_v33 = vmul.f32 %v4143_v27, %v13867_v22 }
 0x204   :  { %v8984_v4 = vld [vmem:[#allocation5 + $0x430] sm:$0xf]  ;;  %v8473_v24 = vor.u32 %v12532_v6, %v8472_v2  ;;  %3935 = vmatpush.bf16.msra.mxu3 %v10073_v14  ;;  %v9370_v2 = vld [vmem:[#allocation5 + $0x770] sm:$0xf0]  ;;  %v8861_v14 = vor.u32 %v12620_v58, %v8858_v60 }
 0x205   :  { %v12660_v8 = vld [vmem:[#allocation5 + $0x46c] sm:$0xf0]  ;;  %v12876_v6 = vld [vmem:[#allocation5 + $0xb34] sm:$0xf] }
 0x206   :  { %v9496_v11 = vld [vmem:[#allocation5 + $0x830] sm:$0xf]  ;;  %v8985_v31 = vor.u32 %v12660_v8, %v8984_v4  ;;  %3894 = vmatpush.bf16.msra.mxu0 %v8473_v24  ;;  %v13004_v3 = vld [vmem:[#allocation5 + $0xf34] sm:$0xf]  ;;  %v14781_v8 = vperm.slane %v13859_v34, 2 }
 0x207   :  { %v12788_v16 = vld [vmem:[#allocation5 + $0x86c] sm:$0xf0]  ;;  %v10394_v4 = vld [vmem:[#allocation5 + $0xf70] sm:$0xf0] }
 0x208   :  { %v10008_v35 = vld [vmem:[#allocation5 + $0xc30] sm:$0xf]  ;;  %v9497_v38 = vor.u32 %v12788_v16, %v9496_v11  ;;  %3908 = vmatpush.bf16.msra.mxu1 %v8985_v31  ;;  %v3339_v11 = vadd.f32 %v13903_v32, %v14781_v8  ;;  %v9373_v16 = vor.u32 %v12748_v1, %v9370_v2  ;;  %v10397_v26 = vor.u32 %v13004_v3, %v10394_v4  ;;  %v12860_v23 = vld [vmem:[#allocation5 + $0xab4] sm:$0xf] }
 0x209   :  { %v12916_v41 = vld [vmem:[#allocation5 + $0xc6c] sm:$0xf0]  ;;  %v9818_v24 = vld [vmem:[#allocation5 + $0xaf0] sm:$0xf0]  ;;  %v13979_v32 = vadd.f32 %v13880_v40, %v3255_v48  ;;  %3895 = vmatmul.bf16.vlgmr.msra.gmra.mxu0 %v13836_v61  ;;  %v13989_v1 = vadd.f32 %v13897_v47, %v3311_v12  ;;  %v4144_v47 = vmul.f32 0.044715, %v13884_v17 }
 0x20a   :  { %v10009_v50 = vor.u32 %v12916_v41, %v10008_v35  ;;  %3922 = vmatpush.bf16.msra.mxu2 %v9497_v38  ;;  %3943 = vmatpush.bf16.msrb.mxu0 %v8925_v51  ;;  %v9885_v35 = vor.u32 %v12876_v6, %v9882_v7  ;;  %v12604_v41 = vld [vmem:[#allocation5 + $0x2b4] sm:$0xf]  ;;  %v3353_v31 = vadd.f32 %v13905_v45, %v3339_v11  ;;  %v14782_v12 = vperm.slane %v13859_v34, 3 }
 0x20b   :  { %v12988_v30 = vld [vmem:[#allocation5 + $0xeb4] sm:$0xf]  ;;  %3909 = vmatmul.bf16.vlgmr.msra.gmra.mxu1 %v13840_v0  ;;  %v8797_v38 = vor.u32 %v12604_v41, %v8794_v15  ;;  %v9821_v42 = vor.u32 %v12860_v23, %v9818_v24  ;;  %v4159_v60 = vmul.f32 0.044715, %v13979_v32  ;;  %v4160_v41 = vmul.f32 0.044715, %v13989_v1 }
 0x20c   :  { %3936 = vmatpush.bf16.msra.mxu3 %v10009_v50  ;;  %3957 = vmatpush.bf16.msrb.mxu1 %v9437_v52  ;;  %v10330_v43 = vld [vmem:[#allocation5 + $0xef0] sm:$0xf0]  ;;  %v4145_v34 = vmul.f32 0.044715, %v13901_v28 }
 0x20d   :  { %3923 = vmatmul.bf16.vlgmr.msra.gmra.mxu2 %v13834_v55  ;;  %v12588_v40 = vld [vmem:[#allocation5 + $0x234] sm:$0xf]  ;;  %v10333_v50 = vor.u32 %v12988_v30, %v10330_v43 }
 0x20e   :  { %3971 = vmatpush.bf16.msrb.mxu2 %v9949_v63  ;;  %3944 = vmatpush.bf16.msrb.mxu0 %v8861_v14  ;;  %v8730_v44 = vld [vmem:[#allocation5 + $0x270] sm:$0xf0] }
 0x20f   :  { %3937 = vmatmul.bf16.vlgmr.msra.gmra.mxu3 %v13838_v62  ;;  %v12716_v49 = vld [vmem:[#allocation5 + $0x634] sm:$0xf]  ;;  %v8733_v2 = vor.u32 %v12588_v40, %v8730_v44  ;;  %v14005_v40 = vmul.f32 0.5, %v13867_v22 }
 0x210   :  { %3985 = vmatpush.bf16.msrb.mxu3 %v10461_v19  ;;  %3958 = vmatpush.bf16.msrb.mxu1 %v9373_v16  ;;  %v9242_v51 = vld [vmem:[#allocation5 + $0x670] sm:$0xf0]  ;;  %v3367_v19 = vadd.f32 %v13911_v56, %v3353_v31  ;;  %v4207_v16 = vmul.f32 %v4175_v33, %v13867_v22  ;;  %v3395_v31 = vadd.f32 %v13920_v9, %v14782_v12 }
 0x211   :  { %v12844_v52 = vld [vmem:[#allocation5 + $0xa34] sm:$0xf]  ;;  %v9245_v6 = vor.u32 %v12716_v49, %v9242_v51  ;;  %v4176_v49 = vmul.f32 %v4144_v47, %v13884_v17  ;;  %v4177_v47 = vmul.f32 %v4145_v34, %v13901_v28 }
 0x212   :  { %3972 = vmatpush.bf16.msrb.mxu2 %v9885_v35  ;;  %v9754_v63 = vld [vmem:[#allocation5 + $0xa70] sm:$0xf0]  ;;  %3945 = vmatpush.bf16.msrb.mxu0 %v8797_v38  ;;  %v13996_v15 = vadd.f32 %v13914_v5, %v3367_v19  ;;  %v4239_v44 = vadd.f32 %v4207_v16, %v13867_v22 }
 0x213   :  { %v12972_v58 = vld [vmem:[#allocation5 + $0xe34] sm:$0xf]  ;;  %v9757_v7 = vor.u32 %v12844_v52, %v9754_v63  ;;  %v4192_v52 = vmul.f32 %v4160_v41, %v13989_v1 }
 0x214   :  { %3986 = vmatpush.bf16.msrb.mxu3 %v10397_v26  ;;  %v10266_v45 = vld [vmem:[#allocation5 + $0xe70] sm:$0xf0]  ;;  %3959 = vmatpush.bf16.msrb.mxu1 %v9309_v39  ;;  %v4191_v26 = vmul.f32 %v4159_v60, %v13979_v32  ;;  %v4161_v9 = vmul.f32 0.044715, %v13996_v15 }
 0x215   :  { %v12572_v48 = vld [vmem:[#allocation5 + $0x1b4] sm:$0xf]  ;;  %v10269_v13 = vor.u32 %v12972_v58, %v10266_v45  ;;  %v14013_v58 = vpop.f32.mrf.mxu1  ;;  %v4224_v16 = vmul.f32 %v4192_v52, %v13989_v1 }
 0x216   :  { %3973 = vmatpush.bf16.msrb.mxu2 %v9821_v42  ;;  %v8666_v3 = vld [vmem:[#allocation5 + $0x1f0] sm:$0xf0]  ;;  %3946 = vmatpush.bf16.msrb.mxu0 %v8733_v2  ;;  %v4223_v33 = vmul.f32 %v4191_v26, %v13979_v32  ;;  %v14021_v26 = vpop.f32.mrf.mxu2 }
 0x217   :  { %v12700_v4 = vld [vmem:[#allocation5 + $0x5b4] sm:$0xf]  ;;  %v8669_v29 = vor.u32 %v12572_v48, %v8666_v3  ;;  %v4256_v34 = vadd.f32 %v4224_v16, %v13989_v1 }
 0x218   :  { %3987 = vmatpush.bf16.msrb.mxu3 %v10333_v50  ;;  %v9178_v8 = vld [vmem:[#allocation5 + $0x5f0] sm:$0xf0]  ;;  %3960 = vmatpush.bf16.msrb.mxu1 %v9245_v6  ;;  %v3409_v6 = vadd.f32 %v13922_v20, %v3395_v31  ;;  %v4193_v31 = vmul.f32 %v4161_v9, %v13996_v15  ;;  %v9952_v9 = vld [vmem:[#allocation5 + $0xbb8] sm:$0xf] }
 0x219   :  { %v12828_v11 = vld [vmem:[#allocation5 + $0x9b4] sm:$0xf]  ;;  %v9181_v23 = vor.u32 %v12700_v4, %v9178_v8  ;;  %v4208_v8 = vmul.f32 %v4176_v49, %v13884_v17  ;;  %v8928_v49 = vld [vmem:[#allocation5 + $0x3b8] sm:$0xf] }
 0x21a   :  { %v9690_v14 = vld [vmem:[#allocation5 + $0x9f0] sm:$0xf0]  ;;  %3974 = vmatpush.bf16.msrb.mxu2 %v9757_v7  ;;  %3947 = vmatpush.bf16.msrb.mxu0 %v8669_v29  ;;  %v4255_v29 = vadd.f32 %v4223_v33, %v13979_v32 }
 0x21b   :  { %v12956_v35 = vld [vmem:[#allocation5 + $0xdb4] sm:$0xf]  ;;  %v9693_v24 = vor.u32 %v12828_v11, %v9690_v14  ;;  %v4240_v52 = vadd.f32 %v4208_v8, %v13884_v17 }
 0x21c   :  { %v10202_v56 = vld [vmem:[#allocation5 + $0xdf0] sm:$0xf0]  ;;  %3988 = vmatpush.bf16.msrb.mxu3 %v10269_v13  ;;  %3961 = vmatpush.bf16.msrb.mxu1 %v9181_v23  ;;  %v4271_v13 = vmul.f32 0.7978846, %v4239_v44  ;;  %v14023_v23 = vpop.f32.mrf.mxu0 }
 0x21d   :  { %v12556_v27 = vld [vmem:[#allocation5 + $0x134] sm:$0xf]  ;;  %v10205_v5 = vor.u32 %v12956_v35, %v10202_v56  ;;  %v4146_v35 = vmul.f32 0.044715, %v13918_v59 }
 0x21e   :  { %v8602_v30 = vld [vmem:[#allocation5 + $0x170] sm:$0xf0]  ;;  %3975 = vmatpush.bf16.msrb.mxu2 %v9693_v24  ;;  %13554 = vtanh.f32 %v4271_v13 }
 0x21f   :  { %v12684_v43 = vld [vmem:[#allocation5 + $0x534] sm:$0xf]  ;;  %v8605_v63 = vor.u32 %v12556_v27, %v8602_v30 }
 0x220   :  { %v9114_v38 = vld [vmem:[#allocation5 + $0x570] sm:$0xf0]  ;;  %3989 = vmatpush.bf16.msrb.mxu3 %v10205_v5  ;;  %v3423_v5 = vadd.f32 %v13928_v37, %v3409_v6  ;;  %v4287_v37 = vmul.f32 0.7978846, %v4255_v29  ;;  %v12757_v29 = vld [vmem:[#allocation5 + $0x774] sm:$0xf0] }
 0x221   :  { %v12812_v39 = vld [vmem:[#allocation5 + $0x934] sm:$0xf]  ;;  %v9117_v45 = vor.u32 %v12684_v43, %v9114_v38  ;;  %3948 = vmatpush.bf16.msrb.mxu0 %v8605_v63  ;;  %v4209_v63 = vmul.f32 %v4177_v47, %v13901_v28 }
 0x222   :  { %v9626_v42 = vld [vmem:[#allocation5 + $0x970] sm:$0xf0]  ;;  %v14037_v8 = vadd.f32 %v13933_v53, %v3423_v5  ;;  %13556 = vtanh.f32 %v4287_v37  ;;  %v13013_v5 = vld [vmem:[#allocation5 + $0xf74] sm:$0xf0] }
 0x223   :  { %v12940_v50 = vld [vmem:[#allocation5 + $0xd34] sm:$0xf]  ;;  %v9629_v22 = vor.u32 %v12812_v39, %v9626_v42  ;;  %3962 = vmatpush.bf16.msrb.mxu1 %v9117_v45  ;;  %v12773_v45 = vld [vmem:[#allocation5 + $0x7f4] sm:$0xf0] }
 0x224   :  { %v10138_v51 = vld [vmem:[#allocation5 + $0xd70] sm:$0xf0] }
 0x225   :  { %v12540_v60 = vld [vmem:[#allocation5 + $0xb4] sm:$0xf]  ;;  %v10141_v7 = vor.u32 %v12940_v50, %v10138_v51  ;;  %3976 = vmatpush.bf16.msrb.mxu2 %v9629_v22  ;;  %v12645_v50 = vld [vmem:[#allocation5 + $0x3f4] sm:$0xf0] }
 0x226   :  { %v8538_v19 = vld [vmem:[#allocation5 + $0xf0] sm:$0xf0]  ;;  %v9440_v51 = vld [vmem:[#allocation5 + $0x7b8] sm:$0xf] }
 0x227   :  { %v12668_v2 = vld [vmem:[#allocation5 + $0x4b4] sm:$0xf]  ;;  %v8541_v56 = vor.u32 %v12540_v60, %v8538_v19  ;;  %3990 = vmatpush.bf16.msrb.mxu3 %v10141_v7  ;;  %v12901_v22 = vld [vmem:[#allocation5 + $0xbf4] sm:$0xf0]  ;;  %v4178_v60 = vmul.f32 %v4146_v35, %v13918_v59  ;;  %v14031_v19 = vpop.f32.mrf.mxu3  ;;  %v9441_v16 = vor.u32 %v12773_v45, %v9440_v51 }
 0x228   :  { %v9050_v48 = vld [vmem:[#allocation5 + $0x4f0] sm:$0xf0]  ;;  %v9953_v47 = vor.u32 %v12901_v22, %v9952_v9  ;;  %v8864_v35 = vld [vmem:[#allocation5 + $0x338] sm:$0xf] }
 0x229   :  { %v12796_v3 = vld [vmem:[#allocation5 + $0x8b4] sm:$0xf]  ;;  %v9053_v24 = vor.u32 %v12668_v2, %v9050_v48  ;;  %3949 = vmatpush.bf16.msrb.mxu0 %v8541_v56  ;;  %v14033_v2 = vpop.f32.mrf.mxu1  ;;  %v10464_v48 = vld [vmem:[#allocation5 + $0xfb8] sm:$0xf]  ;;  %v4210_v53 = vmul.f32 %v4178_v60, %v13918_v59 }
 0x22a   :  { %v9562_v4 = vld [vmem:[#allocation5 + $0x8f0] sm:$0xf0]  ;;  %v12629_v56 = vld [vmem:[#allocation5 + $0x374] sm:$0xf0] }
 0x22b   :  { %v12924_v11 = vld [vmem:[#allocation5 + $0xcb4] sm:$0xf]  ;;  %v9565_v27 = vor.u32 %v12796_v3, %v9562_v4  ;;  %3963 = vmatpush.bf16.msrb.mxu1 %v9053_v24  ;;  %v13029_v3 = vld [vmem:[#allocation5 + $0xff4] sm:$0xf0]  ;;  %v4225_v4 = vmul.f32 %v4193_v31, %v13996_v15  ;;  %v4242_v37 = vadd.f32 %v4210_v53, %v13918_v59 }
 0x22c   :  { %v10074_v14 = vld [vmem:[#allocation5 + $0xcf0] sm:$0xf0]  ;;  %v9888_v24 = vld [vmem:[#allocation5 + $0xb38] sm:$0xf] }
 0x22d   :  { %v12524_v41 = vld [vmem:[#allocation5 + $0x34] sm:$0xf]  ;;  %v10077_v38 = vor.u32 %v12924_v11, %v10074_v14  ;;  %3977 = vmatpush.bf16.msrb.mxu2 %v9565_v27  ;;  %v8929_v14 = vor.u32 %v12645_v50, %v8928_v49  ;;  %v12885_v27 = vld [vmem:[#allocation5 + $0xb74] sm:$0xf0]  ;;  %v4257_v13 = vadd.f32 %v4225_v4, %v13996_v15 }
 0x22e   :  { %v8474_v20 = vld [vmem:[#allocation5 + $0x70] sm:$0xf0]  ;;  %v10400_v31 = vld [vmem:[#allocation5 + $0xf38] sm:$0xf]  ;;  %v9889_v50 = vor.u32 %v12885_v27, %v9888_v24 }
 0x22f   :  { %v12652_v30 = vld [vmem:[#allocation5 + $0x434] sm:$0xf]  ;;  %v8477_v33 = vor.u32 %v12524_v41, %v8474_v20  ;;  %3991 = vmatpush.bf16.msrb.mxu3 %v10077_v38  ;;  %v9376_v41 = vld [vmem:[#allocation5 + $0x738] sm:$0xf]  ;;  %v10465_v20 = vor.u32 %v13029_v3, %v10464_v48  ;;  %v4288_v38 = vmul.f32 0.7978846, %v4256_v34  ;;  %v10401_v34 = vor.u32 %v13013_v5, %v10400_v31  ;;  %v14049_v60 = vpop.f32.mrf.mxu3  ;;  %v13555_v48 = vpop.eup %13554 }
 0x230   :  { %v8986_v43 = vld [vmem:[#allocation5 + $0x470] sm:$0xf0]  ;;  %v9377_v49 = vor.u32 %v12757_v29, %v9376_v41  ;;  %v8800_v51 = vld [vmem:[#allocation5 + $0x2b8] sm:$0xf]  ;;  %v14054_v3 = vmul.f32 0.5, %v13979_v32  ;;  %v14060_v5 = vadd.f32 1.0, %v13555_v48 }
 0x231   :  { %v12780_v12 = vld [vmem:[#allocation5 + $0x834] sm:$0xf]  ;;  %v8989_v6 = vor.u32 %v12652_v30, %v8986_v43  ;;  %3950 = vmatpush.bf16.msrb.mxu0 %v8477_v33  ;;  %v4272_v30 = vmul.f32 0.7978846, %v4240_v52  ;;  %v4241_v43 = vadd.f32 %v4209_v63, %v13901_v28  ;;  %v12613_v52 = vld [vmem:[#allocation5 + $0x2f4] sm:$0xf0] }
 0x232   :  { %v9498_v39 = vld [vmem:[#allocation5 + $0x870] sm:$0xf0]  ;;  %v9312_v63 = vld [vmem:[#allocation5 + $0x6b8] sm:$0xf]  ;;  %v4289_v4 = vmul.f32 0.7978846, %v4257_v13 }
 0x233   :  { %v12908_v42 = vld [vmem:[#allocation5 + $0xc34] sm:$0xf]  ;;  %v9501_v7 = vor.u32 %v12780_v12, %v9498_v39  ;;  %v14041_v12 = vpop.f32.mrf.mxu2  ;;  %3964 = vmatpush.bf16.msrb.mxu1 %v8989_v6  ;;  %v4162_v39 = vmul.f32 0.044715, %v14037_v8  ;;  %v12741_v33 = vld [vmem:[#allocation5 + $0x6f4] sm:$0xf0]  ;;  %13558 = vtanh.f32 %v4272_v30 }
 0x234   :  { %v10010_v44 = vld [vmem:[#allocation5 + $0xc70] sm:$0xf0]  ;;  %v9824_v45 = vld [vmem:[#allocation5 + $0xab8] sm:$0xf]  ;;  %v4273_v22 = vmul.f32 0.7978846, %v4241_v43  ;;  %3951 = vmatmul.bf16.vlgmr.msrb.gmra.mxu0 %v13836_v61  ;;  %13560 = vtanh.f32 %v4288_v38 }
 0x235   :  { %v10013_v11 = vor.u32 %v12908_v42, %v10010_v44  ;;  %3978 = vmatpush.bf16.msrb.mxu2 %v9501_v7  ;;  %3999 = vmatpush.bf16.msra.mxu0 %v8929_v14  ;;  %v8865_v42 = vor.u32 %v12629_v56, %v8864_v35  ;;  %v14045_v44 = vpop.f32.mrf.mxu0  ;;  %v12869_v9 = vld [vmem:[#allocation5 + $0xaf4] sm:$0xf0]  ;;  %v8801_v14 = vor.u32 %v12613_v52, %v8800_v51  ;;  %v4274_v43 = vmul.f32 0.7978846, %v4242_v37 }
 0x236   :  { %v10336_v6 = vld [vmem:[#allocation5 + $0xeb8] sm:$0xf]  ;;  %3965 = vmatmul.bf16.vlgmr.msrb.gmra.mxu1 %v13840_v0  ;;  %v9313_v35 = vor.u32 %v12741_v33, %v9312_v63  ;;  %v9825_v56 = vor.u32 %v12869_v9, %v9824_v45  ;;  %13562 = vtanh.f32 %v4273_v22  ;;  %v14783_v45 = vperm.slane %v13930_v46, 4 }
 0x237   :  { %3992 = vmatpush.bf16.msrb.mxu3 %v10013_v11  ;;  %4013 = vmatpush.bf16.msra.mxu1 %v9441_v16  ;;  %v12997_v7 = vld [vmem:[#allocation5 + $0xef4] sm:$0xf0]  ;;  %v4194_v11 = vmul.f32 %v4162_v39, %v14037_v8  ;;  %v13557_v16 = vpop.eup %13556  ;;  %13564 = vtanh.f32 %v4289_v4  ;;  %v14073_v48 = vmul.f32 0.5, %v13884_v17  ;;  %v14084_v17 = vpop.f32.mrf.mxu3 }
 0x238   :  { %3979 = vmatmul.bf16.vlgmr.msrb.gmra.mxu2 %v13834_v55  ;;  %v8736_v41 = vld [vmem:[#allocation5 + $0x238] sm:$0xf]  ;;  %v10337_v32 = vor.u32 %v12997_v7, %v10336_v6  ;;  %v3451_v9 = vadd.f32 %v13939_v21, %v14783_v45  ;;  %13566 = vtanh.f32 %v4274_v43  ;;  %v14081_v21 = vld [vmem:[#allocation7] sm:$0xff]  ;;  %v14093_v45 = vmul.f32 0.5, %v13901_v28 }
 0x239   :  { %4027 = vmatpush.bf16.msra.mxu2 %v9953_v47  ;;  %4000 = vmatpush.bf16.msra.mxu0 %v8865_v42  ;;  %v14058_v47 = vpop.f32.mrf.mxu1  ;;  %v9248_v29 = vld [vmem:[#allocation5 + $0x638] sm:$0xf]  ;;  %v4226_v13 = vmul.f32 %v4194_v11, %v14037_v8  ;;  %v14063_v42 = vadd.f32 1.0, %v13557_v16  ;;  %v14076_v11 = vmul.f32 0.5, %v13989_v1 }
 0x23a   :  { %3993 = vmatmul.bf16.vlgmr.msrb.gmra.mxu3 %v13838_v62  ;;  %v12725_v24 = vld [vmem:[#allocation5 + $0x674] sm:$0xf0]  ;;  %14785 = vst [vmem:[#allocation16_spill] sm:$0xff] %v14093_v45 }
 0x23b   :  { %4041 = vmatpush.bf16.msra.mxu3 %v10465_v20  ;;  %4014 = vmatpush.bf16.msra.mxu1 %v9377_v49  ;;  %v12597_v20 = vld [vmem:[#allocation5 + $0x274] sm:$0xf0]  ;;  %v13559_v49 = vpop.eup %13558  ;;  %v9249_v51 = vor.u32 %v12725_v24, %v9248_v29 }
 0x23c   :  { %v9760_v27 = vld [vmem:[#allocation5 + $0xa38] sm:$0xf]  ;;  %v8737_v39 = vor.u32 %v12597_v20, %v8736_v41  ;;  %v14078_v4 = vadd.f32 1.0, %v13559_v49  ;;  %v14779_v41 = vperm.slane %v14081_v21, 6 }
 0x23d   :  { %4028 = vmatpush.bf16.msra.mxu2 %v9889_v50  ;;  %v12853_v30 = vld [vmem:[#allocation5 + $0xa74] sm:$0xf0]  ;;  %4001 = vmatpush.bf16.msra.mxu0 %v8801_v14  ;;  %v14065_v50 = vpop.f32.mrf.mxu2  ;;  %v14067_v38 = vpop.f32.mrf.mxu0 }
 0x23e   :  { %v10272_v53 = vld [vmem:[#allocation5 + $0xe38] sm:$0xf]  ;;  %v9761_v52 = vor.u32 %v12853_v30, %v9760_v27 }
 0x23f   :  { %4042 = vmatpush.bf16.msra.mxu3 %v10401_v34  ;;  %v12981_v31 = vld [vmem:[#allocation5 + $0xe74] sm:$0xf0]  ;;  %4015 = vmatpush.bf16.msra.mxu1 %v9313_v35  ;;  %v13561_v35 = vpop.eup %13560 }
 0x240   :  { %v8672_v63 = vld [vmem:[#allocation5 + $0x1b8] sm:$0xf]  ;;  %v10273_v22 = vor.u32 %v12981_v31, %v10272_v53  ;;  %v13563_v29 = vpop.eup %13562  ;;  %v3465_v53 = vadd.f32 %v13941_v36, %v3451_v9  ;;  %v14784_v31 = vperm.slane %v13930_v46, 5  ;;  %v14100_v36 = vmul.f32 0.5, %v13996_v15 }
 0x241   :  { %4029 = vmatpush.bf16.msra.mxu2 %v9825_v56  ;;  %v12581_v34 = vld [vmem:[#allocation5 + $0x1f4] sm:$0xf0]  ;;  %v4258_v56 = vadd.f32 %v4226_v13, %v14037_v8  ;;  %4002 = vmatpush.bf16.msra.mxu0 %v8737_v39 }
 0x242   :  { %v9184_v33 = vld [vmem:[#allocation5 + $0x5b8] sm:$0xf]  ;;  %v8673_v20 = vor.u32 %v12581_v34, %v8672_v63  ;;  %v3507_v13 = vadd.f32 %v13999_v18, %v14784_v31  ;;  %14787 = vst [vmem:[#allocation18_spill] sm:$0xff] %v14100_v36  ;;  %v3479_v15 = vadd.f32 %v13947_v54, %v3465_v53  ;;  %v14119_v54 = vmul.f32 0.5, %v14037_v8  ;;  %v12829_v36 = vld [vmem:[#allocation5 + $0x9bc] sm:$0xf] }
 0x243   :  { %4043 = vmatpush.bf16.msra.mxu3 %v10337_v32  ;;  %v12709_v37 = vld [vmem:[#allocation5 + $0x5f4] sm:$0xf0]  ;;  %v14086_v32 = vpop.f32.mrf.mxu1  ;;  %4016 = vmatpush.bf16.msra.mxu1 %v9249_v51  ;;  %v4290_v46 = vmul.f32 0.7978846, %v4258_v56 }
 0x244   :  { %v9696_v6 = vld [vmem:[#allocation5 + $0x9b8] sm:$0xf]  ;;  %v9185_v1 = vor.u32 %v12709_v37, %v9184_v33  ;;  %v14095_v33 = vadd.f32 1.0, %v13561_v35  ;;  %v13565_v37 = vpop.eup %13564  ;;  %v3521_v56 = vadd.f32 %v14013_v58, %v3507_v13  ;;  %14791 = vst [vmem:[#allocation22_spill] sm:$0xff] %v14119_v54 }
 0x245   :  { %v12837_v7 = vld [vmem:[#allocation5 + $0x9f4] sm:$0xf0]  ;;  %4030 = vmatpush.bf16.msra.mxu2 %v9761_v52  ;;  %4003 = vmatpush.bf16.msra.mxu0 %v8673_v20  ;;  %v13567_v9 = vpop.eup %13566  ;;  %v14105_v28 = vpop.f32.mrf.mxu2  ;;  %13568 = vtanh.f32 %v4290_v46 }
 0x246   :  { %v10208_v14 = vld [vmem:[#allocation5 + $0xdb8] sm:$0xf]  ;;  %v9697_v24 = vor.u32 %v12837_v7, %v9696_v6  ;;  %v14097_v6 = vadd.f32 1.0, %v13563_v29  ;;  %v3535_v8 = vadd.f32 %v14021_v26, %v3521_v56 }
 0x247   :  { %v12965_v16 = vld [vmem:[#allocation5 + $0xdf4] sm:$0xf0]  ;;  %4044 = vmatpush.bf16.msra.mxu3 %v10273_v22  ;;  %v3561_v22 = vadd.f32 %v14023_v23, %v14779_v41  ;;  %4017 = vmatpush.bf16.msra.mxu1 %v9185_v1  ;;  %v14110_v23 = vmul.f32 0.5, %v13918_v59  ;;  %v14112_v41 = vpop.f32.mrf.mxu0  ;;  %v14122_v59 = vpop.f32.mrf.mxu3 }
 0x248   :  { %v8608_v27 = vld [vmem:[#allocation5 + $0x138] sm:$0xf]  ;;  %v10209_v39 = vor.u32 %v12965_v16, %v10208_v14  ;;  %14786 = vst [vmem:[#allocation17_spill] sm:$0xff] %v14097_v6  ;;  %v14134_v54 = vadd.f32 %v14031_v19, %v3535_v8  ;;  %v4148_v8 = vmul.f32 0.044715, %v13954_v25 }
 0x249   :  { %v12565_v30 = vld [vmem:[#allocation5 + $0x174] sm:$0xf0]  ;;  %4031 = vmatpush.bf16.msra.mxu2 %v9697_v24  ;;  %14788 = vst [vmem:[#allocation19_spill] sm:$0xff] %v14110_v23 }
 0x24a   :  { %v9120_v43 = vld [vmem:[#allocation5 + $0x538] sm:$0xf]  ;;  %v8609_v18 = vor.u32 %v12565_v30, %v8608_v27 }
 0x24b   :  { %v12693_v49 = vld [vmem:[#allocation5 + $0x574] sm:$0xf0]  ;;  %4045 = vmatpush.bf16.msra.mxu3 %v10209_v39  ;;  %v3575_v39 = vadd.f32 %v14033_v2, %v3561_v22  ;;  %v14128_v2 = vpop.f32.mrf.mxu1  ;;  %v12637_v22 = vld [vmem:[#allocation5 + $0x3bc] sm:$0xf] }
 0x24c   :  { %v9632_v63 = vld [vmem:[#allocation5 + $0x938] sm:$0xf]  ;;  %v9121_v7 = vor.u32 %v12693_v49, %v9120_v43  ;;  %v14114_v43 = vadd.f32 1.0, %v13565_v37  ;;  %v14116_v49 = vadd.f32 1.0, %v13567_v9  ;;  %4004 = vmatpush.bf16.msra.mxu0 %v8609_v18  ;;  %v14125_v9 = vadd.f32 %v13950_v10, %v3479_v15 }
 0x24d   :  { %v12821_v34 = vld [vmem:[#allocation5 + $0x974] sm:$0xf0]  ;;  %v4147_v10 = vmul.f32 0.044715, %v13937_v57  ;;  %v3589_v15 = vadd.f32 %v14041_v12, %v3575_v39 }
 0x24e   :  { %v10144_v51 = vld [vmem:[#allocation5 + $0xd38] sm:$0xf]  ;;  %v9633_v14 = vor.u32 %v12821_v34, %v9632_v63  ;;  %14789 = vst [vmem:[#allocation20_spill] sm:$0xff] %v14114_v43  ;;  %4018 = vmatpush.bf16.msra.mxu1 %v9121_v7  ;;  %v8930_v7 = vld [vmem:[#allocation5 + $0x3f8] sm:$0xf0] }
 0x24f   :  { %v12949_v52 = vld [vmem:[#allocation5 + $0xd74] sm:$0xf0]  ;;  %14790 = vst [vmem:[#allocation21_spill] sm:$0xff] %v14116_v49  ;;  %v14136_v49 = vpop.f32.mrf.mxu2  ;;  %v14138_v23 = vpop.f32.mrf.mxu0  ;;  %v9890_v43 = vld [vmem:[#allocation5 + $0xb78] sm:$0xf0]  ;;  %v4179_v19 = vmul.f32 %v4147_v10, %v13937_v57 }
 0x250   :  { %v8544_v16 = vld [vmem:[#allocation5 + $0xb8] sm:$0xf]  ;;  %v10145_v20 = vor.u32 %v12949_v52, %v10144_v51  ;;  %4032 = vmatpush.bf16.msra.mxu2 %v9633_v14  ;;  %v12765_v14 = vld [vmem:[#allocation5 + $0x7bc] sm:$0xf] }
 0x251   :  { %v12549_v35 = vld [vmem:[#allocation5 + $0xf4] sm:$0xf0] }
 0x252   :  { %v9056_v29 = vld [vmem:[#allocation5 + $0x4b8] sm:$0xf]  ;;  %v8545_v58 = vor.u32 %v12549_v35, %v8544_v16  ;;  %4046 = vmatpush.bf16.msra.mxu3 %v10145_v20  ;;  %v13021_v20 = vld [vmem:[#allocation5 + $0xfbc] sm:$0xf] }
 0x253   :  { %v12677_v27 = vld [vmem:[#allocation5 + $0x4f4] sm:$0xf0] }
 0x254   :  { %v9568_v30 = vld [vmem:[#allocation5 + $0x8b8] sm:$0xf]  ;;  %v9057_v63 = vor.u32 %v12677_v27, %v9056_v29  ;;  %4005 = vmatpush.bf16.msra.mxu0 %v8545_v58  ;;  %v9442_v27 = vld [vmem:[#allocation5 + $0x7f8] sm:$0xf0] }
 0x255   :  { %v12805_v31 = vld [vmem:[#allocation5 + $0x8f4] sm:$0xf0]  ;;  %v9445_v12 = vor.u32 %v12765_v14, %v9442_v27 }
 0x256   :  { %v10080_v1 = vld [vmem:[#allocation5 + $0xcb8] sm:$0xf]  ;;  %v9569_v34 = vor.u32 %v12805_v31, %v9568_v30  ;;  %v12893_v30 = vld [vmem:[#allocation5 + $0xbbc] sm:$0xf]  ;;  %4019 = vmatpush.bf16.msra.mxu1 %v9057_v63 }
 0x257   :  { %v12933_v24 = vld [vmem:[#allocation5 + $0xcf4] sm:$0xf0]  ;;  %v9954_v31 = vld [vmem:[#allocation5 + $0xbf8] sm:$0xf0] }
 0x258   :  { %v8480_v53 = vld [vmem:[#allocation5 + $0x38] sm:$0xf]  ;;  %v10081_v18 = vor.u32 %v12933_v24, %v10080_v1  ;;  %4033 = vmatpush.bf16.msra.mxu2 %v9569_v34  ;;  %v10466_v1 = vld [vmem:[#allocation5 + $0xff8] sm:$0xf0]  ;;  %v4163_v24 = vmul.f32 0.044715, %v14125_v9  ;;  %v9957_v39 = vor.u32 %v12893_v30, %v9954_v31  ;;  %v14151_v30 = vpop.f32.mrf.mxu3  ;;  %v14153_v31 = vpop.f32.mrf.mxu1 }
 0x259   :  { %v12533_v13 = vld [vmem:[#allocation5 + $0x74] sm:$0xf0]  ;;  %v12621_v63 = vld [vmem:[#allocation5 + $0x33c] sm:$0xf] }
 0x25a   :  { %v8992_v51 = vld [vmem:[#allocation5 + $0x438] sm:$0xf]  ;;  %v8481_v29 = vor.u32 %v12533_v13, %v8480_v53  ;;  %4047 = vmatpush.bf16.msra.mxu3 %v10081_v18  ;;  %v8933_v53 = vor.u32 %v12637_v22, %v8930_v7  ;;  %v13569_v13 = vpop.eup %13568  ;;  %v8866_v34 = vld [vmem:[#allocation5 + $0x378] sm:$0xf0]  ;;  %v14143_v18 = vadd.f32 %v14049_v60, %v3589_v15  ;;  %v4164_v22 = vmul.f32 0.044715, %v14134_v54 }
 0x25b   :  { %v12661_v52 = vld [vmem:[#allocation5 + $0x474] sm:$0xf0]  ;;  %v14792_v7 = vperm.slane %v14081_v21, 6  ;;  %v14149_v27 = vadd.f32 1.0, %v13569_v13  ;;  %v12605_v15 = vld [vmem:[#allocation5 + $0x2bc] sm:$0xf]  ;;  %v4195_v13 = vmul.f32 %v4163_v24, %v14125_v9 }
 0x25c   :  { %v9504_v37 = vld [vmem:[#allocation5 + $0x838] sm:$0xf]  ;;  %v8993_v26 = vor.u32 %v12661_v52, %v8992_v51  ;;  %v12749_v51 = vld [vmem:[#allocation5 + $0x73c] sm:$0xf]  ;;  %4006 = vmatpush.bf16.msra.mxu0 %v8481_v29  ;;  %v10469_v52 = vor.u32 %v13021_v20, %v10466_v1  ;;  %v8869_v29 = vor.u32 %v12621_v63, %v8866_v34  ;;  %v4180_v63 = vmul.f32 %v4148_v8, %v13954_v25 }
 0x25d   :  { %v12789_v16 = vld [vmem:[#allocation5 + $0x874] sm:$0xf0]  ;;  %v3563_v14 = vadd.f32 %v14045_v44, %v14792_v7  ;;  %14793 = vst [vmem:[#allocation23_spill] sm:$0xff] %v14149_v27  ;;  %v9314_v20 = vld [vmem:[#allocation5 + $0x6f8] sm:$0xf0]  ;;  %v4196_v34 = vmul.f32 %v4164_v22, %v14134_v54 }
 0x25e   :  { %v10016_v46 = vld [vmem:[#allocation5 + $0xc38] sm:$0xf]  ;;  %v9505_v56 = vor.u32 %v12789_v16, %v9504_v37  ;;  %v9378_v37 = vld [vmem:[#allocation5 + $0x778] sm:$0xf0]  ;;  %4020 = vmatpush.bf16.msra.mxu1 %v8993_v26 }
 0x25f   :  { %v12917_v35 = vld [vmem:[#allocation5 + $0xc74] sm:$0xf0]  ;;  %v12877_v16 = vld [vmem:[#allocation5 + $0xb3c] sm:$0xf]  ;;  %v9381_v60 = vor.u32 %v12749_v51, %v9378_v37  ;;  %4007 = vmatmul.bf16.vlgmr.msra.gmra.mxu0 %v13836_v61  ;;  %v3577_v51 = vadd.f32 %v14058_v47, %v3563_v14  ;;  %v14166_v37 = vpop.f32.mrf.mxu2 }
 0x260   :  { %v10017_v58 = vor.u32 %v12917_v35, %v10016_v46  ;;  %4034 = vmatpush.bf16.msra.mxu2 %v9505_v56  ;;  %v13005_v46 = vld [vmem:[#allocation5 + $0xf3c] sm:$0xf]  ;;  %4055 = vmatpush.bf16.msrb.mxu0 %v8933_v53  ;;  %v9893_v10 = vor.u32 %v12877_v16, %v9890_v43  ;;  %v4211_v53 = vmul.f32 %v4179_v19, %v13937_v57 }
 0x261   :  { %v10402_v35 = vld [vmem:[#allocation5 + $0xf78] sm:$0xf0]  ;;  %4021 = vmatmul.bf16.vlgmr.msra.gmra.mxu1 %v13840_v0 }
 0x262   :  { %4048 = vmatpush.bf16.msra.mxu3 %v10017_v58  ;;  %4069 = vmatpush.bf16.msrb.mxu1 %v9445_v12  ;;  %v8802_v26 = vld [vmem:[#allocation5 + $0x2f8] sm:$0xf0]  ;;  %v10405_v44 = vor.u32 %v13005_v46, %v10402_v35  ;;  %v4149_v12 = vmul.f32 0.044715, %v14143_v18  ;;  %v4243_v14 = vadd.f32 %v4211_v53, %v13937_v57 }
 0x263   :  { %v12733_v56 = vld [vmem:[#allocation5 + $0x6bc] sm:$0xf]  ;;  %4035 = vmatmul.bf16.vlgmr.msra.gmra.mxu2 %v13834_v55  ;;  %v8805_v24 = vor.u32 %v12605_v15, %v8802_v26 }
 0x264   :  { %4083 = vmatpush.bf16.msrb.mxu2 %v9957_v39  ;;  %v12861_v1 = vld [vmem:[#allocation5 + $0xabc] sm:$0xf]  ;;  %4056 = vmatpush.bf16.msrb.mxu0 %v8869_v29  ;;  %v9317_v16 = vor.u32 %v12733_v56, %v9314_v20  ;;  %v4227_v29 = vmul.f32 %v4195_v13, %v14125_v9  ;;  %v4212_v56 = vmul.f32 %v4180_v63, %v13954_v25 }
 0x265   :  { %v9826_v58 = vld [vmem:[#allocation5 + $0xaf8] sm:$0xf0]  ;;  %4049 = vmatmul.bf16.vlgmr.msra.gmra.mxu3 %v13838_v62  ;;  %v3591_v20 = vadd.f32 %v14065_v50, %v3577_v51  ;;  %v4275_v51 = vmul.f32 0.7978846, %v4243_v14 }
 0x266   :  { %4097 = vmatpush.bf16.msrb.mxu3 %v10469_v52  ;;  %v12989_v43 = vld [vmem:[#allocation5 + $0xebc] sm:$0xf]  ;;  %v630_v52 = vperm.slane %v14081_v21, 7  ;;  %4070 = vmatpush.bf16.msrb.mxu1 %v9381_v60  ;;  %v9829_v19 = vor.u32 %v12861_v1, %v9826_v58  ;;  %v14169_v21 = vmul.f32 0.5, %v13937_v57  ;;  %v4181_v60 = vmul.f32 %v4149_v12, %v14143_v18  ;;  %v14179_v58 = vpop.f32.mrf.mxu3 }
 0x267   :  { %v10338_v39 = vld [vmem:[#allocation5 + $0xef8] sm:$0xf0]  ;;  %13570 = vtanh.f32 %v4275_v51 }
 0x268   :  { %4084 = vmatpush.bf16.msrb.mxu2 %v9893_v10  ;;  %v12589_v8 = vld [vmem:[#allocation5 + $0x23c] sm:$0xf]  ;;  %v10341_v7 = vor.u32 %v12989_v43, %v10338_v39  ;;  %14794 = vst [vmem:[#allocation24_spill] sm:$0xff] %v14169_v21  ;;  %v14174_v10 = vpop.f32.mrf.mxu0  ;;  %4057 = vmatpush.bf16.msrb.mxu0 %v8805_v24  ;;  %v3617_v39 = vadd.f32 %v14067_v38, %v630_v52 }
 0x269   :  { %v8738_v46 = vld [vmem:[#allocation5 + $0x278] sm:$0xf0]  ;;  %v3619_v21 = vadd.f32 %v14112_v41, %v630_v52  ;;  %v4259_v24 = vadd.f32 %v4227_v29, %v14125_v9  ;;  %v14190_v41 = vadd.f32 %v14084_v17, %v3591_v20 }
 0x26a   :  { %v12717_v35 = vld [vmem:[#allocation5 + $0x63c] sm:$0xf]  ;;  %4098 = vmatpush.bf16.msrb.mxu3 %v10405_v44  ;;  %v4228_v44 = vmul.f32 %v4196_v34, %v14134_v54  ;;  %v8741_v1 = vor.u32 %v12589_v8, %v8738_v46  ;;  %4071 = vmatpush.bf16.msrb.mxu1 %v9317_v16  ;;  %v4213_v16 = vmul.f32 %v4181_v60, %v14143_v18 }
 0x26b   :  { %v9250_v22 = vld [vmem:[#allocation5 + $0x678] sm:$0xf0]  ;;  %v4244_v46 = vadd.f32 %v4212_v56, %v13954_v25  ;;  %v3631_v29 = vadd.f32 %v14086_v32, %v3617_v39  ;;  %v3633_v60 = vadd.f32 %v14128_v2, %v3619_v21  ;;  %v4291_v17 = vmul.f32 0.7978846, %v4259_v24 }
 0x26c   :  { %v12845_v27 = vld [vmem:[#allocation5 + $0xa3c] sm:$0xf]  ;;  %4085 = vmatpush.bf16.msrb.mxu2 %v9829_v19  ;;  %v9253_v57 = vor.u32 %v12717_v35, %v9250_v22  ;;  %v14185_v19 = vpop.f32.mrf.mxu1  ;;  %v4260_v38 = vadd.f32 %v4228_v44, %v14134_v54  ;;  %4058 = vmatpush.bf16.msrb.mxu0 %v8741_v1  ;;  %v4245_v20 = vadd.f32 %v4213_v16, %v14143_v18  ;;  %v14195_v1 = vpop.f32.mrf.mxu2  ;;  %v4165_v32 = vmul.f32 0.044715, %v14190_v41 }
 0x26d   :  { %v9762_v47 = vld [vmem:[#allocation5 + $0xa78] sm:$0xf0]  ;;  %v3647_v24 = vadd.f32 %v14136_v49, %v3633_v60  ;;  %13572 = vtanh.f32 %v4291_v17 }
 0x26e   :  { %v12973_v15 = vld [vmem:[#allocation5 + $0xe3c] sm:$0xf]  ;;  %v9765_v53 = vor.u32 %v12845_v27, %v9762_v47  ;;  %4099 = vmatpush.bf16.msrb.mxu3 %v10341_v7  ;;  %4072 = vmatpush.bf16.msrb.mxu1 %v9253_v57  ;;  %v4197_v51 = vmul.f32 %v4165_v32, %v14190_v41  ;;  %v10584_v32 = vld [vmem:[#allocation8 + $0xe0] sm:$0xf] }
 0x26f   :  { %v10274_v26 = vld [vmem:[#allocation5 + $0xe78] sm:$0xf0] }
 0x270   :  { %v12573_v13 = vld [vmem:[#allocation5 + $0x1bc] sm:$0xf]  ;;  %v10277_v63 = vor.u32 %v12973_v15, %v10274_v26  ;;  %4086 = vmatpush.bf16.msrb.mxu2 %v9765_v53  ;;  %v14197_v57 = vpop.f32.mrf.mxu0 }
 0x271   :  { %v8674_v12 = vld [vmem:[#allocation5 + $0x1f8] sm:$0xf0] }
 0x272   :  { %v12701_v43 = vld [vmem:[#allocation5 + $0x5bc] sm:$0xf]  ;;  %v8677_v52 = vor.u32 %v12573_v13, %v8674_v12  ;;  %4100 = vmatpush.bf16.msrb.mxu3 %v10277_v63  ;;  %v14199_v13 = vmul.f32 0.7978846, %v4244_v46  ;;  %v14201_v12 = vmul.f32 0.7978846, %v4260_v38 }
 0x273   :  { %v9186_v34 = vld [vmem:[#allocation5 + $0x5f8] sm:$0xf0]  ;;  %v14206_v38 = vmul.f32 0.7978846, %v4245_v20 }
 0x274   :  { %v9698_v50 = vld [vmem:[#allocation5 + $0x9f8] sm:$0xf0]  ;;  %v9189_v35 = vor.u32 %v12701_v43, %v9186_v34  ;;  %4059 = vmatpush.bf16.msrb.mxu0 %v8677_v52  ;;  %v14208_v52 = vpop.f32.mrf.mxu3  ;;  %13574 = vtanh.f32 %v14199_v13 }
 0x275   :  { %v12957_v27 = vld [vmem:[#allocation5 + $0xdbc] sm:$0xf]  ;;  %v9701_v7 = vor.u32 %v12829_v36, %v9698_v50  ;;  %v3645_v50 = vadd.f32 %v14105_v28, %v3631_v29  ;;  %14795 = vst [vmem:[#allocation25_spill] sm:$0xff] %v14208_v52  ;;  %v14215_v28 = vld [vmem:[#allocation7 + $0x8] sm:$0xff]  ;;  %13576 = vtanh.f32 %v14201_v12 }
 0x276   :  { %v10210_v8 = vld [vmem:[#allocation5 + $0xdf8] sm:$0xf0]  ;;  %4073 = vmatpush.bf16.msrb.mxu1 %v9189_v35  ;;  %v14210_v35 = vpop.f32.mrf.mxu1  ;;  %v14798_v13 = vperm.slane %v14215_v28, 0  ;;  %13578 = vtanh.f32 %v14206_v38  ;;  %v10936_v38 = vld [vmem:[#allocation8 + $0x3a0] sm:$0xf] }
 0x277   :  { %v12557_v22 = vld [vmem:[#allocation5 + $0x13c] sm:$0xf]  ;;  %v10213_v15 = vor.u32 %v12957_v27, %v10210_v8  ;;  %4087 = vmatpush.bf16.msrb.mxu2 %v9701_v7  ;;  %v14219_v20 = vadd.f32 %v14122_v59, %v3645_v50  ;;  %v13571_v59 = vpop.eup %13570  ;;  %v4229_v50 = vmul.f32 %v4197_v51, %v14190_v41 }
 0x278   :  { %v8610_v47 = vld [vmem:[#allocation5 + $0x178] sm:$0xf0]  ;;  %v14236_v52 = vadd.f32 1.0, %v13571_v59  ;;  %v10552_v59 = vld [vmem:[#allocation8 + $0xa0] sm:$0xf] }
 0x279   :  { %v12685_v14 = vld [vmem:[#allocation5 + $0x53c] sm:$0xf]  ;;  %v8613_v2 = vor.u32 %v12557_v22, %v8610_v47  ;;  %4101 = vmatpush.bf16.msrb.mxu3 %v10213_v15  ;;  %v14213_v47 = vmul.f32 0.5, %v14125_v9  ;;  %v14222_v9 = vadd.f32 %v14151_v30, %v3647_v24  ;;  %v14228_v24 = vpop.f32.mrf.mxu0 }
 0x27a   :  { %v9122_v26 = vld [vmem:[#allocation5 + $0x578] sm:$0xf0] }
 0x27b   :  { %v12813_v56 = vld [vmem:[#allocation5 + $0x93c] sm:$0xf]  ;;  %v9125_v21 = vor.u32 %v12685_v14, %v9122_v26  ;;  %14796 = vst [vmem:[#allocation26_spill] sm:$0xff] %v14213_v47  ;;  %4060 = vmatpush.bf16.msrb.mxu0 %v8613_v2  ;;  %v13573_v47 = vpop.eup %13572 }
 0x27c   :  { %v9634_v44 = vld [vmem:[#allocation5 + $0x978] sm:$0xf0]  ;;  %v14233_v51 = vpop.f32.mrf.mxu3  ;;  %v14244_v12 = vadd.f32 1.0, %v13573_v47  ;;  %v13084_v47 = vld [vmem:[#allocation8 + $0x1ac] sm:$0xf0] }
 0x27d   :  { %v12941_v36 = vld [vmem:[#allocation5 + $0xd3c] sm:$0xf]  ;;  %v9637_v43 = vor.u32 %v12813_v56, %v9634_v44  ;;  %4074 = vmatpush.bf16.msrb.mxu1 %v9125_v21  ;;  %v13060_v21 = vld [vmem:[#allocation8 + $0xec] sm:$0xf0] }
 0x27e   :  { %v10146_v53 = vld [vmem:[#allocation5 + $0xd78] sm:$0xf0]  ;;  %v10585_v6 = vor.u32 %v13060_v21, %v10584_v32  ;;  %v10952_v32 = vld [vmem:[#allocation8 + $0x3c0] sm:$0xf]  ;;  %v13152_v21 = vld [vmem:[#allocation8 + $0x3cc] sm:$0xf0] }
 0x27f   :  { %v12541_v39 = vld [vmem:[#allocation5 + $0xbc] sm:$0xf]  ;;  %v10149_v16 = vor.u32 %v12941_v36, %v10146_v53  ;;  %4088 = vmatpush.bf16.msrb.mxu2 %v9637_v43  ;;  %v10712_v43 = vld [vmem:[#allocation8 + $0x1e0] sm:$0xf] }
 0x280   :  { %v8546_v63 = vld [vmem:[#allocation5 + $0xf8] sm:$0xf0] }
 0x281   :  { %v12669_v34 = vld [vmem:[#allocation5 + $0x4bc] sm:$0xf]  ;;  %v8549_v49 = vor.u32 %v12541_v39, %v8546_v63  ;;  %4102 = vmatpush.bf16.msrb.mxu3 %v10149_v16  ;;  %v14224_v39 = vpop.f32.mrf.mxu2 }
 0x282   :  { %v9058_v27 = vld [vmem:[#allocation5 + $0x4f8] sm:$0xf0]  ;;  %14797 = vst [vmem:[#allocation27_spill] sm:$0xff] %v14224_v39  ;;  %v13120_v39 = vld [vmem:[#allocation8 + $0x2cc] sm:$0xf0] }
 0x283   :  { %v12797_v8 = vld [vmem:[#allocation5 + $0x8bc] sm:$0xf]  ;;  %v9061_v60 = vor.u32 %v12669_v34, %v9058_v27  ;;  %4061 = vmatpush.bf16.msrb.mxu0 %v8549_v49  ;;  %v13092_v34 = vld [vmem:[#allocation8 + $0x1ec] sm:$0xf0]  ;;  %v10840_v27 = vld [vmem:[#allocation8 + $0x2e0] sm:$0xf] }
 0x284   :  { %v9570_v46 = vld [vmem:[#allocation5 + $0x8f8] sm:$0xf0]  ;;  %v4150_v49 = vmul.f32 0.044715, %v14219_v20  ;;  %v10713_v30 = vor.u32 %v13092_v34, %v10712_v43  ;;  %v14247_v43 = vmul.f32 0.5, %v13954_v25  ;;  %v10953_v25 = vor.u32 %v13152_v21, %v10952_v32 }
 0x285   :  { %v12925_v7 = vld [vmem:[#allocation5 + $0xcbc] sm:$0xf]  ;;  %v9573_v15 = vor.u32 %v12797_v8, %v9570_v46  ;;  %v13124_v8 = vld [vmem:[#allocation8 + $0x2ec] sm:$0xf0]  ;;  %4075 = vmatpush.bf16.msrb.mxu1 %v9061_v60  ;;  %v10568_v60 = vld [vmem:[#allocation8 + $0xc0] sm:$0xf] }
 0x286   :  { %v10082_v22 = vld [vmem:[#allocation5 + $0xcf8] sm:$0xf0]  ;;  %v10841_v45 = vor.u32 %v13124_v8, %v10840_v27  ;;  %v10920_v21 = vld [vmem:[#allocation8 + $0x380] sm:$0xf] }
 0x287   :  { %v12525_v14 = vld [vmem:[#allocation5 + $0x3c] sm:$0xf]  ;;  %v10085_v17 = vor.u32 %v12925_v7, %v10082_v22  ;;  %4089 = vmatpush.bf16.msrb.mxu2 %v9573_v15  ;;  %v10968_v7 = vld [vmem:[#allocation8 + $0x3e0] sm:$0xf]  ;;  %v13156_v22 = vld [vmem:[#allocation8 + $0x3ec] sm:$0xf0] }
 0x288   :  { %v8482_v29 = vld [vmem:[#allocation5 + $0x78] sm:$0xf0]  ;;  %v13056_v15 = vld [vmem:[#allocation8 + $0xcc] sm:$0xf0] }
 0x289   :  { %v12653_v26 = vld [vmem:[#allocation5 + $0x43c] sm:$0xf]  ;;  %v8485_v63 = vor.u32 %v12525_v14, %v8482_v29  ;;  %v4166_v14 = vmul.f32 0.044715, %v14222_v9  ;;  %4103 = vmatpush.bf16.msrb.mxu3 %v10085_v17  ;;  %v4261_v17 = vadd.f32 %v4229_v50, %v14190_v41  ;;  %v10569_v27 = vor.u32 %v13056_v15, %v10568_v60  ;;  %v13052_v50 = vld [vmem:[#allocation8 + $0xac] sm:$0xf0] }
 0x28a   :  { %v8994_v56 = vld [vmem:[#allocation5 + $0x478] sm:$0xf0] }
 0x28b   :  { %v12781_v44 = vld [vmem:[#allocation5 + $0x83c] sm:$0xf]  ;;  %v8997_v16 = vor.u32 %v12653_v26, %v8994_v56  ;;  %v10696_v26 = vld [vmem:[#allocation8 + $0x1c0] sm:$0xf]  ;;  %4062 = vmatpush.bf16.msrb.mxu0 %v8485_v63  ;;  %v10969_v56 = vor.u32 %v13156_v22, %v10968_v7  ;;  %v4182_v63 = vmul.f32 %v4150_v49, %v14219_v20  ;;  %v4198_v34 = vmul.f32 %v4166_v14, %v14222_v9  ;;  %v13116_v7 = vld [vmem:[#allocation8 + $0x2ac] sm:$0xf0]  ;;  %v13575_v22 = vpop.eup %13574 }
 0x28c   :  { %v9506_v36 = vld [vmem:[#allocation5 + $0x878] sm:$0xf0]  ;;  %v4293_v49 = vmul.f32 0.7978846, %v4261_v17  ;;  %v13577_v14 = vpop.eup %13576  ;;  %v13112_v17 = vld [vmem:[#allocation8 + $0x28c] sm:$0xf0] }
 0x28d   :  { %v12909_v53 = vld [vmem:[#allocation5 + $0xc3c] sm:$0xf]  ;;  %v9509_v46 = vor.u32 %v12781_v44, %v9506_v36  ;;  %v13088_v44 = vld [vmem:[#allocation8 + $0x1cc] sm:$0xf0]  ;;  %v10824_v36 = vld [vmem:[#allocation8 + $0x2c0] sm:$0xf]  ;;  %4076 = vmatpush.bf16.msrb.mxu1 %v8997_v16  ;;  %v4230_v60 = vmul.f32 %v4198_v34, %v14222_v9 }
 0x28e   :  { %v10018_v2 = vld [vmem:[#allocation5 + $0xc78] sm:$0xf0]  ;;  %v10825_v8 = vor.u32 %v13120_v39, %v10824_v36  ;;  %v10680_v16 = vld [vmem:[#allocation8 + $0x1a0] sm:$0xf]  ;;  %4063 = vmatmul.bf16.vlgmr.msrb.gmra.mxu0 %v13836_v61  ;;  %v13148_v39 = vld [vmem:[#allocation8 + $0x3ac] sm:$0xf0]  ;;  %13580 = vtanh.f32 %v4293_v49 }
 0x28f   :  { %v10021_v29 = vor.u32 %v12909_v53, %v10018_v2  ;;  %v3673_v53 = vadd.f32 %v14138_v23, %v14798_v13  ;;  %v14242_v2 = vpop.f32.mrf.mxu1  ;;  %4090 = vmatpush.bf16.msrb.mxu2 %v9509_v46  ;;  %7497 = vmatpush.bf16.msra.mxu0 %v10585_v6  ;;  %v10697_v23 = vor.u32 %v13088_v44, %v10696_v26  ;;  %v10808_v46 = vld [vmem:[#allocation8 + $0x2a0] sm:$0xf]  ;;  %v14261_v61 = vmul.f32 0.5, %v14134_v54  ;;  %v13080_v36 = vld [vmem:[#allocation8 + $0x18c] sm:$0xf0] }
 0x290   :  { %4077 = vmatmul.bf16.vlgmr.msrb.gmra.mxu1 %v13840_v0  ;;  %v10681_v15 = vor.u32 %v13084_v47, %v10680_v16  ;;  %v10809_v0 = vor.u32 %v13116_v7, %v10808_v46  ;;  %v10536_v26 = vld [vmem:[#allocation8 + $0x80] sm:$0xf]  ;;  %v10937_v44 = vor.u32 %v13148_v39, %v10936_v38  ;;  %v14266_v13 = vadd.f32 1.0, %v13575_v22  ;;  %v13044_v47 = vld [vmem:[#allocation8 + $0x6c] sm:$0xf0] }
 0x291   :  { %4104 = vmatpush.bf16.msrb.mxu3 %v10021_v29  ;;  %7511 = vmatpush.bf16.msra.mxu1 %v10713_v30  ;;  %v3687_v6 = vadd.f32 %v14153_v31, %v3673_v53  ;;  %v14254_v30 = vpop.f32.mrf.mxu2  ;;  %v4214_v29 = vmul.f32 %v4182_v63, %v14219_v20  ;;  %v10553_v31 = vor.u32 %v13052_v50, %v10552_v59  ;;  %v10792_v54 = vld [vmem:[#allocation8 + $0x280] sm:$0xf]  ;;  %v13144_v63 = vld [vmem:[#allocation8 + $0x38c] sm:$0xf0]  ;;  %v14273_v34 = vadd.f32 1.0, %v13577_v14 }
 0x292   :  { %4091 = vmatmul.bf16.vlgmr.msrb.gmra.mxu2 %v13834_v55  ;;  %v13048_v55 = vld [vmem:[#allocation8 + $0x8c] sm:$0xf0]  ;;  %v4262_v59 = vadd.f32 %v4230_v60, %v14222_v9  ;;  %v10793_v16 = vor.u32 %v13112_v17, %v10792_v54  ;;  %v10648_v46 = vld [vmem:[#allocation8 + $0x160] sm:$0xf]  ;;  %v14799_v7 = vperm.slane %v14215_v28, 0  ;;  %v14286_v14 = vmul.f32 0.5, %v14190_v41 }
 0x293   :  { %7525 = vmatpush.bf16.msra.mxu2 %v10841_v45  ;;  %v14256_v45 = vpop.f32.mrf.mxu0  ;;  %7498 = vmatpush.bf16.msra.mxu0 %v10569_v27  ;;  %v3701_v53 = vadd.f32 %v14166_v37, %v3687_v6  ;;  %v13579_v27 = vpop.eup %13578  ;;  %v10537_v50 = vor.u32 %v13048_v55, %v10536_v26  ;;  %v13076_v49 = vld [vmem:[#allocation8 + $0x16c] sm:$0xf0]  ;;  %v10776_v6 = vld [vmem:[#allocation8 + $0x260] sm:$0xf] }
 0x294   :  { %4105 = vmatmul.bf16.vlgmr.msrb.gmra.mxu3 %v13838_v62  ;;  %v14269_v62 = vpop.f32.mrf.mxu3  ;;  %v3675_v22 = vadd.f32 %v14174_v10, %v14799_v7  ;;  %v13108_v38 = vld [vmem:[#allocation8 + $0x26c] sm:$0xf0]  ;;  %v14283_v39 = vadd.f32 1.0, %v13579_v27  ;;  %v4294_v26 = vmul.f32 0.7978846, %v4262_v59  ;;  %v632_v10 = vperm.slane %v14215_v28, 1 }
 0x295   :  { %7539 = vmatpush.bf16.msra.mxu3 %v10969_v56  ;;  %7512 = vmatpush.bf16.msra.mxu1 %v10697_v23  ;;  %v10664_v56 = vld [vmem:[#allocation8 + $0x180] sm:$0xf]  ;;  %v14276_v23 = vmul.f32 0.5, %v14143_v18  ;;  %v10921_v18 = vor.u32 %v13144_v63, %v10920_v21  ;;  %v10649_v41 = vor.u32 %v13076_v49, %v10648_v46  ;;  %v13072_v63 = vld [vmem:[#allocation8 + $0x14c] sm:$0xf0] }
 0x296   :  { %v10665_v37 = vor.u32 %v13080_v36, %v10664_v56  ;;  %v13581_v56 = vpop.eup %13580  ;;  %v10777_v36 = vor.u32 %v13108_v38, %v10776_v6  ;;  %v10504_v54 = vld [vmem:[#allocation8 + $0x40] sm:$0xf]  ;;  %v13036_v6 = vld [vmem:[#allocation8 + $0x2c] sm:$0xf0] }
 0x297   :  { %7526 = vmatpush.bf16.msra.mxu2 %v10825_v8  ;;  %v14271_v32 = vpop.f32.mrf.mxu1  ;;  %v4246_v8 = vadd.f32 %v4214_v29, %v14219_v20  ;;  %7499 = vmatpush.bf16.msra.mxu0 %v10553_v31  ;;  %v14289_v29 = vadd.f32 %v14179_v58, %v3701_v53  ;;  %v10904_v31 = vld [vmem:[#allocation8 + $0x360] sm:$0xf]  ;;  %v13040_v58 = vld [vmem:[#allocation8 + $0x4c] sm:$0xf0]  ;;  %v3689_v53 = vadd.f32 %v14185_v19, %v3675_v22  ;;  %v14303_v19 = vadd.f32 1.0, %v13581_v56 }
 0x298   :  { %v10632_v17 = vld [vmem:[#allocation8 + $0x140] sm:$0xf]  ;;  %v10505_v46 = vor.u32 %v13040_v58, %v10504_v54  ;;  %v4384_v56 = vmul.f32 %v14095_v33, %v14076_v11  ;;  %v3731_v58 = vadd.f32 %v14228_v24, %v632_v10  ;;  %v13032_v33 = vld [vmem:[#allocation8 + $0xc] sm:$0xf0] }
 0x299   :  { %7540 = vmatpush.bf16.msra.mxu3 %v10953_v25  ;;  %7513 = vmatpush.bf16.msra.mxu1 %v10681_v15  ;;  %v10520_v25 = vld [vmem:[#allocation8 + $0x60] sm:$0xf]  ;;  %v14291_v60 = vpop.f32.mrf.mxu2  ;;  %v13140_v15 = vld [vmem:[#allocation8 + $0x36c] sm:$0xf0]  ;;  %v4151_v59 = vmul.f32 0.044715, %v14289_v29  ;;  %v10633_v22 = vor.u32 %v13072_v63, %v10632_v17 }
 0x29a   :  { %v10521_v55 = vor.u32 %v13044_v47, %v10520_v25  ;;  %v10905_v21 = vor.u32 %v13140_v15, %v10904_v31  ;;  %v10760_v27 = vld [vmem:[#allocation8 + $0x240] sm:$0xf]  ;;  %v13136_v47 = vld [vmem:[#allocation8 + $0x34c] sm:$0xf0]  ;;  %v4383_v31 = vmul.f32 %v14063_v42, %v14054_v3 }
 0x29b   :  { %7527 = vmatpush.bf16.msra.mxu2 %v10809_v0  ;;  %v4278_v0 = vmul.f32 0.7978846, %v4246_v8  ;;  %7500 = vmatpush.bf16.msra.mxu0 %v10537_v50  ;;  %v13104_v8 = vld [vmem:[#allocation8 + $0x24c] sm:$0xf0]  ;;  %v10888_v25 = vld [vmem:[#allocation8 + $0x340] sm:$0xf]  ;;  %v4183_v3 = vmul.f32 %v4151_v59, %v14289_v29 }
 0x29c   :  { %v14298_v50 = vpop.f32.mrf.mxu3  ;;  %v10488_v49 = vld [vmem:[#allocation8 + $0x20] sm:$0xf] }
 0x29d   :  { %7541 = vmatpush.bf16.msra.mxu3 %v10937_v44  ;;  %v14294_v44 = vpop.f32.mrf.mxu0  ;;  %7514 = vmatpush.bf16.msra.mxu1 %v10665_v37  ;;  %v4367_v37 = vmul.f32 %v14060_v5, %v14005_v40  ;;  %13582 = vtanh.f32 %v4278_v0  ;;  %v10616_v38 = vld [vmem:[#allocation8 + $0x120] sm:$0xf]  ;;  %v3703_v40 = vadd.f32 %v14195_v1, %v3689_v53  ;;  %v10889_v5 = vor.u32 %v13136_v47, %v10888_v25  ;;  %v13100_v0 = vld [vmem:[#allocation8 + $0x22c] sm:$0xf0] }
 0x29e   :  { %v10744_v15 = vld [vmem:[#allocation8 + $0x220] sm:$0xf]  ;;  %13584 = vtanh.f32 %v4294_v26  ;;  %v13132_v1 = vld [vmem:[#allocation8 + $0x32c] sm:$0xf0]  ;;  %v4215_v47 = vmul.f32 %v4183_v3, %v14289_v29 }
 0x29f   :  { %7528 = vmatpush.bf16.msra.mxu2 %v10793_v16  ;;  %v3729_v16 = vadd.f32 %v14197_v57, %v632_v10  ;;  %7501 = vmatpush.bf16.msra.mxu0 %v10521_v55  ;;  %v14305_v7 = vpop.f32.mrf.mxu1  ;;  %v13068_v57 = vld [vmem:[#allocation8 + $0x12c] sm:$0xf0]  ;;  %v4368_v55 = vmul.f32 %v14078_v4, %v14073_v48  ;;  %v10872_v42 = vld [vmem:[#allocation8 + $0x320] sm:$0xf]  ;;  %v633_v48 = vperm.slane %v14215_v28, 2  ;;  %v10489_v4 = vor.u32 %v13036_v6, %v10488_v49 }
 0x2a0   :  { %v10472_v11 = vld [vmem:[#allocation8] sm:$0xf]  ;;  %v10745_v26 = vor.u32 %v13100_v0, %v10744_v15  ;;  %v10873_v10 = vor.u32 %v13132_v1, %v10872_v42  ;;  %v13128_v25 = vld [vmem:[#allocation8 + $0x30c] sm:$0xf0] }
 0x2a1   :  { %7542 = vmatpush.bf16.msra.mxu3 %v10921_v18  ;;  %7515 = vmatpush.bf16.msra.mxu1 %v10649_v41  ;;  %v10761_v18 = vor.u32 %v13104_v8, %v10760_v27  ;;  %v14315_v41 = vmul.f32 0.5, %v14219_v20  ;;  %v3743_v54 = vadd.f32 %v14210_v35, %v3729_v16  ;;  %v14324_v20 = vpop.f32.mrf.mxu2  ;;  %v10600_v53 = vld [vmem:[#allocation8 + $0x100] sm:$0xf]  ;;  %v14802_v27 = vld [vmem:[#allocation25_spill] sm:$0xff]  ;;  %v14334_v49 = vpack.c.bf16 %v4384_v56, %v4368_v55 }
 0x2a2   :  { %v10728_v63 = vld [vmem:[#allocation8 + $0x200] sm:$0xf]  ;;  %v14329_v24 = vadd.f32 %v14802_v27, %v3703_v40  ;;  %v13096_v8 = vld [vmem:[#allocation8 + $0x20c] sm:$0xf0]  ;;  %v3785_v40 = vadd.f32 %v14256_v45, %v633_v48  ;;  %v3787_v27 = vadd.f32 %v14294_v44, %v633_v48  ;;  %v14805_v44 = vld [vmem:[#allocation16_spill] sm:$0xff] }
 0x2a3   :  { %7529 = vmatpush.bf16.msra.mxu2 %v10777_v36  ;;  %14800 = vst [vmem:[#allocation28_spill] sm:$0xff] %v14315_v41  ;;  %v14318_v36 = vmul.f32 0.5, %v14222_v9  ;;  %7502 = vmatpush.bf16.msra.mxu0 %v10505_v46  ;;  %v10617_v9 = vor.u32 %v13068_v57, %v10616_v38  ;;  %v13583_v35 = vpop.eup %13582  ;;  %v10856_v59 = vld [vmem:[#allocation8 + $0x300] sm:$0xf]  ;;  %v13188_v46 = vld [vmem:[#allocation8 + $0x4ec] sm:$0xf0]  ;;  %v3745_v57 = vadd.f32 %v14242_v2, %v3731_v58 }
 0x2a4   :  { %v11096_v16 = vld [vmem:[#allocation8 + $0x4e0] sm:$0xf]  ;;  %v13220_v15 = vld [vmem:[#allocation8 + $0x5ec] sm:$0xf0]  ;;  %v13585_v1 = vpop.eup %13584  ;;  %v14339_v3 = vadd.f32 1.0, %v13583_v35  ;;  %v10729_v2 = vor.u32 %v13096_v8, %v10728_v63  ;;  %v634_v58 = vperm.slane %v14215_v28, 3 }
 0x2a5   :  { %7543 = vmatpush.bf16.msra.mxu3 %v10905_v21  ;;  %14801 = vst [vmem:[#allocation29_spill] sm:$0xff] %v14318_v36  ;;  %v14326_v17 = vpop.f32.mrf.mxu0  ;;  %7516 = vmatpush.bf16.msra.mxu1 %v10633_v22  ;;  %v13064_v21 = vld [vmem:[#allocation8 + $0x10c] sm:$0xf0]  ;;  %v11224_v22 = vld [vmem:[#allocation8 + $0x5e0] sm:$0xf]  ;;  %v14807_v36 = vld [vmem:[#allocation18_spill] sm:$0xff] }
 0x2a6   :  { %v14803_v6 = vld [vmem:[#allocation27_spill] sm:$0xff]  ;;  %v13252_v42 = vld [vmem:[#allocation8 + $0x6ec] sm:$0xf0]  ;;  %14804 = vst [vmem:[#allocation25_spill] sm:$0xff] %v14339_v3  ;;  %v10601_v55 = vor.u32 %v13064_v21, %v10600_v53  ;;  %v14808_v3 = vld [vmem:[#allocation20_spill] sm:$0xff] }
 0x2a7   :  { %7530 = vmatpush.bf16.msra.mxu2 %v10761_v18  ;;  %v14332_v18 = vpack.c.bf16 %v4383_v31, %v4367_v37  ;;  %v3757_v38 = vadd.f32 %v14803_v6, %v3743_v54  ;;  %7503 = vmatpush.bf16.msra.mxu0 %v10489_v4  ;;  %v11352_v0 = vld [vmem:[#allocation8 + $0x6e0] sm:$0xf]  ;;  %v14342_v37 = vpop.f32.mrf.mxu3  ;;  %v14344_v31 = vpop.f32.mrf.mxu1  ;;  %v13284_v45 = vld [vmem:[#allocation8 + $0x7ec] sm:$0xf0]  ;;  %v4167_v54 = vmul.f32 0.044715, %v14329_v24  ;;  %v10857_v4 = vor.u32 %v13128_v25, %v10856_v59 }
 0x2a8   :  { %v11480_v56 = vld [vmem:[#allocation8 + $0x7e0] sm:$0xf]  ;;  %v11353_v35 = vor.u32 %v13252_v42, %v11352_v0  ;;  %v14806_v48 = vld [vmem:[#allocation17_spill] sm:$0xff]  ;;  %v14811_v25 = vld [vmem:[#allocation22_spill] sm:$0xff]  ;;  %v3759_v42 = vadd.f32 %v14254_v30, %v3745_v57 }
 0x2a9   :  { %7544 = vmatpush.bf16.msra.mxu3 %v10889_v5  ;;  %v10473_v5 = vor.u32 %v13032_v33, %v10472_v11  ;;  %7517 = vmatpush.bf16.msra.mxu1 %v10617_v9  ;;  %v11097_v11 = vor.u32 %v13188_v46, %v11096_v16  ;;  %v11225_v33 = vor.u32 %v13220_v15, %v11224_v22  ;;  %v13184_v53 = vld [vmem:[#allocation8 + $0x4cc] sm:$0xf0]  ;;  %v11208_v21 = vld [vmem:[#allocation8 + $0x5c0] sm:$0xf] }
 0x2aa   :  { %v4369_v6 = vmul.f32 %v14806_v48, %v14805_v44  ;;  %v4385_v9 = vmul.f32 %v14808_v3, %v14807_v36  ;;  %v14353_v63 = vadd.f32 %v14233_v51, %v3757_v38  ;;  %v11481_v8 = vor.u32 %v13284_v45, %v11480_v56  ;;  %v14809_v41 = vld [vmem:[#allocation19_spill] sm:$0xff]  ;;  %v13216_v22 = vld [vmem:[#allocation8 + $0x5cc] sm:$0xf0]  ;;  %v14362_v44 = vpop.f32.mrf.mxu2 }
 0x2ab   :  { %7531 = vmatpush.bf16.msra.mxu2 %v10745_v26  ;;  %v11080_v26 = vld [vmem:[#allocation8 + $0x4c0] sm:$0xf]  ;;  %7504 = vmatpush.bf16.msra.mxu0 %v10473_v5  ;;  %v13248_v0 = vld [vmem:[#allocation8 + $0x6cc] sm:$0xf0]  ;;  %v3799_v36 = vadd.f32 %v14271_v32, %v3785_v40  ;;  %v3801_v3 = vadd.f32 %v14305_v7, %v3787_v27  ;;  %v14364_v5 = vadd.f32 1.0, %v13585_v1  ;;  %v4247_v56 = vadd.f32 %v4215_v47, %v14289_v29 }
 0x2ac   :  { %v14812_v16 = vld [vmem:[#allocation23_spill] sm:$0xff]  ;;  %v13280_v38 = vld [vmem:[#allocation8 + $0x7cc] sm:$0xf0]  ;;  %v3841_v45 = vadd.f32 %v14326_v17, %v634_v58  ;;  %v11081_v30 = vor.u32 %v13184_v53, %v11080_v26  ;;  %v14371_v7 = vpack.c.bf16 %v4385_v9, %v4369_v6  ;;  %v11209_v57 = vor.u32 %v13216_v22, %v11208_v21 }
 0x2ad   :  { %7545 = vmatpush.bf16.msra.mxu3 %v10873_v10  ;;  %v14810_v10 = vld [vmem:[#allocation21_spill] sm:$0xff]  ;;  %v4386_v46 = vmul.f32 %v14812_v16, %v14811_v25  ;;  %v11336_v15 = vld [vmem:[#allocation8 + $0x6c0] sm:$0xf]  ;;  %7518 = vmatpush.bf16.msra.mxu1 %v10601_v55  ;;  %v3842_v32 = vpop.f32.mrf.mxu0  ;;  %v3813_v48 = vadd.f32 %v14291_v60, %v3799_v36  ;;  %v3815_v6 = vadd.f32 %v14324_v20, %v3801_v3  ;;  %v14385_v53 = vmul.f32 0.7978846, %v4247_v56 }
 0x2ae   :  { %v4370_v59 = vmul.f32 %v14810_v10, %v14809_v41  ;;  %v11464_v51 = vld [vmem:[#allocation8 + $0x7c0] sm:$0xf]  ;;  %v14367_v41 = vmul.f32 0.5, %v14289_v29  ;;  %v11337_v40 = vor.u32 %v13248_v0, %v11336_v15  ;;  %v13180_v1 = vld [vmem:[#allocation8 + $0x4ac] sm:$0xf0]  ;;  %7505 = vmatmul.bf16.vlgmr.msra.gmra.mxu0 %v14332_v18  ;;  %v3855_v21 = vadd.f32 %v14344_v31, %v3841_v45 }
 0x2af   :  { %7532 = vmatpush.bf16.msra.mxu2 %v10729_v2  ;;  %7553 = vmatpush.bf16.msrb.mxu0 %v11097_v11  ;;  %v11064_v27 = vld [vmem:[#allocation8 + $0x4a0] sm:$0xf]  ;;  %v4199_v2 = vmul.f32 %v4167_v54, %v14329_v24  ;;  %v11465_v17 = vor.u32 %v13280_v38, %v11464_v51  ;;  %v13212_v47 = vld [vmem:[#allocation8 + $0x5ac] sm:$0xf0]  ;;  %v3882_v9 = vpop.f32.mrf.mxu3  ;;  %v3856_v10 = vpop.f32.mrf.mxu1  ;;  %v14393_v36 = vadd.f32 %v14298_v50, %v3813_v48  ;;  %13586 = vtanh.f32 %v14385_v53 }
 0x2b0   :  { %v11192_v55 = vld [vmem:[#allocation8 + $0x5a0] sm:$0xf]  ;;  %v14375_v29 = vpack.c.bf16 %v4386_v46, %v4370_v59  ;;  %v13244_v11 = vld [vmem:[#allocation8 + $0x6ac] sm:$0xf0]  ;;  %7519 = vmatmul.bf16.vlgmr.msra.gmra.mxu1 %v14334_v49  ;;  %v14396_v38 = vadd.f32 %v14342_v37, %v3815_v6  ;;  %v3869_v56 = vadd.f32 %v14362_v44, %v3855_v21 }
 0x2b1   :  { %7546 = vmatpush.bf16.msra.mxu3 %v10857_v4  ;;  %7567 = vmatpush.bf16.msrb.mxu1 %v11225_v33  ;;  %v11320_v4 = vld [vmem:[#allocation8 + $0x6a0] sm:$0xf]  ;;  %v4152_v33 = vmul.f32 0.044715, %v14353_v63  ;;  %v13276_v26 = vld [vmem:[#allocation8 + $0x7ac] sm:$0xf0]  ;;  %v11193_v60 = vor.u32 %v13212_v47, %v11192_v55  ;;  %v4231_v31 = vmul.f32 %v4199_v2, %v14329_v24 }
 0x2b2   :  { %7533 = vmatmul.bf16.vlgmr.msra.gmra.mxu2 %v14371_v7  ;;  %v11448_v54 = vld [vmem:[#allocation8 + $0x7a0] sm:$0xf]  ;;  %v11321_v20 = vor.u32 %v13244_v11, %v11320_v4  ;;  %v13176_v25 = vld [vmem:[#allocation8 + $0x48c] sm:$0xf0]  ;;  %v4153_v11 = vmul.f32 0.044715, %v14393_v36 }
 0x2b3   :  { %7581 = vmatpush.bf16.msrb.mxu2 %v11353_v35  ;;  %v14379_v35 = vadd.f32 %v14269_v62, %v3759_v42  ;;  %7554 = vmatpush.bf16.msrb.mxu0 %v11081_v30  ;;  %v11065_v62 = vor.u32 %v13180_v1, %v11064_v27  ;;  %v11048_v59 = vld [vmem:[#allocation8 + $0x480] sm:$0xf]  ;;  %v11449_v46 = vor.u32 %v13276_v26, %v11448_v54  ;;  %v13208_v22 = vld [vmem:[#allocation8 + $0x58c] sm:$0xf0]  ;;  %v4169_v6 = vmul.f32 0.044715, %v14396_v38 }
 0x2b4   :  { %7547 = vmatmul.bf16.vlgmr.msra.gmra.mxu3 %v14375_v29  ;;  %v11176_v16 = vld [vmem:[#allocation8 + $0x580] sm:$0xf]  ;;  %v13240_v0 = vld [vmem:[#allocation8 + $0x68c] sm:$0xf0]  ;;  %v11049_v30 = vor.u32 %v13176_v25, %v11048_v59  ;;  %v4263_v37 = vadd.f32 %v4231_v31, %v14329_v24  ;;  %v14404_v54 = vadd.f32 %v3882_v9, %v3869_v56 }
 0x2b5   :  { %7595 = vmatpush.bf16.msrb.mxu3 %v11481_v8  ;;  %v3843_v8 = vadd.f32 %v3842_v32, %v634_v58  ;;  %7568 = vmatpush.bf16.msrb.mxu1 %v11209_v57  ;;  %v11304_v15 = vld [vmem:[#allocation8 + $0x680] sm:$0xf]  ;;  %v4184_v58 = vmul.f32 %v4152_v33, %v14353_v63  ;;  %v4168_v42 = vmul.f32 0.044715, %v14379_v35  ;;  %v13272_v51 = vld [vmem:[#allocation8 + $0x78c] sm:$0xf0]  ;;  %v3870_v32 = vpop.f32.mrf.mxu2  ;;  %v11177_v57 = vor.u32 %v13208_v22, %v11176_v16 }
 0x2b6   :  { %v11432_v3 = vld [vmem:[#allocation8 + $0x780] sm:$0xf]  ;;  %v13172_v1 = vld [vmem:[#allocation8 + $0x46c] sm:$0xf0] }
 0x2b7   :  { %7582 = vmatpush.bf16.msrb.mxu2 %v11337_v40  ;;  %v3857_v45 = vadd.f32 %v3856_v10, %v3843_v8  ;;  %7555 = vmatpush.bf16.msrb.mxu0 %v11065_v62  ;;  %v11305_v40 = vor.u32 %v13240_v0, %v11304_v15  ;;  %v11032_v27 = vld [vmem:[#allocation8 + $0x460] sm:$0xf]  ;;  %v11433_v50 = vor.u32 %v13272_v51, %v11432_v3  ;;  %v13204_v2 = vld [vmem:[#allocation8 + $0x56c] sm:$0xf0]  ;;  %v3884_v8 = vpop.f32.mrf.mxu3  ;;  %v14406_v15 = vmul.f32 0.7978846, %v4263_v37 }
 0x2b8   :  { %v11160_v55 = vld [vmem:[#allocation8 + $0x560] sm:$0xf]  ;;  %v13236_v47 = vld [vmem:[#allocation8 + $0x66c] sm:$0xf0]  ;;  %v4216_v44 = vmul.f32 %v4184_v58, %v14353_v63  ;;  %v4200_v4 = vmul.f32 %v4168_v42, %v14379_v35  ;;  %v11033_v21 = vor.u32 %v13172_v1, %v11032_v27  ;;  %v4185_v42 = vmul.f32 %v4153_v11, %v14393_v36  ;;  %v14415_v1 = vpop.f32.mrf.mxu0 }
 0x2b9   :  { %7596 = vmatpush.bf16.msrb.mxu3 %v11465_v17  ;;  %7569 = vmatpush.bf16.msrb.mxu1 %v11193_v60  ;;  %v11288_v17 = vld [vmem:[#allocation8 + $0x660] sm:$0xf]  ;;  %v13268_v48 = vld [vmem:[#allocation8 + $0x76c] sm:$0xf0]  ;;  %v3871_v26 = vadd.f32 %v3870_v32, %v3857_v45  ;;  %v11161_v62 = vor.u32 %v13204_v2, %v11160_v55  ;;  %v4154_v3 = vmul.f32 0.044715, %v14404_v54  ;;  %v4201_v45 = vmul.f32 %v4169_v6, %v14396_v38 }
 0x2ba   :  { %v11416_v33 = vld [vmem:[#allocation8 + $0x760] sm:$0xf]  ;;  %v11289_v10 = vor.u32 %v13236_v47, %v11288_v17  ;;  %v13200_v16 = vld [vmem:[#allocation8 + $0x54c] sm:$0xf0]  ;;  %v4248_v9 = vadd.f32 %v4216_v44, %v14353_v63  ;;  %v4232_v0 = vmul.f32 %v4200_v4, %v14379_v35  ;;  %v4217_v11 = vmul.f32 %v4185_v42, %v14393_v36 }
 0x2bb   :  { %7583 = vmatpush.bf16.msrb.mxu2 %v11321_v20  ;;  %7556 = vmatpush.bf16.msrb.mxu0 %v11049_v30  ;;  %v11016_v60 = vld [vmem:[#allocation8 + $0x440] sm:$0xf]  ;;  %v13168_v20 = vld [vmem:[#allocation8 + $0x44c] sm:$0xf0]  ;;  %v11417_v25 = vor.u32 %v13268_v48, %v11416_v33  ;;  %v14412_v51 = vadd.f32 %v3884_v8, %v3871_v26  ;;  %v14423_v8 = vpop.f32.mrf.mxu1  ;;  %13588 = vtanh.f32 %v14406_v15 }
 0x2bc   :  { %v11144_v59 = vld [vmem:[#allocation8 + $0x540] sm:$0xf]  ;;  %v13232_v22 = vld [vmem:[#allocation8 + $0x64c] sm:$0xf0]  ;;  %v11017_v56 = vor.u32 %v13168_v20, %v11016_v60  ;;  %v14417_v47 = vmul.f32 0.7978846, %v4248_v9  ;;  %v4264_v4 = vadd.f32 %v4232_v0, %v14379_v35 }
 0x2bd   :  { %7597 = vmatpush.bf16.msrb.mxu3 %v11449_v46  ;;  %7570 = vmatpush.bf16.msrb.mxu1 %v11177_v57  ;;  %v11272_v46 = vld [vmem:[#allocation8 + $0x640] sm:$0xf]  ;;  %v13264_v58 = vld [vmem:[#allocation8 + $0x74c] sm:$0xf0]  ;;  %v11145_v30 = vor.u32 %v13200_v16, %v11144_v59  ;;  %v4170_v33 = vmul.f32 0.044715, %v14412_v51 }
 0x2be   :  { %v11400_v31 = vld [vmem:[#allocation8 + $0x740] sm:$0xf]  ;;  %v11273_v32 = vor.u32 %v13232_v22, %v11272_v46  ;;  %v13228_v17 = vld [vmem:[#allocation8 + $0x62c] sm:$0xf0]  ;;  %v14813_v0 = vld [vmem:[#allocation24_spill] sm:$0xff]  ;;  %13590 = vtanh.f32 %v14417_v47 }
 0x2bf   :  { %7584 = vmatpush.bf16.msrb.mxu2 %v11305_v40  ;;  %7557 = vmatpush.bf16.msrb.mxu0 %v11033_v21  ;;  %v11000_v57 = vld [vmem:[#allocation8 + $0x420] sm:$0xf]  ;;  %v13164_v40 = vld [vmem:[#allocation8 + $0x42c] sm:$0xf0]  ;;  %v11401_v55 = vor.u32 %v13264_v58, %v11400_v31  ;;  %v4233_v21 = vmul.f32 %v4201_v45, %v14396_v38  ;;  %v4371_v31 = vmul.f32 %v14236_v52, %v14813_v0  ;;  %v14814_v58 = vld [vmem:[#allocation26_spill] sm:$0xff] }
 0x2c0   :  { %v11128_v27 = vld [vmem:[#allocation8 + $0x520] sm:$0xf]  ;;  %v13260_v44 = vld [vmem:[#allocation8 + $0x72c] sm:$0xf0]  ;;  %v11001_v48 = vor.u32 %v13164_v40, %v11000_v57  ;;  %v4387_v42 = vmul.f32 %v14244_v12, %v14814_v58  ;;  %v4373_v57 = vmul.f32 %v14283_v39, %v14276_v23  ;;  %v4389_v40 = vmul.f32 %v14303_v19, %v14286_v14 }
 0x2c1   :  { %7598 = vmatpush.bf16.msrb.mxu3 %v11433_v50  ;;  %7571 = vmatpush.bf16.msrb.mxu1 %v11161_v62  ;;  %v13196_v50 = vld [vmem:[#allocation8 + $0x52c] sm:$0xf0]  ;;  %v11256_v2 = vld [vmem:[#allocation8 + $0x620] sm:$0xf]  ;;  %v4249_v52 = vadd.f32 %v4217_v11, %v14393_v36  ;;  %v4202_v12 = vmul.f32 %v4170_v33, %v14412_v51  ;;  %v14815_v33 = vld [vmem:[#allocation28_spill] sm:$0xff] }
 0x2c2   :  { %v11384_v37 = vld [vmem:[#allocation8 + $0x720] sm:$0xf]  ;;  %v13160_v26 = vld [vmem:[#allocation8 + $0x40c] sm:$0xf0]  ;;  %v11129_v62 = vor.u32 %v13196_v50, %v11128_v27  ;;  %v14458_v58 = vpack.c.bf16 %v4389_v40, %v4373_v57 }
 0x2c3   :  { %7585 = vmatpush.bf16.msrb.mxu2 %v11289_v10  ;;  %7558 = vmatpush.bf16.msrb.mxu0 %v11017_v56  ;;  %v10984_v6 = vld [vmem:[#allocation8 + $0x400] sm:$0xf]  ;;  %v11257_v10 = vor.u32 %v13228_v17, %v11256_v2  ;;  %v13192_v20 = vld [vmem:[#allocation8 + $0x50c] sm:$0xf0]  ;;  %v11385_v16 = vor.u32 %v13260_v44, %v11384_v37  ;;  %v635_v2 = vperm.slane %v14215_v28, 4  ;;  %v14446_v17 = vpop.f32.mrf.mxu3 }
 0x2c4   :  { %v11112_v60 = vld [vmem:[#allocation8 + $0x500] sm:$0xf]  ;;  %v13224_v46 = vld [vmem:[#allocation8 + $0x60c] sm:$0xf0]  ;;  %v10985_v27 = vor.u32 %v13160_v26, %v10984_v6 }
 0x2c5   :  { %7599 = vmatpush.bf16.msrb.mxu3 %v11417_v25  ;;  %7572 = vmatpush.bf16.msrb.mxu1 %v11145_v30  ;;  %v11240_v59 = vld [vmem:[#allocation8 + $0x600] sm:$0xf]  ;;  %v4186_v25 = vmul.f32 %v4154_v3, %v14404_v54  ;;  %v13256_v9 = vld [vmem:[#allocation8 + $0x70c] sm:$0xf0]  ;;  %v4388_v3 = vmul.f32 %v14273_v34, %v14261_v61  ;;  %v4265_v61 = vadd.f32 %v4233_v21, %v14396_v38  ;;  %v14442_v34 = vpop.f32.mrf.mxu2 }
 0x2c6   :  { %v11368_v22 = vld [vmem:[#allocation8 + $0x700] sm:$0xf]  ;;  %v13316_v45 = vld [vmem:[#allocation8 + $0x8ec] sm:$0xf0]  ;;  %v11113_v23 = vor.u32 %v13192_v20, %v11112_v60  ;;  %v11241_v39 = vor.u32 %v13224_v46, %v11240_v59  ;;  %v3898_v60 = vpop.f32.mrf.mxu0 }
 0x2c7   :  { %7586 = vmatpush.bf16.msrb.mxu2 %v11273_v32  ;;  %v11608_v56 = vld [vmem:[#allocation8 + $0x8e0] sm:$0xf]  ;;  %v4372_v32 = vmul.f32 %v14266_v13, %v14247_v43  ;;  %7559 = vmatpush.bf16.msrb.mxu0 %v11001_v48  ;;  %v13380_v43 = vld [vmem:[#allocation8 + $0xaec] sm:$0xf0]  ;;  %v4296_v13 = vmul.f32 0.7978846, %v4264_v4  ;;  %v4218_v53 = vmul.f32 %v4186_v25, %v14404_v54  ;;  %v11369_v37 = vor.u32 %v13256_v9, %v11368_v22 }
 0x2c8   :  { %v11736_v30 = vld [vmem:[#allocation8 + $0x9e0] sm:$0xf]  ;;  %v13412_v19 = vld [vmem:[#allocation8 + $0xbec] sm:$0xf0]  ;;  %v11609_v44 = vor.u32 %v13316_v45, %v11608_v56  ;;  %v4281_v22 = vmul.f32 0.7978846, %v4249_v52  ;;  %v14454_v9 = vpack.c.bf16 %v4387_v42, %v4371_v31  ;;  %v13587_v45 = vpop.eup %13586  ;;  %v3899_v52 = vadd.f32 %v3898_v60, %v635_v2  ;;  %v3912_v31 = vpop.f32.mrf.mxu1 }
 0x2c9   :  { %7600 = vmatpush.bf16.msrb.mxu3 %v11401_v55  ;;  %v13348_v55 = vld [vmem:[#allocation8 + $0x9ec] sm:$0xf0]  ;;  %v11864_v50 = vld [vmem:[#allocation8 + $0xae0] sm:$0xf]  ;;  %7573 = vmatpush.bf16.msrb.mxu1 %v11129_v62  ;;  %v14456_v0 = vpack.c.bf16 %v4388_v3, %v4372_v32  ;;  %13592 = vtanh.f32 %v4296_v13 }
 0x2ca   :  { %v11992_v14 = vld [vmem:[#allocation8 + $0xbe0] sm:$0xf]  ;;  %v11737_v4 = vor.u32 %v13348_v55, %v11736_v30  ;;  %v11865_v11 = vor.u32 %v13380_v43, %v11864_v50  ;;  %v14816_v48 = vld [vmem:[#allocation25_spill] sm:$0xff]  ;;  %v4297_v30 = vmul.f32 0.7978846, %v4265_v61  ;;  %13594 = vtanh.f32 %v4281_v22 }
 0x2cb   :  { %7587 = vmatpush.bf16.msrb.mxu2 %v11257_v10  ;;  %v4374_v6 = vmul.f32 %v14816_v48, %v14815_v33  ;;  %v11592_v26 = vld [vmem:[#allocation8 + $0x8c0] sm:$0xf]  ;;  %v13312_v21 = vld [vmem:[#allocation8 + $0x8cc] sm:$0xf0]  ;;  %v4234_v10 = vmul.f32 %v4202_v12, %v14412_v51  ;;  %7560 = vmatpush.bf16.msrb.mxu0 %v10985_v27  ;;  %v11993_v28 = vor.u32 %v13412_v19, %v11992_v14  ;;  %v13589_v19 = vpop.eup %13588 }
 0x2cc   :  { %v11720_v62 = vld [vmem:[#allocation8 + $0x9c0] sm:$0xf]  ;;  %v14817_v20 = vld [vmem:[#allocation29_spill] sm:$0xff]  ;;  %v4250_v12 = vadd.f32 %v4218_v53, %v14404_v54  ;;  %v11593_v27 = vor.u32 %v13312_v21, %v11592_v26  ;;  %v14476_v21 = vld [vmem:[#allocation7 + $0x8] sm:$0xff]  ;;  %13596 = vtanh.f32 %v4297_v30  ;;  %v14482_v22 = vadd.f32 1.0, %v13589_v19 }
 0x2cd   :  { %7601 = vmatpush.bf16.msrb.mxu3 %v11385_v16  ;;  %v4390_v59 = vmul.f32 %v14364_v5, %v14817_v20  ;;  %v13344_v25 = vld [vmem:[#allocation8 + $0x9cc] sm:$0xf0]  ;;  %v11848_v16 = vld [vmem:[#allocation8 + $0xac0] sm:$0xf]  ;;  %7574 = vmatpush.bf16.msrb.mxu1 %v11113_v23  ;;  %v3897_v5 = vadd.f32 %v14415_v1, %v635_v2  ;;  %v4266_v55 = vadd.f32 %v4234_v10, %v14412_v51  ;;  %v14467_v23 = vadd.f32 1.0, %v13587_v45  ;;  %v3940_v10 = vpop.f32.mrf.mxu3 }
 0x2ce   :  { %v13376_v46 = vld [vmem:[#allocation8 + $0xacc] sm:$0xf0]  ;;  %v11976_v15 = vld [vmem:[#allocation8 + $0xbc0] sm:$0xf]  ;;  %v11721_v42 = vor.u32 %v13344_v25, %v11720_v62  ;;  %7561 = vmatmul.bf16.vlgmr.msrb.gmra.mxu0 %v14454_v9  ;;  %v4282_v53 = vmul.f32 0.7978846, %v4250_v12 }
 0x2cf   :  { %7588 = vmatpush.bf16.msrb.mxu2 %v11241_v39  ;;  %v13408_v56 = vld [vmem:[#allocation8 + $0xbcc] sm:$0xf0]  ;;  %7609 = vmatpush.bf16.msra.mxu0 %v11609_v44  ;;  %v11849_v32 = vor.u32 %v13376_v46, %v11848_v16  ;;  %v11576_v3 = vld [vmem:[#allocation8 + $0x8a0] sm:$0xf]  ;;  %v14465_v1 = vpack.c.bf16 %v4390_v59, %v4374_v6  ;;  %v14470_v39 = vmul.f32 0.5, %v14329_v24  ;;  %v3911_v2 = vadd.f32 %v14423_v8, %v3897_v5  ;;  %v3926_v24 = vpop.f32.mrf.mxu2  ;;  %v13591_v59 = vpop.eup %13590 }
 0x2d0   :  { %v13308_v57 = vld [vmem:[#allocation8 + $0x8ac] sm:$0xf0]  ;;  %v11704_v40 = vld [vmem:[#allocation8 + $0x9a0] sm:$0xf]  ;;  %v11977_v50 = vor.u32 %v13408_v56, %v11976_v15  ;;  %7575 = vmatmul.bf16.vlgmr.msrb.gmra.mxu1 %v14456_v0  ;;  %v636_v62 = vperm.slane %v14476_v21, 5  ;;  %v14480_v25 = vmul.f32 0.5, %v14353_v63  ;;  %v13593_v15 = vpop.eup %13592  ;;  %v3952_v5 = vpop.f32.mrf.mxu0  ;;  %13598 = vtanh.f32 %v4282_v53 }
 0x2d1   :  { %7602 = vmatpush.bf16.msrb.mxu3 %v11369_v37  ;;  %7623 = vmatpush.bf16.msra.mxu1 %v11737_v4  ;;  %v13340_v43 = vld [vmem:[#allocation8 + $0x9ac] sm:$0xf0]  ;;  %v11832_v47 = vld [vmem:[#allocation8 + $0xaa0] sm:$0xf]  ;;  %v11577_v37 = vor.u32 %v13308_v57, %v11576_v3  ;;  %v4298_v8 = vmul.f32 0.7978846, %v4266_v55  ;;  %v3925_v45 = vadd.f32 %v14442_v34, %v3911_v2 }
 0x2d2   :  { %v13372_v61 = vld [vmem:[#allocation8 + $0xaac] sm:$0xf0]  ;;  %7589 = vmatmul.bf16.vlgmr.msrb.gmra.mxu2 %v14458_v58  ;;  %v11960_v13 = vld [vmem:[#allocation8 + $0xba0] sm:$0xf]  ;;  %v11705_v33 = vor.u32 %v13340_v43, %v11704_v40  ;;  %v14485_v56 = vmul.f32 0.5, %v14379_v35  ;;  %v13595_v35 = vpop.eup %13594  ;;  %v14495_v19 = vmul.f32 0.5, %v14393_v36 }
 0x2d3   :  { %7637 = vmatpush.bf16.msra.mxu2 %v11865_v11  ;;  %v13404_v14 = vld [vmem:[#allocation8 + $0xbac] sm:$0xf0]  ;;  %7610 = vmatpush.bf16.msra.mxu0 %v11593_v27  ;;  %v11560_v44 = vld [vmem:[#allocation8 + $0x880] sm:$0xf]  ;;  %v3913_v11 = vadd.f32 %v3912_v31, %v3899_v52  ;;  %v11833_v48 = vor.u32 %v13372_v61, %v11832_v47  ;;  %v3953_v52 = vadd.f32 %v3952_v5, %v636_v62  ;;  %v3966_v31 = vpop.f32.mrf.mxu1  ;;  %13600 = vtanh.f32 %v4298_v8 }
 0x2d4   :  { %7603 = vmatmul.bf16.vlgmr.msrb.gmra.mxu3 %v14465_v1  ;;  %v13304_v4 = vld [vmem:[#allocation8 + $0x88c] sm:$0xf0]  ;;  %v11688_v6 = vld [vmem:[#allocation8 + $0x980] sm:$0xf]  ;;  %v11961_v60 = vor.u32 %v13404_v14, %v11960_v13  ;;  %v14492_v13 = vadd.f32 1.0, %v13593_v15  ;;  %v13597_v14 = vpop.eup %13596  ;;  %v14498_v53 = vmul.f32 0.5, %v14396_v38  ;;  %v14501_v2 = vadd.f32 %v14446_v17, %v3925_v45 }
 0x2d5   :  { %7651 = vmatpush.bf16.msra.mxu3 %v11993_v28  ;;  %7624 = vmatpush.bf16.msra.mxu1 %v11721_v42  ;;  %v13336_v26 = vld [vmem:[#allocation8 + $0x98c] sm:$0xf0]  ;;  %v11816_v28 = vld [vmem:[#allocation8 + $0xa80] sm:$0xf]  ;;  %v11561_v30 = vor.u32 %v13304_v4, %v11560_v44  ;;  %v3927_v27 = vadd.f32 %v3926_v24, %v3913_v11  ;;  %v3967_v43 = vadd.f32 %v3966_v31, %v3953_v52  ;;  %v3994_v38 = vpop.f32.mrf.mxu3  ;;  %v4122_v15 = vmul.f32 0.5, %v14404_v54 }
 0x2d6   :  { %v13368_v20 = vld [vmem:[#allocation8 + $0xa8c] sm:$0xf0]  ;;  %v11944_v16 = vld [vmem:[#allocation8 + $0xb80] sm:$0xf]  ;;  %v11689_v12 = vor.u32 %v13336_v26, %v11688_v6  ;;  %v14507_v45 = vmul.f32 0.5, %v14412_v51 }
 0x2d7   :  { %7638 = vmatpush.bf16.msra.mxu2 %v11849_v32  ;;  %v13400_v46 = vld [vmem:[#allocation8 + $0xb8c] sm:$0xf0]  ;;  %7611 = vmatpush.bf16.msra.mxu0 %v11577_v37  ;;  %v11817_v63 = vor.u32 %v13368_v20, %v11816_v28  ;;  %v11544_v42 = vld [vmem:[#allocation8 + $0x860] sm:$0xf]  ;;  %v14503_v44 = vadd.f32 %v3940_v10, %v3927_v27  ;;  %v3980_v24 = vpop.f32.mrf.mxu2  ;;  %v13599_v28 = vpop.eup %13598  ;;  %v4345_v20 = vadd.f32 1.0, %v13595_v35 }
 0x2d8   :  { %v13300_v32 = vld [vmem:[#allocation8 + $0x86c] sm:$0xf0]  ;;  %v11672_v3 = vld [vmem:[#allocation8 + $0x960] sm:$0xf]  ;;  %v11945_v34 = vor.u32 %v13400_v46, %v11944_v16  ;;  %v3981_v26 = vadd.f32 %v3980_v24, %v3967_v43  ;;  %v4361_v16 = vadd.f32 1.0, %v13597_v14  ;;  %v3954_v5 = vpop.f32.mrf.mxu0 }
 0x2d9   :  { %7652 = vmatpush.bf16.msra.mxu3 %v11977_v50  ;;  %7625 = vmatpush.bf16.msra.mxu1 %v11705_v33  ;;  %v13332_v57 = vld [vmem:[#allocation8 + $0x96c] sm:$0xf0]  ;;  %v11800_v40 = vld [vmem:[#allocation8 + $0xa60] sm:$0xf]  ;;  %v14490_v50 = vadd.f32 1.0, %v13591_v59  ;;  %v11545_v37 = vor.u32 %v13300_v32, %v11544_v42  ;;  %v13601_v46 = vpop.eup %13600  ;;  %v3955_v42 = vadd.f32 %v3954_v5, %v636_v62  ;;  %v4392_v5 = vmul.f32 %v14492_v13, %v14485_v56 }
 0x2da   :  { %v13364_v55 = vld [vmem:[#allocation8 + $0xa6c] sm:$0xf0]  ;;  %v11928_v47 = vld [vmem:[#allocation8 + $0xb60] sm:$0xf]  ;;  %v11673_v4 = vor.u32 %v13332_v57, %v11672_v3  ;;  %v14513_v51 = vadd.f32 %v3994_v38, %v3981_v26  ;;  %v4362_v14 = vadd.f32 1.0, %v13601_v46 }
 0x2db   :  { %7639 = vmatpush.bf16.msra.mxu2 %v11833_v48  ;;  %v13396_v61 = vld [vmem:[#allocation8 + $0xb6c] sm:$0xf0]  ;;  %7612 = vmatpush.bf16.msra.mxu0 %v11561_v30  ;;  %v11801_v11 = vor.u32 %v13364_v55, %v11800_v40  ;;  %v11528_v33 = vld [vmem:[#allocation8 + $0x840] sm:$0xf]  ;;  %v4155_v30 = vmul.f32 0.044715, %v14501_v2  ;;  %v3968_v32 = vpop.f32.mrf.mxu1 }
 0x2dc   :  { %v13296_v48 = vld [vmem:[#allocation8 + $0x84c] sm:$0xf0]  ;;  %v11656_v6 = vld [vmem:[#allocation8 + $0x940] sm:$0xf]  ;;  %v11929_v36 = vor.u32 %v13396_v61, %v11928_v47  ;;  %v4346_v55 = vadd.f32 1.0, %v13599_v28  ;;  %v3969_v43 = vadd.f32 %v3968_v32, %v3955_v42 }
 0x2dd   :  { %7653 = vmatpush.bf16.msra.mxu3 %v11961_v60  ;;  %7626 = vmatpush.bf16.msra.mxu1 %v11689_v12  ;;  %v13328_v8 = vld [vmem:[#allocation8 + $0x94c] sm:$0xf0]  ;;  %v11784_v60 = vld [vmem:[#allocation8 + $0xa40] sm:$0xf]  ;;  %v11529_v12 = vor.u32 %v13296_v48, %v11528_v33  ;;  %v4375_v33 = vmul.f32 %v14467_v23, %v14367_v41  ;;  %v4391_v48 = vmul.f32 %v14482_v22, %v14470_v39  ;;  %v4156_v28 = vmul.f32 0.044715, %v14513_v51  ;;  %v3996_v46 = vpop.f32.mrf.mxu3 }
 0x2de   :  { %v13360_v17 = vld [vmem:[#allocation8 + $0xa4c] sm:$0xf0]  ;;  %v11912_v59 = vld [vmem:[#allocation8 + $0xb40] sm:$0xf]  ;;  %v11657_v52 = vor.u32 %v13328_v8, %v11656_v6  ;;  %v4376_v39 = vmul.f32 %v14490_v50, %v14480_v25  ;;  %v4394_v50 = vmul.f32 %v4362_v14, %v14507_v45 }
 0x2df   :  { %7640 = vmatpush.bf16.msra.mxu2 %v11817_v63  ;;  %v13392_v10 = vld [vmem:[#allocation8 + $0xb4c] sm:$0xf0]  ;;  %7613 = vmatpush.bf16.msra.mxu0 %v11545_v37  ;;  %v11512_v27 = vld [vmem:[#allocation8 + $0x820] sm:$0xf]  ;;  %v4171_v63 = vmul.f32 0.044715, %v14503_v44  ;;  %v11785_v31 = vor.u32 %v13360_v17, %v11784_v60  ;;  %v4187_v37 = vmul.f32 %v4155_v30, %v14501_v2  ;;  %v3982_v38 = vpop.f32.mrf.mxu2 }
 0x2e0   :  { %v13292_v54 = vld [vmem:[#allocation8 + $0x82c] sm:$0xf0]  ;;  %v11640_v3 = vld [vmem:[#allocation8 + $0x920] sm:$0xf]  ;;  %v11913_v35 = vor.u32 %v13392_v10, %v11912_v59  ;;  %v3983_v10 = vadd.f32 %v3982_v38, %v3969_v43  ;;  %v14538_v14 = vpack.c.bf16 %v4392_v5, %v4376_v39 }
 0x2e1   :  { %7654 = vmatpush.bf16.msra.mxu3 %v11945_v34  ;;  %7627 = vmatpush.bf16.msra.mxu1 %v11673_v4  ;;  %v13324_v34 = vld [vmem:[#allocation8 + $0x92c] sm:$0xf0]  ;;  %v11768_v57 = vld [vmem:[#allocation8 + $0xa20] sm:$0xf]  ;;  %v11513_v4 = vor.u32 %v13292_v54, %v11512_v27  ;;  %v4203_v6 = vmul.f32 %v4171_v63, %v14503_v44  ;;  %v4377_v27 = vmul.f32 %v4345_v20, %v14495_v19 }
 0x2e2   :  { %v13356_v40 = vld [vmem:[#allocation8 + $0xa2c] sm:$0xf0]  ;;  %v11896_v47 = vld [vmem:[#allocation8 + $0xb20] sm:$0xf]  ;;  %v4393_v63 = vmul.f32 %v4361_v16, %v14498_v53  ;;  %v14529_v42 = vadd.f32 %v3996_v46, %v3983_v10  ;;  %v4188_v19 = vmul.f32 %v4156_v28, %v14513_v51 }
 0x2e3   :  { %7641 = vmatpush.bf16.msra.mxu2 %v11801_v11  ;;  %v13388_v61 = vld [vmem:[#allocation8 + $0xb2c] sm:$0xf0]  ;;  %7614 = vmatpush.bf16.msra.mxu0 %v11529_v12  ;;  %v11496_v62 = vld [vmem:[#allocation8 + $0x800] sm:$0xf]  ;;  %v11769_v26 = vor.u32 %v13356_v40, %v11768_v57 }
 0x2e4   :  { %v13288_v11 = vld [vmem:[#allocation8 + $0x80c] sm:$0xf0]  ;;  %v11624_v24 = vld [vmem:[#allocation8 + $0x900] sm:$0xf]  ;;  %v11897_v59 = vor.u32 %v13388_v61, %v11896_v47  ;;  %v4172_v53 = vmul.f32 0.044715, %v14529_v42  ;;  %v14536_v61 = vpack.c.bf16 %v4391_v48, %v4375_v33 }
 0x2e5   :  { %7655 = vmatpush.bf16.msra.mxu3 %v11929_v36  ;;  %7628 = vmatpush.bf16.msra.mxu1 %v11657_v52  ;;  %v11641_v36 = vor.u32 %v13324_v34, %v11640_v3  ;;  %v13320_v8 = vld [vmem:[#allocation8 + $0x90c] sm:$0xf0]  ;;  %v11752_v60 = vld [vmem:[#allocation8 + $0xa00] sm:$0xf]  ;;  %v4378_v52 = vmul.f32 %v4346_v55, %v4122_v15  ;;  %v11497_v32 = vor.u32 %v13288_v11, %v11496_v62 }
 0x2e6   :  { %v13352_v17 = vld [vmem:[#allocation8 + $0xa0c] sm:$0xf0]  ;;  %v11880_v41 = vld [vmem:[#allocation8 + $0xb00] sm:$0xf]  ;;  %v11625_v56 = vor.u32 %v13320_v8, %v11624_v24  ;;  %v4204_v47 = vmul.f32 %v4172_v53, %v14529_v42 }
 0x2e7   :  { %7642 = vmatpush.bf16.msra.mxu2 %v11785_v31  ;;  %v13384_v23 = vld [vmem:[#allocation8 + $0xb0c] sm:$0xf0]  ;;  %v12120_v22 = vld [vmem:[#allocation8 + $0xce0] sm:$0xf]  ;;  %v4219_v31 = vmul.f32 %v4187_v37, %v14501_v2  ;;  %7615 = vmatpush.bf16.msra.mxu0 %v11513_v4  ;;  %v11753_v13 = vor.u32 %v13352_v17, %v11752_v60  ;;  %v14540_v37 = vpack.c.bf16 %v4393_v63, %v4377_v27 }
 0x2e8   :  { %v13444_v30 = vld [vmem:[#allocation8 + $0xcec] sm:$0xf0]  ;;  %v12248_v12 = vld [vmem:[#allocation8 + $0xde0] sm:$0xf]  ;;  %v11881_v20 = vor.u32 %v13384_v23, %v11880_v41  ;;  %v4236_v60 = vmul.f32 %v4204_v47, %v14529_v42 }
 0x2e9   :  { %7656 = vmatpush.bf16.msra.mxu3 %v11913_v35  ;;  %v13476_v54 = vld [vmem:[#allocation8 + $0xdec] sm:$0xf0]  ;;  %v12376_v3 = vld [vmem:[#allocation8 + $0xee0] sm:$0xf]  ;;  %v4235_v35 = vmul.f32 %v4203_v6, %v14503_v44  ;;  %7629 = vmatpush.bf16.msra.mxu1 %v11641_v36  ;;  %v12121_v16 = vor.u32 %v13444_v30, %v12120_v22  ;;  %v4251_v24 = vadd.f32 %v4219_v31, %v14501_v2 }
 0x2ea   :  { %v13508_v25 = vld [vmem:[#allocation8 + $0xeec] sm:$0xf0]  ;;  %v12104_v15 = vld [vmem:[#allocation8 + $0xcc0] sm:$0xf]  ;;  %v12249_v57 = vor.u32 %v13476_v54, %v12248_v12  ;;  %v14544_v36 = vpack.c.bf16 %v4394_v50, %v4378_v52 }
 0x2eb   :  { %7643 = vmatpush.bf16.msra.mxu2 %v11769_v26  ;;  %v13440_v34 = vld [vmem:[#allocation8 + $0xccc] sm:$0xf0]  ;;  %v12377_v40 = vor.u32 %v13508_v25, %v12376_v3  ;;  %v12232_v55 = vld [vmem:[#allocation8 + $0xdc0] sm:$0xf]  ;;  %7616 = vmatpush.bf16.msra.mxu0 %v11497_v32  ;;  %v4267_v6 = vadd.f32 %v4235_v35, %v14503_v44  ;;  %v4220_v26 = vmul.f32 %v4188_v19, %v14513_v51  ;;  %v4283_v22 = vmul.f32 0.7978846, %v4251_v24 }
 0x2ec   :  { %v12504_v43 = vld [vmem:[#allocation8 + $0xfe0] sm:$0xf]  ;;  %v13540_v45 = vld [vmem:[#allocation8 + $0xfec] sm:$0xf0]  ;;  %v12105_v33 = vor.u32 %v13440_v34, %v12104_v15  ;;  %v4268_v32 = vadd.f32 %v4236_v60, %v14529_v42  ;;  %v637_v25 = vperm.slane %v14476_v21, 6  ;;  %v4008_v15 = vpop.f32.mrf.mxu0 }
 0x2ed   :  { %7657 = vmatpush.bf16.msra.mxu3 %v11897_v59  ;;  %v13472_v4 = vld [vmem:[#allocation8 + $0xdcc] sm:$0xf0]  ;;  %v12360_v62 = vld [vmem:[#allocation8 + $0xec0] sm:$0xf]  ;;  %7630 = vmatpush.bf16.msra.mxu1 %v11625_v56  ;;  %v12505_v8 = vor.u32 %v13540_v45, %v12504_v43  ;;  %v4299_v30 = vmul.f32 0.7978846, %v4267_v6  ;;  %v4252_v12 = vadd.f32 %v4220_v26, %v14513_v51  ;;  %13602 = vtanh.f32 %v4283_v22  ;;  %v4050_v22 = vpop.f32.mrf.mxu3 }
 0x2ee   :  { %v13504_v11 = vld [vmem:[#allocation8 + $0xecc] sm:$0xf0]  ;;  %v12088_v48 = vld [vmem:[#allocation8 + $0xca0] sm:$0xf]  ;;  %v12233_v17 = vor.u32 %v13472_v4, %v12232_v55  ;;  %7617 = vmatmul.bf16.vlgmr.msra.gmra.mxu0 %v14536_v61  ;;  %v4300_v55 = vmul.f32 0.7978846, %v4268_v32  ;;  %v4009_v47 = vadd.f32 %v4008_v15, %v637_v25  ;;  %v4022_v4 = vpop.f32.mrf.mxu1 }
 0x2ef   :  { %7644 = vmatpush.bf16.msra.mxu2 %v11753_v13  ;;  %7665 = vmatpush.bf16.msrb.mxu0 %v12121_v16  ;;  %v13436_v38 = vld [vmem:[#allocation8 + $0xcac] sm:$0xf0]  ;;  %v12361_v28 = vor.u32 %v13504_v11, %v12360_v62  ;;  %v12216_v59 = vld [vmem:[#allocation8 + $0xda0] sm:$0xf]  ;;  %13604 = vtanh.f32 %v4299_v30 }
 0x2f0   :  { %v12488_v10 = vld [vmem:[#allocation8 + $0xfc0] sm:$0xf]  ;;  %v13536_v46 = vld [vmem:[#allocation8 + $0xfcc] sm:$0xf0]  ;;  %7631 = vmatmul.bf16.vlgmr.msra.gmra.mxu1 %v14538_v14  ;;  %v12089_v5 = vor.u32 %v13436_v38, %v12088_v48 }
 0x2f1   :  { %7658 = vmatpush.bf16.msra.mxu3 %v11881_v20  ;;  %7679 = vmatpush.bf16.msrb.mxu1 %v12249_v57  ;;  %v13468_v41 = vld [vmem:[#allocation8 + $0xdac] sm:$0xf0]  ;;  %v12344_v23 = vld [vmem:[#allocation8 + $0xea0] sm:$0xf]  ;;  %v12489_v31 = vor.u32 %v13536_v46, %v12488_v10  ;;  %v4284_v20 = vmul.f32 0.7978846, %v4252_v12 }
 0x2f2   :  { %v13500_v39 = vld [vmem:[#allocation8 + $0xeac] sm:$0xf0]  ;;  %7645 = vmatmul.bf16.vlgmr.msra.gmra.mxu2 %v14540_v37  ;;  %v12072_v27 = vld [vmem:[#allocation8 + $0xc80] sm:$0xf]  ;;  %v12217_v54 = vor.u32 %v13468_v41, %v12216_v59  ;;  %v4036_v59 = vpop.f32.mrf.mxu2 }
 0x2f3   :  { %7693 = vmatpush.bf16.msrb.mxu2 %v12377_v40  ;;  %7666 = vmatpush.bf16.msrb.mxu0 %v12105_v33  ;;  %v13432_v63 = vld [vmem:[#allocation8 + $0xc8c] sm:$0xf0]  ;;  %v12200_v52 = vld [vmem:[#allocation8 + $0xd80] sm:$0xf]  ;;  %v12345_v3 = vor.u32 %v13500_v39, %v12344_v23  ;;  %v4023_v33 = vadd.f32 %v4022_v4, %v4009_v47  ;;  %13606 = vtanh.f32 %v4284_v20  ;;  %v13603_v23 = vpop.eup %13602 }
 0x2f4   :  { %7659 = vmatmul.bf16.vlgmr.msra.gmra.mxu3 %v14544_v36  ;;  %v12472_v50 = vld [vmem:[#allocation8 + $0xfa0] sm:$0xf]  ;;  %v13532_v35 = vld [vmem:[#allocation8 + $0xfac] sm:$0xf0]  ;;  %v12073_v16 = vor.u32 %v13432_v63, %v12072_v27  ;;  %13608 = vtanh.f32 %v4300_v55  ;;  %v4123_v27 = vmul.f32 0.5, %v14501_v2  ;;  %v4139_v63 = vmul.f32 0.5, %v14503_v44 }
 0x2f5   :  { %7707 = vmatpush.bf16.msrb.mxu3 %v12505_v8  ;;  %7680 = vmatpush.bf16.msrb.mxu1 %v12233_v17  ;;  %v13464_v56 = vld [vmem:[#allocation8 + $0xd8c] sm:$0xf0]  ;;  %v12328_v13 = vld [vmem:[#allocation8 + $0xe80] sm:$0xf]  ;;  %v12473_v40 = vor.u32 %v13532_v35, %v12472_v50  ;;  %v4037_v39 = vadd.f32 %v4036_v59, %v4023_v33 }
 0x2f6   :  { %v13496_v19 = vld [vmem:[#allocation8 + $0xe8c] sm:$0xf0]  ;;  %v12056_v53 = vld [vmem:[#allocation8 + $0xc60] sm:$0xf]  ;;  %v12201_v43 = vor.u32 %v13464_v56, %v12200_v52  ;;  %v13605_v52 = vpop.eup %13604 }
 0x2f7   :  { %7694 = vmatpush.bf16.msrb.mxu2 %v12361_v28  ;;  %7667 = vmatpush.bf16.msrb.mxu0 %v12089_v5  ;;  %v13428_v34 = vld [vmem:[#allocation8 + $0xc6c] sm:$0xf0]  ;;  %v12184_v57 = vld [vmem:[#allocation8 + $0xd60] sm:$0xf]  ;;  %v12329_v45 = vor.u32 %v13496_v19, %v12328_v13 }
 0x2f8   :  { %v12456_v62 = vld [vmem:[#allocation8 + $0xf80] sm:$0xf]  ;;  %v13528_v11 = vld [vmem:[#allocation8 + $0xf8c] sm:$0xf0]  ;;  %v12057_v48 = vor.u32 %v13428_v34, %v12056_v53  ;;  %v4024_v53 = vpop.f32.mrf.mxu1 }
 0x2f9   :  { %7708 = vmatpush.bf16.msrb.mxu3 %v12489_v31  ;;  %7681 = vmatpush.bf16.msrb.mxu1 %v12217_v54  ;;  %v13460_v24 = vld [vmem:[#allocation8 + $0xd6c] sm:$0xf0]  ;;  %v12312_v6 = vld [vmem:[#allocation8 + $0xe60] sm:$0xf]  ;;  %v12457_v60 = vor.u32 %v13528_v11, %v12456_v62  ;;  %v14559_v31 = vadd.f32 %v4050_v22, %v4037_v39  ;;  %v4010_v54 = vpop.f32.mrf.mxu0  ;;  %v13607_v15 = vpop.eup %13606  ;;  %v4363_v62 = vadd.f32 1.0, %v13605_v52 }
 0x2fa   :  { %v13492_v26 = vld [vmem:[#allocation8 + $0xe6c] sm:$0xf0]  ;;  %v12040_v38 = vld [vmem:[#allocation8 + $0xc40] sm:$0xf]  ;;  %v12185_v17 = vor.u32 %v13460_v24, %v12184_v57  ;;  %v4011_v2 = vadd.f32 %v4010_v54, %v637_v25  ;;  %v13609_v55 = vpop.eup %13608  ;;  %v4052_v39 = vpop.f32.mrf.mxu3  ;;  %v13058_v22 = vld [vmem:[#allocation8 + $0xe4] sm:$0xf] }
 0x2fb   :  { %7695 = vmatpush.bf16.msrb.mxu2 %v12345_v3  ;;  %7668 = vmatpush.bf16.msrb.mxu0 %v12073_v16  ;;  %v13424_v8 = vld [vmem:[#allocation8 + $0xc4c] sm:$0xf0]  ;;  %v12313_v28 = vor.u32 %v13492_v26, %v12312_v6  ;;  %v12168_v10 = vld [vmem:[#allocation8 + $0xd40] sm:$0xf]  ;;  %v4157_v34 = vmul.f32 0.044715, %v14559_v31 }
 0x2fc   :  { %v12440_v46 = vld [vmem:[#allocation8 + $0xf60] sm:$0xf]  ;;  %v13524_v41 = vld [vmem:[#allocation8 + $0xf6c] sm:$0xf0]  ;;  %v12041_v32 = vor.u32 %v13424_v8, %v12040_v38  ;;  %v4124_v38 = vmul.f32 0.5, %v14513_v51  ;;  %v4140_v8 = vmul.f32 0.5, %v14529_v42  ;;  %v4395_v42 = vmul.f32 %v4363_v62, %v4139_v63 }
 0x2fd   :  { %7709 = vmatpush.bf16.msrb.mxu3 %v12473_v40  ;;  %7682 = vmatpush.bf16.msrb.mxu1 %v12201_v43  ;;  %v13456_v30 = vld [vmem:[#allocation8 + $0xd4c] sm:$0xf0]  ;;  %v12296_v12 = vld [vmem:[#allocation8 + $0xe40] sm:$0xf]  ;;  %v12441_v56 = vor.u32 %v13524_v41, %v12440_v46  ;;  %v4347_v43 = vadd.f32 1.0, %v13603_v23  ;;  %v4189_v11 = vmul.f32 %v4157_v34, %v14559_v31  ;;  %v4348_v46 = vadd.f32 1.0, %v13607_v15 }
 0x2fe   :  { %v13488_v5 = vld [vmem:[#allocation8 + $0xe4c] sm:$0xf0]  ;;  %v12024_v3 = vld [vmem:[#allocation8 + $0xc20] sm:$0xf]  ;;  %v12169_v13 = vor.u32 %v13456_v30, %v12168_v10  ;;  %v10586_v30 = vld [vmem:[#allocation8 + $0xf0] sm:$0xf0] }
 0x2ff   :  { %7696 = vmatpush.bf16.msrb.mxu2 %v12329_v45  ;;  %7669 = vmatpush.bf16.msrb.mxu0 %v12057_v48  ;;  %v13420_v50 = vld [vmem:[#allocation8 + $0xc2c] sm:$0xf0]  ;;  %v12152_v35 = vld [vmem:[#allocation8 + $0xd20] sm:$0xf]  ;;  %v12297_v19 = vor.u32 %v13488_v5, %v12296_v12  ;;  %v4025_v45 = vadd.f32 %v4024_v53, %v4011_v2  ;;  %v4221_v41 = vmul.f32 %v4189_v11, %v14559_v31  ;;  %v4364_v12 = vadd.f32 1.0, %v13609_v55 }
 0x300   :  { %v13452_v44 = vld [vmem:[#allocation8 + $0xd2c] sm:$0xf0]  ;;  %v12424_v20 = vld [vmem:[#allocation8 + $0xf40] sm:$0xf]  ;;  %v12025_v24 = vor.u32 %v13420_v50, %v12024_v3  ;;  %v13090_v52 = vld [vmem:[#allocation8 + $0x1e4] sm:$0xf]  ;;  %v10589_v53 = vor.u32 %v13058_v22, %v10586_v30  ;;  %v4380_v15 = vmul.f32 %v4348_v46, %v4124_v38 }
 0x301   :  { %7710 = vmatpush.bf16.msrb.mxu3 %v12457_v60  ;;  %7683 = vmatpush.bf16.msrb.mxu1 %v12185_v17  ;;  %v13520_v16 = vld [vmem:[#allocation8 + $0xf4c] sm:$0xf0]  ;;  %v12280_v57 = vld [vmem:[#allocation8 + $0xe20] sm:$0xf]  ;;  %v12153_v60 = vor.u32 %v13452_v44, %v12152_v35  ;;  %v10714_v51 = vld [vmem:[#allocation8 + $0x1f0] sm:$0xf0]  ;;  %v4253_v54 = vadd.f32 %v4221_v41, %v14559_v31  ;;  %v4396_v34 = vmul.f32 %v4364_v12, %v4140_v8 }
 0x302   :  { %v13484_v40 = vld [vmem:[#allocation8 + $0xe2c] sm:$0xf0]  ;;  %v12008_v47 = vld [vmem:[#allocation8 + $0xc00] sm:$0xf]  ;;  %v12425_v48 = vor.u32 %v13520_v16, %v12424_v20  ;;  %v13122_v50 = vld [vmem:[#allocation8 + $0x2e4] sm:$0xf]  ;;  %v10717_v63 = vor.u32 %v13090_v52, %v10714_v51 }
 0x303   :  { %7697 = vmatpush.bf16.msrb.mxu2 %v12313_v28  ;;  %v13416_v4 = vld [vmem:[#allocation8 + $0xc0c] sm:$0xf0]  ;;  %7670 = vmatpush.bf16.msrb.mxu0 %v12041_v32  ;;  %v12136_v25 = vld [vmem:[#allocation8 + $0xd00] sm:$0xf]  ;;  %v12281_v17 = vor.u32 %v13484_v40, %v12280_v57  ;;  %v4038_v28 = vpop.f32.mrf.mxu2  ;;  %v4379_v32 = vmul.f32 %v4347_v43, %v4123_v27  ;;  %v10842_v35 = vld [vmem:[#allocation8 + $0x2f0] sm:$0xf0] }
 0x304   :  { %v13448_v6 = vld [vmem:[#allocation8 + $0xd0c] sm:$0xf0]  ;;  %v12264_v26 = vld [vmem:[#allocation8 + $0xe00] sm:$0xf]  ;;  %v4039_v23 = vadd.f32 %v4038_v28, %v4025_v45  ;;  %v12009_v5 = vor.u32 %v13416_v4, %v12008_v47  ;;  %v10570_v44 = vld [vmem:[#allocation8 + $0xd0] sm:$0xf0]  ;;  %v10845_v55 = vor.u32 %v13122_v50, %v10842_v35 }
 0x305   :  { %v13480_v33 = vld [vmem:[#allocation8 + $0xe0c] sm:$0xf0]  ;;  %7711 = vmatpush.bf16.msrb.mxu3 %v12441_v56  ;;  %7684 = vmatpush.bf16.msrb.mxu1 %v12169_v13  ;;  %v12408_v59 = vld [vmem:[#allocation8 + $0xf20] sm:$0xf]  ;;  %v13054_v56 = vld [vmem:[#allocation8 + $0xc4] sm:$0xf] }
 0x306   :  { %v13516_v10 = vld [vmem:[#allocation8 + $0xf2c] sm:$0xf0]  ;;  %v14569_v3 = vadd.f32 %v4052_v39, %v4039_v23  ;;  %v12265_v2 = vor.u32 %v13480_v33, %v12264_v26  ;;  %v12392_v20 = vld [vmem:[#allocation8 + $0xf00] sm:$0xf]  ;;  %v13154_v57 = vld [vmem:[#allocation8 + $0x3e4] sm:$0xf] }
 0x307   :  { %7698 = vmatpush.bf16.msrb.mxu2 %v12297_v19  ;;  %7671 = vmatpush.bf16.msrb.mxu0 %v12025_v24  ;;  %v12409_v13 = vor.u32 %v13516_v10, %v12408_v59  ;;  %v12137_v19 = vor.u32 %v13448_v6, %v12136_v25  ;;  %v13512_v16 = vld [vmem:[#allocation8 + $0xf0c] sm:$0xf0]  ;;  %v10970_v40 = vld [vmem:[#allocation8 + $0x3f0] sm:$0xf0]  ;;  %v13086_v43 = vld [vmem:[#allocation8 + $0x1c4] sm:$0xf]  ;;  %v14573_v25 = vpack.c.bf16 %v4395_v42, %v4379_v32 }
 0x308   :  { %v4173_v27 = vmul.f32 0.044715, %v14569_v3  ;;  %v10698_v45 = vld [vmem:[#allocation8 + $0x1d0] sm:$0xf0]  ;;  %v4285_v47 = vmul.f32 0.7978846, %v4253_v54  ;;  %v12393_v24 = vor.u32 %v13512_v16, %v12392_v20  ;;  %v10573_v6 = vor.u32 %v13054_v56, %v10570_v44 }
 0x309   :  { %7712 = vmatpush.bf16.msrb.mxu3 %v12425_v48  ;;  %7685 = vmatpush.bf16.msrb.mxu1 %v12153_v60  ;;  %v13118_v62 = vld [vmem:[#allocation8 + $0x2c4] sm:$0xf]  ;;  %v10826_v11 = vld [vmem:[#allocation8 + $0x2d0] sm:$0xf0]  ;;  %v10973_v26 = vor.u32 %v13154_v57, %v10970_v40  ;;  %v14576_v48 = vpack.c.bf16 %v4396_v34, %v4380_v15  ;;  %v10701_v38 = vor.u32 %v13086_v43, %v10698_v45  ;;  %v638_v22 = vperm.slane %v14476_v21, 7 }
 0x30a   :  { %v4205_v4 = vmul.f32 %v4173_v27, %v14569_v3  ;;  %v13050_v8 = vld [vmem:[#allocation8 + $0xa4] sm:$0xf]  ;;  %v10829_v28 = vor.u32 %v13118_v62, %v10826_v11  ;;  %v10554_v59 = vld [vmem:[#allocation8 + $0xb0] sm:$0xf0]  ;;  %13610 = vtanh.f32 %v4285_v47 }
 0x30b   :  { %7699 = vmatpush.bf16.msrb.mxu2 %v12281_v17  ;;  %7672 = vmatpush.bf16.msrb.mxu0 %v12009_v5  ;;  %v13150_v60 = vld [vmem:[#allocation8 + $0x3c4] sm:$0xf]  ;;  %v10954_v17 = vld [vmem:[#allocation8 + $0x3d0] sm:$0xf0]  ;;  %v10557_v52 = vor.u32 %v13050_v8, %v10554_v59  ;;  %v4125_v59 = vmul.f32 0.5, %v14559_v31 }
 0x30c   :  { %v4237_v33 = vmul.f32 %v4205_v4, %v14569_v3  ;;  %v13082_v10 = vld [vmem:[#allocation8 + $0x1a4] sm:$0xf]  ;;  %v10682_v46 = vld [vmem:[#allocation8 + $0x1b0] sm:$0xf0]  ;;  %v10957_v12 = vor.u32 %v13150_v60, %v10954_v17 }
 0x30d   :  { %7713 = vmatpush.bf16.msrb.mxu3 %v12409_v13  ;;  %7686 = vmatpush.bf16.msrb.mxu1 %v12137_v19  ;;  %v13114_v23 = vld [vmem:[#allocation8 + $0x2a4] sm:$0xf]  ;;  %v10810_v39 = vld [vmem:[#allocation8 + $0x2b0] sm:$0xf0]  ;;  %v10685_v51 = vor.u32 %v13082_v10, %v10682_v46  ;;  %v4078_v45 = vpop.f32.mrf.mxu1  ;;  %v4141_v10 = vmul.f32 0.5, %v14569_v3 }
 0x30e   :  { %7673 = vmatmul.bf16.vlgmr.msrb.gmra.mxu0 %v14573_v25  ;;  %v4269_v41 = vadd.f32 %v4237_v33, %v14569_v3  ;;  %v13046_v30 = vld [vmem:[#allocation8 + $0x84] sm:$0xf]  ;;  %v10938_v42 = vld [vmem:[#allocation8 + $0x3b0] sm:$0xf0]  ;;  %v10813_v54 = vor.u32 %v13114_v23, %v10810_v39 }
 0x30f   :  { %7700 = vmatpush.bf16.msrb.mxu2 %v12265_v2  ;;  %7721 = vmatpush.bf16.msra.mxu0 %v10589_v53  ;;  %v13146_v32 = vld [vmem:[#allocation8 + $0x3a4] sm:$0xf]  ;;  %v10538_v50 = vld [vmem:[#allocation8 + $0x90] sm:$0xf0]  ;;  %v4064_v2 = vpop.f32.mrf.mxu0 }
 0x310   :  { %7687 = vmatmul.bf16.vlgmr.msrb.gmra.mxu1 %v14576_v48  ;;  %v4301_v5 = vmul.f32 0.7978846, %v4269_v41  ;;  %v13078_v35 = vld [vmem:[#allocation8 + $0x184] sm:$0xf]  ;;  %v10666_v56 = vld [vmem:[#allocation8 + $0x190] sm:$0xf0]  ;;  %v10941_v53 = vor.u32 %v13146_v32, %v10938_v42  ;;  %v13611_v44 = vpop.eup %13610  ;;  %v4065_v20 = vadd.f32 %v4064_v2, %v638_v22  ;;  %v10541_v16 = vor.u32 %v13046_v30, %v10538_v50 }
 0x311   :  { %7735 = vmatpush.bf16.msra.mxu1 %v10717_v63  ;;  %7714 = vmatpush.bf16.msrb.mxu3 %v12393_v24  ;;  %v13110_v13 = vld [vmem:[#allocation8 + $0x284] sm:$0xf]  ;;  %v10794_v19 = vld [vmem:[#allocation8 + $0x290] sm:$0xf0]  ;;  %v10669_v27 = vor.u32 %v13078_v35, %v10666_v56  ;;  %v4349_v62 = vadd.f32 1.0, %v13611_v44 }
 0x312   :  { %13612 = vtanh.f32 %v4301_v5  ;;  %v13042_v63 = vld [vmem:[#allocation8 + $0x64] sm:$0xf]  ;;  %v10922_v34 = vld [vmem:[#allocation8 + $0x390] sm:$0xf0]  ;;  %v10797_v57 = vor.u32 %v13110_v13, %v10794_v19  ;;  %v4079_v11 = vadd.f32 %v4078_v45, %v4065_v20 }
 0x313   :  { %7749 = vmatpush.bf16.msra.mxu2 %v10845_v55  ;;  %7722 = vmatpush.bf16.msra.mxu0 %v10573_v6  ;;  %v13142_v15 = vld [vmem:[#allocation8 + $0x384] sm:$0xf]  ;;  %v10522_v40 = vld [vmem:[#allocation8 + $0x70] sm:$0xf0]  ;;  %v4381_v32 = vmul.f32 %v4349_v62, %v4125_v59 }
 0x314   :  { %v13074_v55 = vld [vmem:[#allocation8 + $0x164] sm:$0xf]  ;;  %v10650_v43 = vld [vmem:[#allocation8 + $0x170] sm:$0xf0] }
 0x315   :  { %7763 = vmatpush.bf16.msra.mxu3 %v10973_v26  ;;  %7736 = vmatpush.bf16.msra.mxu1 %v10701_v38  ;;  %v13106_v47 = vld [vmem:[#allocation8 + $0x264] sm:$0xf]  ;;  %v10778_v4 = vld [vmem:[#allocation8 + $0x270] sm:$0xf0]  ;;  %v10925_v26 = vor.u32 %v13142_v15, %v10922_v34  ;;  %v10525_v38 = vor.u32 %v13042_v63, %v10522_v40  ;;  %v10653_v8 = vor.u32 %v13074_v55, %v10650_v43  ;;  %v4092_v39 = vpop.f32.mrf.mxu2  ;;  %v4080_v55 = vpop.f32.mrf.mxu1 }
 0x316   :  { %v13038_v24 = vld [vmem:[#allocation8 + $0x44] sm:$0xf]  ;;  %v10506_v6 = vld [vmem:[#allocation8 + $0x50] sm:$0xf0]  ;;  %v10781_v46 = vor.u32 %v13106_v47, %v10778_v4  ;;  %v4093_v5 = vadd.f32 %v4092_v39, %v4079_v11 }
 0x317   :  { %7750 = vmatpush.bf16.msra.mxu2 %v10829_v28  ;;  %7723 = vmatpush.bf16.msra.mxu0 %v10557_v52  ;;  %v13070_v60 = vld [vmem:[#allocation8 + $0x144] sm:$0xf]  ;;  %v10906_v28 = vld [vmem:[#allocation8 + $0x370] sm:$0xf0]  ;;  %v4106_v52 = vpop.f32.mrf.mxu3  ;;  %v10509_v50 = vor.u32 %v13038_v24, %v10506_v6 }
 0x318   :  { %v13613_v33 = vpop.eup %13612  ;;  %v13138_v17 = vld [vmem:[#allocation8 + $0x364] sm:$0xf]  ;;  %v10634_v41 = vld [vmem:[#allocation8 + $0x150] sm:$0xf0]  ;;  %v14586_v13 = vadd.f32 %v4106_v52, %v4093_v5 }
 0x319   :  { %7764 = vmatpush.bf16.msra.mxu3 %v10957_v12  ;;  %7737 = vmatpush.bf16.msra.mxu1 %v10685_v51  ;;  %v4365_v23 = vadd.f32 1.0, %v13613_v33  ;;  %v13102_v30 = vld [vmem:[#allocation8 + $0x244] sm:$0xf]  ;;  %v10762_v12 = vld [vmem:[#allocation8 + $0x250] sm:$0xf0]  ;;  %v4066_v51 = vpop.f32.mrf.mxu0  ;;  %v10637_v31 = vor.u32 %v13070_v60, %v10634_v41 }
 0x31a   :  { %v13034_v35 = vld [vmem:[#allocation8 + $0x24] sm:$0xf]  ;;  %v10890_v56 = vld [vmem:[#allocation8 + $0x350] sm:$0xf0]  ;;  %v4067_v19 = vadd.f32 %v4066_v51, %v638_v22  ;;  %v10765_v2 = vor.u32 %v13102_v30, %v10762_v12  ;;  %v4158_v15 = vmul.f32 0.044715, %v14586_v13 }
 0x31b   :  { %7751 = vmatpush.bf16.msra.mxu2 %v10813_v54  ;;  %7724 = vmatpush.bf16.msra.mxu0 %v10541_v16  ;;  %v4397_v42 = vmul.f32 %v4365_v23, %v4141_v10  ;;  %v10909_v54 = vor.u32 %v13138_v17, %v10906_v28  ;;  %v13134_v3 = vld [vmem:[#allocation8 + $0x344] sm:$0xf]  ;;  %v10490_v44 = vld [vmem:[#allocation8 + $0x30] sm:$0xf0] }
 0x31c   :  { %v13066_v20 = vld [vmem:[#allocation8 + $0x124] sm:$0xf]  ;;  %v10618_v16 = vld [vmem:[#allocation8 + $0x130] sm:$0xf0]  ;;  %v10893_v40 = vor.u32 %v13134_v3, %v10890_v56  ;;  %v10493_v21 = vor.u32 %v13034_v35, %v10490_v44  ;;  %v4190_v4 = vmul.f32 %v4158_v15, %v14586_v13  ;;  %v4081_v62 = vadd.f32 %v4080_v55, %v4067_v19 }
 0x31d   :  { %7765 = vmatpush.bf16.msra.mxu3 %v10941_v53  ;;  %7738 = vmatpush.bf16.msra.mxu1 %v10669_v27  ;;  %v14590_v53 = vpack.c.bf16 %v4397_v42, %v4381_v32  ;;  %v13098_v27 = vld [vmem:[#allocation8 + $0x224] sm:$0xf]  ;;  %v10746_v63 = vld [vmem:[#allocation8 + $0x230] sm:$0xf0]  ;;  %v10621_v22 = vor.u32 %v13066_v20, %v10618_v16  ;;  %v4094_v33 = vpop.f32.mrf.mxu2 }
 0x31e   :  { %v13030_v34 = vld [vmem:[#allocation8 + $0x4] sm:$0xf]  ;;  %v10874_v47 = vld [vmem:[#allocation8 + $0x330] sm:$0xf0]  ;;  %v10749_v11 = vor.u32 %v13098_v27, %v10746_v63  ;;  %v4222_v17 = vmul.f32 %v4190_v4, %v14586_v13  ;;  %v4095_v28 = vadd.f32 %v4094_v33, %v4081_v62 }
 0x31f   :  { %7752 = vmatpush.bf16.msra.mxu2 %v10797_v57  ;;  %7725 = vmatpush.bf16.msra.mxu0 %v10525_v38  ;;  %v10474_v57 = vld [vmem:[#allocation8 + $0x10] sm:$0xf0]  ;;  %v13062_v43 = vld [vmem:[#allocation8 + $0x104] sm:$0xf]  ;;  %v4108_v23 = vpop.f32.mrf.mxu3 }
 0x320   :  { %7701 = vmatmul.bf16.vlgmr.msrb.gmra.mxu2 %v14590_v53  ;;  %v13130_v45 = vld [vmem:[#allocation8 + $0x324] sm:$0xf]  ;;  %v10602_v24 = vld [vmem:[#allocation8 + $0x110] sm:$0xf0]  ;;  %v10477_v39 = vor.u32 %v13030_v34, %v10474_v57  ;;  %v4254_v12 = vadd.f32 %v4222_v17, %v14586_v13  ;;  %v14597_v5 = vadd.f32 %v4108_v23, %v4095_v28 }
 0x321   :  { %7766 = vmatpush.bf16.msra.mxu3 %v10925_v26  ;;  %7739 = vmatpush.bf16.msra.mxu1 %v10653_v8  ;;  %v13094_v6 = vld [vmem:[#allocation8 + $0x204] sm:$0xf]  ;;  %v10730_v26 = vld [vmem:[#allocation8 + $0x210] sm:$0xf0]  ;;  %v10877_v41 = vor.u32 %v13130_v45, %v10874_v47  ;;  %v10605_v30 = vor.u32 %v13062_v43, %v10602_v24 }
 0x322   :  { %v13186_v38 = vld [vmem:[#allocation8 + $0x4e4] sm:$0xf]  ;;  %v11098_v8 = vld [vmem:[#allocation8 + $0x4f0] sm:$0xf0]  ;;  %v10733_v52 = vor.u32 %v13094_v6, %v10730_v26  ;;  %v4174_v19 = vmul.f32 0.044715, %v14597_v5 }
 0x323   :  { %7753 = vmatpush.bf16.msra.mxu2 %v10781_v46  ;;  %7726 = vmatpush.bf16.msra.mxu0 %v10509_v50  ;;  %v13218_v60 = vld [vmem:[#allocation8 + $0x5e4] sm:$0xf]  ;;  %v11226_v59 = vld [vmem:[#allocation8 + $0x5f0] sm:$0xf0]  ;;  %v11101_v51 = vor.u32 %v13186_v38, %v11098_v8  ;;  %v4286_v16 = vmul.f32 0.7978846, %v4254_v12 }
 0x324   :  { %v13250_v10 = vld [vmem:[#allocation8 + $0x6e4] sm:$0xf]  ;;  %v11354_v46 = vld [vmem:[#allocation8 + $0x6f0] sm:$0xf0]  ;;  %v11229_v50 = vor.u32 %v13218_v60, %v11226_v59  ;;  %v4206_v27 = vmul.f32 %v4174_v19, %v14597_v5 }
 0x325   :  { %7767 = vmatpush.bf16.msra.mxu3 %v10909_v54  ;;  %7740 = vmatpush.bf16.msra.mxu1 %v10637_v31  ;;  %v13182_v32 = vld [vmem:[#allocation8 + $0x4c4] sm:$0xf]  ;;  %v10858_v54 = vld [vmem:[#allocation8 + $0x310] sm:$0xf0]  ;;  %v11357_v31 = vor.u32 %v13250_v10, %v11354_v46  ;;  %13614 = vtanh.f32 %v4286_v16 }
 0x326   :  { %v13126_v42 = vld [vmem:[#allocation8 + $0x304] sm:$0xf]  ;;  %v11082_v35 = vld [vmem:[#allocation8 + $0x4d0] sm:$0xf0] }
 0x327   :  { %7754 = vmatpush.bf16.msra.mxu2 %v10765_v2  ;;  %7727 = vmatpush.bf16.msra.mxu0 %v10493_v21  ;;  %v13214_v3 = vld [vmem:[#allocation8 + $0x5c4] sm:$0xf]  ;;  %v11210_v56 = vld [vmem:[#allocation8 + $0x5d0] sm:$0xf0]  ;;  %v10861_v20 = vor.u32 %v13126_v42, %v10858_v54  ;;  %v11085_v63 = vor.u32 %v13182_v32, %v11082_v35  ;;  %v4238_v21 = vmul.f32 %v4206_v27, %v14597_v5 }
 0x328   :  { %v13246_v2 = vld [vmem:[#allocation8 + $0x6c4] sm:$0xf]  ;;  %v11338_v44 = vld [vmem:[#allocation8 + $0x6d0] sm:$0xf0]  ;;  %v11213_v15 = vor.u32 %v13214_v3, %v11210_v56 }
 0x329   :  { %7768 = vmatpush.bf16.msra.mxu3 %v10893_v40  ;;  %7741 = vmatpush.bf16.msra.mxu1 %v10621_v22  ;;  %v11341_v34 = vor.u32 %v13246_v2, %v11338_v44  ;;  %v13178_v57 = vld [vmem:[#allocation8 + $0x4a4] sm:$0xf]  ;;  %v11066_v40 = vld [vmem:[#allocation8 + $0x4b0] sm:$0xf0]  ;;  %v4270_v47 = vadd.f32 %v4238_v21, %v14597_v5  ;;  %v4126_v2 = vmul.f32 0.5, %v14586_v13  ;;  %v4142_v44 = vmul.f32 0.5, %v14597_v5 }
 0x32a   :  { %v13210_v55 = vld [vmem:[#allocation8 + $0x5a4] sm:$0xf]  ;;  %v11194_v22 = vld [vmem:[#allocation8 + $0x5b0] sm:$0xf0]  ;;  %v11069_v4 = vor.u32 %v13178_v57, %v11066_v40 }
 0x32b   :  { %7755 = vmatpush.bf16.msra.mxu2 %v10749_v11  ;;  %7728 = vmatpush.bf16.msra.mxu0 %v10477_v39  ;;  %v13242_v43 = vld [vmem:[#allocation8 + $0x6a4] sm:$0xf]  ;;  %v11322_v45 = vld [vmem:[#allocation8 + $0x6b0] sm:$0xf0]  ;;  %v11197_v11 = vor.u32 %v13210_v55, %v11194_v22  ;;  %v4302_v38 = vmul.f32 0.7978846, %v4270_v47  ;;  %v13615_v23 = vpop.eup %13614 }
 0x32c   :  { %v13174_v62 = vld [vmem:[#allocation8 + $0x484] sm:$0xf]  ;;  %v11325_v24 = vor.u32 %v13242_v43, %v11322_v45  ;;  %v11050_v6 = vld [vmem:[#allocation8 + $0x490] sm:$0xf0]  ;;  %v4350_v42 = vadd.f32 1.0, %v13615_v23 }
 0x32d   :  { %7769 = vmatpush.bf16.msra.mxu3 %v10877_v41  ;;  %7742 = vmatpush.bf16.msra.mxu1 %v10605_v30  ;;  %v13206_v26 = vld [vmem:[#allocation8 + $0x584] sm:$0xf]  ;;  %v11178_v33 = vld [vmem:[#allocation8 + $0x590] sm:$0xf0]  ;;  %13616 = vtanh.f32 %v4302_v38  ;;  %v11053_v17 = vor.u32 %v13174_v62, %v11050_v6 }
 0x32e   :  { %7729 = vmatmul.bf16.vlgmr.msra.gmra.mxu0 %v14332_v18  ;;  %v13238_v8 = vld [vmem:[#allocation8 + $0x684] sm:$0xf]  ;;  %v11306_v60 = vld [vmem:[#allocation8 + $0x690] sm:$0xf0]  ;;  %v11181_v28 = vor.u32 %v13206_v26, %v11178_v33  ;;  %v4382_v57 = vmul.f32 %v4350_v42, %v4126_v2 }
 0x32f   :  { %7756 = vmatpush.bf16.msra.mxu2 %v10733_v52  ;;  %7777 = vmatpush.bf16.msrb.mxu0 %v11101_v51  ;;  %v11309_v59 = vor.u32 %v13238_v8, %v11306_v60  ;;  %v13170_v10 = vld [vmem:[#allocation8 + $0x464] sm:$0xf]  ;;  %v11034_v46 = vld [vmem:[#allocation8 + $0x470] sm:$0xf0] }
 0x330   :  { %7743 = vmatmul.bf16.vlgmr.msra.gmra.mxu1 %v14334_v49  ;;  %v13202_v41 = vld [vmem:[#allocation8 + $0x564] sm:$0xf]  ;;  %v11162_v39 = vld [vmem:[#allocation8 + $0x570] sm:$0xf0]  ;;  %v11037_v52 = vor.u32 %v13170_v10, %v11034_v46 }
 0x331   :  { %7791 = vmatpush.bf16.msrb.mxu1 %v11229_v50  ;;  %7770 = vmatpush.bf16.msra.mxu3 %v10861_v20  ;;  %v13234_v30 = vld [vmem:[#allocation8 + $0x664] sm:$0xf]  ;;  %v11290_v12 = vld [vmem:[#allocation8 + $0x670] sm:$0xf0]  ;;  %v11165_v54 = vor.u32 %v13202_v41, %v11162_v39 }
 0x332   :  { %7757 = vmatmul.bf16.vlgmr.msra.gmra.mxu2 %v14371_v7  ;;  %v13166_v51 = vld [vmem:[#allocation8 + $0x444] sm:$0xf]  ;;  %v11018_v32 = vld [vmem:[#allocation8 + $0x450] sm:$0xf0]  ;;  %v11293_v50 = vor.u32 %v13234_v30, %v11290_v12 }
 0x333   :  { %7805 = vmatpush.bf16.msrb.mxu2 %v11357_v31  ;;  %7778 = vmatpush.bf16.msrb.mxu0 %v11085_v63  ;;  %v13198_v31 = vld [vmem:[#allocation8 + $0x544] sm:$0xf]  ;;  %v11146_v35 = vld [vmem:[#allocation8 + $0x550] sm:$0xf0]  ;;  %v13617_v3 = vpop.eup %13616  ;;  %v11021_v16 = vor.u32 %v13166_v51, %v11018_v32 }
 0x334   :  { %v13230_v56 = vld [vmem:[#allocation8 + $0x644] sm:$0xf]  ;;  %v11274_v19 = vld [vmem:[#allocation8 + $0x650] sm:$0xf0]  ;;  %v4366_v20 = vadd.f32 1.0, %v13617_v3  ;;  %v11149_v27 = vor.u32 %v13198_v31, %v11146_v35 }
 0x335   :  { %7792 = vmatpush.bf16.msrb.mxu1 %v11213_v15  ;;  %v13282_v63 = vld [vmem:[#allocation8 + $0x7e4] sm:$0xf]  ;;  %v11482_v15 = vld [vmem:[#allocation8 + $0x7f0] sm:$0xf0] }
 0x336   :  { %v4398_v40 = vmul.f32 %v4366_v20, %v4142_v44  ;;  %v13162_v55 = vld [vmem:[#allocation8 + $0x424] sm:$0xf]  ;;  %v11002_v21 = vld [vmem:[#allocation8 + $0x430] sm:$0xf0]  ;;  %v11485_v5 = vor.u32 %v13282_v63, %v11482_v15 }
 0x337   :  { %7806 = vmatpush.bf16.msrb.mxu2 %v11341_v34  ;;  %7779 = vmatpush.bf16.msrb.mxu0 %v11069_v4  ;;  %v11277_v34 = vor.u32 %v13230_v56, %v11274_v19  ;;  %v13194_v22 = vld [vmem:[#allocation8 + $0x524] sm:$0xf]  ;;  %v11130_v43 = vld [vmem:[#allocation8 + $0x530] sm:$0xf0]  ;;  %v11005_v4 = vor.u32 %v13162_v55, %v11002_v21 }
 0x338   :  { %v13226_v45 = vld [vmem:[#allocation8 + $0x624] sm:$0xf]  ;;  %v11258_v47 = vld [vmem:[#allocation8 + $0x630] sm:$0xf0]  ;;  %v14608_v13 = vpack.c.bf16 %v4398_v40, %v4382_v57  ;;  %v11133_v6 = vor.u32 %v13194_v22, %v11130_v43 }
 0x339   :  { %7793 = vmatpush.bf16.msrb.mxu1 %v11197_v11  ;;  %v13158_v62 = vld [vmem:[#allocation8 + $0x404] sm:$0xf]  ;;  %v11261_v26 = vor.u32 %v13226_v45, %v11258_v47  ;;  %v10986_v33 = vld [vmem:[#allocation8 + $0x410] sm:$0xf0] }
 0x33a   :  { %v13278_v11 = vld [vmem:[#allocation8 + $0x7c4] sm:$0xf]  ;;  %v11114_v8 = vld [vmem:[#allocation8 + $0x510] sm:$0xf0]  ;;  %7715 = vmatmul.bf16.vlgmr.msrb.gmra.mxu3 %v14608_v13  ;;  %v10989_v23 = vor.u32 %v13158_v62, %v10986_v33 }
 0x33b   :  { %7807 = vmatpush.bf16.msrb.mxu2 %v11325_v24  ;;  %7780 = vmatpush.bf16.msrb.mxu0 %v11053_v17  ;;  %v11466_v24 = vld [vmem:[#allocation8 + $0x7d0] sm:$0xf0]  ;;  %v13190_v38 = vld [vmem:[#allocation8 + $0x504] sm:$0xf] }
 0x33c   :  { %v13222_v60 = vld [vmem:[#allocation8 + $0x604] sm:$0xf]  ;;  %v11242_v17 = vld [vmem:[#allocation8 + $0x610] sm:$0xf0]  ;;  %7819 = vmatpush.bf16.msrb.mxu3 %v11485_v5  ;;  %v11117_v12 = vor.u32 %v13190_v38, %v11114_v8 }
 0x33d   :  { %7794 = vmatpush.bf16.msrb.mxu1 %v11181_v28  ;;  %v13314_v28 = vld [vmem:[#allocation8 + $0x8e4] sm:$0xf]  ;;  %v11610_v10 = vld [vmem:[#allocation8 + $0x8f0] sm:$0xf0] }
 0x33e   :  { %v13346_v46 = vld [vmem:[#allocation8 + $0x9e4] sm:$0xf]  ;;  %v11738_v41 = vld [vmem:[#allocation8 + $0x9f0] sm:$0xf0]  ;;  %v11613_v51 = vor.u32 %v13314_v28, %v11610_v10 }
 0x33f   :  { %7808 = vmatpush.bf16.msrb.mxu2 %v11309_v59  ;;  %7781 = vmatpush.bf16.msrb.mxu0 %v11037_v52  ;;  %v11469_v59 = vor.u32 %v13278_v11, %v11466_v24  ;;  %v13378_v39 = vld [vmem:[#allocation8 + $0xae4] sm:$0xf]  ;;  %v11866_v30 = vld [vmem:[#allocation8 + $0xaf0] sm:$0xf0]  ;;  %v11245_v52 = vor.u32 %v13222_v60, %v11242_v17  ;;  %v11741_v32 = vor.u32 %v13346_v46, %v11738_v41 }
 0x340   :  { %v13274_v42 = vld [vmem:[#allocation8 + $0x7a4] sm:$0xf]  ;;  %v11869_v31 = vor.u32 %v13378_v39, %v11866_v30  ;;  %v11594_v35 = vld [vmem:[#allocation8 + $0x8d0] sm:$0xf0] }
 0x341   :  { %7795 = vmatpush.bf16.msrb.mxu1 %v11165_v54  ;;  %v11450_v54 = vld [vmem:[#allocation8 + $0x7b0] sm:$0xf0]  ;;  %7820 = vmatpush.bf16.msrb.mxu3 %v11469_v59  ;;  %v13342_v3 = vld [vmem:[#allocation8 + $0x9c4] sm:$0xf] }
 0x342   :  { %v11722_v56 = vld [vmem:[#allocation8 + $0x9d0] sm:$0xf0]  ;;  %v13374_v19 = vld [vmem:[#allocation8 + $0xac4] sm:$0xf]  ;;  %v11453_v44 = vor.u32 %v13274_v42, %v11450_v54 }
 0x343   :  { %7809 = vmatpush.bf16.msrb.mxu2 %v11293_v50  ;;  %7782 = vmatpush.bf16.msrb.mxu0 %v11021_v16  ;;  %v13310_v50 = vld [vmem:[#allocation8 + $0x8c4] sm:$0xf]  ;;  %v11850_v2 = vld [vmem:[#allocation8 + $0xad0] sm:$0xf0]  ;;  %v11725_v16 = vor.u32 %v13342_v3, %v11722_v56 }
 0x344   :  { %v11597_v20 = vor.u32 %v13310_v50, %v11594_v35  ;;  %v11434_v63 = vld [vmem:[#allocation8 + $0x790] sm:$0xf0]  ;;  %v13306_v15 = vld [vmem:[#allocation8 + $0x8a4] sm:$0xf] }
 0x345   :  { %7796 = vmatpush.bf16.msrb.mxu1 %v11149_v27  ;;  %v13270_v27 = vld [vmem:[#allocation8 + $0x784] sm:$0xf]  ;;  %v11578_v57 = vld [vmem:[#allocation8 + $0x8b0] sm:$0xf0]  ;;  %7821 = vmatpush.bf16.msrb.mxu3 %v11453_v44 }
 0x346   :  { %v13338_v40 = vld [vmem:[#allocation8 + $0x9a4] sm:$0xf]  ;;  %v11706_v55 = vld [vmem:[#allocation8 + $0x9b0] sm:$0xf0]  ;;  %v11437_v43 = vor.u32 %v13270_v27, %v11434_v63  ;;  %v11581_v45 = vor.u32 %v13306_v15, %v11578_v57 }
 0x347   :  { %7810 = vmatpush.bf16.msrb.mxu2 %v11277_v34  ;;  %7783 = vmatpush.bf16.msrb.mxu0 %v11005_v4  ;;  %v11853_v34 = vor.u32 %v13374_v19, %v11850_v2  ;;  %v13370_v21 = vld [vmem:[#allocation8 + $0xaa4] sm:$0xf]  ;;  %v11834_v22 = vld [vmem:[#allocation8 + $0xab0] sm:$0xf0]  ;;  %v11709_v47 = vor.u32 %v13338_v40, %v11706_v55 }
 0x348   :  { %v13266_v5 = vld [vmem:[#allocation8 + $0x764] sm:$0xf]  ;;  %v11418_v4 = vld [vmem:[#allocation8 + $0x770] sm:$0xf0]  ;;  %v11837_v11 = vor.u32 %v13370_v21, %v11834_v22 }
 0x349   :  { %7797 = vmatpush.bf16.msrb.mxu1 %v11133_v6  ;;  %v13302_v62 = vld [vmem:[#allocation8 + $0x884] sm:$0xf]  ;;  %v11562_v24 = vld [vmem:[#allocation8 + $0x890] sm:$0xf0]  ;;  %7822 = vmatpush.bf16.msrb.mxu3 %v11437_v43  ;;  %v11421_v8 = vor.u32 %v13266_v5, %v11418_v4 }
 0x34a   :  { %v13334_v6 = vld [vmem:[#allocation8 + $0x984] sm:$0xf]  ;;  %v11818_v38 = vld [vmem:[#allocation8 + $0xa90] sm:$0xf0]  ;;  %v11565_v60 = vor.u32 %v13302_v62, %v11562_v24  ;;  %7771 = vmatmul.bf16.vlgmr.msra.gmra.mxu3 %v14375_v29 }
 0x34b   :  { %7811 = vmatpush.bf16.msrb.mxu2 %v11261_v26  ;;  %7784 = vmatpush.bf16.msrb.mxu0 %v10989_v23  ;;  %v11690_v26 = vld [vmem:[#allocation8 + $0x990] sm:$0xf0]  ;;  %v13366_v33 = vld [vmem:[#allocation8 + $0xa84] sm:$0xf] }
 0x34c   :  { %v11693_v17 = vor.u32 %v13334_v6, %v11690_v26  ;;  %v13262_v28 = vld [vmem:[#allocation8 + $0x744] sm:$0xf]  ;;  %v11402_v59 = vld [vmem:[#allocation8 + $0x750] sm:$0xf0]  ;;  %v11821_v46 = vor.u32 %v13366_v33, %v11818_v38 }
 0x34d   :  { %7798 = vmatpush.bf16.msrb.mxu1 %v11117_v12  ;;  %v13298_v10 = vld [vmem:[#allocation8 + $0x864] sm:$0xf]  ;;  %v11546_v41 = vld [vmem:[#allocation8 + $0x870] sm:$0xf0]  ;;  %7823 = vmatpush.bf16.msrb.mxu3 %v11421_v8 }
 0x34e   :  { %7785 = vmatmul.bf16.vlgmr.msrb.gmra.mxu0 %v14454_v9  ;;  %v13330_v23 = vld [vmem:[#allocation8 + $0x964] sm:$0xf]  ;;  %v11674_v39 = vld [vmem:[#allocation8 + $0x970] sm:$0xf0] }
 0x34f   :  { %7812 = vmatpush.bf16.msrb.mxu2 %v11245_v52  ;;  %7833 = vmatpush.bf16.msra.mxu0 %v11613_v51  ;;  %v13362_v30 = vld [vmem:[#allocation8 + $0xa64] sm:$0xf]  ;;  %v11802_v12 = vld [vmem:[#allocation8 + $0xa70] sm:$0xf0]  ;;  %v11405_v52 = vor.u32 %v13262_v28, %v11402_v59  ;;  %v11549_v51 = vor.u32 %v13298_v10, %v11546_v41 }
 0x350   :  { %7799 = vmatmul.bf16.vlgmr.msrb.gmra.mxu1 %v14456_v0  ;;  %v13258_v42 = vld [vmem:[#allocation8 + $0x724] sm:$0xf]  ;;  %v11386_v54 = vld [vmem:[#allocation8 + $0x730] sm:$0xf0] }
 0x351   :  { %7847 = vmatpush.bf16.msra.mxu1 %v11741_v32  ;;  %v11677_v32 = vor.u32 %v13330_v23, %v11674_v39  ;;  %v13294_v50 = vld [vmem:[#allocation8 + $0x844] sm:$0xf]  ;;  %v11530_v35 = vld [vmem:[#allocation8 + $0x850] sm:$0xf0]  ;;  %7824 = vmatpush.bf16.msrb.mxu3 %v11405_v52  ;;  %v11389_v44 = vor.u32 %v13258_v42, %v11386_v54 }
 0x352   :  { %7813 = vmatmul.bf16.vlgmr.msrb.gmra.mxu2 %v14458_v58  ;;  %v13326_v3 = vld [vmem:[#allocation8 + $0x944] sm:$0xf]  ;;  %v11658_v56 = vld [vmem:[#allocation8 + $0x950] sm:$0xf0] }
 0x353   :  { %7861 = vmatpush.bf16.msra.mxu2 %v11869_v31  ;;  %7834 = vmatpush.bf16.msra.mxu0 %v11597_v20  ;;  %v11805_v31 = vor.u32 %v13362_v30, %v11802_v12  ;;  %v13358_v19 = vld [vmem:[#allocation8 + $0xa44] sm:$0xf]  ;;  %v11786_v2 = vld [vmem:[#allocation8 + $0xa50] sm:$0xf0]  ;;  %v11661_v27 = vor.u32 %v13326_v3, %v11658_v56 }
 0x354   :  { %v13254_v20 = vld [vmem:[#allocation8 + $0x704] sm:$0xf]  ;;  %v11370_v63 = vld [vmem:[#allocation8 + $0x710] sm:$0xf0]  ;;  %v11789_v57 = vor.u32 %v13358_v19, %v11786_v2 }
 0x355   :  { %7848 = vmatpush.bf16.msra.mxu1 %v11725_v16  ;;  %v11533_v16 = vor.u32 %v13294_v50, %v11530_v35  ;;  %v13290_v15 = vld [vmem:[#allocation8 + $0x824] sm:$0xf]  ;;  %v11642_v55 = vld [vmem:[#allocation8 + $0x930] sm:$0xf0]  ;;  %7825 = vmatpush.bf16.msrb.mxu3 %v11389_v44 }
 0x356   :  { %v13322_v40 = vld [vmem:[#allocation8 + $0x924] sm:$0xf]  ;;  %v11770_v22 = vld [vmem:[#allocation8 + $0xa30] sm:$0xf0] }
 0x357   :  { %7862 = vmatpush.bf16.msra.mxu2 %v11853_v34  ;;  %7835 = vmatpush.bf16.msra.mxu0 %v11581_v45  ;;  %v11514_v34 = vld [vmem:[#allocation8 + $0x830] sm:$0xf0]  ;;  %v13354_v21 = vld [vmem:[#allocation8 + $0xa24] sm:$0xf]  ;;  %v11645_v4 = vor.u32 %v13322_v40, %v11642_v55 }
 0x358   :  { %v13410_v43 = vld [vmem:[#allocation8 + $0xbe4] sm:$0xf]  ;;  %v11994_v45 = vld [vmem:[#allocation8 + $0xbf0] sm:$0xf0]  ;;  %v11517_v5 = vor.u32 %v13290_v15, %v11514_v34  ;;  %v11773_v6 = vor.u32 %v13354_v21, %v11770_v22 }
 0x359   :  { %7849 = vmatpush.bf16.msra.mxu1 %v11709_v47  ;;  %v11373_v47 = vor.u32 %v13254_v20, %v11370_v63  ;;  %v13286_v62 = vld [vmem:[#allocation8 + $0x804] sm:$0xf]  ;;  %v11997_v26 = vor.u32 %v13410_v43, %v11994_v45  ;;  %v11626_v33 = vld [vmem:[#allocation8 + $0x910] sm:$0xf0] }
 0x35a   :  { %v13318_v24 = vld [vmem:[#allocation8 + $0x904] sm:$0xf]  ;;  %v11754_v8 = vld [vmem:[#allocation8 + $0xa10] sm:$0xf0] }
 0x35b   :  { %7863 = vmatpush.bf16.msra.mxu2 %v11837_v11  ;;  %7836 = vmatpush.bf16.msra.mxu0 %v11565_v60  ;;  %v11498_v11 = vld [vmem:[#allocation8 + $0x810] sm:$0xf0]  ;;  %v13350_v38 = vld [vmem:[#allocation8 + $0xa04] sm:$0xf]  ;;  %v11629_v23 = vor.u32 %v13318_v24, %v11626_v33 }
 0x35c   :  { %v13406_v60 = vld [vmem:[#allocation8 + $0xbc4] sm:$0xf]  ;;  %7826 = vmatpush.bf16.msrb.mxu3 %v11373_v47  ;;  %v12122_v59 = vld [vmem:[#allocation8 + $0xcf0] sm:$0xf0]  ;;  %v11501_v41 = vor.u32 %v13286_v62, %v11498_v11  ;;  %v11757_v12 = vor.u32 %v13350_v38, %v11754_v8 }
 0x35d   :  { %7850 = vmatpush.bf16.msra.mxu1 %v11693_v17  ;;  %v11978_v17 = vld [vmem:[#allocation8 + $0xbd0] sm:$0xf0]  ;;  %v13442_v28 = vld [vmem:[#allocation8 + $0xce4] sm:$0xf] }
 0x35e   :  { %v13474_v10 = vld [vmem:[#allocation8 + $0xde4] sm:$0xf]  ;;  %v12378_v30 = vld [vmem:[#allocation8 + $0xef0] sm:$0xf0]  ;;  %v11981_v52 = vor.u32 %v13406_v60, %v11978_v17 }
 0x35f   :  { %7864 = vmatpush.bf16.msra.mxu2 %v11821_v46  ;;  %7837 = vmatpush.bf16.msra.mxu0 %v11549_v51  ;;  %v12250_v46 = vld [vmem:[#allocation8 + $0xdf0] sm:$0xf0]  ;;  %v13506_v39 = vld [vmem:[#allocation8 + $0xee4] sm:$0xf]  ;;  %v12125_v51 = vor.u32 %v13442_v28, %v12122_v59 }
 0x360   :  { %7875 = vmatpush.bf16.msra.mxu3 %v11997_v26  ;;  %v13402_v42 = vld [vmem:[#allocation8 + $0xba4] sm:$0xf]  ;;  %v11962_v54 = vld [vmem:[#allocation8 + $0xbb0] sm:$0xf0] }
 0x361   :  { %7851 = vmatpush.bf16.msra.mxu1 %v11677_v32  ;;  %7827 = vmatmul.bf16.vlgmr.msrb.gmra.mxu3 %v14465_v1  ;;  %v12253_v32 = vor.u32 %v13474_v10, %v12250_v46  ;;  %v13438_v50 = vld [vmem:[#allocation8 + $0xcc4] sm:$0xf]  ;;  %v12106_v35 = vld [vmem:[#allocation8 + $0xcd0] sm:$0xf0]  ;;  %v11965_v44 = vor.u32 %v13402_v42, %v11962_v54 }
 0x362   :  { %v13470_v3 = vld [vmem:[#allocation8 + $0xdc4] sm:$0xf]  ;;  %v12234_v56 = vld [vmem:[#allocation8 + $0xdd0] sm:$0xf0]  ;;  %v12109_v20 = vor.u32 %v13438_v50, %v12106_v35 }
 0x363   :  { %7865 = vmatpush.bf16.msra.mxu2 %v11805_v31  ;;  %7838 = vmatpush.bf16.msra.mxu0 %v11533_v16  ;;  %v12381_v31 = vor.u32 %v13506_v39, %v12378_v30  ;;  %v13502_v19 = vld [vmem:[#allocation8 + $0xec4] sm:$0xf]  ;;  %v12362_v2 = vld [vmem:[#allocation8 + $0xed0] sm:$0xf0]  ;;  %v12237_v16 = vor.u32 %v13470_v3, %v12234_v56 }
 0x364   :  { %7876 = vmatpush.bf16.msra.mxu3 %v11981_v52  ;;  %v11946_v63 = vld [vmem:[#allocation8 + $0xb90] sm:$0xf0]  ;;  %v13434_v15 = vld [vmem:[#allocation8 + $0xca4] sm:$0xf]  ;;  %v12365_v34 = vor.u32 %v13502_v19, %v12362_v2 }
 0x365   :  { %7852 = vmatpush.bf16.msra.mxu1 %v11661_v27  ;;  %v13398_v27 = vld [vmem:[#allocation8 + $0xb84] sm:$0xf]  ;;  %v12218_v55 = vld [vmem:[#allocation8 + $0xdb0] sm:$0xf0] }
 0x366   :  { %v13466_v40 = vld [vmem:[#allocation8 + $0xda4] sm:$0xf]  ;;  %v12346_v22 = vld [vmem:[#allocation8 + $0xeb0] sm:$0xf0]  ;;  %v11949_v43 = vor.u32 %v13398_v27, %v11946_v63 }
 0x367   :  { %7866 = vmatpush.bf16.msra.mxu2 %v11789_v57  ;;  %7839 = vmatpush.bf16.msra.mxu0 %v11517_v5  ;;  %v12090_v57 = vld [vmem:[#allocation8 + $0xcb0] sm:$0xf0]  ;;  %v13498_v21 = vld [vmem:[#allocation8 + $0xea4] sm:$0xf]  ;;  %v12221_v47 = vor.u32 %v13466_v40, %v12218_v55 }
 0x368   :  { %7877 = vmatpush.bf16.msra.mxu3 %v11965_v44  ;;  %v12093_v45 = vor.u32 %v13434_v15, %v12090_v57  ;;  %v13394_v5 = vld [vmem:[#allocation8 + $0xb64] sm:$0xf]  ;;  %v12349_v11 = vor.u32 %v13498_v21, %v12346_v22  ;;  %v12074_v24 = vld [vmem:[#allocation8 + $0xc90] sm:$0xf0] }
 0x369   :  { %7853 = vmatpush.bf16.msra.mxu1 %v11645_v4  ;;  %v11930_v4 = vld [vmem:[#allocation8 + $0xb70] sm:$0xf0]  ;;  %v13430_v62 = vld [vmem:[#allocation8 + $0xc84] sm:$0xf] }
 0x36a   :  { %v12202_v26 = vld [vmem:[#allocation8 + $0xd90] sm:$0xf0]  ;;  %v13494_v33 = vld [vmem:[#allocation8 + $0xe84] sm:$0xf]  ;;  %v11933_v8 = vor.u32 %v13394_v5, %v11930_v4  ;;  %v12077_v60 = vor.u32 %v13430_v62, %v12074_v24 }
 0x36b   :  { %7867 = vmatpush.bf16.msra.mxu2 %v11773_v6  ;;  %7840 = vmatpush.bf16.msra.mxu0 %v11501_v41  ;;  %v13462_v6 = vld [vmem:[#allocation8 + $0xd84] sm:$0xf]  ;;  %v12330_v38 = vld [vmem:[#allocation8 + $0xe90] sm:$0xf0] }
 0x36c   :  { %7878 = vmatpush.bf16.msra.mxu3 %v11949_v43  ;;  %v12205_v17 = vor.u32 %v13462_v6, %v12202_v26  ;;  %v13390_v28 = vld [vmem:[#allocation8 + $0xb44] sm:$0xf]  ;;  %v11914_v59 = vld [vmem:[#allocation8 + $0xb50] sm:$0xf0]  ;;  %v12333_v46 = vor.u32 %v13494_v33, %v12330_v38 }
 0x36d   :  { %7854 = vmatpush.bf16.msra.mxu1 %v11629_v23  ;;  %v13426_v10 = vld [vmem:[#allocation8 + $0xc64] sm:$0xf]  ;;  %v12058_v41 = vld [vmem:[#allocation8 + $0xc70] sm:$0xf0]  ;;  %v11917_v52 = vor.u32 %v13390_v28, %v11914_v59  ;;  %v10592_v28 = vld [vmem:[#allocation8 + $0xe8] sm:$0xf] }
 0x36e   :  { %7841 = vmatmul.bf16.vlgmr.msra.gmra.mxu0 %v14536_v61  ;;  %v13458_v23 = vld [vmem:[#allocation8 + $0xd64] sm:$0xf]  ;;  %v12186_v39 = vld [vmem:[#allocation8 + $0xd70] sm:$0xf0]  ;;  %v13061_v59 = vld [vmem:[#allocation8 + $0xf4] sm:$0xf0] }
 0x36f   :  { %7868 = vmatpush.bf16.msra.mxu2 %v11757_v12  ;;  %7889 = vmatpush.bf16.msrb.mxu0 %v12125_v51  ;;  %v13490_v30 = vld [vmem:[#allocation8 + $0xe64] sm:$0xf]  ;;  %v12314_v12 = vld [vmem:[#allocation8 + $0xe70] sm:$0xf0]  ;;  %v12061_v51 = vor.u32 %v13426_v10, %v12058_v41  ;;  %v10720_v10 = vld [vmem:[#allocation8 + $0x1e8] sm:$0xf] }
 0x370   :  { %7855 = vmatmul.bf16.vlgmr.msra.gmra.mxu1 %v14538_v14  ;;  %7879 = vmatpush.bf16.msra.mxu3 %v11933_v8  ;;  %v13386_v42 = vld [vmem:[#allocation8 + $0xb24] sm:$0xf]  ;;  %v11898_v54 = vld [vmem:[#allocation8 + $0xb30] sm:$0xf0] }
 0x371   :  { %7903 = vmatpush.bf16.msrb.mxu1 %v12253_v32  ;;  %v12189_v32 = vor.u32 %v13458_v23, %v12186_v39  ;;  %v13422_v50 = vld [vmem:[#allocation8 + $0xc44] sm:$0xf]  ;;  %v12042_v35 = vld [vmem:[#allocation8 + $0xc50] sm:$0xf0]  ;;  %v11901_v44 = vor.u32 %v13386_v42, %v11898_v54  ;;  %v10848_v39 = vld [vmem:[#allocation8 + $0x2e8] sm:$0xf] }
 0x372   :  { %7869 = vmatmul.bf16.vlgmr.msra.gmra.mxu2 %v14540_v37  ;;  %v13454_v3 = vld [vmem:[#allocation8 + $0xd44] sm:$0xf]  ;;  %v12170_v56 = vld [vmem:[#allocation8 + $0xd50] sm:$0xf0] }
 0x373   :  { %7917 = vmatpush.bf16.msrb.mxu2 %v12381_v31  ;;  %7890 = vmatpush.bf16.msrb.mxu0 %v12109_v20  ;;  %v12317_v31 = vor.u32 %v13490_v30, %v12314_v12  ;;  %v13486_v19 = vld [vmem:[#allocation8 + $0xe44] sm:$0xf]  ;;  %v12298_v2 = vld [vmem:[#allocation8 + $0xe50] sm:$0xf0]  ;;  %v12173_v27 = vor.u32 %v13454_v3, %v12170_v56  ;;  %v13125_v30 = vld [vmem:[#allocation8 + $0x2f4] sm:$0xf0] }
 0x374   :  { %7880 = vmatpush.bf16.msra.mxu3 %v11917_v52  ;;  %v13382_v20 = vld [vmem:[#allocation8 + $0xb04] sm:$0xf]  ;;  %v11882_v63 = vld [vmem:[#allocation8 + $0xb10] sm:$0xf0]  ;;  %v12301_v57 = vor.u32 %v13486_v19, %v12298_v2  ;;  %v13057_v3 = vld [vmem:[#allocation8 + $0xd4] sm:$0xf0] }
 0x375   :  { %7904 = vmatpush.bf16.msrb.mxu1 %v12237_v16  ;;  %v12045_v16 = vor.u32 %v13422_v50, %v12042_v35  ;;  %v13418_v15 = vld [vmem:[#allocation8 + $0xc24] sm:$0xf]  ;;  %v12154_v55 = vld [vmem:[#allocation8 + $0xd30] sm:$0xf0]  ;;  %v10849_v35 = vor.u32 %v13125_v30, %v10848_v39  ;;  %v10704_v56 = vld [vmem:[#allocation8 + $0x1c8] sm:$0xf]  ;;  %v14631_v30 = vpop.f32.mrf.mxu3 }
 0x376   :  { %v13450_v40 = vld [vmem:[#allocation8 + $0xd24] sm:$0xf]  ;;  %v12282_v22 = vld [vmem:[#allocation8 + $0xe30] sm:$0xf0]  ;;  %v13089_v19 = vld [vmem:[#allocation8 + $0x1d4] sm:$0xf0] }
 0x377   :  { %7918 = vmatpush.bf16.msrb.mxu2 %v12365_v34  ;;  %7891 = vmatpush.bf16.msrb.mxu0 %v12093_v45  ;;  %v12026_v34 = vld [vmem:[#allocation8 + $0xc30] sm:$0xf0]  ;;  %v13482_v21 = vld [vmem:[#allocation8 + $0xe24] sm:$0xf]  ;;  %v12157_v4 = vor.u32 %v13450_v40, %v12154_v55  ;;  %v10832_v2 = vld [vmem:[#allocation8 + $0x2c8] sm:$0xf] }
 0x378   :  { %v13538_v43 = vld [vmem:[#allocation8 + $0xfe4] sm:$0xf]  ;;  %v12506_v45 = vld [vmem:[#allocation8 + $0xff0] sm:$0xf0]  ;;  %7881 = vmatpush.bf16.msra.mxu3 %v11901_v44  ;;  %v12029_v5 = vor.u32 %v13418_v15, %v12026_v34  ;;  %v12285_v6 = vor.u32 %v13482_v21, %v12282_v22  ;;  %v13121_v44 = vld [vmem:[#allocation8 + $0x2d4] sm:$0xf0] }
 0x379   :  { %7905 = vmatpush.bf16.msrb.mxu1 %v12221_v47  ;;  %v11885_v47 = vor.u32 %v13382_v20, %v11882_v63  ;;  %v13414_v62 = vld [vmem:[#allocation8 + $0xc04] sm:$0xf]  ;;  %v12509_v26 = vor.u32 %v13538_v43, %v12506_v45  ;;  %v12138_v33 = vld [vmem:[#allocation8 + $0xd10] sm:$0xf0]  ;;  %v10560_v34 = vld [vmem:[#allocation8 + $0xa8] sm:$0xf]  ;;  %v14625_v45 = vpop.f32.mrf.mxu1 }
 0x37a   :  { %v13446_v24 = vld [vmem:[#allocation8 + $0xd04] sm:$0xf]  ;;  %v12266_v8 = vld [vmem:[#allocation8 + $0xe10] sm:$0xf0]  ;;  %v13053_v40 = vld [vmem:[#allocation8 + $0xb4] sm:$0xf0] }
 0x37b   :  { %7919 = vmatpush.bf16.msrb.mxu2 %v12349_v11  ;;  %7892 = vmatpush.bf16.msrb.mxu0 %v12077_v60  ;;  %v12010_v11 = vld [vmem:[#allocation8 + $0xc10] sm:$0xf0]  ;;  %v13478_v38 = vld [vmem:[#allocation8 + $0xe04] sm:$0xf]  ;;  %v12141_v23 = vor.u32 %v13446_v24, %v12138_v33  ;;  %v10688_v55 = vld [vmem:[#allocation8 + $0x1a8] sm:$0xf] }
 0x37c   :  { %v13534_v60 = vld [vmem:[#allocation8 + $0xfc4] sm:$0xf]  ;;  %7882 = vmatpush.bf16.msra.mxu3 %v11885_v47  ;;  %v12013_v41 = vor.u32 %v13414_v62, %v12010_v11  ;;  %v12269_v12 = vor.u32 %v13478_v38, %v12266_v8  ;;  %v12474_v50 = vld [vmem:[#allocation8 + $0xfb0] sm:$0xf0]  ;;  %v13085_v21 = vld [vmem:[#allocation8 + $0x1b4] sm:$0xf0]  ;;  %v14627_v47 = vpop.f32.mrf.mxu2 }
 0x37d   :  { %7906 = vmatpush.bf16.msrb.mxu1 %v12205_v17  ;;  %v12490_v17 = vld [vmem:[#allocation8 + $0xfd0] sm:$0xf0]  ;;  %v13530_v54 = vld [vmem:[#allocation8 + $0xfa4] sm:$0xf]  ;;  %v10816_v22 = vld [vmem:[#allocation8 + $0x2a8] sm:$0xf]  ;;  %v10689_v62 = vor.u32 %v13085_v21, %v10688_v55 }
 0x37e   :  { %v12493_v52 = vor.u32 %v13534_v60, %v12490_v17  ;;  %v12477_v20 = vor.u32 %v13530_v54, %v12474_v50  ;;  %v13526_v63 = vld [vmem:[#allocation8 + $0xf84] sm:$0xf]  ;;  %v12458_v15 = vld [vmem:[#allocation8 + $0xf90] sm:$0xf0]  ;;  %v13117_v43 = vld [vmem:[#allocation8 + $0x2b4] sm:$0xf0] }
 0x37f   :  { %7920 = vmatpush.bf16.msrb.mxu2 %v12333_v46  ;;  %7893 = vmatpush.bf16.msrb.mxu0 %v12061_v51  ;;  %v13093_v46 = vld [vmem:[#allocation8 + $0x1f4] sm:$0xf0]  ;;  %v14619_v51 = vpop.f32.mrf.mxu0  ;;  %v13522_v11 = vld [vmem:[#allocation8 + $0xf64] sm:$0xf]  ;;  %v12442_v24 = vld [vmem:[#allocation8 + $0xf70] sm:$0xf0] }
 0x380   :  { %7931 = vmatpush.bf16.msrb.mxu3 %v12509_v26  ;;  %v10721_v42 = vor.u32 %v13093_v46, %v10720_v10  ;;  %v10817_v26 = vor.u32 %v13117_v43, %v10816_v22  ;;  %v13049_v33 = vld [vmem:[#allocation8 + $0x94] sm:$0xf0]  ;;  %v10672_v38 = vld [vmem:[#allocation8 + $0x188] sm:$0xf]  ;;  %v13510_v43 = vld [vmem:[#allocation8 + $0xf04] sm:$0xf] }
 0x381   :  { %7907 = vmatpush.bf16.msrb.mxu1 %v12189_v32  ;;  %7883 = vmatmul.bf16.vlgmr.msra.gmra.mxu3 %v14544_v36  ;;  %v10593_v32 = vor.u32 %v13061_v59, %v10592_v28  ;;  %v13081_v8 = vld [vmem:[#allocation8 + $0x194] sm:$0xf0]  ;;  %v10800_v17 = vld [vmem:[#allocation8 + $0x288] sm:$0xf]  ;;  %v12445_v59 = vor.u32 %v13522_v11, %v12442_v24 }
 0x382   :  { %v13113_v28 = vld [vmem:[#allocation8 + $0x294] sm:$0xf0]  ;;  %v10673_v46 = vor.u32 %v13081_v8, %v10672_v38  ;;  %v10528_v39 = vld [vmem:[#allocation8 + $0x68] sm:$0xf] }
 0x383   :  { %7921 = vmatpush.bf16.msrb.mxu2 %v12317_v31  ;;  %7894 = vmatpush.bf16.msrb.mxu0 %v12045_v16  ;;  %v10576_v31 = vld [vmem:[#allocation8 + $0xc8] sm:$0xf]  ;;  %v13109_v50 = vld [vmem:[#allocation8 + $0x274] sm:$0xf0] }
 0x384   :  { %7932 = vmatpush.bf16.msrb.mxu3 %v12493_v52  ;;  %v10577_v16 = vor.u32 %v13057_v3, %v10576_v31  ;;  %v13045_v52 = vld [vmem:[#allocation8 + $0x74] sm:$0xf0]  ;;  %v10784_v54 = vld [vmem:[#allocation8 + $0x268] sm:$0xf]  ;;  %v14633_v31 = vld [vmem:[#allocation10] sm:$0xf] }
 0x385   :  { %7908 = vmatpush.bf16.msrb.mxu1 %v12173_v27  ;;  %v10705_v27 = vor.u32 %v13089_v19, %v10704_v56  ;;  %v10529_v3 = vor.u32 %v13045_v52, %v10528_v39  ;;  %v13514_v19 = vld [vmem:[#allocation8 + $0xf24] sm:$0xf]  ;;  %v13105_v55 = vld [vmem:[#allocation8 + $0x254] sm:$0xf0]  ;;  %v4929_v21 = vperm.slane %v14633_v31, 0 }
 0x386   :  { %v10496_v11 = vld [vmem:[#allocation8 + $0x28] sm:$0xf]  ;;  %v13037_v24 = vld [vmem:[#allocation8 + $0x34] sm:$0xf0] }
 0x387   :  { %7922 = vmatpush.bf16.msrb.mxu2 %v12301_v57  ;;  %7895 = vmatpush.bf16.msrb.mxu0 %v12029_v5  ;;  %v10833_v57 = vor.u32 %v13121_v44, %v10832_v2  ;;  %v12461_v5 = vor.u32 %v13526_v63, %v12458_v15  ;;  %v14629_v60 = vpop.f32.mrf.mxu0  ;;  %v12410_v2 = vld [vmem:[#allocation8 + $0xf30] sm:$0xf0]  ;;  %v10512_v44 = vld [vmem:[#allocation8 + $0x48] sm:$0xf]  ;;  %v13041_v63 = vld [vmem:[#allocation8 + $0x54] sm:$0xf0] }
 0x388   :  { %7933 = vmatpush.bf16.msrb.mxu3 %v12477_v20  ;;  %v14635_v20 = vpop.f32.mrf.mxu1  ;;  %v10640_v15 = vld [vmem:[#allocation8 + $0x148] sm:$0xf]  ;;  %v12413_v22 = vor.u32 %v13514_v19, %v12410_v2  ;;  %v13101_v8 = vld [vmem:[#allocation8 + $0x234] sm:$0xf0] }
 0x389   :  { %7909 = vmatpush.bf16.msrb.mxu1 %v12157_v4  ;;  %v10561_v4 = vor.u32 %v13053_v40, %v10560_v34  ;;  %v13073_v34 = vld [vmem:[#allocation8 + $0x154] sm:$0xf0]  ;;  %v10768_v40 = vld [vmem:[#allocation8 + $0x248] sm:$0xf] }
 0x38a   :  { %v10752_v38 = vld [vmem:[#allocation8 + $0x228] sm:$0xf]  ;;  %v13153_v2 = vld [vmem:[#allocation8 + $0x3d4] sm:$0xf0] }
 0x38b   :  { %7923 = vmatpush.bf16.msrb.mxu2 %v12285_v6  ;;  %7896 = vmatpush.bf16.msrb.mxu0 %v12013_v41  ;;  %v10544_v6 = vld [vmem:[#allocation8 + $0x88] sm:$0xf]  ;;  %v13518_v41 = vld [vmem:[#allocation8 + $0xf44] sm:$0xf] }
 0x38c   :  { %7934 = vmatpush.bf16.msrb.mxu3 %v12461_v5  ;;  %v10545_v10 = vor.u32 %v13049_v33, %v10544_v6  ;;  %v10513_v5 = vor.u32 %v13041_v63, %v10512_v44  ;;  %v10769_v6 = vor.u32 %v13105_v55, %v10768_v40  ;;  %v13069_v33 = vld [vmem:[#allocation8 + $0x134] sm:$0xf0]  ;;  %v10480_v39 = vld [vmem:[#allocation8 + $0x8] sm:$0xf] }
 0x38d   :  { %7910 = vmatpush.bf16.msrb.mxu1 %v12141_v23  ;;  %v12426_v23 = vld [vmem:[#allocation8 + $0xf50] sm:$0xf0]  ;;  %v10608_v52 = vld [vmem:[#allocation8 + $0x108] sm:$0xf]  ;;  %v13189_v44 = vld [vmem:[#allocation8 + $0x4f4] sm:$0xf0] }
 0x38e   :  { %7897 = vmatmul.bf16.vlgmr.msrb.gmra.mxu0 %v14573_v25  ;;  %v10960_v19 = vld [vmem:[#allocation8 + $0x3c8] sm:$0xf]  ;;  %v13221_v63 = vld [vmem:[#allocation8 + $0x5f4] sm:$0xf0] }
 0x38f   :  { %7924 = vmatpush.bf16.msrb.mxu2 %v12269_v12  ;;  %7945 = vmatpush.bf16.msra.mxu0 %v10593_v32  ;;  %v10801_v12 = vor.u32 %v13113_v28, %v10800_v17  ;;  %v10656_v32 = vld [vmem:[#allocation8 + $0x168] sm:$0xf]  ;;  %v13157_v28 = vld [vmem:[#allocation8 + $0x3f4] sm:$0xf0] }
 0x390   :  { %7911 = vmatmul.bf16.vlgmr.msrb.gmra.mxu1 %v14576_v48  ;;  %7935 = vmatpush.bf16.msrb.mxu3 %v12445_v59  ;;  %v10976_v17 = vld [vmem:[#allocation8 + $0x3e8] sm:$0xf]  ;;  %v14642_v59 = vpop.f32.mrf.mxu3 }
 0x391   :  { %7959 = vmatpush.bf16.msra.mxu1 %v10721_v42  ;;  %v13077_v42 = vld [vmem:[#allocation8 + $0x174] sm:$0xf0] }
 0x392   :  { %7925 = vmatmul.bf16.vlgmr.msrb.gmra.mxu2 %v14590_v53  ;;  %v10657_v56 = vor.u32 %v13077_v42, %v10656_v32  ;;  %v14647_v32 = vpop.f32.mrf.mxu1 }
 0x393   :  { %7973 = vmatpush.bf16.msra.mxu2 %v10849_v35  ;;  %7946 = vmatpush.bf16.msra.mxu0 %v10577_v16  ;;  %v12429_v35 = vor.u32 %v13518_v41, %v12426_v23  ;;  %v14637_v16 = vpop.f32.mrf.mxu2  ;;  %v10497_v41 = vor.u32 %v13037_v24, %v10496_v11 }
 0x395   :  { %7960 = vmatpush.bf16.msra.mxu1 %v10705_v27  ;;  %v10785_v27 = vor.u32 %v13109_v50, %v10784_v54  ;;  %7936 = vmatpush.bf16.msrb.mxu3 %v12429_v35  ;;  %v10753_v54 = vor.u32 %v13101_v8, %v10752_v38  ;;  %v10977_v50 = vor.u32 %v13157_v28, %v10976_v17  ;;  %v13065_v35 = vld [vmem:[#allocation8 + $0x114] sm:$0xf0]  ;;  %v11216_v28 = vld [vmem:[#allocation8 + $0x5c8] sm:$0xf] }
 0x396   :  { %v10609_v55 = vor.u32 %v13065_v35, %v10608_v52  ;;  %v13185_v17 = vld [vmem:[#allocation8 + $0x4d4] sm:$0xf0]  ;;  %v11072_v52 = vld [vmem:[#allocation8 + $0x4a8] sm:$0xf] }
 0x397   :  { %7974 = vmatpush.bf16.msra.mxu2 %v10833_v57  ;;  %7947 = vmatpush.bf16.msra.mxu0 %v10561_v4  ;;  %v14639_v57 = vpop.f32.mrf.mxu0  ;;  %v10641_v4 = vor.u32 %v13073_v34, %v10640_v15 }
 0x398   :  { %v14659_v38 = vpop.f32.mrf.mxu3 }
 0x399   :  { %7961 = vmatpush.bf16.msra.mxu1 %v10689_v62  ;;  %v12394_v62 = vld [vmem:[#allocation8 + $0xf10] sm:$0xf0]  ;;  %7937 = vmatpush.bf16.msrb.mxu3 %v12413_v22  ;;  %v11360_v22 = vld [vmem:[#allocation8 + $0x6e8] sm:$0xf] }
 0x39b   :  { %7975 = vmatpush.bf16.msra.mxu2 %v10817_v26  ;;  %7948 = vmatpush.bf16.msra.mxu0 %v10545_v10  ;;  %v10624_v26 = vld [vmem:[#allocation8 + $0x128] sm:$0xf]  ;;  %v12397_v10 = vor.u32 %v13510_v43, %v12394_v62  ;;  %v14649_v42 = vpop.f32.mrf.mxu2  ;;  %v13253_v43 = vld [vmem:[#allocation8 + $0x6f4] sm:$0xf0] }
 0x39c   :  { %v10625_v23 = vor.u32 %v13069_v33, %v10624_v26  ;;  %v11088_v26 = vld [vmem:[#allocation8 + $0x4c8] sm:$0xf]  ;;  %v7509_v33 = vadd.f32 %v14629_v60, %v4929_v21  ;;  %v11361_v8 = vor.u32 %v13253_v43, %v11360_v22  ;;  %v13141_v22 = vld [vmem:[#allocation8 + $0x374] sm:$0xf0] }
 0x39d   :  { %7962 = vmatpush.bf16.msra.mxu1 %v10673_v46  ;;  %v7507_v46 = vadd.f32 %v14619_v51, %v4929_v21  ;;  %v11104_v51 = vld [vmem:[#allocation8 + $0x4e8] sm:$0xf]  ;;  %7938 = vmatpush.bf16.msrb.mxu3 %v12397_v10  ;;  %v13217_v10 = vld [vmem:[#allocation8 + $0x5d4] sm:$0xf0] }
 0x39e   :  { %v11105_v11 = vor.u32 %v13189_v44, %v11104_v51  ;;  %v10928_v60 = vld [vmem:[#allocation8 + $0x388] sm:$0xf]  ;;  %v13145_v21 = vld [vmem:[#allocation8 + $0x394] sm:$0xf0] }
 0x39f   :  { %7976 = vmatpush.bf16.msra.mxu2 %v10801_v12  ;;  %7949 = vmatpush.bf16.msra.mxu0 %v10529_v3  ;;  %v13033_v12 = vld [vmem:[#allocation8 + $0x14] sm:$0xf0]  ;;  %v10736_v3 = vld [vmem:[#allocation8 + $0x208] sm:$0xf]  ;;  %v7521_v15 = vadd.f32 %v14625_v45, %v7507_v46  ;;  %v14652_v34 = vpop.f32.mrf.mxu0 }
 0x3a0   :  { %v10481_v40 = vor.u32 %v13033_v12, %v10480_v39  ;;  %7939 = vmatmul.bf16.vlgmr.msrb.gmra.mxu3 %v14608_v13  ;;  %v13149_v45 = vld [vmem:[#allocation8 + $0x3b4] sm:$0xf0]  ;;  %v11089_v39 = vor.u32 %v13185_v17, %v11088_v26  ;;  %v11217_v12 = vor.u32 %v13217_v10, %v11216_v28  ;;  %v11328_v44 = vld [vmem:[#allocation8 + $0x6a8] sm:$0xf] }
 0x3a1   :  { %7963 = vmatpush.bf16.msra.mxu1 %v10657_v56  ;;  %v13097_v56 = vld [vmem:[#allocation8 + $0x214] sm:$0xf0]  ;;  %7987 = vmatpush.bf16.msra.mxu3 %v10977_v50  ;;  %v7535_v62 = vadd.f32 %v14627_v47, %v7521_v15  ;;  %v11344_v47 = vld [vmem:[#allocation8 + $0x6c8] sm:$0xf]  ;;  %v14663_v50 = vpop.f32.mrf.mxu1 }
 0x3a2   :  { %v13249_v46 = vld [vmem:[#allocation8 + $0x6d4] sm:$0xf0]  ;;  %v11056_v43 = vld [vmem:[#allocation8 + $0x488] sm:$0xf] }
 0x3a3   :  { %7977 = vmatpush.bf16.msra.mxu2 %v10785_v27  ;;  %7950 = vmatpush.bf16.msra.mxu0 %v10513_v5  ;;  %v11232_v27 = vld [vmem:[#allocation8 + $0x5e8] sm:$0xf]  ;;  %v10737_v5 = vor.u32 %v13097_v56, %v10736_v3  ;;  %v14665_v35 = vpop.f32.mrf.mxu2  ;;  %v11345_v3 = vor.u32 %v13249_v46, %v11344_v47  ;;  %v13181_v56 = vld [vmem:[#allocation8 + $0x4b4] sm:$0xf0] }
 0x3a4   :  { %v11233_v24 = vor.u32 %v13221_v63, %v11232_v27  ;;  %v10929_v63 = vor.u32 %v13145_v21, %v10928_v60  ;;  %v11073_v15 = vor.u32 %v13181_v56, %v11072_v52  ;;  %v10896_v28 = vld [vmem:[#allocation8 + $0x348] sm:$0xf]  ;;  %v13137_v10 = vld [vmem:[#allocation8 + $0x354] sm:$0xf0] }
 0x3a5   :  { %7964 = vmatpush.bf16.msra.mxu1 %v10641_v4  ;;  %v10961_v4 = vor.u32 %v13153_v2, %v10960_v19  ;;  %v11200_v19 = vld [vmem:[#allocation8 + $0x5a8] sm:$0xf]  ;;  %v13237_v21 = vld [vmem:[#allocation8 + $0x674] sm:$0xf0] }
 0x3a6   :  { %v11040_v47 = vld [vmem:[#allocation8 + $0x468] sm:$0xf] }
 0x3a7   :  { %7978 = vmatpush.bf16.msra.mxu2 %v10769_v6  ;;  %7951 = vmatpush.bf16.msra.mxu0 %v10497_v41  ;;  %v10944_v6 = vld [vmem:[#allocation8 + $0x3a8] sm:$0xf]  ;;  %v7618_v51 = vpop.f32.mrf.mxu0 }
 0x3a8   :  { %7988 = vmatpush.bf16.msra.mxu3 %v10961_v4  ;;  %v10945_v41 = vor.u32 %v13149_v45, %v10944_v6  ;;  %v11184_v4 = vld [vmem:[#allocation8 + $0x588] sm:$0xf]  ;;  %v13241_v6 = vld [vmem:[#allocation8 + $0x694] sm:$0xf0]  ;;  %v7606_v45 = vpop.f32.mrf.mxu3 }
 0x3a9   :  { %7965 = vmatpush.bf16.msra.mxu1 %v10625_v23  ;;  %v7549_v23 = vadd.f32 %v14631_v30, %v7535_v62  ;;  %v13213_v30 = vld [vmem:[#allocation8 + $0x5b4] sm:$0xf0]  ;;  %v11296_v60 = vld [vmem:[#allocation8 + $0x668] sm:$0xf] }
 0x3aa   :  { %v13209_v62 = vld [vmem:[#allocation8 + $0x594] sm:$0xf0] }
 0x3ab   :  { %7979 = vmatpush.bf16.msra.mxu2 %v10753_v54  ;;  %7952 = vmatpush.bf16.msra.mxu0 %v10481_v40  ;;  %v7523_v54 = vadd.f32 %v14635_v20, %v7509_v33  ;;  %v7563_v2 = vadd.f32 %v14639_v57, %v7549_v23  ;;  %v13245_v20 = vld [vmem:[#allocation8 + $0x6b4] sm:$0xf0]  ;;  %v11201_v40 = vor.u32 %v13213_v30, %v11200_v19  ;;  %v10880_v19 = vld [vmem:[#allocation8 + $0x328] sm:$0xf] }
 0x3ac   :  { %7989 = vmatpush.bf16.msra.mxu3 %v10945_v41  ;;  %v11329_v57 = vor.u32 %v13245_v20, %v11328_v44  ;;  %v11185_v17 = vor.u32 %v13209_v62, %v11184_v4  ;;  %v7632_v41 = vpop.f32.mrf.mxu1  ;;  %v11024_v30 = vld [vmem:[#allocation8 + $0x448] sm:$0xf]  ;;  %v11297_v44 = vor.u32 %v13237_v21, %v11296_v60  ;;  %v13169_v20 = vld [vmem:[#allocation8 + $0x454] sm:$0xf0] }
 0x3ad   :  { %7966 = vmatpush.bf16.msra.mxu1 %v10609_v55  ;;  %v7537_v27 = vadd.f32 %v14637_v16, %v7523_v54  ;;  %v10912_v55 = vld [vmem:[#allocation8 + $0x368] sm:$0xf]  ;;  %v13129_v62 = vld [vmem:[#allocation8 + $0x314] sm:$0xf0] }
 0x3ae   :  { %7953 = vmatmul.bf16.vlgmr.msra.gmra.mxu0 %v14332_v18  ;;  %v10913_v26 = vor.u32 %v13141_v22, %v10912_v55  ;;  %v13233_v55 = vld [vmem:[#allocation8 + $0x654] sm:$0xf0]  ;;  %v11120_v21 = vld [vmem:[#allocation8 + $0x508] sm:$0xf] }
 0x3af   :  { %7980 = vmatpush.bf16.msra.mxu2 %v10737_v5  ;;  %8001 = vmatpush.bf16.msrb.mxu0 %v11105_v11  ;;  %v13177_v5 = vld [vmem:[#allocation8 + $0x494] sm:$0xf0]  ;;  %v7577_v11 = vadd.f32 %v14647_v32, %v7563_v2  ;;  %v7551_v16 = vadd.f32 %v14642_v59, %v7537_v27  ;;  %v7646_v32 = vpop.f32.mrf.mxu2  ;;  %v11168_v59 = vld [vmem:[#allocation8 + $0x568] sm:$0xf]  ;;  %v7620_v54 = vpop.f32.mrf.mxu0 }
 0x3b0   :  { %7967 = vmatmul.bf16.vlgmr.msra.gmra.mxu1 %v14334_v49  ;;  %7990 = vmatpush.bf16.msra.mxu3 %v10929_v63  ;;  %v11152_v27 = vld [vmem:[#allocation8 + $0x548] sm:$0xf]  ;;  %v13201_v63 = vld [vmem:[#allocation8 + $0x554] sm:$0xf0]  ;;  %v7660_v22 = vpop.f32.mrf.mxu3 }
 0x3b1   :  { %8015 = vmatpush.bf16.msrb.mxu1 %v11233_v24  ;;  %v11312_v24 = vld [vmem:[#allocation8 + $0x688] sm:$0xf]  ;;  %v7591_v33 = vadd.f32 %v14649_v42, %v7577_v11  ;;  %v7565_v46 = vadd.f32 %v14652_v34, %v7551_v16  ;;  %v10897_v42 = vor.u32 %v13137_v10, %v10896_v28  ;;  %v13133_v34 = vld [vmem:[#allocation8 + $0x334] sm:$0xf0]  ;;  %v11153_v4 = vor.u32 %v13201_v63, %v11152_v27 }
 0x3b2   :  { %7981 = vmatmul.bf16.vlgmr.msra.gmra.mxu2 %v14371_v7  ;;  %v11313_v23 = vor.u32 %v13241_v6, %v11312_v24  ;;  %v13165_v11 = vld [vmem:[#allocation8 + $0x434] sm:$0xf0]  ;;  %v11136_v6 = vld [vmem:[#allocation8 + $0x528] sm:$0xf] }
 0x3b3   :  { %8029 = vmatpush.bf16.msrb.mxu2 %v11361_v8  ;;  %8002 = vmatpush.bf16.msrb.mxu0 %v11089_v39  ;;  %v11057_v8 = vor.u32 %v13177_v5, %v11056_v43  ;;  %v13173_v39 = vld [vmem:[#allocation8 + $0x474] sm:$0xf0]  ;;  %v7605_v52 = vadd.f32 %v14659_v38, %v7591_v33  ;;  %v7579_v2 = vadd.f32 %v14663_v50, %v7565_v46  ;;  %v11008_v50 = vld [vmem:[#allocation8 + $0x428] sm:$0xf] }
 0x3b4   :  { %7991 = vmatpush.bf16.msra.mxu3 %v10913_v26  ;;  %v10881_v43 = vor.u32 %v13133_v34, %v10880_v19  ;;  %v11025_v5 = vor.u32 %v13169_v20, %v11024_v30  ;;  %v13197_v16 = vld [vmem:[#allocation8 + $0x534] sm:$0xf0]  ;;  %v7634_v28 = vpop.f32.mrf.mxu1  ;;  %v11472_v19 = vld [vmem:[#allocation8 + $0x7c8] sm:$0xf] }
 0x3b5   :  { %8016 = vmatpush.bf16.msrb.mxu1 %v11217_v12  ;;  %v13205_v12 = vld [vmem:[#allocation8 + $0x574] sm:$0xf0]  ;;  %v7593_v38 = vadd.f32 %v14665_v35, %v7579_v2  ;;  %v11616_v30 = vld [vmem:[#allocation8 + $0x8e8] sm:$0xf] }
 0x3b6   :  { %v11169_v56 = vor.u32 %v13205_v12, %v11168_v59  ;;  %v13229_v33 = vld [vmem:[#allocation8 + $0x634] sm:$0xf0]  ;;  %v11137_v59 = vor.u32 %v13197_v16, %v11136_v6  ;;  %v10992_v12 = vld [vmem:[#allocation8 + $0x408] sm:$0xf] }
 0x3b7   :  { %8030 = vmatpush.bf16.msrb.mxu2 %v11345_v3  ;;  %8003 = vmatpush.bf16.msrb.mxu0 %v11073_v15  ;;  %v11041_v3 = vor.u32 %v13173_v39, %v11040_v47  ;;  %v7619_v15 = vadd.f32 %v7618_v51, %v7605_v52  ;;  %v11264_v51 = vld [vmem:[#allocation8 + $0x628] sm:$0xf]  ;;  %v13285_v35 = vld [vmem:[#allocation8 + $0x7f4] sm:$0xf0]  ;;  %v7648_v10 = vpop.f32.mrf.mxu2  ;;  %v11009_v39 = vor.u32 %v13165_v11, %v11008_v50 }
 0x3b8   :  { %7992 = vmatpush.bf16.msra.mxu3 %v10897_v42  ;;  %v13161_v60 = vld [vmem:[#allocation8 + $0x414] sm:$0xf0]  ;;  %v11744_v2 = vld [vmem:[#allocation8 + $0x9e8] sm:$0xf] }
 0x3b9   :  { %8017 = vmatpush.bf16.msrb.mxu1 %v11201_v40  ;;  %v11280_v40 = vld [vmem:[#allocation8 + $0x648] sm:$0xf]  ;;  %v7633_v26 = vadd.f32 %v7632_v41, %v7619_v15  ;;  %v11265_v41 = vor.u32 %v13229_v33, %v11264_v51  ;;  %v13281_v34 = vld [vmem:[#allocation8 + $0x7d4] sm:$0xf0]  ;;  %v10993_v27 = vor.u32 %v13161_v60, %v10992_v12 }
 0x3ba   :  { %v11281_v24 = vor.u32 %v13233_v55, %v11280_v40  ;;  %v11872_v15 = vld [vmem:[#allocation8 + $0xae8] sm:$0xf]  ;;  %v7662_v55 = vpop.f32.mrf.mxu3  ;;  %v13277_v50 = vld [vmem:[#allocation8 + $0x7b4] sm:$0xf0] }
 0x3bb   :  { %8031 = vmatpush.bf16.msrb.mxu2 %v11329_v57  ;;  %8004 = vmatpush.bf16.msrb.mxu0 %v11057_v8  ;;  %v10864_v57 = vld [vmem:[#allocation8 + $0x308] sm:$0xf]  ;;  %v7647_v46 = vadd.f32 %v7646_v32, %v7633_v26  ;;  %v13317_v32 = vld [vmem:[#allocation8 + $0x8f4] sm:$0xf0] }
 0x3bc   :  { %v11488_v8 = vld [vmem:[#allocation8 + $0x7e8] sm:$0xf]  ;;  %7993 = vmatpush.bf16.msra.mxu3 %v10881_v43  ;;  %v10865_v47 = vor.u32 %v13129_v62, %v10864_v57  ;;  %v11473_v43 = vor.u32 %v13281_v34, %v11472_v19  ;;  %v13313_v51 = vld [vmem:[#allocation8 + $0x8d4] sm:$0xf0] }
 0x3bd   :  { %8018 = vmatpush.bf16.msrb.mxu1 %v11185_v17  ;;  %v7607_v17 = vadd.f32 %v7606_v45, %v7593_v38  ;;  %v11489_v52 = vor.u32 %v13285_v35, %v11488_v8  ;;  %v13225_v45 = vld [vmem:[#allocation8 + $0x614] sm:$0xf0]  ;;  %v7661_v20 = vadd.f32 %v7660_v22, %v7647_v46  ;;  %v11456_v62 = vld [vmem:[#allocation8 + $0x7a8] sm:$0xf] }
 0x3be   :  { %v11600_v22 = vld [vmem:[#allocation8 + $0x8c8] sm:$0xf]  ;;  %v13345_v33 = vld [vmem:[#allocation8 + $0x9d4] sm:$0xf0] }
 0x3bf   :  { %8032 = vmatpush.bf16.msrb.mxu2 %v11313_v23  ;;  %8005 = vmatpush.bf16.msrb.mxu0 %v11041_v3  ;;  %v7674_v23 = vpop.f32.mrf.mxu0  ;;  %v7621_v42 = vadd.f32 %v7620_v54, %v7607_v17  ;;  %v13193_v3 = vld [vmem:[#allocation8 + $0x514] sm:$0xf0]  ;;  %v7702_v6 = vpop.f32.mrf.mxu2  ;;  %v11728_v26 = vld [vmem:[#allocation8 + $0x9c8] sm:$0xf]  ;;  %v11457_v17 = vor.u32 %v13277_v50, %v11456_v62  ;;  %v11601_v46 = vor.u32 %v13313_v51, %v11600_v22 }
 0x3c0   :  { %7994 = vmatpush.bf16.msra.mxu3 %v10865_v47  ;;  %v11121_v63 = vor.u32 %v13193_v3, %v11120_v21  ;;  %v13381_v54 = vld [vmem:[#allocation8 + $0xaf4] sm:$0xf0]  ;;  %v7675_v57 = vadd.f32 %v7674_v23, %v7661_v20  ;;  %v11856_v8 = vld [vmem:[#allocation8 + $0xac8] sm:$0xf]  ;;  %v11729_v23 = vor.u32 %v13345_v33, %v11728_v26 }
 0x3c1   :  { %8019 = vmatpush.bf16.msrb.mxu1 %v11169_v56  ;;  %v11248_v56 = vld [vmem:[#allocation8 + $0x608] sm:$0xf]  ;;  %v7635_v40 = vadd.f32 %v7634_v28, %v7621_v42  ;;  %v11873_v16 = vor.u32 %v13381_v54, %v11872_v15  ;;  %v13377_v35 = vld [vmem:[#allocation8 + $0xad4] sm:$0xf0] }
 0x3c2   :  { %v11249_v38 = vor.u32 %v13225_v45, %v11248_v56  ;;  %v11857_v60 = vor.u32 %v13377_v35, %v11856_v8  ;;  %v13309_v21 = vld [vmem:[#allocation8 + $0x8b4] sm:$0xf0]  ;;  %v11712_v42 = vld [vmem:[#allocation8 + $0x9a8] sm:$0xf]  ;;  %v7716_v34 = vpop.f32.mrf.mxu3 }
 0x3c3   :  { %8033 = vmatpush.bf16.msrb.mxu2 %v11297_v44  ;;  %8006 = vmatpush.bf16.msrb.mxu0 %v11025_v5  ;;  %v13349_v44 = vld [vmem:[#allocation8 + $0x9f4] sm:$0xf0]  ;;  %v11617_v5 = vor.u32 %v13317_v32, %v11616_v30  ;;  %v7649_v11 = vadd.f32 %v7648_v10, %v7635_v40  ;;  %v11440_v10 = vld [vmem:[#allocation8 + $0x788] sm:$0xf] }
 0x3c4   :  { %8043 = vmatpush.bf16.msrb.mxu3 %v11489_v52  ;;  %v11840_v3 = vld [vmem:[#allocation8 + $0xaa8] sm:$0xf]  ;;  %v13373_v56 = vld [vmem:[#allocation8 + $0xab4] sm:$0xf0] }
 0x3c5   :  { %8020 = vmatpush.bf16.msrb.mxu1 %v11153_v4  ;;  %7995 = vmatmul.bf16.vlgmr.msra.gmra.mxu3 %v14375_v29  ;;  %v11745_v4 = vor.u32 %v13349_v44, %v11744_v2  ;;  %v7663_v12 = vadd.f32 %v7662_v55, %v7649_v11  ;;  %v11424_v44 = vld [vmem:[#allocation8 + $0x768] sm:$0xf]  ;;  %v13269_v20 = vld [vmem:[#allocation8 + $0x774] sm:$0xf0] }
 0x3c6   :  { %v13305_v15 = vld [vmem:[#allocation8 + $0x894] sm:$0xf0]  ;;  %v11696_v54 = vld [vmem:[#allocation8 + $0x988] sm:$0xf] }
 0x3c7   :  { %8034 = vmatpush.bf16.msrb.mxu2 %v11281_v24  ;;  %8007 = vmatpush.bf16.msrb.mxu0 %v11009_v39  ;;  %v7688_v24 = vpop.f32.mrf.mxu1  ;;  %v7676_v47 = vpop.f32.mrf.mxu0  ;;  %v13273_v39 = vld [vmem:[#allocation8 + $0x794] sm:$0xf0]  ;;  %v11824_v55 = vld [vmem:[#allocation8 + $0xa88] sm:$0xf] }
 0x3c8   :  { %8044 = vmatpush.bf16.msrb.mxu3 %v11473_v43  ;;  %v7689_v28 = vadd.f32 %v7688_v24, %v7675_v57  ;;  %v7677_v45 = vadd.f32 %v7676_v47, %v7663_v12  ;;  %v11441_v19 = vor.u32 %v13273_v39, %v11440_v10  ;;  %v13337_v40 = vld [vmem:[#allocation8 + $0x994] sm:$0xf0]  ;;  %v7704_v57 = vpop.f32.mrf.mxu2  ;;  %v11408_v22 = vld [vmem:[#allocation8 + $0x748] sm:$0xf] }
 0x3c9   :  { %8021 = vmatpush.bf16.msrb.mxu1 %v11137_v59  ;;  %v11584_v59 = vld [vmem:[#allocation8 + $0x8a8] sm:$0xf]  ;;  %v11697_v50 = vor.u32 %v13337_v40, %v11696_v54  ;;  %v13265_v11 = vld [vmem:[#allocation8 + $0x754] sm:$0xf0] }
 0x3ca   :  { %v7703_v52 = vadd.f32 %v7702_v6, %v7689_v28  ;;  %v11585_v30 = vor.u32 %v13309_v21, %v11584_v59  ;;  %v11552_v24 = vld [vmem:[#allocation8 + $0x868] sm:$0xf]  ;;  %v13333_v26 = vld [vmem:[#allocation8 + $0x974] sm:$0xf0]  ;;  %v7718_v28 = vpop.f32.mrf.mxu3 }
 0x3cb   :  { %8035 = vmatpush.bf16.msrb.mxu2 %v11265_v41  ;;  %8008 = vmatpush.bf16.msrb.mxu0 %v10993_v27  ;;  %v13341_v41 = vld [vmem:[#allocation8 + $0x9b4] sm:$0xf0]  ;;  %v11568_v27 = vld [vmem:[#allocation8 + $0x888] sm:$0xf] }
 0x3cc   :  { %8045 = vmatpush.bf16.msrb.mxu3 %v11457_v17  ;;  %v11713_v32 = vor.u32 %v13341_v41, %v11712_v42  ;;  %v7717_v2 = vadd.f32 %v7716_v34, %v7703_v52  ;;  %v11569_v62 = vor.u32 %v13305_v15, %v11568_v27  ;;  %v11680_v51 = vld [vmem:[#allocation8 + $0x968] sm:$0xf]  ;;  %v13365_v35 = vld [vmem:[#allocation8 + $0xa74] sm:$0xf0]  ;;  %v11409_v17 = vor.u32 %v13265_v11, %v11408_v22 }
 0x3cd   :  { %8022 = vmatpush.bf16.msrb.mxu1 %v11121_v63  ;;  %v11841_v63 = vor.u32 %v13373_v56, %v11840_v3  ;;  %v11808_v8 = vld [vmem:[#allocation8 + $0xa68] sm:$0xf]  ;;  %v13261_v39 = vld [vmem:[#allocation8 + $0x734] sm:$0xf0] }
 0x3ce   :  { %8009 = vmatmul.bf16.vlgmr.msrb.gmra.mxu0 %v14454_v9  ;;  %8393 = vst [vmem:[#allocation11] sm:$0xff] %v7717_v2  ;;  %v11392_v10 = vld [vmem:[#allocation8 + $0x728] sm:$0xf]  ;;  %v11809_v12 = vor.u32 %v13365_v35, %v11808_v8  ;;  %v13329_v42 = vld [vmem:[#allocation8 + $0x954] sm:$0xf0] }
 0x3cf   :  { %8036 = vmatpush.bf16.msrb.mxu2 %v11249_v38  ;;  %8057 = vmatpush.bf16.msra.mxu0 %v11617_v5  ;;  %v13369_v38 = vld [vmem:[#allocation8 + $0xa94] sm:$0xf0]  ;;  %v7690_v43 = vpop.f32.mrf.mxu1  ;;  %v11425_v5 = vor.u32 %v13269_v20, %v11424_v44  ;;  %v11536_v59 = vld [vmem:[#allocation8 + $0x848] sm:$0xf]  ;;  %v11393_v3 = vor.u32 %v13261_v39, %v11392_v10 }
 0x3d0   :  { %8023 = vmatmul.bf16.vlgmr.msrb.gmra.mxu1 %v14456_v0  ;;  %8046 = vmatpush.bf16.msrb.mxu3 %v11441_v19  ;;  %v11825_v6 = vor.u32 %v13369_v38, %v11824_v55  ;;  %v11664_v21 = vld [vmem:[#allocation8 + $0x948] sm:$0xf]  ;;  %v13361_v52 = vld [vmem:[#allocation8 + $0xa54] sm:$0xf0] }
 0x3d1   :  { %8071 = vmatpush.bf16.msra.mxu1 %v11745_v4  ;;  %v7691_v4 = vadd.f32 %v7690_v43, %v7677_v45  ;;  %v11792_v41 = vld [vmem:[#allocation8 + $0xa48] sm:$0xf]  ;;  %v11665_v19 = vor.u32 %v13329_v42, %v11664_v21  ;;  %v13257_v34 = vld [vmem:[#allocation8 + $0x714] sm:$0xf0] }
 0x3d2   :  { %8037 = vmatmul.bf16.vlgmr.msrb.gmra.mxu2 %v14458_v58  ;;  %v11376_v56 = vld [vmem:[#allocation8 + $0x708] sm:$0xf]  ;;  %v11793_v2 = vor.u32 %v13361_v52, %v11792_v41  ;;  %v13325_v20 = vld [vmem:[#allocation8 + $0x934] sm:$0xf0] }
 0x3d3   :  { %8085 = vmatpush.bf16.msra.mxu2 %v11873_v16  ;;  %8058 = vmatpush.bf16.msra.mxu0 %v11601_v46  ;;  %v13301_v16 = vld [vmem:[#allocation8 + $0x874] sm:$0xf0]  ;;  %v7705_v33 = vadd.f32 %v7704_v57, %v7691_v4  ;;  %v11681_v46 = vor.u32 %v13333_v26, %v11680_v51  ;;  %v11648_v44 = vld [vmem:[#allocation8 + $0x928] sm:$0xf]  ;;  %v11377_v40 = vor.u32 %v13257_v34, %v11376_v56 }
 0x3d4   :  { %8047 = vmatpush.bf16.msrb.mxu3 %v11425_v5  ;;  %v11553_v47 = vor.u32 %v13301_v16, %v11552_v24  ;;  %v11776_v27 = vld [vmem:[#allocation8 + $0xa28] sm:$0xf]  ;;  %v13413_v54 = vld [vmem:[#allocation8 + $0xbf4] sm:$0xf0]  ;;  %v11649_v38 = vor.u32 %v13325_v20, %v11648_v44 }
 0x3d5   :  { %8072 = vmatpush.bf16.msra.mxu1 %v11729_v23  ;;  %v7719_v23 = vadd.f32 %v7718_v28, %v7705_v33  ;;  %v12000_v15 = vld [vmem:[#allocation8 + $0xbe8] sm:$0xf]  ;;  %v13289_v57 = vld [vmem:[#allocation8 + $0x814] sm:$0xf0] }
 0x3d6   :  { %v11504_v43 = vld [vmem:[#allocation8 + $0x808] sm:$0xf]  ;;  %v13353_v11 = vld [vmem:[#allocation8 + $0xa14] sm:$0xf0] }
 0x3d7   :  { %8086 = vmatpush.bf16.msra.mxu2 %v11857_v60  ;;  %8059 = vmatpush.bf16.msra.mxu0 %v11585_v30  ;;  %v13297_v60 = vld [vmem:[#allocation8 + $0x854] sm:$0xf0]  ;;  %8397 = vst [vmem:[#allocation11 + $0x20] sm:$0xff] %v7719_v23  ;;  %v11520_v30 = vld [vmem:[#allocation8 + $0x828] sm:$0xf]  ;;  %v11505_v8 = vor.u32 %v13289_v57, %v11504_v43 }
 0x3d8   :  { %8048 = vmatpush.bf16.msrb.mxu3 %v11409_v17  ;;  %v11537_v45 = vor.u32 %v13297_v60, %v11536_v59  ;;  %v11632_v5 = vld [vmem:[#allocation8 + $0x908] sm:$0xf]  ;;  %v13445_v51 = vld [vmem:[#allocation8 + $0xcf4] sm:$0xf0] }
 0x3d9   :  { %8073 = vmatpush.bf16.msra.mxu1 %v11713_v32  ;;  %v13293_v32 = vld [vmem:[#allocation8 + $0x834] sm:$0xf0]  ;;  %v11760_v22 = vld [vmem:[#allocation8 + $0xa08] sm:$0xf] }
 0x3da   :  { %v11521_v55 = vor.u32 %v13293_v32, %v11520_v30  ;;  %v11984_v24 = vld [vmem:[#allocation8 + $0xbc8] sm:$0xf]  ;;  %v13477_v33 = vld [vmem:[#allocation8 + $0xdf4] sm:$0xf0] }
 0x3db   :  { %8087 = vmatpush.bf16.msra.mxu2 %v11841_v63  ;;  %8060 = vmatpush.bf16.msra.mxu0 %v11569_v62  ;;  %v13357_v63 = vld [vmem:[#allocation8 + $0xa34] sm:$0xf0]  ;;  %v12001_v62 = vor.u32 %v13413_v54, %v12000_v15  ;;  %v12128_v16 = vld [vmem:[#allocation8 + $0xce8] sm:$0xf] }
 0x3dc   :  { %8049 = vmatpush.bf16.msrb.mxu3 %v11393_v3  ;;  %v11777_v4 = vor.u32 %v13357_v63, %v11776_v27  ;;  %v12256_v26 = vld [vmem:[#allocation8 + $0xde8] sm:$0xf]  ;;  %v13509_v28 = vld [vmem:[#allocation8 + $0xef4] sm:$0xf0]  ;;  %v12129_v23 = vor.u32 %v13445_v51, %v12128_v16  ;;  %v14691_v16 = vpop.f32.mrf.mxu2 }
 0x3dd   :  { %8074 = vmatpush.bf16.msra.mxu1 %v11697_v50  ;;  %v13321_v50 = vld [vmem:[#allocation8 + $0x914] sm:$0xf0]  ;;  %v12384_v17 = vld [vmem:[#allocation8 + $0xee8] sm:$0xf]  ;;  %v12257_v10 = vor.u32 %v13477_v33, %v12256_v26 }
 0x3de   :  { %v11633_v35 = vor.u32 %v13321_v50, %v11632_v5  ;;  %v11968_v39 = vld [vmem:[#allocation8 + $0xba8] sm:$0xf]  ;;  %v13405_v59 = vld [vmem:[#allocation8 + $0xbb4] sm:$0xf0]  ;;  %v12385_v60 = vor.u32 %v13509_v28, %v12384_v17 }
 0x3df   :  { %8088 = vmatpush.bf16.msra.mxu2 %v11825_v6  ;;  %8061 = vmatpush.bf16.msra.mxu0 %v11553_v47  ;;  %v13409_v6 = vld [vmem:[#allocation8 + $0xbd4] sm:$0xf0]  ;;  %v11761_v47 = vor.u32 %v13353_v11, %v11760_v22  ;;  %v12240_v42 = vld [vmem:[#allocation8 + $0xdc8] sm:$0xf]  ;;  %v11969_v56 = vor.u32 %v13405_v59, %v11968_v39  ;;  %v4930_v59 = vperm.slane %v14633_v31, 1 }
 0x3e0   :  { %8050 = vmatpush.bf16.msrb.mxu3 %v11377_v40  ;;  %v13441_v21 = vld [vmem:[#allocation8 + $0xcd4] sm:$0xf0]  ;;  %v12368_v52 = vld [vmem:[#allocation8 + $0xec8] sm:$0xf] }
 0x3e1   :  { %8075 = vmatpush.bf16.msra.mxu1 %v11681_v46  ;;  %v11985_v46 = vor.u32 %v13409_v6, %v11984_v24  ;;  %v13473_v41 = vld [vmem:[#allocation8 + $0xdd4] sm:$0xf0]  ;;  %v11952_v34 = vld [vmem:[#allocation8 + $0xb88] sm:$0xf] }
 0x3e2   :  { %v13505_v3 = vld [vmem:[#allocation8 + $0xed4] sm:$0xf0]  ;;  %v12096_v32 = vld [vmem:[#allocation8 + $0xca8] sm:$0xf] }
 0x3e3   :  { %8089 = vmatpush.bf16.msra.mxu2 %v11809_v12  ;;  %8062 = vmatpush.bf16.msra.mxu0 %v11537_v45  ;;  %v12112_v12 = vld [vmem:[#allocation8 + $0xcc8] sm:$0xf]  ;;  %v13401_v30 = vld [vmem:[#allocation8 + $0xb94] sm:$0xf0]  ;;  %v12369_v44 = vor.u32 %v13505_v3, %v12368_v52 }
 0x3e4   :  { %8099 = vmatpush.bf16.msra.mxu3 %v12001_v62  ;;  %v12113_v45 = vor.u32 %v13441_v21, %v12112_v12  ;;  %v13437_v20 = vld [vmem:[#allocation8 + $0xcb4] sm:$0xf0]  ;;  %v12224_v27 = vld [vmem:[#allocation8 + $0xda8] sm:$0xf]  ;;  %v11953_v40 = vor.u32 %v13401_v30, %v11952_v34 }
 0x3e5   :  { %8076 = vmatpush.bf16.msra.mxu1 %v11665_v19  ;;  %8051 = vmatmul.bf16.vlgmr.msrb.gmra.mxu3 %v14465_v1  ;;  %v12241_v19 = vor.u32 %v13473_v41, %v12240_v42  ;;  %v13469_v63 = vld [vmem:[#allocation8 + $0xdb4] sm:$0xf0]  ;;  %v12352_v15 = vld [vmem:[#allocation8 + $0xea8] sm:$0xf] }
 0x3e6   :  { %v13501_v54 = vld [vmem:[#allocation8 + $0xeb4] sm:$0xf0]  ;;  %v11936_v43 = vld [vmem:[#allocation8 + $0xb68] sm:$0xf] }
 0x3e7   :  { %8090 = vmatpush.bf16.msra.mxu2 %v11793_v2  ;;  %8063 = vmatpush.bf16.msra.mxu0 %v11521_v55  ;;  %v14684_v2 = vpop.f32.mrf.mxu0  ;;  %v12097_v55 = vor.u32 %v13437_v20, %v12096_v32  ;;  %v13397_v57 = vld [vmem:[#allocation8 + $0xb74] sm:$0xf0]  ;;  %v12080_v5 = vld [vmem:[#allocation8 + $0xc88] sm:$0xf]  ;;  %v12353_v62 = vor.u32 %v13501_v54, %v12352_v15 }
 0x3e8   :  { %8100 = vmatpush.bf16.msra.mxu3 %v11985_v46  ;;  %v13433_v50 = vld [vmem:[#allocation8 + $0xc94] sm:$0xf0]  ;;  %v12208_v22 = vld [vmem:[#allocation8 + $0xd88] sm:$0xf]  ;;  %v11937_v51 = vor.u32 %v13397_v57, %v11936_v43  ;;  %v7731_v43 = vadd.f32 %v14684_v2, %v4930_v59  ;;  %v14703_v57 = vpop.f32.mrf.mxu2 }
 0x3e9   :  { %8077 = vmatpush.bf16.msra.mxu1 %v11649_v38  ;;  %v12225_v38 = vor.u32 %v13469_v63, %v12224_v27  ;;  %v13465_v11 = vld [vmem:[#allocation8 + $0xd94] sm:$0xf0]  ;;  %v12336_v24 = vld [vmem:[#allocation8 + $0xe88] sm:$0xf]  ;;  %v12081_v26 = vor.u32 %v13433_v50, %v12080_v5 }
 0x3ea   :  { %v13497_v6 = vld [vmem:[#allocation8 + $0xe94] sm:$0xf0]  ;;  %v12209_v33 = vor.u32 %v13465_v11, %v12208_v22  ;;  %v12064_v17 = vld [vmem:[#allocation8 + $0xc68] sm:$0xf] }
 0x3eb   :  { %8091 = vmatpush.bf16.msra.mxu2 %v11777_v4  ;;  %8064 = vmatpush.bf16.msra.mxu0 %v11505_v8  ;;  %v14689_v4 = vpop.f32.mrf.mxu1  ;;  %v11920_v8 = vld [vmem:[#allocation8 + $0xb48] sm:$0xf]  ;;  %v12337_v28 = vor.u32 %v13497_v6, %v12336_v24  ;;  %v13493_v39 = vld [vmem:[#allocation8 + $0xe74] sm:$0xf0] }
 0x3ec   :  { %8101 = vmatpush.bf16.msra.mxu3 %v11969_v56  ;;  %v12192_v46 = vld [vmem:[#allocation8 + $0xd68] sm:$0xf]  ;;  %v13389_v3 = vld [vmem:[#allocation8 + $0xb34] sm:$0xf0] }
 0x3ed   :  { %8078 = vmatpush.bf16.msra.mxu1 %v11633_v35  ;;  %v13393_v35 = vld [vmem:[#allocation8 + $0xb54] sm:$0xf0]  ;;  %v11904_v52 = vld [vmem:[#allocation8 + $0xb28] sm:$0xf] }
 0x3ee   :  { %8065 = vmatmul.bf16.vlgmr.msra.gmra.mxu0 %v14536_v61  ;;  %v11921_v21 = vor.u32 %v13393_v35, %v11920_v8  ;;  %v12048_v56 = vld [vmem:[#allocation8 + $0xc48] sm:$0xf]  ;;  %v13457_v30 = vld [vmem:[#allocation8 + $0xd54] sm:$0xf0]  ;;  %v11905_v27 = vor.u32 %v13389_v3, %v11904_v52  ;;  %v13059_v52 = vld [vmem:[#allocation8 + $0xec] sm:$0xf] }
 0x3ef   :  { %8092 = vmatpush.bf16.msra.mxu2 %v11761_v47  ;;  %8113 = vmatpush.bf16.msrb.mxu0 %v12129_v23  ;;  %v13429_v47 = vld [vmem:[#allocation8 + $0xc74] sm:$0xf0]  ;;  %v14694_v12 = vpop.f32.mrf.mxu0  ;;  %v12176_v34 = vld [vmem:[#allocation8 + $0xd48] sm:$0xf] }
 0x3f0   :  { %8079 = vmatmul.bf16.vlgmr.msra.gmra.mxu1 %v14538_v14  ;;  %8102 = vmatpush.bf16.msra.mxu3 %v11953_v40  ;;  %v13461_v23 = vld [vmem:[#allocation8 + $0xd74] sm:$0xf0]  ;;  %v12065_v42 = vor.u32 %v13429_v47, %v12064_v17  ;;  %v12304_v32 = vld [vmem:[#allocation8 + $0xe48] sm:$0xf]  ;;  %v12177_v54 = vor.u32 %v13457_v30, %v12176_v34  ;;  %v10722_v34 = vld [vmem:[#allocation8 + $0x1f8] sm:$0xf0] }
 0x3f1   :  { %8127 = vmatpush.bf16.msrb.mxu1 %v12257_v10  ;;  %v12320_v10 = vld [vmem:[#allocation8 + $0xe68] sm:$0xf]  ;;  %v12193_v41 = vor.u32 %v13461_v23, %v12192_v46  ;;  %v13385_v40 = vld [vmem:[#allocation8 + $0xb14] sm:$0xf0] }
 0x3f2   :  { %8093 = vmatmul.bf16.vlgmr.msra.gmra.mxu2 %v14540_v37  ;;  %v11888_v63 = vld [vmem:[#allocation8 + $0xb08] sm:$0xf]  ;;  %v13453_v50 = vld [vmem:[#allocation8 + $0xd34] sm:$0xf0] }
 0x3f3   :  { %8141 = vmatpush.bf16.msrb.mxu2 %v12385_v60  ;;  %8114 = vmatpush.bf16.msrb.mxu0 %v12113_v45  ;;  %v14696_v60 = vpop.f32.mrf.mxu3  ;;  %v12321_v45 = vor.u32 %v13493_v39, %v12320_v10  ;;  %v14698_v20 = vpop.f32.mrf.mxu1  ;;  %v12288_v22 = vld [vmem:[#allocation8 + $0xe28] sm:$0xf]  ;;  %v13485_v11 = vld [vmem:[#allocation8 + $0xe34] sm:$0xf0] }
 0x3f4   :  { %8103 = vmatpush.bf16.msra.mxu3 %v11937_v51  ;;  %v12512_v24 = vld [vmem:[#allocation8 + $0xfe8] sm:$0xf]  ;;  %v13541_v6 = vld [vmem:[#allocation8 + $0xff4] sm:$0xf0]  ;;  %v12289_v46 = vor.u32 %v13485_v11, %v12288_v22  ;;  %v13087_v22 = vld [vmem:[#allocation8 + $0x1cc] sm:$0xf] }
 0x3f5   :  { %8128 = vmatpush.bf16.msrb.mxu1 %v12241_v19  ;;  %v13425_v19 = vld [vmem:[#allocation8 + $0xc54] sm:$0xf0]  ;;  %v12016_v35 = vld [vmem:[#allocation8 + $0xc08] sm:$0xf]  ;;  %v12513_v23 = vor.u32 %v13541_v6, %v12512_v24  ;;  %v10706_v11 = vld [vmem:[#allocation8 + $0x1d8] sm:$0xf0] }
 0x3f6   :  { %v12049_v15 = vor.u32 %v13425_v19, %v12048_v56  ;;  %v13417_v17 = vld [vmem:[#allocation8 + $0xc14] sm:$0xf0]  ;;  %v12144_v2 = vld [vmem:[#allocation8 + $0xd08] sm:$0xf]  ;;  %v13091_v19 = vld [vmem:[#allocation8 + $0x1ec] sm:$0xf] }
 0x3f7   :  { %8142 = vmatpush.bf16.msrb.mxu2 %v12369_v44  ;;  %8115 = vmatpush.bf16.msrb.mxu0 %v12097_v55  ;;  %v13489_v44 = vld [vmem:[#allocation8 + $0xe54] sm:$0xf0]  ;;  %v12032_v55 = vld [vmem:[#allocation8 + $0xc28] sm:$0xf]  ;;  %v7786_v51 = vpop.f32.mrf.mxu0  ;;  %v10834_v24 = vld [vmem:[#allocation8 + $0x2d8] sm:$0xf0] }
 0x3f8   :  { %8104 = vmatpush.bf16.msra.mxu3 %v11921_v21  ;;  %v12305_v5 = vor.u32 %v13489_v44, %v12304_v32  ;;  %v13449_v10 = vld [vmem:[#allocation8 + $0xd14] sm:$0xf0]  ;;  %v12272_v39 = vld [vmem:[#allocation8 + $0xe08] sm:$0xf]  ;;  %v13123_v32 = vld [vmem:[#allocation8 + $0x2ec] sm:$0xf] }
 0x3f9   :  { %8129 = vmatpush.bf16.msrb.mxu1 %v12225_v38  ;;  %v13421_v38 = vld [vmem:[#allocation8 + $0xc34] sm:$0xf0]  ;;  %v12145_v30 = vor.u32 %v13449_v10, %v12144_v2  ;;  %v10850_v44 = vld [vmem:[#allocation8 + $0x2f8] sm:$0xf0] }
 0x3fa   :  { %v13481_v21 = vld [vmem:[#allocation8 + $0xe14] sm:$0xf0] }
 0x3fb   :  { %8143 = vmatpush.bf16.msrb.mxu2 %v12353_v62  ;;  %8116 = vmatpush.bf16.msrb.mxu0 %v12081_v26  ;;  %v12160_v62 = vld [vmem:[#allocation8 + $0xd28] sm:$0xf]  ;;  %v11889_v26 = vor.u32 %v13385_v40, %v11888_v63  ;;  %v14706_v47 = vpop.f32.mrf.mxu3  ;;  %v7800_v56 = vpop.f32.mrf.mxu1 }
 0x3fc   :  { %8105 = vmatpush.bf16.msra.mxu3 %v11905_v27  ;;  %v12161_v8 = vor.u32 %v13453_v50, %v12160_v62  ;;  %v14709_v27 = vpop.f32.mrf.mxu2  ;;  %v10853_v62 = vor.u32 %v13123_v32, %v10850_v44  ;;  %v10578_v50 = vld [vmem:[#allocation8 + $0xd8] sm:$0xf0]  ;;  %v13079_v44 = vld [vmem:[#allocation8 + $0x18c] sm:$0xf] }
 0x3fd   :  { %8130 = vmatpush.bf16.msrb.mxu1 %v12209_v33  ;;  %v12033_v33 = vor.u32 %v13421_v38, %v12032_v55  ;;  %v10725_v55 = vor.u32 %v13091_v19, %v10722_v34  ;;  %v12480_v38 = vld [vmem:[#allocation8 + $0xfa8] sm:$0xf]  ;;  %v13525_v34 = vld [vmem:[#allocation8 + $0xf74] sm:$0xf0]  ;;  %v10546_v32 = vld [vmem:[#allocation8 + $0x98] sm:$0xf0] }
 0x3fe   :  { %v12448_v19 = vld [vmem:[#allocation8 + $0xf68] sm:$0xf] }
 0x3ff   :  { %8144 = vmatpush.bf16.msrb.mxu2 %v12337_v28  ;;  %8117 = vmatpush.bf16.msrb.mxu0 %v12065_v42  ;;  %v7745_v28 = vadd.f32 %v14689_v4, %v7731_v43  ;;  %v12496_v42 = vld [vmem:[#allocation8 + $0xfc8] sm:$0xf]  ;;  %v12017_v4 = vor.u32 %v13417_v17, %v12016_v35  ;;  %v13533_v43 = vld [vmem:[#allocation8 + $0xfb4] sm:$0xf0]  ;;  %v7788_v6 = vpop.f32.mrf.mxu0  ;;  %v13051_v17 = vld [vmem:[#allocation8 + $0xac] sm:$0xf] }
 0x400   :  { %8106 = vmatpush.bf16.msra.mxu3 %v11889_v26  ;;  %v12481_v31 = vor.u32 %v13533_v43, %v12480_v38  ;;  %v13529_v35 = vld [vmem:[#allocation8 + $0xf94] sm:$0xf0]  ;;  %v12432_v43 = vld [vmem:[#allocation8 + $0xf48] sm:$0xf] }
 0x401   :  { %8131 = vmatpush.bf16.msrb.mxu1 %v12193_v41  ;;  %v13537_v41 = vld [vmem:[#allocation8 + $0xfd4] sm:$0xf0]  ;;  %v7759_v3 = vadd.f32 %v14691_v16, %v7745_v28  ;;  %v7733_v16 = vadd.f32 %v14694_v12, %v4930_v59 }
 0x403   :  { %8145 = vmatpush.bf16.msrb.mxu2 %v12321_v45  ;;  %8118 = vmatpush.bf16.msrb.mxu0 %v12049_v15  ;;  %v10594_v45 = vld [vmem:[#allocation8 + $0xf8] sm:$0xf0]  ;;  %v7773_v63 = vadd.f32 %v14696_v60, %v7759_v3  ;;  %v12273_v15 = vor.u32 %v13481_v21, %v12272_v39  ;;  %v13119_v60 = vld [vmem:[#allocation8 + $0x2cc] sm:$0xf]  ;;  %v7747_v59 = vadd.f32 %v14698_v20, %v7733_v16  ;;  %v7828_v2 = vpop.f32.mrf.mxu3  ;;  %v7802_v21 = vpop.f32.mrf.mxu1 }
 0x404   :  { %8155 = vmatpush.bf16.msrb.mxu3 %v12513_v23  ;;  %v10597_v40 = vor.u32 %v13059_v52, %v10594_v45  ;;  %v10837_v28 = vor.u32 %v13119_v60, %v10834_v24  ;;  %v13083_v23 = vld [vmem:[#allocation8 + $0x1ac] sm:$0xf]  ;;  %v10818_v39 = vld [vmem:[#allocation8 + $0x2b8] sm:$0xf0] }
 0x405   :  { %8132 = vmatpush.bf16.msrb.mxu1 %v12177_v54  ;;  %v12497_v54 = vor.u32 %v13537_v41, %v12496_v42  ;;  %8107 = vmatmul.bf16.vlgmr.msra.gmra.mxu3 %v14544_v36  ;;  %v7787_v26 = vadd.f32 %v7786_v51, %v7773_v63  ;;  %v10690_v51 = vld [vmem:[#allocation8 + $0x1b8] sm:$0xf0]  ;;  %v7761_v10 = vadd.f32 %v14703_v57, %v7747_v59  ;;  %v13115_v20 = vld [vmem:[#allocation8 + $0x2ac] sm:$0xf]  ;;  %v7816_v57 = vpop.f32.mrf.mxu2 }
 0x406   :  { %v10693_v45 = vor.u32 %v13083_v23, %v10690_v51  ;;  %v10674_v63 = vld [vmem:[#allocation8 + $0x198] sm:$0xf0] }
 0x407   :  { %8146 = vmatpush.bf16.msrb.mxu2 %v12305_v5  ;;  %8119 = vmatpush.bf16.msrb.mxu0 %v12033_v33  ;;  %v13055_v5 = vld [vmem:[#allocation8 + $0xcc] sm:$0xf]  ;;  %v10709_v33 = vor.u32 %v13087_v22, %v10706_v11  ;;  %v7801_v42 = vadd.f32 %v7800_v56, %v7787_v26  ;;  %v7775_v52 = vadd.f32 %v14706_v47, %v7761_v10  ;;  %v7842_v56 = vpop.f32.mrf.mxu0  ;;  %v10530_v22 = vld [vmem:[#allocation8 + $0x78] sm:$0xf0] }
 0x408   :  { %8156 = vmatpush.bf16.msrb.mxu3 %v12497_v54  ;;  %v10581_v12 = vor.u32 %v13055_v5, %v10578_v50  ;;  %v10802_v54 = vld [vmem:[#allocation8 + $0x298] sm:$0xf0]  ;;  %v12449_v47 = vor.u32 %v13525_v34, %v12448_v19  ;;  %v10677_v38 = vor.u32 %v13079_v44, %v10674_v63  ;;  %v13521_v5 = vld [vmem:[#allocation8 + $0xf54] sm:$0xf0]  ;;  %v13075_v11 = vld [vmem:[#allocation8 + $0x16c] sm:$0xf] }
 0x409   :  { %8133 = vmatpush.bf16.msrb.mxu1 %v12161_v8  ;;  %v12464_v8 = vld [vmem:[#allocation8 + $0xf88] sm:$0xf]  ;;  %v7815_v16 = vadd.f32 %v14709_v27, %v7801_v42  ;;  %v10658_v60 = vld [vmem:[#allocation8 + $0x178] sm:$0xf0]  ;;  %v13107_v26 = vld [vmem:[#allocation8 + $0x26c] sm:$0xf] }
 0x40a   :  { %v12465_v41 = vor.u32 %v13529_v35, %v12464_v8  ;;  %v10661_v8 = vor.u32 %v13075_v11, %v10658_v60  ;;  %v12416_v35 = vld [vmem:[#allocation8 + $0xf28] sm:$0xf]  ;;  %v10514_v51 = vld [vmem:[#allocation8 + $0x58] sm:$0xf0]  ;;  %v13071_v10 = vld [vmem:[#allocation8 + $0x14c] sm:$0xf] }
 0x40b   :  { %8147 = vmatpush.bf16.msrb.mxu2 %v12289_v46  ;;  %8120 = vmatpush.bf16.msrb.mxu0 %v12017_v4  ;;  %v10562_v46 = vld [vmem:[#allocation8 + $0xb8] sm:$0xf0]  ;;  %v13047_v4 = vld [vmem:[#allocation8 + $0x8c] sm:$0xf]  ;;  %v7829_v24 = vadd.f32 %v7828_v2, %v7815_v16  ;;  %v7856_v59 = vpop.f32.mrf.mxu1  ;;  %v7830_v27 = vpop.f32.mrf.mxu3  ;;  %v13513_v19 = vld [vmem:[#allocation8 + $0xf14] sm:$0xf0] }
 0x40c   :  { %8157 = vmatpush.bf16.msrb.mxu3 %v12481_v31  ;;  %v10565_v3 = vor.u32 %v13051_v17, %v10562_v46  ;;  %v10786_v31 = vld [vmem:[#allocation8 + $0x278] sm:$0xf0]  ;;  %v13517_v17 = vld [vmem:[#allocation8 + $0xf34] sm:$0xf0]  ;;  %v13035_v34 = vld [vmem:[#allocation8 + $0x2c] sm:$0xf] }
 0x40d   :  { %8134 = vmatpush.bf16.msrb.mxu1 %v12145_v30  ;;  %v10821_v30 = vor.u32 %v13115_v20, %v10818_v39  ;;  %v7870_v46 = vpop.f32.mrf.mxu2  ;;  %v10789_v23 = vor.u32 %v13107_v26, %v10786_v31  ;;  %v10642_v2 = vld [vmem:[#allocation8 + $0x158] sm:$0xf0]  ;;  %v7843_v20 = vadd.f32 %v7842_v56, %v7829_v24  ;;  %v13103_v39 = vld [vmem:[#allocation8 + $0x24c] sm:$0xf] }
 0x40e   :  { %8121 = vmatmul.bf16.vlgmr.msrb.gmra.mxu0 %v14573_v25  ;;  %v10770_v42 = vld [vmem:[#allocation8 + $0x258] sm:$0xf0]  ;;  %v13067_v44 = vld [vmem:[#allocation8 + $0x12c] sm:$0xf] }
 0x40f   :  { %8148 = vmatpush.bf16.msrb.mxu2 %v12273_v15  ;;  %8169 = vmatpush.bf16.msra.mxu0 %v10597_v40  ;;  %v13111_v15 = vld [vmem:[#allocation8 + $0x28c] sm:$0xf]  ;;  %v7789_v40 = vadd.f32 %v7788_v6, %v7775_v52  ;;  %v12400_v52 = vld [vmem:[#allocation8 + $0xf08] sm:$0xf]  ;;  %v10626_v63 = vld [vmem:[#allocation8 + $0x138] sm:$0xf0] }
 0x410   :  { %8135 = vmatmul.bf16.vlgmr.msrb.gmra.mxu1 %v14576_v48  ;;  %8158 = vmatpush.bf16.msrb.mxu3 %v12465_v41  ;;  %v10805_v50 = vor.u32 %v13111_v15, %v10802_v54  ;;  %v12417_v41 = vor.u32 %v13517_v17, %v12416_v35  ;;  %v13099_v15 = vld [vmem:[#allocation8 + $0x22c] sm:$0xf]  ;;  %v7857_v54 = vadd.f32 %v7856_v59, %v7843_v20  ;;  %v10754_v16 = vld [vmem:[#allocation8 + $0x238] sm:$0xf0] }
 0x411   :  { %8183 = vmatpush.bf16.msra.mxu1 %v10725_v55  ;;  %v10549_v55 = vor.u32 %v13047_v4, %v10546_v32  ;;  %v7803_v6 = vadd.f32 %v7802_v21, %v7789_v40  ;;  %v10498_v4 = vld [vmem:[#allocation8 + $0x38] sm:$0xf0]  ;;  %v10773_v32 = vor.u32 %v13103_v39, %v10770_v42  ;;  %v10757_v11 = vor.u32 %v13099_v15, %v10754_v16  ;;  %v13095_v26 = vld [vmem:[#allocation8 + $0x20c] sm:$0xf] }
 0x412   :  { %8149 = vmatmul.bf16.vlgmr.msrb.gmra.mxu2 %v14590_v53  ;;  %v10978_v40 = vld [vmem:[#allocation8 + $0x3f8] sm:$0xf0]  ;;  %v7871_v59 = vadd.f32 %v7870_v46, %v7857_v54  ;;  %v13219_v17 = vld [vmem:[#allocation8 + $0x5ec] sm:$0xf] }
 0x413   :  { %8197 = vmatpush.bf16.msra.mxu2 %v10853_v62  ;;  %8170 = vmatpush.bf16.msra.mxu0 %v10581_v12  ;;  %v13043_v62 = vld [vmem:[#allocation8 + $0x6c] sm:$0xf]  ;;  %v12433_v12 = vor.u32 %v13521_v5, %v12432_v43  ;;  %v7817_v21 = vadd.f32 %v7816_v57, %v7803_v6  ;;  %v12401_v57 = vor.u32 %v13513_v19, %v12400_v52  ;;  %v10610_v24 = vld [vmem:[#allocation8 + $0x118] sm:$0xf0] }
 0x414   :  { %8159 = vmatpush.bf16.msrb.mxu3 %v12449_v47  ;;  %v13155_v47 = vld [vmem:[#allocation8 + $0x3ec] sm:$0xf]  ;;  %v10629_v43 = vor.u32 %v13067_v44, %v10626_v63  ;;  %v10738_v31 = vld [vmem:[#allocation8 + $0x218] sm:$0xf0] }
 0x415   :  { %8184 = vmatpush.bf16.msra.mxu1 %v10709_v33  ;;  %v10533_v33 = vor.u32 %v13043_v62, %v10530_v22  ;;  %v7831_v56 = vadd.f32 %v7830_v27, %v7817_v21  ;;  %v13031_v5 = vld [vmem:[#allocation8 + $0xc] sm:$0xf]  ;;  %v10482_v62 = vld [vmem:[#allocation8 + $0x18] sm:$0xf0]  ;;  %v7858_v22 = vpop.f32.mrf.mxu1  ;;  %v10981_v60 = vor.u32 %v13155_v47, %v10978_v40  ;;  %v10741_v46 = vor.u32 %v13095_v26, %v10738_v31 }
 0x416   :  { %v10962_v6 = vld [vmem:[#allocation8 + $0x3d8] sm:$0xf0]  ;;  %v13183_v19 = vld [vmem:[#allocation8 + $0x4cc] sm:$0xf] }
 0x417   :  { %8198 = vmatpush.bf16.msra.mxu2 %v10837_v28  ;;  %8171 = vmatpush.bf16.msra.mxu0 %v10565_v3  ;;  %v13039_v28 = vld [vmem:[#allocation8 + $0x4c] sm:$0xf]  ;;  %v11106_v35 = vld [vmem:[#allocation8 + $0x4f8] sm:$0xf0] }
 0x418   :  { %8160 = vmatpush.bf16.msrb.mxu3 %v12433_v12  ;;  %v10517_v3 = vor.u32 %v13039_v28, %v10514_v51  ;;  %v13151_v12 = vld [vmem:[#allocation8 + $0x3cc] sm:$0xf]  ;;  %v11234_v28 = vld [vmem:[#allocation8 + $0x5f8] sm:$0xf0]  ;;  %v10485_v51 = vor.u32 %v13031_v5, %v10482_v62 }
 0x419   :  { %8185 = vmatpush.bf16.msra.mxu1 %v10693_v45  ;;  %v10645_v45 = vor.u32 %v13071_v10, %v10642_v2  ;;  %v13251_v2 = vld [vmem:[#allocation8 + $0x6ec] sm:$0xf]  ;;  %v11362_v20 = vld [vmem:[#allocation8 + $0x6f8] sm:$0xf0]  ;;  %v10965_v42 = vor.u32 %v13151_v12, %v10962_v6  ;;  %v11237_v21 = vor.u32 %v13219_v17, %v11234_v28 }
 0x41a   :  { %v13247_v63 = vld [vmem:[#allocation8 + $0x6cc] sm:$0xf]  ;;  %v11346_v15 = vld [vmem:[#allocation8 + $0x6d8] sm:$0xf0] }
 0x41b   :  { %8199 = vmatpush.bf16.msra.mxu2 %v10821_v30  ;;  %8172 = vmatpush.bf16.msra.mxu0 %v10549_v55  ;;  %v7844_v30 = vpop.f32.mrf.mxu0  ;;  %v7884_v55 = vpop.f32.mrf.mxu3  ;;  %v11349_v62 = vor.u32 %v13247_v63, %v11346_v15  ;;  %v13243_v26 = vld [vmem:[#allocation8 + $0x6ac] sm:$0xf]  ;;  %v11330_v31 = vld [vmem:[#allocation8 + $0x6b8] sm:$0xf0] }
 0x41c   :  { %8161 = vmatpush.bf16.msrb.mxu3 %v12417_v41  ;;  %v7845_v27 = vadd.f32 %v7844_v30, %v7831_v56  ;;  %v13215_v30 = vld [vmem:[#allocation8 + $0x5cc] sm:$0xf]  ;;  %v11058_v17 = vld [vmem:[#allocation8 + $0x498] sm:$0xf0] }
 0x41d   :  { %8186 = vmatpush.bf16.msra.mxu1 %v10677_v38  ;;  %v10501_v38 = vor.u32 %v13035_v34, %v10498_v4  ;;  %v11365_v34 = vor.u32 %v13251_v2, %v11362_v20  ;;  %v11090_v4 = vld [vmem:[#allocation8 + $0x4d8] sm:$0xf0]  ;;  %v7912_v54 = vpop.f32.mrf.mxu1  ;;  %v13139_v6 = vld [vmem:[#allocation8 + $0x36c] sm:$0xf] }
 0x41e   :  { %v7859_v41 = vadd.f32 %v7858_v22, %v7845_v27  ;;  %v11093_v40 = vor.u32 %v13183_v19, %v11090_v4  ;;  %v13211_v22 = vld [vmem:[#allocation8 + $0x5ac] sm:$0xf]  ;;  %v11042_v19 = vld [vmem:[#allocation8 + $0x478] sm:$0xf0] }
 0x41f   :  { %8200 = vmatpush.bf16.msra.mxu2 %v10805_v50  ;;  %8173 = vmatpush.bf16.msra.mxu0 %v10533_v33  ;;  %v13063_v50 = vld [vmem:[#allocation8 + $0x10c] sm:$0xf]  ;;  %v11170_v4 = vld [vmem:[#allocation8 + $0x578] sm:$0xf0] }
 0x420   :  { %v13187_v33 = vld [vmem:[#allocation8 + $0x4ec] sm:$0xf]  ;;  %8162 = vmatpush.bf16.msrb.mxu3 %v12401_v57  ;;  %v10613_v10 = vor.u32 %v13063_v50, %v10610_v24  ;;  %v11074_v50 = vld [vmem:[#allocation8 + $0x4b8] sm:$0xf0] }
 0x421   :  { %8187 = vmatpush.bf16.msra.mxu1 %v10661_v8  ;;  %v7872_v8 = vpop.f32.mrf.mxu2  ;;  %v11109_v52 = vor.u32 %v13187_v33, %v11106_v35  ;;  %v13143_v57 = vld [vmem:[#allocation8 + $0x38c] sm:$0xf]  ;;  %v11333_v35 = vor.u32 %v13243_v26, %v11330_v31 }
 0x422   :  { %v7873_v47 = vadd.f32 %v7872_v8, %v7859_v41  ;;  %v13175_v33 = vld [vmem:[#allocation8 + $0x48c] sm:$0xf] }
 0x423   :  { %8201 = vmatpush.bf16.msra.mxu2 %v10789_v23  ;;  %8174 = vmatpush.bf16.msra.mxu0 %v10517_v3  ;;  %v7885_v23 = vadd.f32 %v7884_v55, %v7871_v59  ;;  %v7898_v39 = vpop.f32.mrf.mxu0  ;;  %v13147_v3 = vld [vmem:[#allocation8 + $0x3ac] sm:$0xf]  ;;  %v7886_v56 = vpop.f32.mrf.mxu3 }
 0x424   :  { %8211 = vmatpush.bf16.msra.mxu3 %v10981_v60  ;;  %v7887_v24 = vadd.f32 %v7886_v56, %v7873_v47  ;;  %v13207_v28 = vld [vmem:[#allocation8 + $0x58c] sm:$0xf]  ;;  %v10882_v47 = vld [vmem:[#allocation8 + $0x338] sm:$0xf0] }
 0x425   :  { %8188 = vmatpush.bf16.msra.mxu1 %v10645_v45  ;;  %8163 = vmatmul.bf16.vlgmr.msrb.gmra.mxu3 %v14608_v13  ;;  %v10946_v45 = vld [vmem:[#allocation8 + $0x3b8] sm:$0xf0]  ;;  %v7899_v44 = vadd.f32 %v7898_v39, %v7885_v23  ;;  %v13135_v41 = vld [vmem:[#allocation8 + $0x34c] sm:$0xf] }
 0x426   :  { %v10949_v16 = vor.u32 %v13147_v3, %v10946_v45  ;;  %v11186_v23 = vld [vmem:[#allocation8 + $0x598] sm:$0xf0]  ;;  %v7914_v3 = vpop.f32.mrf.mxu1 }
 0x427   :  { %8202 = vmatpush.bf16.msra.mxu2 %v10773_v32  ;;  %8175 = vmatpush.bf16.msra.mxu0 %v10501_v38  ;;  %v11218_v32 = vld [vmem:[#allocation8 + $0x5d8] sm:$0xf0]  ;;  %v7913_v60 = vadd.f32 %v7912_v54, %v7899_v44 }
 0x428   :  { %8212 = vmatpush.bf16.msra.mxu3 %v10965_v42  ;;  %v11221_v55 = vor.u32 %v13215_v30, %v11218_v32  ;;  %v10930_v38 = vld [vmem:[#allocation8 + $0x398] sm:$0xf0]  ;;  %v11189_v42 = vor.u32 %v13207_v28, %v11186_v23  ;;  %v13235_v32 = vld [vmem:[#allocation8 + $0x66c] sm:$0xf] }
 0x429   :  { %8189 = vmatpush.bf16.msra.mxu1 %v10629_v43  ;;  %v13179_v43 = vld [vmem:[#allocation8 + $0x4ac] sm:$0xf]  ;;  %v7926_v5 = vpop.f32.mrf.mxu2  ;;  %v10933_v59 = vor.u32 %v13143_v57, %v10930_v38  ;;  %v11298_v44 = vld [vmem:[#allocation8 + $0x678] sm:$0xf0] }
 0x42a   :  { %v11077_v27 = vor.u32 %v13179_v43, %v11074_v50  ;;  %v11026_v57 = vld [vmem:[#allocation8 + $0x458] sm:$0xf0]  ;;  %v13199_v38 = vld [vmem:[#allocation8 + $0x54c] sm:$0xf] }
 0x42b   :  { %8203 = vmatpush.bf16.msra.mxu2 %v10757_v11  ;;  %8176 = vmatpush.bf16.msra.mxu0 %v10485_v51  ;;  %v11202_v11 = vld [vmem:[#allocation8 + $0x5b8] sm:$0xf0]  ;;  %v7900_v8 = vpop.f32.mrf.mxu0  ;;  %v7940_v20 = vpop.f32.mrf.mxu3 }
 0x42c   :  { %8213 = vmatpush.bf16.msra.mxu3 %v10949_v16  ;;  %v11205_v12 = vor.u32 %v13211_v22, %v11202_v11  ;;  %v7901_v51 = vadd.f32 %v7900_v8, %v7887_v24  ;;  %v13131_v16 = vld [vmem:[#allocation8 + $0x32c] sm:$0xf]  ;;  %v11154_v43 = vld [vmem:[#allocation8 + $0x558] sm:$0xf0] }
 0x42d   :  { %8190 = vmatpush.bf16.msra.mxu1 %v10613_v10  ;;  %v11314_v10 = vld [vmem:[#allocation8 + $0x698] sm:$0xf0]  ;;  %v10885_v22 = vor.u32 %v13131_v16, %v10882_v47  ;;  %v13227_v8 = vld [vmem:[#allocation8 + $0x62c] sm:$0xf] }
 0x42e   :  { %8177 = vmatmul.bf16.vlgmr.msra.gmra.mxu0 %v14332_v18  ;;  %v10914_v18 = vld [vmem:[#allocation8 + $0x378] sm:$0xf0]  ;;  %v7915_v30 = vadd.f32 %v7914_v3, %v7901_v51  ;;  %v13315_v3 = vld [vmem:[#allocation8 + $0x8ec] sm:$0xf] }
 0x42f   :  { %8204 = vmatpush.bf16.msra.mxu2 %v10741_v46  ;;  %8225 = vmatpush.bf16.msrb.mxu0 %v11109_v52  ;;  %v10917_v2 = vor.u32 %v13139_v6, %v10914_v18  ;;  %v11061_v46 = vor.u32 %v13175_v33, %v11058_v17  ;;  %v10898_v52 = vld [vmem:[#allocation8 + $0x358] sm:$0xf0]  ;;  %v13195_v6 = vld [vmem:[#allocation8 + $0x52c] sm:$0xf] }
 0x430   :  { %8191 = vmatmul.bf16.vlgmr.msra.gmra.mxu1 %v14334_v49  ;;  %v7927_v49 = vadd.f32 %v7926_v5, %v7913_v60  ;;  %8214 = vmatpush.bf16.msra.mxu3 %v10933_v59  ;;  %v10901_v15 = vor.u32 %v13135_v41, %v10898_v52  ;;  %v11282_v50 = vld [vmem:[#allocation8 + $0x658] sm:$0xf0]  ;;  %v13127_v60 = vld [vmem:[#allocation8 + $0x30c] sm:$0xf]  ;;  %v11157_v59 = vor.u32 %v13199_v38, %v11154_v43 }
 0x431   :  { %8239 = vmatpush.bf16.msrb.mxu1 %v11237_v21  ;;  %v13171_v21 = vld [vmem:[#allocation8 + $0x46c] sm:$0xf]  ;;  %v7928_v63 = vpop.f32.mrf.mxu2  ;;  %v10866_v24 = vld [vmem:[#allocation8 + $0x318] sm:$0xf0] }
 0x432   :  { %8205 = vmatmul.bf16.vlgmr.msra.gmra.mxu2 %v14371_v7  ;;  %v13239_v7 = vld [vmem:[#allocation8 + $0x68c] sm:$0xf]  ;;  %v7941_v39 = vadd.f32 %v7940_v20, %v7927_v49  ;;  %v11045_v54 = vor.u32 %v13171_v21, %v11042_v19  ;;  %v7929_v5 = vadd.f32 %v7928_v63, %v7915_v30  ;;  %v11138_v33 = vld [vmem:[#allocation8 + $0x538] sm:$0xf0]  ;;  %v10869_v23 = vor.u32 %v13127_v60, %v10866_v24 }
 0x433   :  { %8253 = vmatpush.bf16.msrb.mxu2 %v11365_v34  ;;  %8226 = vmatpush.bf16.msrb.mxu0 %v11093_v40  ;;  %v11317_v45 = vor.u32 %v13239_v7, %v11314_v10  ;;  %v13203_v34 = vld [vmem:[#allocation8 + $0x56c] sm:$0xf]  ;;  %v7942_v11 = vpop.f32.mrf.mxu3  ;;  %v11490_v28 = vld [vmem:[#allocation8 + $0x7f8] sm:$0xf0]  ;;  %v11141_v51 = vor.u32 %v13195_v6, %v11138_v33 }
 0x434   :  { %8394 = vst [vmem:[#allocation11 + $0x8] sm:$0xff] %v7941_v39  ;;  %8215 = vmatpush.bf16.msra.mxu3 %v10917_v2  ;;  %v11173_v56 = vor.u32 %v13203_v34, %v11170_v4  ;;  %v13167_v40 = vld [vmem:[#allocation8 + $0x44c] sm:$0xf]  ;;  %v7943_v26 = vadd.f32 %v7942_v11, %v7929_v5  ;;  %v10994_v10 = vld [vmem:[#allocation8 + $0x418] sm:$0xf0] }
 0x435   :  { %8240 = vmatpush.bf16.msrb.mxu1 %v11221_v55  ;;  %v11301_v55 = vor.u32 %v13235_v32, %v11298_v44  ;;  %v11029_v31 = vor.u32 %v13167_v40, %v11026_v57  ;;  %v13283_v17 = vld [vmem:[#allocation8 + $0x7ec] sm:$0xf]  ;;  %v11250_v41 = vld [vmem:[#allocation8 + $0x618] sm:$0xf0] }
 0x436   :  { %8398 = vst [vmem:[#allocation11 + $0x28] sm:$0xff] %v7943_v26  ;;  %v13159_v7 = vld [vmem:[#allocation8 + $0x40c] sm:$0xf]  ;;  %v11493_v39 = vor.u32 %v13283_v17, %v11490_v28  ;;  %v11474_v21 = vld [vmem:[#allocation8 + $0x7d8] sm:$0xf0] }
 0x437   :  { %8254 = vmatpush.bf16.msrb.mxu2 %v11349_v62  ;;  %8227 = vmatpush.bf16.msrb.mxu0 %v11077_v27  ;;  %v13231_v62 = vld [vmem:[#allocation8 + $0x64c] sm:$0xf]  ;;  %v11746_v34 = vld [vmem:[#allocation8 + $0x9f8] sm:$0xf0]  ;;  %v10997_v4 = vor.u32 %v13159_v7, %v10994_v10 }
 0x438   :  { %8216 = vmatpush.bf16.msra.mxu3 %v10901_v15  ;;  %v13163_v27 = vld [vmem:[#allocation8 + $0x42c] sm:$0xf]  ;;  %v11285_v18 = vor.u32 %v13231_v62, %v11282_v50  ;;  %v11874_v44 = vld [vmem:[#allocation8 + $0xaf8] sm:$0xf0] }
 0x439   :  { %8241 = vmatpush.bf16.msrb.mxu1 %v11205_v12  ;;  %v11010_v12 = vld [vmem:[#allocation8 + $0x438] sm:$0xf0]  ;;  %v13191_v2 = vld [vmem:[#allocation8 + $0x50c] sm:$0xf] }
 0x43a   :  { %v11013_v49 = vor.u32 %v13163_v27, %v11010_v12  ;;  %v13279_v52 = vld [vmem:[#allocation8 + $0x7cc] sm:$0xf]  ;;  %v11458_v47 = vld [vmem:[#allocation8 + $0x7b8] sm:$0xf0] }
 0x43b   :  { %8255 = vmatpush.bf16.msrb.mxu2 %v11333_v35  ;;  %8228 = vmatpush.bf16.msrb.mxu0 %v11061_v46  ;;  %v11266_v35 = vld [vmem:[#allocation8 + $0x638] sm:$0xf0]  ;;  %v13347_v19 = vld [vmem:[#allocation8 + $0x9ec] sm:$0xf]  ;;  %v11477_v15 = vor.u32 %v13279_v52, %v11474_v21 }
 0x43c   :  { %8217 = vmatpush.bf16.msra.mxu3 %v10885_v22  ;;  %v11269_v20 = vor.u32 %v13227_v8, %v11266_v35  ;;  %v11122_v46 = vld [vmem:[#allocation8 + $0x518] sm:$0xf0]  ;;  %v13379_v32 = vld [vmem:[#allocation8 + $0xaec] sm:$0xf] }
 0x43d   :  { %8242 = vmatpush.bf16.msrb.mxu1 %v11189_v42  ;;  %v13223_v42 = vld [vmem:[#allocation8 + $0x60c] sm:$0xf]  ;;  %v11125_v30 = vor.u32 %v13191_v2, %v11122_v46  ;;  %v11602_v57 = vld [vmem:[#allocation8 + $0x8d8] sm:$0xf0] }
 0x43e   :  { %v11253_v63 = vor.u32 %v13223_v42, %v11250_v41  ;;  %v13275_v16 = vld [vmem:[#allocation8 + $0x7ac] sm:$0xf]  ;;  %v11730_v43 = vld [vmem:[#allocation8 + $0x9d8] sm:$0xf0] }
 0x43f   :  { %8256 = vmatpush.bf16.msrb.mxu2 %v11317_v45  ;;  %8229 = vmatpush.bf16.msrb.mxu0 %v11045_v54  ;;  %v11618_v45 = vld [vmem:[#allocation8 + $0x8f8] sm:$0xf0]  ;;  %v13311_v40 = vld [vmem:[#allocation8 + $0x8cc] sm:$0xf]  ;;  %v11461_v50 = vor.u32 %v13275_v16, %v11458_v47 }
 0x440   :  { %8218 = vmatpush.bf16.msra.mxu3 %v10869_v23  ;;  %v11621_v54 = vor.u32 %v13315_v3, %v11618_v45  ;;  %v13343_v38 = vld [vmem:[#allocation8 + $0x9cc] sm:$0xf]  ;;  %v11858_v62 = vld [vmem:[#allocation8 + $0xad8] sm:$0xf0]  ;;  %v11605_v22 = vor.u32 %v13311_v40, %v11602_v57 }
 0x441   :  { %8243 = vmatpush.bf16.msrb.mxu1 %v11173_v56  ;;  %v11749_v56 = vor.u32 %v13347_v19, %v11746_v34  ;;  %v13375_v5 = vld [vmem:[#allocation8 + $0xacc] sm:$0xf]  ;;  %v11442_v60 = vld [vmem:[#allocation8 + $0x798] sm:$0xf0] }
 0x442   :  { %v13271_v11 = vld [vmem:[#allocation8 + $0x78c] sm:$0xf]  ;;  %v11861_v26 = vor.u32 %v13375_v5, %v11858_v62  ;;  %v11714_v27 = vld [vmem:[#allocation8 + $0x9b8] sm:$0xf0] }
 0x443   :  { %8257 = vmatpush.bf16.msrb.mxu2 %v11301_v55  ;;  %8230 = vmatpush.bf16.msrb.mxu0 %v11029_v31  ;;  %v11877_v55 = vor.u32 %v13379_v32, %v11874_v44  ;;  %v13307_v24 = vld [vmem:[#allocation8 + $0x8ac] sm:$0xf]  ;;  %v11586_v31 = vld [vmem:[#allocation8 + $0x8b8] sm:$0xf0] }
 0x444   :  { %8267 = vmatpush.bf16.msrb.mxu3 %v11493_v39  ;;  %v13371_v12 = vld [vmem:[#allocation8 + $0xaac] sm:$0xf]  ;;  %v11842_v6 = vld [vmem:[#allocation8 + $0xab8] sm:$0xf0]  ;;  %v11589_v33 = vor.u32 %v13307_v24, %v11586_v31 }
 0x445   :  { %8244 = vmatpush.bf16.msrb.mxu1 %v11157_v59  ;;  %8219 = vmatmul.bf16.vlgmr.msra.gmra.mxu3 %v14375_v29  ;;  %v11733_v29 = vor.u32 %v13343_v38, %v11730_v43  ;;  %v13339_v59 = vld [vmem:[#allocation8 + $0x9ac] sm:$0xf]  ;;  %v11426_v17 = vld [vmem:[#allocation8 + $0x778] sm:$0xf0] }
 0x446   :  { %v11717_v8 = vor.u32 %v13339_v59, %v11714_v27  ;;  %v13267_v35 = vld [vmem:[#allocation8 + $0x76c] sm:$0xf]  ;;  %v11570_v23 = vld [vmem:[#allocation8 + $0x898] sm:$0xf0] }
 0x447   :  { %8258 = vmatpush.bf16.msrb.mxu2 %v11285_v18  ;;  %8231 = vmatpush.bf16.msrb.mxu0 %v11013_v49  ;;  %v11445_v18 = vor.u32 %v13271_v11, %v11442_v60  ;;  %v13303_v28 = vld [vmem:[#allocation8 + $0x88c] sm:$0xf]  ;;  %v11410_v39 = vld [vmem:[#allocation8 + $0x758] sm:$0xf0] }
 0x448   :  { %8268 = vmatpush.bf16.msrb.mxu3 %v11477_v15  ;;  %v13335_v49 = vld [vmem:[#allocation8 + $0x98c] sm:$0xf]  ;;  %v11573_v10 = vor.u32 %v13303_v28, %v11570_v23  ;;  %v11554_v41 = vld [vmem:[#allocation8 + $0x878] sm:$0xf0] }
 0x449   :  { %8245 = vmatpush.bf16.msrb.mxu1 %v11141_v51  ;;  %v11698_v51 = vld [vmem:[#allocation8 + $0x998] sm:$0xf0]  ;;  %v13367_v7 = vld [vmem:[#allocation8 + $0xa8c] sm:$0xf] }
 0x44a   :  { %v11701_v2 = vor.u32 %v13335_v49, %v11698_v51  ;;  %v13299_v46 = vld [vmem:[#allocation8 + $0x86c] sm:$0xf]  ;;  %v11682_v21 = vld [vmem:[#allocation8 + $0x978] sm:$0xf0] }
 0x44b   :  { %8259 = vmatpush.bf16.msrb.mxu2 %v11269_v20  ;;  %8232 = vmatpush.bf16.msrb.mxu0 %v10997_v4  ;;  %v13263_v20 = vld [vmem:[#allocation8 + $0x74c] sm:$0xf]  ;;  %v11810_v45 = vld [vmem:[#allocation8 + $0xa78] sm:$0xf0]  ;;  %v11557_v34 = vor.u32 %v13299_v46, %v11554_v41 }
 0x44c   :  { %8269 = vmatpush.bf16.msrb.mxu3 %v11461_v50  ;;  %v13331_v52 = vld [vmem:[#allocation8 + $0x96c] sm:$0xf]  ;;  %v11413_v19 = vor.u32 %v13263_v20, %v11410_v39  ;;  %v11394_v32 = vld [vmem:[#allocation8 + $0x738] sm:$0xf0] }
 0x44d   :  { %8246 = vmatpush.bf16.msrb.mxu1 %v11125_v30  ;;  %v13363_v3 = vld [vmem:[#allocation8 + $0xa6c] sm:$0xf]  ;;  %v11685_v4 = vor.u32 %v13331_v52, %v11682_v21  ;;  %v11538_v15 = vld [vmem:[#allocation8 + $0x858] sm:$0xf0] }
 0x44e   :  { %8233 = vmatmul.bf16.vlgmr.msrb.gmra.mxu0 %v14454_v9  ;;  %v11845_v9 = vor.u32 %v13371_v12, %v11842_v6  ;;  %v13259_v30 = vld [vmem:[#allocation8 + $0x72c] sm:$0xf]  ;;  %v11794_v47 = vld [vmem:[#allocation8 + $0xa58] sm:$0xf0] }
 0x44f   :  { %8260 = vmatpush.bf16.msrb.mxu2 %v11253_v63  ;;  %8281 = vmatpush.bf16.msra.mxu0 %v11621_v54  ;;  %v13295_v44 = vld [vmem:[#allocation8 + $0x84c] sm:$0xf]  ;;  %v11813_v63 = vor.u32 %v13363_v3, %v11810_v45  ;;  %v11397_v40 = vor.u32 %v13259_v30, %v11394_v32  ;;  %v11378_v43 = vld [vmem:[#allocation8 + $0x718] sm:$0xf0] }
 0x450   :  { %8247 = vmatmul.bf16.vlgmr.msrb.gmra.mxu1 %v14456_v0  ;;  %v11826_v0 = vld [vmem:[#allocation8 + $0xa98] sm:$0xf0]  ;;  %8270 = vmatpush.bf16.msrb.mxu3 %v11445_v18  ;;  %v13327_v54 = vld [vmem:[#allocation8 + $0x94c] sm:$0xf]  ;;  %v11541_v57 = vor.u32 %v13295_v44, %v11538_v15 }
 0x451   :  { %8295 = vmatpush.bf16.msra.mxu1 %v11749_v56  ;;  %v11829_v42 = vor.u32 %v13367_v7, %v11826_v0  ;;  %v11666_v56 = vld [vmem:[#allocation8 + $0x958] sm:$0xf0]  ;;  %v13359_v16 = vld [vmem:[#allocation8 + $0xa4c] sm:$0xf] }
 0x452   :  { %8261 = vmatmul.bf16.vlgmr.msrb.gmra.mxu2 %v14458_v58  ;;  %v11429_v58 = vor.u32 %v13267_v35, %v11426_v17  ;;  %v11669_v38 = vor.u32 %v13327_v54, %v11666_v56  ;;  %v13291_v5 = vld [vmem:[#allocation8 + $0x82c] sm:$0xf]  ;;  %v11522_v62 = vld [vmem:[#allocation8 + $0x838] sm:$0xf0]  ;;  %v11797_v50 = vor.u32 %v13359_v16, %v11794_v47  ;;  %v14732_v16 = vpop.f32.mrf.mxu0 }
 0x453   :  { %8309 = vmatpush.bf16.msra.mxu2 %v11877_v55  ;;  %8282 = vmatpush.bf16.msra.mxu0 %v11605_v22  ;;  %v13255_v55 = vld [vmem:[#allocation8 + $0x70c] sm:$0xf]  ;;  %v11778_v60 = vld [vmem:[#allocation8 + $0xa38] sm:$0xf0]  ;;  %v11525_v59 = vor.u32 %v13291_v5, %v11522_v62 }
 0x454   :  { %8271 = vmatpush.bf16.msrb.mxu3 %v11429_v58  ;;  %v13323_v22 = vld [vmem:[#allocation8 + $0x92c] sm:$0xf]  ;;  %v11381_v31 = vor.u32 %v13255_v55, %v11378_v43  ;;  %v11506_v6 = vld [vmem:[#allocation8 + $0x818] sm:$0xf0] }
 0x455   :  { %8296 = vmatpush.bf16.msra.mxu1 %v11733_v29  ;;  %v11650_v29 = vld [vmem:[#allocation8 + $0x938] sm:$0xf0]  ;;  %v13355_v11 = vld [vmem:[#allocation8 + $0xa2c] sm:$0xf] }
 0x456   :  { %v13411_v24 = vld [vmem:[#allocation8 + $0xbec] sm:$0xf]  ;;  %v11653_v27 = vor.u32 %v13323_v22, %v11650_v29  ;;  %v11634_v35 = vld [vmem:[#allocation8 + $0x918] sm:$0xf0] }
 0x457   :  { %8310 = vmatpush.bf16.msra.mxu2 %v11861_v26  ;;  %8283 = vmatpush.bf16.msra.mxu0 %v11589_v33  ;;  %v12002_v26 = vld [vmem:[#allocation8 + $0xbf8] sm:$0xf0]  ;;  %v13287_v12 = vld [vmem:[#allocation8 + $0x80c] sm:$0xf]  ;;  %v11781_v33 = vor.u32 %v13355_v11, %v11778_v60 }
 0x458   :  { %8272 = vmatpush.bf16.msrb.mxu3 %v11413_v19  ;;  %v13319_v18 = vld [vmem:[#allocation8 + $0x90c] sm:$0xf]  ;;  %v11762_v28 = vld [vmem:[#allocation8 + $0xa18] sm:$0xf0]  ;;  %v11509_v58 = vor.u32 %v13287_v12, %v11506_v6 }
 0x459   :  { %8297 = vmatpush.bf16.msra.mxu1 %v11717_v8  ;;  %v12005_v8 = vor.u32 %v13411_v24, %v12002_v26  ;;  %v13351_v17 = vld [vmem:[#allocation8 + $0xa0c] sm:$0xf]  ;;  %v11986_v23 = vld [vmem:[#allocation8 + $0xbd8] sm:$0xf0] }
 0x45a   :  { %v13443_v49 = vld [vmem:[#allocation8 + $0xcec] sm:$0xf]  ;;  %v12130_v51 = vld [vmem:[#allocation8 + $0xcf8] sm:$0xf0]  ;;  %v11765_v39 = vor.u32 %v13351_v17, %v11762_v28 }
 0x45b   :  { %8311 = vmatpush.bf16.msra.mxu2 %v11845_v9  ;;  %8284 = vmatpush.bf16.msra.mxu0 %v11573_v10  ;;  %v13407_v9 = vld [vmem:[#allocation8 + $0xbcc] sm:$0xf]  ;;  %v12258_v0 = vld [vmem:[#allocation8 + $0xdf8] sm:$0xf0]  ;;  %v11637_v10 = vor.u32 %v13319_v18, %v11634_v35 }
 0x45c   :  { %8273 = vmatpush.bf16.msrb.mxu3 %v11397_v40  ;;  %v13475_v7 = vld [vmem:[#allocation8 + $0xdec] sm:$0xf]  ;;  %v12386_v20 = vld [vmem:[#allocation8 + $0xef8] sm:$0xf0]  ;;  %v11989_v46 = vor.u32 %v13407_v9, %v11986_v23 }
 0x45d   :  { %8298 = vmatpush.bf16.msra.mxu1 %v11701_v2  ;;  %v13507_v2 = vld [vmem:[#allocation8 + $0xeec] sm:$0xf]  ;;  %v12261_v41 = vor.u32 %v13475_v7, %v12258_v0  ;;  %v11970_v21 = vld [vmem:[#allocation8 + $0xbb8] sm:$0xf0] }
 0x45e   :  { %v13403_v52 = vld [vmem:[#allocation8 + $0xbac] sm:$0xf]  ;;  %v12389_v45 = vor.u32 %v13507_v2, %v12386_v20  ;;  %v12114_v19 = vld [vmem:[#allocation8 + $0xcd8] sm:$0xf0] }
 0x45f   :  { %8312 = vmatpush.bf16.msra.mxu2 %v11829_v42  ;;  %8285 = vmatpush.bf16.msra.mxu0 %v11557_v34  ;;  %v12133_v42 = vor.u32 %v13443_v49, %v12130_v51  ;;  %v13439_v3 = vld [vmem:[#allocation8 + $0xccc] sm:$0xf]  ;;  %v12370_v32 = vld [vmem:[#allocation8 + $0xed8] sm:$0xf0]  ;;  %v11973_v44 = vor.u32 %v13403_v52, %v11970_v21  ;;  %v14741_v51 = vpop.f32.mrf.mxu0  ;;  %v14745_v21 = vld [vmem:[#allocation10] sm:$0xf] }
 0x460   :  { %8274 = vmatpush.bf16.msrb.mxu3 %v11381_v31  ;;  %v13471_v34 = vld [vmem:[#allocation8 + $0xdcc] sm:$0xf]  ;;  %v11954_v54 = vld [vmem:[#allocation8 + $0xb98] sm:$0xf0] }
 0x461   :  { %8299 = vmatpush.bf16.msra.mxu1 %v11685_v4  ;;  %v12242_v4 = vld [vmem:[#allocation8 + $0xdd8] sm:$0xf0]  ;;  %v13503_v30 = vld [vmem:[#allocation8 + $0xecc] sm:$0xf] }
 0x462   :  { %v13399_v15 = vld [vmem:[#allocation8 + $0xb8c] sm:$0xf]  ;;  %v12373_v47 = vor.u32 %v13503_v30, %v12370_v32  ;;  %v12098_v40 = vld [vmem:[#allocation8 + $0xcb8] sm:$0xf0] }
 0x463   :  { %8313 = vmatpush.bf16.msra.mxu2 %v11813_v63  ;;  %8286 = vmatpush.bf16.msra.mxu0 %v11541_v57  ;;  %v12117_v63 = vor.u32 %v13439_v3, %v12114_v19  ;;  %v13435_v56 = vld [vmem:[#allocation8 + $0xcac] sm:$0xf]  ;;  %v12226_v57 = vld [vmem:[#allocation8 + $0xdb8] sm:$0xf0]  ;;  %v11957_v5 = vor.u32 %v13399_v15, %v11954_v54  ;;  %v4931_v3 = vperm.slane %v14745_v21, 2 }
 0x464   :  { %8323 = vmatpush.bf16.msra.mxu3 %v12005_v8  ;;  %v13467_v55 = vld [vmem:[#allocation8 + $0xdac] sm:$0xf]  ;;  %v12354_v43 = vld [vmem:[#allocation8 + $0xeb8] sm:$0xf0]  ;;  %v12101_v62 = vor.u32 %v13435_v56, %v12098_v40 }
 0x465   :  { %8300 = vmatpush.bf16.msra.mxu1 %v11669_v38  ;;  %8275 = vmatmul.bf16.vlgmr.msrb.gmra.mxu3 %v14465_v1  ;;  %v12245_v1 = vor.u32 %v13471_v34, %v12242_v4  ;;  %v13499_v38 = vld [vmem:[#allocation8 + $0xeac] sm:$0xf]  ;;  %v11938_v29 = vld [vmem:[#allocation8 + $0xb78] sm:$0xf0] }
 0x466   :  { %v13395_v22 = vld [vmem:[#allocation8 + $0xb6c] sm:$0xf]  ;;  %v12357_v60 = vor.u32 %v13499_v38, %v12354_v43  ;;  %v12082_v24 = vld [vmem:[#allocation8 + $0xc98] sm:$0xf0] }
 0x467   :  { %8314 = vmatpush.bf16.msra.mxu2 %v11797_v50  ;;  %8287 = vmatpush.bf16.msra.mxu0 %v11525_v59  ;;  %v12229_v50 = vor.u32 %v13467_v55, %v12226_v57  ;;  %v13431_v11 = vld [vmem:[#allocation8 + $0xc8c] sm:$0xf]  ;;  %v14739_v59 = vpop.f32.mrf.mxu2  ;;  %v12066_v17 = vld [vmem:[#allocation8 + $0xc78] sm:$0xf0]  ;;  %v7955_v57 = vadd.f32 %v14732_v16, %v4931_v3 }
 0x468   :  { %8324 = vmatpush.bf16.msra.mxu3 %v11989_v46  ;;  %v13463_v26 = vld [vmem:[#allocation8 + $0xd8c] sm:$0xf]  ;;  %v12085_v12 = vor.u32 %v13431_v11, %v12082_v24  ;;  %v12194_v9 = vld [vmem:[#allocation8 + $0xd78] sm:$0xf0] }
 0x469   :  { %8301 = vmatpush.bf16.msra.mxu1 %v11653_v27  ;;  %v13495_v31 = vld [vmem:[#allocation8 + $0xe8c] sm:$0xf]  ;;  %v11941_v27 = vor.u32 %v13395_v22, %v11938_v29  ;;  %v12322_v49 = vld [vmem:[#allocation8 + $0xe78] sm:$0xf0] }
 0x46a   :  { %v13391_v18 = vld [vmem:[#allocation8 + $0xb4c] sm:$0xf]  ;;  %v11906_v2 = vld [vmem:[#allocation8 + $0xb38] sm:$0xf0] }
 0x46b   :  { %8315 = vmatpush.bf16.msra.mxu2 %v11781_v33  ;;  %8288 = vmatpush.bf16.msra.mxu0 %v11509_v58  ;;  %v11922_v33 = vld [vmem:[#allocation8 + $0xb58] sm:$0xf0]  ;;  %v13427_v8 = vld [vmem:[#allocation8 + $0xc6c] sm:$0xf] }
 0x46c   :  { %8325 = vmatpush.bf16.msra.mxu3 %v11973_v44  ;;  %v13459_v28 = vld [vmem:[#allocation8 + $0xd6c] sm:$0xf]  ;;  %v11925_v7 = vor.u32 %v13391_v18, %v11922_v33  ;;  %v12069_v0 = vor.u32 %v13427_v8, %v12066_v17  ;;  %v12178_v52 = vld [vmem:[#allocation8 + $0xd58] sm:$0xf0] }
 0x46d   :  { %8302 = vmatpush.bf16.msra.mxu1 %v11637_v10  ;;  %v13491_v23 = vld [vmem:[#allocation8 + $0xe6c] sm:$0xf]  ;;  %v12197_v58 = vor.u32 %v13459_v28, %v12194_v9  ;;  %v12306_v19 = vld [vmem:[#allocation8 + $0xe58] sm:$0xf0] }
 0x46e   :  { %8289 = vmatmul.bf16.vlgmr.msra.gmra.mxu0 %v14536_v61  ;;  %v14737_v61 = vpop.f32.mrf.mxu1  ;;  %v13387_v10 = vld [vmem:[#allocation8 + $0xb2c] sm:$0xf]  ;;  %v12325_v46 = vor.u32 %v13491_v23, %v12322_v49  ;;  %v12034_v15 = vld [vmem:[#allocation8 + $0xc38] sm:$0xf0]  ;;  %v7957_v49 = vadd.f32 %v14741_v51, %v4931_v3 }
 0x46f   :  { %8316 = vmatpush.bf16.msra.mxu2 %v11765_v39  ;;  %8337 = vmatpush.bf16.msrb.mxu0 %v12133_v42  ;;  %v13423_v20 = vld [vmem:[#allocation8 + $0xc4c] sm:$0xf]  ;;  %v14743_v39 = vpop.f32.mrf.mxu3  ;;  %v12050_v42 = vld [vmem:[#allocation8 + $0xc58] sm:$0xf0]  ;;  %v11909_v4 = vor.u32 %v13387_v10, %v11906_v2  ;;  %v7984_v54 = vpop.f32.mrf.mxu2  ;;  %v7969_v16 = vadd.f32 %v14737_v61, %v7955_v57 }
 0x470   :  { %8303 = vmatmul.bf16.vlgmr.msra.gmra.mxu1 %v14538_v14  ;;  %v12210_v14 = vld [vmem:[#allocation8 + $0xd98] sm:$0xf0]  ;;  %8326 = vmatpush.bf16.msra.mxu3 %v11957_v5  ;;  %v13383_v30 = vld [vmem:[#allocation8 + $0xb0c] sm:$0xf]  ;;  %v12053_v32 = vor.u32 %v13423_v20, %v12050_v42 }
 0x471   :  { %8351 = vmatpush.bf16.msrb.mxu1 %v12261_v41  ;;  %v12213_v6 = vor.u32 %v13463_v26, %v12210_v14  ;;  %v13455_v41 = vld [vmem:[#allocation8 + $0xd4c] sm:$0xf]  ;;  %v12162_v40 = vld [vmem:[#allocation8 + $0xd38] sm:$0xf0]  ;;  %v7983_v8 = vadd.f32 %v14739_v59, %v7969_v16 }
 0x472   :  { %8317 = vmatmul.bf16.vlgmr.msra.gmra.mxu2 %v14540_v37  ;;  %v12338_v37 = vld [vmem:[#allocation8 + $0xe98] sm:$0xf0]  ;;  %v12181_v44 = vor.u32 %v13455_v41, %v12178_v52  ;;  %v13483_v55 = vld [vmem:[#allocation8 + $0xe2c] sm:$0xf] }
 0x473   :  { %8365 = vmatpush.bf16.msrb.mxu2 %v12389_v45  ;;  %8338 = vmatpush.bf16.msrb.mxu0 %v12117_v63  ;;  %v12341_v35 = vor.u32 %v13495_v31, %v12338_v37  ;;  %v13487_v45 = vld [vmem:[#allocation8 + $0xe4c] sm:$0xf]  ;;  %v11890_v63 = vld [vmem:[#allocation8 + $0xb18] sm:$0xf0]  ;;  %v7997_v61 = vadd.f32 %v14743_v39, %v7983_v8 }
 0x474   :  { %8327 = vmatpush.bf16.msra.mxu3 %v11941_v27  ;;  %v12309_v56 = vor.u32 %v13487_v45, %v12306_v19  ;;  %v12290_v38 = vld [vmem:[#allocation8 + $0xe38] sm:$0xf0]  ;;  %v13539_v43 = vld [vmem:[#allocation8 + $0xfec] sm:$0xf] }
 0x475   :  { %8352 = vmatpush.bf16.msrb.mxu1 %v12245_v1  ;;  %v13419_v1 = vld [vmem:[#allocation8 + $0xc2c] sm:$0xf]  ;;  %v12514_v5 = vld [vmem:[#allocation8 + $0xff8] sm:$0xf0]  ;;  %v12293_v24 = vor.u32 %v13483_v55, %v12290_v38 }
 0x476   :  { %v14748_v34 = vpop.f32.mrf.mxu1  ;;  %v12037_v22 = vor.u32 %v13419_v1, %v12034_v15  ;;  %v13415_v11 = vld [vmem:[#allocation8 + $0xc0c] sm:$0xf]  ;;  %v12517_v26 = vor.u32 %v13539_v43, %v12514_v5  ;;  %v12146_v31 = vld [vmem:[#allocation8 + $0xd18] sm:$0xf0] }
 0x477   :  { %8366 = vmatpush.bf16.msrb.mxu2 %v12373_v47  ;;  %8339 = vmatpush.bf16.msrb.mxu0 %v12101_v62  ;;  %v13451_v47 = vld [vmem:[#allocation8 + $0xd2c] sm:$0xf]  ;;  %v8010_v62 = vpop.f32.mrf.mxu0  ;;  %v12274_v27 = vld [vmem:[#allocation8 + $0xe18] sm:$0xf0]  ;;  %v7998_v33 = vpop.f32.mrf.mxu3  ;;  %v7971_v10 = vadd.f32 %v14748_v34, %v7957_v49 }
 0x478   :  { %8328 = vmatpush.bf16.msra.mxu3 %v11925_v7  ;;  %v12165_v29 = vor.u32 %v13451_v47, %v12162_v40  ;;  %v13447_v14 = vld [vmem:[#allocation8 + $0xd0c] sm:$0xf]  ;;  %v8038_v28 = vpop.f32.mrf.mxu2  ;;  %v8011_v2 = vadd.f32 %v8010_v62, %v7997_v61  ;;  %v12450_v45 = vld [vmem:[#allocation8 + $0xf78] sm:$0xf0] }
 0x479   :  { %8353 = vmatpush.bf16.msrb.mxu1 %v12229_v50  ;;  %v11893_v50 = vor.u32 %v13383_v30, %v11890_v63  ;;  %v13479_v37 = vld [vmem:[#allocation8 + $0xe0c] sm:$0xf]  ;;  %v12149_v17 = vor.u32 %v13447_v14, %v12146_v31  ;;  %v7985_v51 = vadd.f32 %v7984_v54, %v7971_v10  ;;  %v12402_v43 = vld [vmem:[#allocation8 + $0xf18] sm:$0xf0] }
 0x47a   :  { %v12277_v9 = vor.u32 %v13479_v37, %v12274_v27  ;;  %v13531_v7 = vld [vmem:[#allocation8 + $0xfac] sm:$0xf] }
 0x47b   :  { %8367 = vmatpush.bf16.msrb.mxu2 %v12357_v60  ;;  %8340 = vmatpush.bf16.msrb.mxu0 %v12085_v12  ;;  %v12018_v60 = vld [vmem:[#allocation8 + $0xc18] sm:$0xf0]  ;;  %v13535_v12 = vld [vmem:[#allocation8 + $0xfcc] sm:$0xf]  ;;  %v7999_v52 = vadd.f32 %v7998_v33, %v7985_v51 }
 0x47c   :  { %8329 = vmatpush.bf16.msra.mxu3 %v11909_v4  ;;  %v13527_v20 = vld [vmem:[#allocation8 + $0xf8c] sm:$0xf] }
 0x47d   :  { %8354 = vmatpush.bf16.msrb.mxu1 %v12213_v6  ;;  %v12498_v6 = vld [vmem:[#allocation8 + $0xfd8] sm:$0xf0]  ;;  %v13523_v3 = vld [vmem:[#allocation8 + $0xf6c] sm:$0xf] }
 0x47e   :  { %v8024_v18 = vpop.f32.mrf.mxu1  ;;  %v12501_v23 = vor.u32 %v13535_v12, %v12498_v6  ;;  %v12453_v4 = vor.u32 %v13523_v3, %v12450_v45  ;;  %v13515_v54 = vld [vmem:[#allocation8 + $0xf2c] sm:$0xf] }
 0x47f   :  { %8368 = vmatpush.bf16.msrb.mxu2 %v12341_v35  ;;  %8341 = vmatpush.bf16.msrb.mxu0 %v12069_v0  ;;  %v12021_v35 = vor.u32 %v13415_v11, %v12018_v60  ;;  %v12482_v0 = vld [vmem:[#allocation8 + $0xfb8] sm:$0xf0]  ;;  %v8012_v59 = vpop.f32.mrf.mxu0  ;;  %v8052_v42 = vpop.f32.mrf.mxu3  ;;  %v8025_v41 = vadd.f32 %v8024_v18, %v8011_v2  ;;  %v13511_v38 = vld [vmem:[#allocation8 + $0xf0c] sm:$0xf] }
 0x480   :  { %8330 = vmatpush.bf16.msra.mxu3 %v11893_v50  ;;  %v8040_v19 = vpop.f32.mrf.mxu2 }
 0x481   :  { %8355 = vmatpush.bf16.msrb.mxu1 %v12197_v58  ;;  %v12485_v58 = vor.u32 %v13531_v7, %v12482_v0  ;;  %v8039_v30 = vadd.f32 %v8038_v28, %v8025_v41 }
 0x483   :  { %8369 = vmatpush.bf16.msrb.mxu2 %v12325_v46  ;;  %8342 = vmatpush.bf16.msrb.mxu0 %v12053_v32  ;;  %v12466_v46 = vld [vmem:[#allocation8 + $0xf98] sm:$0xf0]  ;;  %v8013_v32 = vadd.f32 %v8012_v59, %v7999_v52  ;;  %v8053_v63 = vadd.f32 %v8052_v42, %v8039_v30  ;;  %v4932_v42 = vperm.slane %v14745_v21, 3 }
 0x484   :  { %8379 = vmatpush.bf16.msrb.mxu3 %v12517_v26  ;;  %v12469_v39 = vor.u32 %v13527_v20, %v12466_v46 }
 0x485   :  { %8356 = vmatpush.bf16.msrb.mxu1 %v12181_v44  ;;  %8331 = vmatmul.bf16.vlgmr.msra.gmra.mxu3 %v14544_v36  ;;  %v13519_v44 = vld [vmem:[#allocation8 + $0xf4c] sm:$0xf] }
 0x486   :  { %v8026_v36 = vpop.f32.mrf.mxu1 }
 0x487   :  { %8370 = vmatpush.bf16.msrb.mxu2 %v12309_v56  ;;  %8343 = vmatpush.bf16.msrb.mxu0 %v12037_v22  ;;  %v8066_v34 = vpop.f32.mrf.mxu0  ;;  %v8054_v1 = vpop.f32.mrf.mxu3  ;;  %v8027_v15 = vadd.f32 %v8026_v36, %v8013_v32  ;;  %v12418_v56 = vld [vmem:[#allocation8 + $0xf38] sm:$0xf0] }
 0x488   :  { %8380 = vmatpush.bf16.msrb.mxu3 %v12501_v23  ;;  %v8094_v47 = vpop.f32.mrf.mxu2  ;;  %v8067_v40 = vadd.f32 %v8066_v34, %v8053_v63  ;;  %v12421_v55 = vor.u32 %v13515_v54, %v12418_v56 }
 0x489   :  { %8357 = vmatpush.bf16.msrb.mxu1 %v12165_v29  ;;  %v8041_v57 = vadd.f32 %v8040_v19, %v8027_v15  ;;  %v12405_v29 = vor.u32 %v13511_v38, %v12402_v43 }
 0x48b   :  { %8371 = vmatpush.bf16.msrb.mxu2 %v12293_v24  ;;  %8344 = vmatpush.bf16.msrb.mxu0 %v12021_v35  ;;  %v8055_v50 = vadd.f32 %v8054_v1, %v8041_v57 }
 0x48c   :  { %8381 = vmatpush.bf16.msrb.mxu3 %v12485_v58 }
 0x48d   :  { %8358 = vmatpush.bf16.msrb.mxu1 %v12149_v17 }
 0x48e   :  { %8345 = vmatmul.bf16.vlgmr.msrb.gmra.mxu0 %v14573_v25  ;;  %v12434_v25 = vld [vmem:[#allocation8 + $0xf58] sm:$0xf0] }
 0x48f   :  { %8372 = vmatpush.bf16.msrb.mxu2 %v12277_v9  ;;  %v8068_v5 = vpop.f32.mrf.mxu0  ;;  %v8108_v22 = vpop.f32.mrf.mxu3 }
 0x490   :  { %8359 = vmatmul.bf16.vlgmr.msrb.gmra.mxu1 %v14576_v48  ;;  %8382 = vmatpush.bf16.msrb.mxu3 %v12469_v39  ;;  %v8080_v48 = vpop.f32.mrf.mxu1  ;;  %v8069_v24 = vadd.f32 %v8068_v5, %v8055_v50  ;;  %v8096_v26 = vpop.f32.mrf.mxu2 }
 0x491   :  { %v8081_v62 = vadd.f32 %v8080_v48, %v8067_v40 }
 0x492   :  { %8373 = vmatmul.bf16.vlgmr.msrb.gmra.mxu2 %v14590_v53  ;;  %v12437_v53 = vor.u32 %v13519_v44, %v12434_v25 }
 0x493   :  { %v8095_v60 = vadd.f32 %v8094_v47, %v8081_v62 }
 0x494   :  { %8383 = vmatpush.bf16.msrb.mxu3 %v12453_v4 }
 0x495   :  { %v8109_v14 = vadd.f32 %v8108_v22, %v8095_v60 }
 0x497   :  { %v8122_v31 = vpop.f32.mrf.mxu0  ;;  %v8110_v12 = vpop.f32.mrf.mxu3 }
 0x498   :  { %8384 = vmatpush.bf16.msrb.mxu3 %v12437_v53  ;;  %v8082_v11 = vpop.f32.mrf.mxu1  ;;  %v8123_v16 = vadd.f32 %v8122_v31, %v8109_v14  ;;  %v8150_v18 = vpop.f32.mrf.mxu2 }
 0x499   :  { %v8083_v37 = vadd.f32 %v8082_v11, %v8069_v24 }
 0x49b   :  { %v8097_v6 = vadd.f32 %v8096_v26, %v8083_v37 }
 0x49c   :  { %8385 = vmatpush.bf16.msrb.mxu3 %v12421_v55 }
 0x49d   :  { %v8111_v8 = vadd.f32 %v8110_v12, %v8097_v6 }
 0x49f   :  { %v8124_v35 = vpop.f32.mrf.mxu0 }
 0x4a0   :  { %8386 = vmatpush.bf16.msrb.mxu3 %v12405_v29  ;;  %v8136_v27 = vpop.f32.mrf.mxu1  ;;  %v8125_v28 = vadd.f32 %v8124_v35, %v8111_v8  ;;  %v8152_v7 = vpop.f32.mrf.mxu2 }
 0x4a1   :  { %v8137_v33 = vadd.f32 %v8136_v27, %v8123_v16 }
 0x4a3   :  { %8387 = vmatmul.bf16.vlgmr.msrb.gmra.mxu3 %v14608_v13  ;;  %v8151_v17 = vadd.f32 %v8150_v18, %v8137_v33 }
 0x4a8   :  { %v8164_v9 = vpop.f32.mrf.mxu3  ;;  %v8138_v49 = vpop.f32.mrf.mxu1 }
 0x4a9   :  { %v8165_v23 = vadd.f32 %v8164_v9, %v8151_v17  ;;  %v8139_v61 = vadd.f32 %v8138_v49, %v8125_v28 }
 0x4ab   :  { %8395 = vst [vmem:[#allocation11 + $0x10] sm:$0xff] %v8165_v23  ;;  %v8153_v0 = vadd.f32 %v8152_v7, %v8139_v61  ;;  %v8178_v13 = vpop.f32.mrf.mxu0 }
 0x4ac   :  { %v8179_v39 = vadd.f32 %v8178_v13, %v4932_v42 }
 0x4b0   :  { %v8166_v59 = vpop.f32.mrf.mxu3  ;;  %v8192_v10 = vpop.f32.mrf.mxu1 }
 0x4b1   :  { %v8167_v58 = vadd.f32 %v8166_v59, %v8153_v0  ;;  %v8193_v52 = vadd.f32 %v8192_v10, %v8179_v39 }
 0x4b3   :  { %8399 = vst [vmem:[#allocation11 + $0x30] sm:$0xff] %v8167_v58  ;;  %v8180_v20 = vpop.f32.mrf.mxu0 }
 0x4b4   :  { %v8181_v4 = vadd.f32 %v8180_v20, %v4932_v42 }
 0x4b5   :  { %v8206_v2 = vpop.f32.mrf.mxu2 }
 0x4b6   :  { %v8207_v19 = vadd.f32 %v8206_v2, %v8193_v52 }
 0x4b8   :  { %v8194_v51 = vpop.f32.mrf.mxu1 }
 0x4b9   :  { %v8195_v44 = vadd.f32 %v8194_v51, %v8181_v4 }
 0x4bd   :  { %v8208_v36 = vpop.f32.mrf.mxu2 }
 0x4be   :  { %v8209_v48 = vadd.f32 %v8208_v36, %v8195_v44 }
 0x4c8   :  { %v8220_v46 = vpop.f32.mrf.mxu3 }
 0x4c9   :  { %v8221_v30 = vadd.f32 %v8220_v46, %v8207_v19 }
 0x4cb   :  { %v8234_v41 = vpop.f32.mrf.mxu0 }
 0x4cc   :  { %v8235_v25 = vadd.f32 %v8234_v41, %v8221_v30 }
 0x4cd   :  { %v8248_v3 = vpop.f32.mrf.mxu1 }
 0x4ce   :  { %v8249_v53 = vadd.f32 %v8248_v3, %v8235_v25 }
 0x4d0   :  { %v8222_v45 = vpop.f32.mrf.mxu3 }
 0x4d1   :  { %v8223_v15 = vadd.f32 %v8222_v45, %v8209_v48 }
 0x4d3   :  { %v8236_v32 = vpop.f32.mrf.mxu0 }
 0x4d4   :  { %v8237_v47 = vadd.f32 %v8236_v32, %v8223_v15 }
 0x4d5   :  { %v8262_v34 = vpop.f32.mrf.mxu2  ;;  %v8250_v1 = vpop.f32.mrf.mxu1 }
 0x4d6   :  { %v8263_v56 = vadd.f32 %v8262_v34, %v8249_v53  ;;  %v8251_v38 = vadd.f32 %v8250_v1, %v8237_v47 }
 0x4dd   :  { %v8264_v21 = vpop.f32.mrf.mxu2 }
 0x4de   :  { %v8265_v62 = vadd.f32 %v8264_v21, %v8251_v38 }
 0x4e8   :  { %v8276_v63 = vpop.f32.mrf.mxu3 }
 0x4e9   :  { %v8277_v40 = vadd.f32 %v8276_v63, %v8263_v56 }
 0x4eb   :  { %v8290_v54 = vpop.f32.mrf.mxu0 }
 0x4ec   :  { %v8291_v5 = vadd.f32 %v8290_v54, %v8277_v40 }
 0x4ed   :  { %v8304_v55 = vpop.f32.mrf.mxu1 }
 0x4ee   :  { %v8305_v22 = vadd.f32 %v8304_v55, %v8291_v5 }
 0x4f0   :  { %v8278_v57 = vpop.f32.mrf.mxu3 }
 0x4f1   :  { %v8279_v29 = vadd.f32 %v8278_v57, %v8265_v62 }
 0x4f3   :  { %v8292_v50 = vpop.f32.mrf.mxu0 }
 0x4f4   :  { %v8293_v26 = vadd.f32 %v8292_v50, %v8279_v29 }
 0x4f5   :  { %v8318_v43 = vpop.f32.mrf.mxu2  ;;  %v8306_v60 = vpop.f32.mrf.mxu1 }
 0x4f6   :  { %v8319_v24 = vadd.f32 %v8318_v43, %v8305_v22  ;;  %v8307_v16 = vadd.f32 %v8306_v60, %v8293_v26 }
 0x4fd   :  { %v8320_v14 = vpop.f32.mrf.mxu2 }
 0x4fe   :  { %v8321_v18 = vadd.f32 %v8320_v14, %v8307_v16 }
 0x508   :  { %v8332_v11 = vpop.f32.mrf.mxu3 }
 0x509   :  { %v8333_v31 = vadd.f32 %v8332_v11, %v8319_v24 }
 0x50b   :  { %v8346_v37 = vpop.f32.mrf.mxu0 }
 0x50c   :  { %v8347_v27 = vadd.f32 %v8346_v37, %v8333_v31 }
 0x50d   :  { %v8360_v12 = vpop.f32.mrf.mxu1 }
 0x50e   :  { %v8361_v8 = vadd.f32 %v8360_v12, %v8347_v27 }
 0x510   :  { %v8334_v6 = vpop.f32.mrf.mxu3 }
 0x511   :  { %v8335_v35 = vadd.f32 %v8334_v6, %v8321_v18 }
 0x513   :  { %v8348_v17 = vpop.f32.mrf.mxu0 }
 0x514   :  { %v8349_v9 = vadd.f32 %v8348_v17, %v8335_v35 }
 0x515   :  { %v8374_v33 = vpop.f32.mrf.mxu2  ;;  %v8362_v61 = vpop.f32.mrf.mxu1 }
 0x516   :  { %v8375_v28 = vadd.f32 %v8374_v33, %v8361_v8  ;;  %v8363_v7 = vadd.f32 %v8362_v61, %v8349_v9 }
 0x51d   :  { %v8376_v0 = vpop.f32.mrf.mxu2 }
 0x51e   :  { %v8377_v59 = vadd.f32 %v8376_v0, %v8363_v7 }
 0x526   :  { %v8388_v23 = vpop.f32.mrf.mxu3 }
 0x527   :  { %v8389_v49 = vadd.f32 %v8388_v23, %v8375_v28 }
 0x529   :  { %8396 = vst [vmem:[#allocation11 + $0x18] sm:$0xff] %v8389_v49 }
 0x52e   :  { %v8390_v58 = vpop.f32.mrf.mxu3 }
 0x52f   :  { %v8391_v13 = vadd.f32 %v8390_v58, %v8377_v59 }
 0x531   :  { %8400 = vst [vmem:[#allocation11 + $0x38] sm:$0xff] %v8391_v13 }
 0x532   :  { %8413 = dma.vmem_to_hbm [thread:$0]  %s8406_s4, 1024, %s8408_s23, [#allocation4], %s13781_s13, %s13781_s13, %s13782_s14  }
 0x533   :  { %13772 = dma.done.wait [#allocation4], 1024  }
 0x534   :  { %13773 = vsyncadd [#allocation4], 4294966272 }
 0x535   :  { %8418 = vsyncpa [#allocation3], 1 }
 0x536   :  { %8419 = vsyncpa [#allocation6], 1 }
 0x537   :  { %8420 = vsyncpa [#allocation9], 1 }
 0x538   :  { %8421 = vsyncpa [#allocation4], 1 }

</bundles_post_ra>
